<compile_context>
chip_gen: v6e
topology: v6e:2x2x1
jax: 0.10.0
libtpu: 0.0.40
codegen_flags: <defaults>
</compile_context>

<pallas_src>
import math

import jax
import jax.numpy as jnp
from jax.experimental import pallas as pl
from jax.experimental.pallas import tpu as pltpu


_VMEM_LIMIT = 32 * 1024 * 1024  # explicit scoped-VMEM cap (safe on v5e/v6e/v7x)


# ----------------------------------------------------------------------------
# helpers
# ----------------------------------------------------------------------------
def _round_up(x, m):
    return ((x + m - 1) // m) * m


def _conv_out_dims(D, H, W, k, stride, pad):
    Do = (D + 2 * pad - k) // stride + 1
    Ho = (H + 2 * pad - k) // stride + 1
    Wo = (W + 2 * pad - k) // stride + 1
    return Do, Ho, Wo


def _tap_views(x, k, stride, pad):
    """Return the k^3 strided tap views of x (N,D,H,W,C), zero-padded."""
    N, D, H, W, C = x.shape
    if pad > 0:
        x = jnp.pad(x, ((0, 0), (pad, pad), (pad, pad), (pad, pad), (0, 0)))
    Do, Ho, Wo = _conv_out_dims(D, H, W, k, stride, pad)
    views = []
    for kd in range(k):
        for kh in range(k):
            for kw in range(k):
                views.append(
                    x[:, kd:kd + (Do - 1) * stride + 1:stride,
                         kh:kh + (Ho - 1) * stride + 1:stride,
                         kw:kw + (Wo - 1) * stride + 1:stride, :])
    return views, (Do, Ho, Wo)


def _extract_windows_stacked(x, k, stride, pad):
    """(N,D,H,W,C) -> (k^3, M, C) tap-major window stack (no transpose pass)."""
    N = x.shape[0]
    C = x.shape[-1]
    views, (Do, Ho, Wo) = _tap_views(x, k, stride, pad)
    win = jnp.stack(views, axis=0).reshape(k ** 3, N * Do * Ho * Wo, C)
    return win, (Do, Ho, Wo)


def _extract_windows_concat_c(x, k, stride, pad):
    """(N,D,H,W,C) -> (M, k^3*C) im2col built by concatenating taps along the
    channel axis (row layout produced directly, no HBM transpose)."""
    N = x.shape[0]
    C = x.shape[-1]
    views, (Do, Ho, Wo) = _tap_views(x, k, stride, pad)
    a = jnp.concatenate(views, axis=-1)  # (N, Do, Ho, Wo, k^3*C)
    return a.reshape(N * Do * Ho * Wo, k ** 3 * C), (Do, Ho, Wo)


# ----------------------------------------------------------------------------
# Pallas kernels
# ----------------------------------------------------------------------------
def _make_fused_gemm_kernel(relu):
    """K-tiled GEMM: acc over K grid axis, then + bias (+ optional ReLU)."""

    def kernel(a_ref, b_ref, bias_ref, o_ref, acc_ref):
        kk = pl.program_id(1)

        @pl.when(kk == 0)
        def _init():
            acc_ref[...] = jnp.zeros_like(acc_ref)

        acc_ref[...] += jnp.dot(a_ref[...], b_ref[...],
                                preferred_element_type=jnp.float32)

        @pl.when(kk == pl.num_programs(1) - 1)
        def _fin():
            out = acc_ref[...] + bias_ref[...]
            if relu:
                out = jnp.maximum(out, 0.0)
            o_ref[...] = out.astype(o_ref.dtype)

    return kernel


def fused_gemm(a, b, bias, relu=False, out_dtype=jnp.float32, tm=512, kt=1024):
    """out = act(a @ b + bias); bf16 operands, f32 accumulation.

    K is tiled as a trailing 'arbitrary' grid axis with a VMEM f32 accumulator,
    so the (K, N) weight never needs to fit VMEM in one block.
    """
    M, K = a.shape
    K2, N = b.shape
    assert K == K2
    TM = tm if M >= tm else _round_up(M, 8)
    Mp = _round_up(M, TM)
    if K <= kt:
        KT, Kp = K, K
    else:
        KT, Kp = kt, _round_up(K, kt)
    a_p = jnp.pad(a.astype(jnp.bfloat16), ((0, Mp - M), (0, Kp - K)))
    b_p = jnp.pad(b.astype(jnp.bfloat16), ((0, Kp - K), (0, 0)))
    bias2 = bias.reshape(1, N).astype(jnp.float32)

    out = pl.pallas_call(
        _make_fused_gemm_kernel(relu),
        out_shape=jax.ShapeDtypeStruct((Mp, N), out_dtype),
        grid=(Mp // TM, Kp // KT),
        in_specs=[
            pl.BlockSpec((TM, KT), lambda i, kk: (i, kk)),
            pl.BlockSpec((KT, N), lambda i, kk: (kk, 0)),
            pl.BlockSpec((1, N), lambda i, kk: (0, 0)),
        ],
        out_specs=pl.BlockSpec((TM, N), lambda i, kk: (i, 0)),
        scratch_shapes=[pltpu.VMEM((TM, N), jnp.float32)],
        compiler_params=pltpu.CompilerParams(
            dimension_semantics=("parallel", "arbitrary"),
            vmem_limit_bytes=_VMEM_LIMIT),
    )(a_p, b_p, bias2)
    return out[:M]


def _make_conv_tap_kernel(relu, add_res, tapg):
    """Tap-accumulation conv GEMM: unrolled group of TAPG (TM,Cin)@(Cin,Cout)
    matmuls per grid step, accumulated into a VMEM f32 scratch."""

    def _accumulate(a_ref, b_ref, acc_ref):
        t = pl.program_id(1)

        @pl.when(t == 0)
        def _init():
            acc_ref[...] = jnp.zeros_like(acc_ref)

        acc = acc_ref[...]
        for g in range(tapg):
            acc = acc + jnp.dot(a_ref[g], b_ref[g],
                                preferred_element_type=jnp.float32)
        acc_ref[...] = acc

    def _finalize(acc_ref, bias_ref, r_ref, o_ref):
        out = acc_ref[...] + bias_ref[...]
        if add_res:
            out = out + r_ref[...].astype(jnp.float32)
        if relu:
            out = jnp.maximum(out, 0.0)
        o_ref[...] = out.astype(o_ref.dtype)

    if add_res:
        def kernel(a_ref, b_ref, bias_ref, r_ref, o_ref, acc_ref):
            _accumulate(a_ref, b_ref, acc_ref)

            @pl.when(pl.program_id(1) == pl.num_programs(1) - 1)
            def _():
                _finalize(acc_ref, bias_ref, r_ref, o_ref)
    else:
        def kernel(a_ref, b_ref, bias_ref, o_ref, acc_ref):
            _accumulate(a_ref, b_ref, acc_ref)

            @pl.when(pl.program_id(1) == pl.num_programs(1) - 1)
            def _():
                _finalize(acc_ref, bias_ref, None, o_ref)

    return kernel


def conv_tap_gemm(win, w3, bias, residual=None, relu=False, tm=512):
    """win: (k^3, M, Cin) bf16, w3: (k^3, Cin, Cout) bf16 -> (M, Cout) bf16."""
    K3, M, Cin = win.shape
    _, _, Cout = w3.shape
    TAPG = 9 if K3 % 9 == 0 else (3 if K3 % 3 == 0 else 1)
    TM = tm if M >= tm else _round_up(M, 8)
    Mp = _round_up(M, TM)
    win_p = jnp.pad(win.astype(jnp.bfloat16), ((0, 0), (0, Mp - M), (0, 0)))
    w3 = w3.astype(jnp.bfloat16)
    bias2 = bias.reshape(1, Cout).astype(jnp.float32)

    in_specs = [
        pl.BlockSpec((TAPG, TM, Cin), lambda i, t: (t, i, 0)),
        pl.BlockSpec((TAPG, Cin, Cout), lambda i, t: (t, 0, 0)),
        pl.BlockSpec((1, Cout), lambda i, t: (0, 0)),
    ]
    args = [win_p, w3, bias2]
    if residual is not None:
        r_p = jnp.pad(residual.astype(jnp.bfloat16), ((0, Mp - M), (0, 0)))
        in_specs.append(pl.BlockSpec((TM, Cout), lambda i, t: (i, 0)))
        args.append(r_p)

    out = pl.pallas_call(
        _make_conv_tap_kernel(relu, residual is not None, TAPG),
        out_shape=jax.ShapeDtypeStruct((Mp, Cout), jnp.bfloat16),
        grid=(Mp // TM, K3 // TAPG),
        in_specs=in_specs,
        out_specs=pl.BlockSpec((TM, Cout), lambda i, t: (i, 0)),
        scratch_shapes=[pltpu.VMEM((TM, Cout), jnp.float32)],
        compiler_params=pltpu.CompilerParams(
            dimension_semantics=("parallel", "arbitrary"),
            vmem_limit_bytes=_VMEM_LIMIT),
    )(*args)
    return out[:M]


def _pool_max_kernel(w_ref, o_ref):
    o_ref[...] = jnp.max(w_ref[...], axis=0)


def _pool_avg_kernel(w_ref, o_ref):
    o_ref[...] = jnp.mean(w_ref[...].astype(jnp.float32), axis=0).astype(o_ref.dtype)


def _pool1d(x, axis, k, stride, pad, op):
    """Pool a single spatial axis with a length-k window (separable pooling).

    Only k strided views are materialized (not k^3), and the reduction runs on
    a lane-dense (rows, 128) layout so all stores are full-width.
    """
    if pad > 0:
        pw = [(0, 0)] * x.ndim
        pw[axis] = (pad, pad)
        cval = -jnp.inf if op == "max" else 0.0
        x = jnp.pad(x, pw, constant_values=cval)
    X = x.shape[axis]
    Xo = (X - k) // stride + 1
    views = []
    for kk in range(k):
        idx = [slice(None)] * x.ndim
        idx[axis] = slice(kk, kk + (Xo - 1) * stride + 1, stride)
        views.append(x[tuple(idx)].reshape(-1))
    out_shape = list(x.shape)
    out_shape[axis] = Xo
    T = math.prod(out_shape)
    win = jnp.stack(views, axis=0)                 # (k, T)

    R = pl.cdiv(T, 128)
    TR = 1024 if R >= 1024 else _round_up(R, 8)
    Rp = _round_up(R, TR)
    win = jnp.pad(win, ((0, 0), (0, Rp * 128 - T)))
    win = win.reshape(k, Rp, 128)                  # lane-dense

    kernel = _pool_max_kernel if op == "max" else _pool_avg_kernel
    out = pl.pallas_call(
        kernel,
        out_shape=jax.ShapeDtypeStruct((Rp, 128), x.dtype),
        grid=(Rp // TR,),
        in_specs=[pl.BlockSpec((k, TR, 128), lambda i: (0, i, 0))],
        out_specs=pl.BlockSpec((TR, 128), lambda i: (i, 0)),
        compiler_params=pltpu.CompilerParams(
            dimension_semantics=("parallel",),
            vmem_limit_bytes=_VMEM_LIMIT),
    )(win)
    return out.reshape(Rp * 128)[:T].reshape(out_shape)


def maxpool3d(x, k=3, stride=2, pad=1):
    # max over a k^3 cube == nested per-axis max (with -inf padding)
    for axis in (3, 2, 1):  # W, H, D
        x = _pool1d(x, axis, k, stride, pad, "max")
    return x


def avgpool3d(x, k=3, stride=3):
    # non-overlapping equal-size windows -> mean of per-axis means == cube mean
    for axis in (3, 2, 1):
        x = _pool1d(x, axis, k, stride, 0, "avg")
    return x


# ----------------------------------------------------------------------------
# model building blocks
# ----------------------------------------------------------------------------
def conv3d_bn_act(x, w, bias, stride, pad, relu=True, residual=None):
    """x: (N,D,H,W,Cin) bf16; w: (k,k,k,Cin,Cout) bf16 with BN scale folded in;
    bias: (Cout,) f32. conv + BN shift + optional residual add + optional ReLU."""
    k, _, _, Cin, Cout = w.shape
    N = x.shape[0]
    if Cin == 1:
        # stem: channel-concat im2col (no transpose), single K block GEMM
        a, (Do, Ho, Wo) = _extract_windows_concat_c(x, k, stride, pad)
        out = fused_gemm(a, w.reshape(k ** 3 * Cin, Cout), bias,
                         relu=relu, out_dtype=jnp.bfloat16)
    else:
        win, (Do, Ho, Wo) = _extract_windows_stacked(x, k, stride, pad)
        res2d = residual.reshape(-1, Cout) if residual is not None else None
        out = conv_tap_gemm(win, w.reshape(k ** 3, Cin, Cout), bias,
                            residual=res2d, relu=relu)
    return out.reshape(N, Do, Ho, Wo, Cout)


def resnet_l1_forward(x_ncdhw, params):
    p = params
    # NCDHW -> NDHWC once; bf16 activations throughout (f32 accumulation in-kernel)
    x = jnp.transpose(x_ncdhw, (0, 2, 3, 4, 1)).astype(jnp.bfloat16)
    # stem: conv1 (k3,s2,p3) + folded bn1 + relu
    x = conv3d_bn_act(x, p["conv1_w"], p["conv1_b"], stride=2, pad=3, relu=True)
    # maxpool k3 s2 p1 (separable)
    x = maxpool3d(x, k=3, stride=2, pad=1)
    # layer1 (BasicBlock x layers[0], stride 1, no downsample)
    for blk in p["layer1"]:
        identity = x
        out = conv3d_bn_act(x, blk["w1"], blk["b1"], stride=1, pad=1, relu=True)
        x = conv3d_bn_act(out, blk["w2"], blk["b2"], stride=1, pad=1, relu=True,
                          residual=identity)
    # avgpool k3 s3 (separable, non-overlapping)
    x = avgpool3d(x, k=3, stride=3)
    # flatten in PyTorch NCDHW order
    x = jnp.transpose(x, (0, 4, 1, 2, 3)).reshape(x.shape[0], -1)
    # fc: K-tiled fused GEMM (bias, no activation)
    x1 = fused_gemm(x, p["fc_w"], p["fc_b"], relu=False, out_dtype=jnp.float32)
    # fc2 (512 -> num_classes): tiny, plain XLA matmul (not worth a kernel launch)
    logits = x1 @ p["fc2_w"] + p["fc2_b"]
    return [logits, x1]


# ----------------------------------------------------------------------------
# parameters (shapes follow ResNet_l1.__init__ with BasicBlock, layers=[1])
# ----------------------------------------------------------------------------
def init_params(key, flat_dim, num_classes=2):
    ks = jax.random.split(key, 8)
    eps = 1e-5

    def conv_w(k, cin, cout, ksz):
        fan_in = cin * ksz ** 3
        return jax.random.normal(k, (ksz, ksz, ksz, cin, cout), jnp.float32) * math.sqrt(
            2.0 / fan_in)

    def bn(c):
        # gamma=1, beta=0, running stats (0,1) -> scale, shift (inference fold)
        scale = jnp.full((c,), 1.0 / math.sqrt(1.0 + eps), jnp.float32)
        shift = jnp.zeros((c,), jnp.float32)
        return scale, shift

    bn1_s, bn1_b = bn(64)
    b1_s1, b1_b1 = bn(64)
    b1_s2, b1_b2 = bn(64)
    return {
        "conv1_w": conv_w(ks[0], 1, 64, 3), "bn1_s": bn1_s, "bn1_b": bn1_b,
        "layer1": [{
            "w1": conv_w(ks[1], 64, 64, 3), "s1": b1_s1, "b1": b1_b1,
            "w2": conv_w(ks[2], 64, 64, 3), "s2": b1_s2, "b2": b1_b2,
        }],
        "fc_w": jax.random.normal(ks[3], (flat_dim, 512), jnp.float32)
        * (1.0 / math.sqrt(flat_dim)),
        "fc_b": jax.random.normal(ks[4], (512,), jnp.float32) * 0.01,
        "fc2_w": jax.random.normal(ks[5], (512, num_classes), jnp.float32)
        * (1.0 / math.sqrt(512.0)),
        "fc2_b": jax.random.normal(ks[6], (num_classes,), jnp.float32) * 0.01,
    }


def prepare_params(raw):
    """Fold inference BN scale into conv weights; cast GEMM weights to bf16."""
    def fold(w, s):
        return (w * s.reshape(1, 1, 1, 1, -1)).astype(jnp.bfloat16)

    return {
        "conv1_w": fold(raw["conv1_w"], raw["bn1_s"]),
        "conv1_b": raw["bn1_b"].astype(jnp.float32),
        "layer1": [{
            "w1": fold(b["w1"], b["s1"]), "b1": b["b1"].astype(jnp.float32),
            "w2": fold(b["w2"], b["s2"]), "b2": b["b2"].astype(jnp.float32),
        } for b in raw["layer1"]],
        "fc_w": raw["fc_w"].astype(jnp.bfloat16),
        "fc_b": raw["fc_b"].astype(jnp.float32),
        "fc2_w": raw["fc2_w"].astype(jnp.float32),
        "fc2_b": raw["fc2_b"].astype(jnp.float32),
    }


# ----------------------------------------------------------------------------
if __name__ == "__main__":
    key = jax.random.PRNGKey(0)
    k_x, k_p = jax.random.split(key)

    # small demo input (PyTorch NCDHW): batch=2, 1 channel, 16^3 volume
    N, C, D, H, W = 2, 1, 16, 16, 16
    x = jax.random.normal(k_x, (N, C, D, H, W), jnp.float32)

    # trace spatial sizes to derive the flatten dim for fc
    d1 = (D + 2 * 3 - 3) // 2 + 1          # conv1
    d2 = (d1 + 2 * 1 - 3) // 2 + 1          # maxpool
    d3 = d2                                 # layer1 (stride 1)
    d4 = (d3 - 3) // 3 + 1                  # avgpool
    flat_dim = 64 * d4 * d4 * d4

    params = prepare_params(init_params(k_p, flat_dim, num_classes=2))

    fwd = jax.jit(resnet_l1_forward)
    logits, feat = fwd(x, params)
    jax.block_until_ready(logits)
    jax.block_until_ready(feat)

    assert logits.shape == (N, 2), logits.shape
    assert feat.shape == (N, 512), feat.shape
    assert bool(jnp.all(jnp.isfinite(logits))) and bool(jnp.all(jnp.isfinite(feat)))
    print("KERNEL_OK")
</pallas_src>

<mosaic_0001>
module attributes {stable_mosaic.version = 11 : i64} {
  func.func @kernel(%arg0: i32, %arg1: i32, %arg2: memref<512x27xbf16, #tpu.memory_space<vmem>>, %arg3: memref<27x64xbf16, #tpu.memory_space<vmem>>, %arg4: memref<1x64xf32, #tpu.memory_space<vmem>>, %arg5: memref<512x64xbf16, #tpu.memory_space<vmem>>, %arg6: memref<512x64xf32, #tpu.memory_space<vmem>>) attributes {dimension_semantics = [#tpu.dimension_semantics<parallel>, #tpu.dimension_semantics<arbitrary>], iteration_bounds = array<i64: 4, 1>, scalar_prefetch = 0 : i64, scratch_operands = 1 : i64, tpu.core_type = #tpu.core_type<tc>, window_params = [{transform_indices = @transform_0, window_bounds = array<i64: 512, 27>}, {transform_indices = @transform_1, window_bounds = array<i64: 27, 64>}, {pipeline_mode = #tpu.pipeline_mode<synchronous>, transform_indices = @transform_2, window_bounds = array<i64: 1, 64>}, {transform_indices = @transform_3, window_bounds = array<i64: 512, 64>}]} {
    %c0_i32 = arith.constant 0 : i32
    %0 = arith.cmpi eq, %arg1, %c0_i32 : i32
    %1 = arith.extui %0 : i1 to i32
    %c0_i32_0 = arith.constant 0 : i32
    %2 = arith.cmpi ne, %1, %c0_i32_0 : i32
    scf.if %2 {
      %cst_10 = arith.constant 0.000000e+00 : f32
      %12 = vector.broadcast %cst_10 : f32 to vector<512x64xf32>
      %c0_11 = arith.constant 0 : index
      %c0_12 = arith.constant 0 : index
      %13 = vector.load %arg6[%c0_11, %c0_12] : memref<512x64xf32, #tpu.memory_space<vmem>>, vector<512x64xf32>
      tpu.vector_store %arg6[%c0_11, %c0_12], %12 {strides = array<i32>} : memref<512x64xf32, #tpu.memory_space<vmem>>, vector<512x64xf32>,
    } else {
    }
    %c0 = arith.constant 0 : index
    %c0_1 = arith.constant 0 : index
    %3 = vector.load %arg6[%c0, %c0_1] : memref<512x64xf32, #tpu.memory_space<vmem>>, vector<512x64xf32>
    %c0_2 = arith.constant 0 : index
    %c0_3 = arith.constant 0 : index
    %4 = vector.load %arg2[%c0_2, %c0_3] : memref<512x27xbf16, #tpu.memory_space<vmem>>, vector<512x27xbf16>
    %c0_4 = arith.constant 0 : index
    %c0_5 = arith.constant 0 : index
    %5 = vector.load %arg3[%c0_4, %c0_5] : memref<27x64xbf16, #tpu.memory_space<vmem>>, vector<27x64xbf16>
    %cst = arith.constant dense<0.000000e+00> : vector<512x64xf32>
    %6 = tpu.matmul %4, %5, %cst {dimension_numbers = #tpu.dot_dimension_numbers<[1], [0], [0], [1], [0, 0, 1, 1], [], []>} : vector<512x27xbf16>, vector<27x64xbf16>, vector<512x64xf32> -> vector<512x64xf32>
    %7 = arith.addf %3, %6 : vector<512x64xf32>
    %c0_6 = arith.constant 0 : index
    %c0_7 = arith.constant 0 : index
    %8 = vector.load %arg6[%c0_6, %c0_7] : memref<512x64xf32, #tpu.memory_space<vmem>>, vector<512x64xf32>
    tpu.vector_store %arg6[%c0_6, %c0_7], %7 {strides = array<i32>} : memref<512x64xf32, #tpu.memory_space<vmem>>, vector<512x64xf32>,
    %c0_i32_8 = arith.constant 0 : i32
    %9 = arith.cmpi eq, %arg1, %c0_i32_8 : i32
    %10 = arith.extui %9 : i1 to i32
    %c0_i32_9 = arith.constant 0 : i32
    %11 = arith.cmpi ne, %10, %c0_i32_9 : i32
    scf.if %11 {
      %c0_10 = arith.constant 0 : index
      %c0_11 = arith.constant 0 : index
      %12 = vector.load %arg6[%c0_10, %c0_11] : memref<512x64xf32, #tpu.memory_space<vmem>>, vector<512x64xf32>
      %c0_12 = arith.constant 0 : index
      %c0_13 = arith.constant 0 : index
      %13 = vector.load %arg4[%c0_12, %c0_13] : memref<1x64xf32, #tpu.memory_space<vmem>>, vector<1x64xf32>
      %14 = vector.broadcast %13 : vector<1x64xf32> to vector<512x64xf32>
      %15 = arith.addf %12, %14 : vector<512x64xf32>
      %cst_14 = arith.constant 0.000000e+00 : f32
      %16 = vector.broadcast %cst_14 : f32 to vector<512x64xf32>
      %17 = arith.maximumf %15, %16 : vector<512x64xf32>
      %18 = arith.truncf %17 : vector<512x64xf32> to vector<512x64xbf16>
      %c0_15 = arith.constant 0 : index
      %c0_16 = arith.constant 0 : index
      %19 = vector.load %arg5[%c0_15, %c0_16] : memref<512x64xbf16, #tpu.memory_space<vmem>>, vector<512x64xbf16>
      tpu.vector_store %arg5[%c0_15, %c0_16], %18 {strides = array<i32>} : memref<512x64xbf16, #tpu.memory_space<vmem>>, vector<512x64xbf16>,
    } else {
    }
    return
  }
  func.func @transform_0(%arg0: i32, %arg1: i32) -> (i32, i32) {
    %c0_i32 = arith.constant 0 : i32
    return %arg0, %arg1 : i32, i32
  }
  func.func @transform_1(%arg0: i32, %arg1: i32) -> (i32, i32) {
    %c0_i32 = arith.constant 0 : i32
    %c0_i32_0 = arith.constant 0 : i32
    return %arg1, %c0_i32 : i32, i32
  }
  func.func @transform_2(%arg0: i32, %arg1: i32) -> (i32, i32) {
    %c0_i32 = arith.constant 0 : i32
    %c0_i32_0 = arith.constant 0 : i32
    %c0_i32_1 = arith.constant 0 : i32
    return %c0_i32, %c0_i32_0 : i32, i32
  }
  func.func @transform_3(%arg0: i32, %arg1: i32) -> (i32, i32) {
    %c0_i32 = arith.constant 0 : i32
    %c0_i32_0 = arith.constant 0 : i32
    return %arg0, %c0_i32 : i32, i32
  }
}

module attributes {stable_mosaic.version = 11 : i64} {
  func.func @_pool_max_kernel(%arg0: i32, %arg1: memref<3x504x128xbf16, #tpu.memory_space<vmem>>, %arg2: memref<504x128xbf16, #tpu.memory_space<vmem>>) attributes {dimension_semantics = [#tpu.dimension_semantics<parallel>], iteration_bounds = array<i64: 1>, scalar_prefetch = 0 : i64, scratch_operands = 0 : i64, tpu.core_type = #tpu.core_type<tc>, window_params = [{transform_indices = @transform_0, window_bounds = array<i64: 3, 504, 128>}, {transform_indices = @transform_1, window_bounds = array<i64: 504, 128>}]} {
    %c0 = arith.constant 0 : index
    %c0_0 = arith.constant 0 : index
    %c0_1 = arith.constant 0 : index
    %0 = vector.load %arg1[%c0, %c0_0, %c0_1] : memref<3x504x128xbf16, #tpu.memory_space<vmem>>, vector<3x504x128xbf16>
    %cst = arith.constant dense<0xFF80> : vector<504x128xbf16>
    %1 = vector.multi_reduction <maximumf>, %0, %cst [0] : vector<3x504x128xbf16> to vector<504x128xbf16>
    %c0_2 = arith.constant 0 : index
    %c0_3 = arith.constant 0 : index
    %2 = vector.load %arg2[%c0_2, %c0_3] : memref<504x128xbf16, #tpu.memory_space<vmem>>, vector<504x128xbf16>
    tpu.vector_store %arg2[%c0_2, %c0_3], %1 {strides = array<i32>} : memref<504x128xbf16, #tpu.memory_space<vmem>>, vector<504x128xbf16>,
    return
  }
  func.func @transform_0(%arg0: i32) -> (i32, i32, i32) {
    %c0_i32 = arith.constant 0 : i32
    %c0_i32_0 = arith.constant 0 : i32
    %c0_i32_1 = arith.constant 0 : i32
    return %c0_i32, %arg0, %c0_i32_0 : i32, i32, i32
  }
  func.func @transform_1(%arg0: i32) -> (i32, i32) {
    %c0_i32 = arith.constant 0 : i32
    %c0_i32_0 = arith.constant 0 : i32
    return %arg0, %c0_i32 : i32, i32
  }
}

module attributes {stable_mosaic.version = 11 : i64} {
  func.func @_pool_max_kernel(%arg0: i32, %arg1: memref<3x256x128xbf16, #tpu.memory_space<vmem>>, %arg2: memref<256x128xbf16, #tpu.memory_space<vmem>>) attributes {dimension_semantics = [#tpu.dimension_semantics<parallel>], iteration_bounds = array<i64: 1>, scalar_prefetch = 0 : i64, scratch_operands = 0 : i64, tpu.core_type = #tpu.core_type<tc>, window_params = [{transform_indices = @transform_0, window_bounds = array<i64: 3, 256, 128>}, {transform_indices = @transform_1, window_bounds = array<i64: 256, 128>}]} {
    %c0 = arith.constant 0 : index
    %c0_0 = arith.constant 0 : index
    %c0_1 = arith.constant 0 : index
    %0 = vector.load %arg1[%c0, %c0_0, %c0_1] : memref<3x256x128xbf16, #tpu.memory_space<vmem>>, vector<3x256x128xbf16>
    %cst = arith.constant dense<0xFF80> : vector<256x128xbf16>
    %1 = vector.multi_reduction <maximumf>, %0, %cst [0] : vector<3x256x128xbf16> to vector<256x128xbf16>
    %c0_2 = arith.constant 0 : index
    %c0_3 = arith.constant 0 : index
    %2 = vector.load %arg2[%c0_2, %c0_3] : memref<256x128xbf16, #tpu.memory_space<vmem>>, vector<256x128xbf16>
    tpu.vector_store %arg2[%c0_2, %c0_3], %1 {strides = array<i32>} : memref<256x128xbf16, #tpu.memory_space<vmem>>, vector<256x128xbf16>,
    return
  }
  func.func @transform_0(%arg0: i32) -> (i32, i32, i32) {
    %c0_i32 = arith.constant 0 : i32
    %c0_i32_0 = arith.constant 0 : i32
    %c0_i32_1 = arith.constant 0 : i32
    return %c0_i32, %arg0, %c0_i32_0 : i32, i32, i32
  }
  func.func @transform_1(%arg0: i32) -> (i32, i32) {
    %c0_i32 = arith.constant 0 : i32
    %c0_i32_0 = arith.constant 0 : i32
    return %arg0, %c0_i32 : i32, i32
  }
}

module attributes {stable_mosaic.version = 11 : i64} {
  func.func @_pool_max_kernel(%arg0: i32, %arg1: memref<3x128x128xbf16, #tpu.memory_space<vmem>>, %arg2: memref<128x128xbf16, #tpu.memory_space<vmem>>) attributes {dimension_semantics = [#tpu.dimension_semantics<parallel>], iteration_bounds = array<i64: 1>, scalar_prefetch = 0 : i64, scratch_operands = 0 : i64, tpu.core_type = #tpu.core_type<tc>, window_params = [{transform_indices = @transform_0, window_bounds = array<i64: 3, 128, 128>}, {transform_indices = @transform_1, window_bounds = array<i64: 128, 128>}]} {
    %c0 = arith.constant 0 : index
    %c0_0 = arith.constant 0 : index
    %c0_1 = arith.constant 0 : index
    %0 = vector.load %arg1[%c0, %c0_0, %c0_1] : memref<3x128x128xbf16, #tpu.memory_space<vmem>>, vector<3x128x128xbf16>
    %cst = arith.constant dense<0xFF80> : vector<128x128xbf16>
    %1 = vector.multi_reduction <maximumf>, %0, %cst [0] : vector<3x128x128xbf16> to vector<128x128xbf16>
    %c0_2 = arith.constant 0 : index
    %c0_3 = arith.constant 0 : index
    %2 = vector.load %arg2[%c0_2, %c0_3] : memref<128x128xbf16, #tpu.memory_space<vmem>>, vector<128x128xbf16>
    tpu.vector_store %arg2[%c0_2, %c0_3], %1 {strides = array<i32>} : memref<128x128xbf16, #tpu.memory_space<vmem>>, vector<128x128xbf16>,
    return
  }
  func.func @transform_0(%arg0: i32) -> (i32, i32, i32) {
    %c0_i32 = arith.constant 0 : i32
    %c0_i32_0 = arith.constant 0 : i32
    %c0_i32_1 = arith.constant 0 : i32
    return %c0_i32, %arg0, %c0_i32_0 : i32, i32, i32
  }
  func.func @transform_1(%arg0: i32) -> (i32, i32) {
    %c0_i32 = arith.constant 0 : i32
    %c0_i32_0 = arith.constant 0 : i32
    return %arg0, %c0_i32 : i32, i32
  }
}

module attributes {stable_mosaic.version = 11 : i64} {
  func.func @kernel(%arg0: i32, %arg1: i32, %arg2: memref<9x256x64xbf16, #tpu.memory_space<vmem>>, %arg3: memref<9x64x64xbf16, #tpu.memory_space<vmem>>, %arg4: memref<1x64xf32, #tpu.memory_space<vmem>>, %arg5: memref<256x64xbf16, #tpu.memory_space<vmem>>, %arg6: memref<256x64xf32, #tpu.memory_space<vmem>>) attributes {dimension_semantics = [#tpu.dimension_semantics<parallel>, #tpu.dimension_semantics<arbitrary>], iteration_bounds = array<i64: 1, 3>, scalar_prefetch = 0 : i64, scratch_operands = 1 : i64, tpu.core_type = #tpu.core_type<tc>, window_params = [{transform_indices = @transform_0, window_bounds = array<i64: 9, 256, 64>}, {transform_indices = @transform_1, window_bounds = array<i64: 9, 64, 64>}, {pipeline_mode = #tpu.pipeline_mode<synchronous>, transform_indices = @transform_2, window_bounds = array<i64: 1, 64>}, {transform_indices = @transform_3, window_bounds = array<i64: 256, 64>}]} {
    %c0_i32 = arith.constant 0 : i32
    %0 = arith.cmpi eq, %arg1, %c0_i32 : i32
    %1 = arith.extui %0 : i1 to i32
    %c0_i32_0 = arith.constant 0 : i32
    %2 = arith.cmpi ne, %1, %c0_i32_0 : i32
    scf.if %2 {
      %cst_59 = arith.constant 0.000000e+00 : f32
      %62 = vector.broadcast %cst_59 : f32 to vector<256x64xf32>
      %c0_60 = arith.constant 0 : index
      %c0_61 = arith.constant 0 : index
      %63 = vector.load %arg6[%c0_60, %c0_61] : memref<256x64xf32, #tpu.memory_space<vmem>>, vector<256x64xf32>
      tpu.vector_store %arg6[%c0_60, %c0_61], %62 {strides = array<i32>} : memref<256x64xf32, #tpu.memory_space<vmem>>, vector<256x64xf32>,
    } else {
    }
    %c0 = arith.constant 0 : index
    %c0_1 = arith.constant 0 : index
    %3 = vector.load %arg6[%c0, %c0_1] : memref<256x64xf32, #tpu.memory_space<vmem>>, vector<256x64xf32>
    %c0_2 = arith.constant 0 : index
    %c0_3 = arith.constant 0 : index
    %c0_4 = arith.constant 0 : index
    %4 = vector.load %arg2[%c0_2, %c0_3, %c0_4] : memref<9x256x64xbf16, #tpu.memory_space<vmem>>, vector<1x256x64xbf16>
    %5 = vector.shape_cast %4 : vector<1x256x64xbf16> to vector<256x64xbf16>
    %c0_5 = arith.constant 0 : index
    %c0_6 = arith.constant 0 : index
    %c0_7 = arith.constant 0 : index
    %6 = vector.load %arg3[%c0_5, %c0_6, %c0_7] : memref<9x64x64xbf16, #tpu.memory_space<vmem>>, vector<1x64x64xbf16>
    %7 = vector.shape_cast %6 : vector<1x64x64xbf16> to vector<64x64xbf16>
    %cst = arith.constant dense<0.000000e+00> : vector<256x64xf32>
    %8 = tpu.matmul %5, %7, %cst {dimension_numbers = #tpu.dot_dimension_numbers<[1], [0], [0], [1], [0, 0, 1, 1], [], []>} : vector<256x64xbf16>, vector<64x64xbf16>, vector<256x64xf32> -> vector<256x64xf32>
    %9 = arith.addf %3, %8 : vector<256x64xf32>
    %c1 = arith.constant 1 : index
    %c0_8 = arith.constant 0 : index
    %c0_9 = arith.constant 0 : index
    %10 = vector.load %arg2[%c1, %c0_8, %c0_9] : memref<9x256x64xbf16, #tpu.memory_space<vmem>>, vector<1x256x64xbf16>
    %11 = vector.shape_cast %10 : vector<1x256x64xbf16> to vector<256x64xbf16>
    %c1_10 = arith.constant 1 : index
    %c0_11 = arith.constant 0 : index
    %c0_12 = arith.constant 0 : index
    %12 = vector.load %arg3[%c1_10, %c0_11, %c0_12] : memref<9x64x64xbf16, #tpu.memory_space<vmem>>, vector<1x64x64xbf16>
    %13 = vector.shape_cast %12 : vector<1x64x64xbf16> to vector<64x64xbf16>
    %cst_13 = arith.constant dense<0.000000e+00> : vector<256x64xf32>
    %14 = tpu.matmul %11, %13, %cst_13 {dimension_numbers = #tpu.dot_dimension_numbers<[1], [0], [0], [1], [0, 0, 1, 1], [], []>} : vector<256x64xbf16>, vector<64x64xbf16>, vector<256x64xf32> -> vector<256x64xf32>
    %15 = arith.addf %9, %14 : vector<256x64xf32>
    %c2 = arith.constant 2 : index
    %c0_14 = arith.constant 0 : index
    %c0_15 = arith.constant 0 : index
    %16 = vector.load %arg2[%c2, %c0_14, %c0_15] : memref<9x256x64xbf16, #tpu.memory_space<vmem>>, vector<1x256x64xbf16>
    %17 = vector.shape_cast %16 : vector<1x256x64xbf16> to vector<256x64xbf16>
    %c2_16 = arith.constant 2 : index
    %c0_17 = arith.constant 0 : index
    %c0_18 = arith.constant 0 : index
    %18 = vector.load %arg3[%c2_16, %c0_17, %c0_18] : memref<9x64x64xbf16, #tpu.memory_space<vmem>>, vector<1x64x64xbf16>
    %19 = vector.shape_cast %18 : vector<1x64x64xbf16> to vector<64x64xbf16>
    %cst_19 = arith.constant dense<0.000000e+00> : vector<256x64xf32>
    %20 = tpu.matmul %17, %19, %cst_19 {dimension_numbers = #tpu.dot_dimension_numbers<[1], [0], [0], [1], [0, 0, 1, 1], [], []>} : vector<256x64xbf16>, vector<64x64xbf16>, vector<256x64xf32> -> vector<256x64xf32>
    %21 = arith.addf %15, %20 : vector<256x64xf32>
    %c3 = arith.constant 3 : index
    %c0_20 = arith.constant 0 : index
    %c0_21 = arith.constant 0 : index
    %22 = vector.load %arg2[%c3, %c0_20, %c0_21] : memref<9x256x64xbf16, #tpu.memory_space<vmem>>, vector<1x256x64xbf16>
    %23 = vector.shape_cast %22 : vector<1x256x64xbf16> to vector<256x64xbf16>
    %c3_22 = arith.constant 3 : index
    %c0_23 = arith.constant 0 : index
    %c0_24 = arith.constant 0 : index
    %24 = vector.load %arg3[%c3_22, %c0_23, %c0_24] : memref<9x64x64xbf16, #tpu.memory_space<vmem>>, vector<1x64x64xbf16>
    %25 = vector.shape_cast %24 : vector<1x64x64xbf16> to vector<64x64xbf16>
    %cst_25 = arith.constant dense<0.000000e+00> : vector<256x64xf32>
    %26 = tpu.matmul %23, %25, %cst_25 {dimension_numbers = #tpu.dot_dimension_numbers<[1], [0], [0], [1], [0, 0, 1, 1], [], []>} : vector<256x64xbf16>, vector<64x64xbf16>, vector<256x64xf32> -> vector<256x64xf32>
    %27 = arith.addf %21, %26 : vector<256x64xf32>
    %c4 = arith.constant 4 : index
    %c0_26 = arith.constant 0 : index
    %c0_27 = arith.constant 0 : index
    %28 = vector.load %arg2[%c4, %c0_26, %c0_27] : memref<9x256x64xbf16, #tpu.memory_space<vmem>>, vector<1x256x64xbf16>
    %29 = vector.shape_cast %28 : vector<1x256x64xbf16> to vector<256x64xbf16>
    %c4_28 = arith.constant 4 : index
    %c0_29 = arith.constant 0 : index
    %c0_30 = arith.constant 0 : index
    %30 = vector.load %arg3[%c4_28, %c0_29, %c0_30] : memref<9x64x64xbf16, #tpu.memory_space<vmem>>, vector<1x64x64xbf16>
    %31 = vector.shape_cast %30 : vector<1x64x64xbf16> to vector<64x64xbf16>
    %cst_31 = arith.constant dense<0.000000e+00> : vector<256x64xf32>
    %32 = tpu.matmul %29, %31, %cst_31 {dimension_numbers = #tpu.dot_dimension_numbers<[1], [0], [0], [1], [0, 0, 1, 1], [], []>} : vector<256x64xbf16>, vector<64x64xbf16>, vector<256x64xf32> -> vector<256x64xf32>
    %33 = arith.addf %27, %32 : vector<256x64xf32>
    %c5 = arith.constant 5 : index
    %c0_32 = arith.constant 0 : index
    %c0_33 = arith.constant 0 : index
    %34 = vector.load %arg2[%c5, %c0_32, %c0_33] : memref<9x256x64xbf16, #tpu.memory_space<vmem>>, vector<1x256x64xbf16>
    %35 = vector.shape_cast %34 : vector<1x256x64xbf16> to vector<256x64xbf16>
    %c5_34 = arith.constant 5 : index
    %c0_35 = arith.constant 0 : index
    %c0_36 = arith.constant 0 : index
    %36 = vector.load %arg3[%c5_34, %c0_35, %c0_36] : memref<9x64x64xbf16, #tpu.memory_space<vmem>>, vector<1x64x64xbf16>
    %37 = vector.shape_cast %36 : vector<1x64x64xbf16> to vector<64x64xbf16>
    %cst_37 = arith.constant dense<0.000000e+00> : vector<256x64xf32>
    %38 = tpu.matmul %35, %37, %cst_37 {dimension_numbers = #tpu.dot_dimension_numbers<[1], [0], [0], [1], [0, 0, 1, 1], [], []>} : vector<256x64xbf16>, vector<64x64xbf16>, vector<256x64xf32> -> vector<256x64xf32>
    %39 = arith.addf %33, %38 : vector<256x64xf32>
    %c6 = arith.constant 6 : index
    %c0_38 = arith.constant 0 : index
    %c0_39 = arith.constant 0 : index
    %40 = vector.load %arg2[%c6, %c0_38, %c0_39] : memref<9x256x64xbf16, #tpu.memory_space<vmem>>, vector<1x256x64xbf16>
    %41 = vector.shape_cast %40 : vector<1x256x64xbf16> to vector<256x64xbf16>
    %c6_40 = arith.constant 6 : index
    %c0_41 = arith.constant 0 : index
    %c0_42 = arith.constant 0 : index
    %42 = vector.load %arg3[%c6_40, %c0_41, %c0_42] : memref<9x64x64xbf16, #tpu.memory_space<vmem>>, vector<1x64x64xbf16>
    %43 = vector.shape_cast %42 : vector<1x64x64xbf16> to vector<64x64xbf16>
    %cst_43 = arith.constant dense<0.000000e+00> : vector<256x64xf32>
    %44 = tpu.matmul %41, %43, %cst_43 {dimension_numbers = #tpu.dot_dimension_numbers<[1], [0], [0], [1], [0, 0, 1, 1], [], []>} : vector<256x64xbf16>, vector<64x64xbf16>, vector<256x64xf32> -> vector<256x64xf32>
    %45 = arith.addf %39, %44 : vector<256x64xf32>
    %c7 = arith.constant 7 : index
    %c0_44 = arith.constant 0 : index
    %c0_45 = arith.constant 0 : index
    %46 = vector.load %arg2[%c7, %c0_44, %c0_45] : memref<9x256x64xbf16, #tpu.memory_space<vmem>>, vector<1x256x64xbf16>
    %47 = vector.shape_cast %46 : vector<1x256x64xbf16> to vector<256x64xbf16>
    %c7_46 = arith.constant 7 : index
    %c0_47 = arith.constant 0 : index
    %c0_48 = arith.constant 0 : index
    %48 = vector.load %arg3[%c7_46, %c0_47, %c0_48] : memref<9x64x64xbf16, #tpu.memory_space<vmem>>, vector<1x64x64xbf16>
    %49 = vector.shape_cast %48 : vector<1x64x64xbf16> to vector<64x64xbf16>
    %cst_49 = arith.constant dense<0.000000e+00> : vector<256x64xf32>
    %50 = tpu.matmul %47, %49, %cst_49 {dimension_numbers = #tpu.dot_dimension_numbers<[1], [0], [0], [1], [0, 0, 1, 1], [], []>} : vector<256x64xbf16>, vector<64x64xbf16>, vector<256x64xf32> -> vector<256x64xf32>
    %51 = arith.addf %45, %50 : vector<256x64xf32>
    %c8 = arith.constant 8 : index
    %c0_50 = arith.constant 0 : index
    %c0_51 = arith.constant 0 : index
    %52 = vector.load %arg2[%c8, %c0_50, %c0_51] : memref<9x256x64xbf16, #tpu.memory_space<vmem>>, vector<1x256x64xbf16>
    %53 = vector.shape_cast %52 : vector<1x256x64xbf16> to vector<256x64xbf16>
    %c8_52 = arith.constant 8 : index
    %c0_53 = arith.constant 0 : index
    %c0_54 = arith.constant 0 : index
    %54 = vector.load %arg3[%c8_52, %c0_53, %c0_54] : memref<9x64x64xbf16, #tpu.memory_space<vmem>>, vector<1x64x64xbf16>
    %55 = vector.shape_cast %54 : vector<1x64x64xbf16> to vector<64x64xbf16>
    %cst_55 = arith.constant dense<0.000000e+00> : vector<256x64xf32>
    %56 = tpu.matmul %53, %55, %cst_55 {dimension_numbers = #tpu.dot_dimension_numbers<[1], [0], [0], [1], [0, 0, 1, 1], [], []>} : vector<256x64xbf16>, vector<64x64xbf16>, vector<256x64xf32> -> vector<256x64xf32>
    %57 = arith.addf %51, %56 : vector<256x64xf32>
    %c0_56 = arith.constant 0 : index
    %c0_57 = arith.constant 0 : index
    %58 = vector.load %arg6[%c0_56, %c0_57] : memref<256x64xf32, #tpu.memory_space<vmem>>, vector<256x64xf32>
    tpu.vector_store %arg6[%c0_56, %c0_57], %57 {strides = array<i32>} : memref<256x64xf32, #tpu.memory_space<vmem>>, vector<256x64xf32>,
    %c2_i32 = arith.constant 2 : i32
    %59 = arith.cmpi eq, %arg1, %c2_i32 : i32
    %60 = arith.extui %59 : i1 to i32
    %c0_i32_58 = arith.constant 0 : i32
    %61 = arith.cmpi ne, %60, %c0_i32_58 : i32
    scf.if %61 {
      %c0_59 = arith.constant 0 : index
      %c0_60 = arith.constant 0 : index
      %62 = vector.load %arg6[%c0_59, %c0_60] : memref<256x64xf32, #tpu.memory_space<vmem>>, vector<256x64xf32>
      %c0_61 = arith.constant 0 : index
      %c0_62 = arith.constant 0 : index
      %63 = vector.load %arg4[%c0_61, %c0_62] : memref<1x64xf32, #tpu.memory_space<vmem>>, vector<1x64xf32>
      %64 = vector.broadcast %63 : vector<1x64xf32> to vector<256x64xf32>
      %65 = arith.addf %62, %64 : vector<256x64xf32>
      %cst_63 = arith.constant 0.000000e+00 : f32
      %66 = vector.broadcast %cst_63 : f32 to vector<256x64xf32>
      %67 = arith.maximumf %65, %66 : vector<256x64xf32>
      %68 = arith.truncf %67 : vector<256x64xf32> to vector<256x64xbf16>
      %c0_64 = arith.constant 0 : index
      %c0_65 = arith.constant 0 : index
      %69 = vector.load %arg5[%c0_64, %c0_65] : memref<256x64xbf16, #tpu.memory_space<vmem>>, vector<256x64xbf16>
      tpu.vector_store %arg5[%c0_64, %c0_65], %68 {strides = array<i32>} : memref<256x64xbf16, #tpu.memory_space<vmem>>, vector<256x64xbf16>,
    } else {
    }
    return
  }
  func.func @transform_0(%arg0: i32, %arg1: i32) -> (i32, i32, i32) {
    %c0_i32 = arith.constant 0 : i32
    %c0_i32_0 = arith.constant 0 : i32
    return %arg1, %arg0, %c0_i32 : i32, i32, i32
  }
  func.func @transform_1(%arg0: i32, %arg1: i32) -> (i32, i32, i32) {
    %c0_i32 = arith.constant 0 : i32
    %c0_i32_0 = arith.constant 0 : i32
    %c0_i32_1 = arith.constant 0 : i32
    return %arg1, %c0_i32, %c0_i32_0 : i32, i32, i32
  }
  func.func @transform_2(%arg0: i32, %arg1: i32) -> (i32, i32) {
    %c0_i32 = arith.constant 0 : i32
    %c0_i32_0 = arith.constant 0 : i32
    %c0_i32_1 = arith.constant 0 : i32
    return %c0_i32, %c0_i32_0 : i32, i32
  }
  func.func @transform_3(%arg0: i32, %arg1: i32) -> (i32, i32) {
    %c0_i32 = arith.constant 0 : i32
    %c0_i32_0 = arith.constant 0 : i32
    return %arg0, %c0_i32 : i32, i32
  }
}

module attributes {stable_mosaic.version = 11 : i64} {
  func.func @kernel(%arg0: i32, %arg1: i32, %arg2: memref<9x256x64xbf16, #tpu.memory_space<vmem>>, %arg3: memref<9x64x64xbf16, #tpu.memory_space<vmem>>, %arg4: memref<1x64xf32, #tpu.memory_space<vmem>>, %arg5: memref<256x64xbf16, #tpu.memory_space<vmem>>, %arg6: memref<256x64xbf16, #tpu.memory_space<vmem>>, %arg7: memref<256x64xf32, #tpu.memory_space<vmem>>) attributes {dimension_semantics = [#tpu.dimension_semantics<parallel>, #tpu.dimension_semantics<arbitrary>], iteration_bounds = array<i64: 1, 3>, scalar_prefetch = 0 : i64, scratch_operands = 1 : i64, tpu.core_type = #tpu.core_type<tc>, window_params = [{transform_indices = @transform_0, window_bounds = array<i64: 9, 256, 64>}, {transform_indices = @transform_1, window_bounds = array<i64: 9, 64, 64>}, {pipeline_mode = #tpu.pipeline_mode<synchronous>, transform_indices = @transform_2, window_bounds = array<i64: 1, 64>}, {transform_indices = @transform_3, window_bounds = array<i64: 256, 64>}, {transform_indices = @transform_4, window_bounds = array<i64: 256, 64>}]} {
    %c0_i32 = arith.constant 0 : i32
    %0 = arith.cmpi eq, %arg1, %c0_i32 : i32
    %1 = arith.extui %0 : i1 to i32
    %c0_i32_0 = arith.constant 0 : i32
    %2 = arith.cmpi ne, %1, %c0_i32_0 : i32
    scf.if %2 {
      %cst_59 = arith.constant 0.000000e+00 : f32
      %62 = vector.broadcast %cst_59 : f32 to vector<256x64xf32>
      %c0_60 = arith.constant 0 : index
      %c0_61 = arith.constant 0 : index
      %63 = vector.load %arg7[%c0_60, %c0_61] : memref<256x64xf32, #tpu.memory_space<vmem>>, vector<256x64xf32>
      tpu.vector_store %arg7[%c0_60, %c0_61], %62 {strides = array<i32>} : memref<256x64xf32, #tpu.memory_space<vmem>>, vector<256x64xf32>,
    } else {
    }
    %c0 = arith.constant 0 : index
    %c0_1 = arith.constant 0 : index
    %3 = vector.load %arg7[%c0, %c0_1] : memref<256x64xf32, #tpu.memory_space<vmem>>, vector<256x64xf32>
    %c0_2 = arith.constant 0 : index
    %c0_3 = arith.constant 0 : index
    %c0_4 = arith.constant 0 : index
    %4 = vector.load %arg2[%c0_2, %c0_3, %c0_4] : memref<9x256x64xbf16, #tpu.memory_space<vmem>>, vector<1x256x64xbf16>
    %5 = vector.shape_cast %4 : vector<1x256x64xbf16> to vector<256x64xbf16>
    %c0_5 = arith.constant 0 : index
    %c0_6 = arith.constant 0 : index
    %c0_7 = arith.constant 0 : index
    %6 = vector.load %arg3[%c0_5, %c0_6, %c0_7] : memref<9x64x64xbf16, #tpu.memory_space<vmem>>, vector<1x64x64xbf16>
    %7 = vector.shape_cast %6 : vector<1x64x64xbf16> to vector<64x64xbf16>
    %cst = arith.constant dense<0.000000e+00> : vector<256x64xf32>
    %8 = tpu.matmul %5, %7, %cst {dimension_numbers = #tpu.dot_dimension_numbers<[1], [0], [0], [1], [0, 0, 1, 1], [], []>} : vector<256x64xbf16>, vector<64x64xbf16>, vector<256x64xf32> -> vector<256x64xf32>
    %9 = arith.addf %3, %8 : vector<256x64xf32>
    %c1 = arith.constant 1 : index
    %c0_8 = arith.constant 0 : index
    %c0_9 = arith.constant 0 : index
    %10 = vector.load %arg2[%c1, %c0_8, %c0_9] : memref<9x256x64xbf16, #tpu.memory_space<vmem>>, vector<1x256x64xbf16>
    %11 = vector.shape_cast %10 : vector<1x256x64xbf16> to vector<256x64xbf16>
    %c1_10 = arith.constant 1 : index
    %c0_11 = arith.constant 0 : index
    %c0_12 = arith.constant 0 : index
    %12 = vector.load %arg3[%c1_10, %c0_11, %c0_12] : memref<9x64x64xbf16, #tpu.memory_space<vmem>>, vector<1x64x64xbf16>
    %13 = vector.shape_cast %12 : vector<1x64x64xbf16> to vector<64x64xbf16>
    %cst_13 = arith.constant dense<0.000000e+00> : vector<256x64xf32>
    %14 = tpu.matmul %11, %13, %cst_13 {dimension_numbers = #tpu.dot_dimension_numbers<[1], [0], [0], [1], [0, 0, 1, 1], [], []>} : vector<256x64xbf16>, vector<64x64xbf16>, vector<256x64xf32> -> vector<256x64xf32>
    %15 = arith.addf %9, %14 : vector<256x64xf32>
    %c2 = arith.constant 2 : index
    %c0_14 = arith.constant 0 : index
    %c0_15 = arith.constant 0 : index
    %16 = vector.load %arg2[%c2, %c0_14, %c0_15] : memref<9x256x64xbf16, #tpu.memory_space<vmem>>, vector<1x256x64xbf16>
    %17 = vector.shape_cast %16 : vector<1x256x64xbf16> to vector<256x64xbf16>
    %c2_16 = arith.constant 2 : index
    %c0_17 = arith.constant 0 : index
    %c0_18 = arith.constant 0 : index
    %18 = vector.load %arg3[%c2_16, %c0_17, %c0_18] : memref<9x64x64xbf16, #tpu.memory_space<vmem>>, vector<1x64x64xbf16>
    %19 = vector.shape_cast %18 : vector<1x64x64xbf16> to vector<64x64xbf16>
    %cst_19 = arith.constant dense<0.000000e+00> : vector<256x64xf32>
    %20 = tpu.matmul %17, %19, %cst_19 {dimension_numbers = #tpu.dot_dimension_numbers<[1], [0], [0], [1], [0, 0, 1, 1], [], []>} : vector<256x64xbf16>, vector<64x64xbf16>, vector<256x64xf32> -> vector<256x64xf32>
    %21 = arith.addf %15, %20 : vector<256x64xf32>
    %c3 = arith.constant 3 : index
    %c0_20 = arith.constant 0 : index
    %c0_21 = arith.constant 0 : index
    %22 = vector.load %arg2[%c3, %c0_20, %c0_21] : memref<9x256x64xbf16, #tpu.memory_space<vmem>>, vector<1x256x64xbf16>
    %23 = vector.shape_cast %22 : vector<1x256x64xbf16> to vector<256x64xbf16>
    %c3_22 = arith.constant 3 : index
    %c0_23 = arith.constant 0 : index
    %c0_24 = arith.constant 0 : index
    %24 = vector.load %arg3[%c3_22, %c0_23, %c0_24] : memref<9x64x64xbf16, #tpu.memory_space<vmem>>, vector<1x64x64xbf16>
    %25 = vector.shape_cast %24 : vector<1x64x64xbf16> to vector<64x64xbf16>
    %cst_25 = arith.constant dense<0.000000e+00> : vector<256x64xf32>
    %26 = tpu.matmul %23, %25, %cst_25 {dimension_numbers = #tpu.dot_dimension_numbers<[1], [0], [0], [1], [0, 0, 1, 1], [], []>} : vector<256x64xbf16>, vector<64x64xbf16>, vector<256x64xf32> -> vector<256x64xf32>
    %27 = arith.addf %21, %26 : vector<256x64xf32>
    %c4 = arith.constant 4 : index
    %c0_26 = arith.constant 0 : index
    %c0_27 = arith.constant 0 : index
    %28 = vector.load %arg2[%c4, %c0_26, %c0_27] : memref<9x256x64xbf16, #tpu.memory_space<vmem>>, vector<1x256x64xbf16>
    %29 = vector.shape_cast %28 : vector<1x256x64xbf16> to vector<256x64xbf16>
    %c4_28 = arith.constant 4 : index
    %c0_29 = arith.constant 0 : index
    %c0_30 = arith.constant 0 : index
    %30 = vector.load %arg3[%c4_28, %c0_29, %c0_30] : memref<9x64x64xbf16, #tpu.memory_space<vmem>>, vector<1x64x64xbf16>
    %31 = vector.shape_cast %30 : vector<1x64x64xbf16> to vector<64x64xbf16>
    %cst_31 = arith.constant dense<0.000000e+00> : vector<256x64xf32>
    %32 = tpu.matmul %29, %31, %cst_31 {dimension_numbers = #tpu.dot_dimension_numbers<[1], [0], [0], [1], [0, 0, 1, 1], [], []>} : vector<256x64xbf16>, vector<64x64xbf16>, vector<256x64xf32> -> vector<256x64xf32>
    %33 = arith.addf %27, %32 : vector<256x64xf32>
    %c5 = arith.constant 5 : index
    %c0_32 = arith.constant 0 : index
    %c0_33 = arith.constant 0 : index
    %34 = vector.load %arg2[%c5, %c0_32, %c0_33] : memref<9x256x64xbf16, #tpu.memory_space<vmem>>, vector<1x256x64xbf16>
    %35 = vector.shape_cast %34 : vector<1x256x64xbf16> to vector<256x64xbf16>
    %c5_34 = arith.constant 5 : index
    %c0_35 = arith.constant 0 : index
    %c0_36 = arith.constant 0 : index
    %36 = vector.load %arg3[%c5_34, %c0_35, %c0_36] : memref<9x64x64xbf16, #tpu.memory_space<vmem>>, vector<1x64x64xbf16>
    %37 = vector.shape_cast %36 : vector<1x64x64xbf16> to vector<64x64xbf16>
    %cst_37 = arith.constant dense<0.000000e+00> : vector<256x64xf32>
    %38 = tpu.matmul %35, %37, %cst_37 {dimension_numbers = #tpu.dot_dimension_numbers<[1], [0], [0], [1], [0, 0, 1, 1], [], []>} : vector<256x64xbf16>, vector<64x64xbf16>, vector<256x64xf32> -> vector<256x64xf32>
    %39 = arith.addf %33, %38 : vector<256x64xf32>
    %c6 = arith.constant 6 : index
    %c0_38 = arith.constant 0 : index
    %c0_39 = arith.constant 0 : index
    %40 = vector.load %arg2[%c6, %c0_38, %c0_39] : memref<9x256x64xbf16, #tpu.memory_space<vmem>>, vector<1x256x64xbf16>
    %41 = vector.shape_cast %40 : vector<1x256x64xbf16> to vector<256x64xbf16>
    %c6_40 = arith.constant 6 : index
    %c0_41 = arith.constant 0 : index
    %c0_42 = arith.constant 0 : index
    %42 = vector.load %arg3[%c6_40, %c0_41, %c0_42] : memref<9x64x64xbf16, #tpu.memory_space<vmem>>, vector<1x64x64xbf16>
    %43 = vector.shape_cast %42 : vector<1x64x64xbf16> to vector<64x64xbf16>
    %cst_43 = arith.constant dense<0.000000e+00> : vector<256x64xf32>
    %44 = tpu.matmul %41, %43, %cst_43 {dimension_numbers = #tpu.dot_dimension_numbers<[1], [0], [0], [1], [0, 0, 1, 1], [], []>} : vector<256x64xbf16>, vector<64x64xbf16>, vector<256x64xf32> -> vector<256x64xf32>
    %45 = arith.addf %39, %44 : vector<256x64xf32>
    %c7 = arith.constant 7 : index
    %c0_44 = arith.constant 0 : index
    %c0_45 = arith.constant 0 : index
    %46 = vector.load %arg2[%c7, %c0_44, %c0_45] : memref<9x256x64xbf16, #tpu.memory_space<vmem>>, vector<1x256x64xbf16>
    %47 = vector.shape_cast %46 : vector<1x256x64xbf16> to vector<256x64xbf16>
    %c7_46 = arith.constant 7 : index
    %c0_47 = arith.constant 0 : index
    %c0_48 = arith.constant 0 : index
    %48 = vector.load %arg3[%c7_46, %c0_47, %c0_48] : memref<9x64x64xbf16, #tpu.memory_space<vmem>>, vector<1x64x64xbf16>
    %49 = vector.shape_cast %48 : vector<1x64x64xbf16> to vector<64x64xbf16>
    %cst_49 = arith.constant dense<0.000000e+00> : vector<256x64xf32>
    %50 = tpu.matmul %47, %49, %cst_49 {dimension_numbers = #tpu.dot_dimension_numbers<[1], [0], [0], [1], [0, 0, 1, 1], [], []>} : vector<256x64xbf16>, vector<64x64xbf16>, vector<256x64xf32> -> vector<256x64xf32>
    %51 = arith.addf %45, %50 : vector<256x64xf32>
    %c8 = arith.constant 8 : index
    %c0_50 = arith.constant 0 : index
    %c0_51 = arith.constant 0 : index
    %52 = vector.load %arg2[%c8, %c0_50, %c0_51] : memref<9x256x64xbf16, #tpu.memory_space<vmem>>, vector<1x256x64xbf16>
    %53 = vector.shape_cast %52 : vector<1x256x64xbf16> to vector<256x64xbf16>
    %c8_52 = arith.constant 8 : index
    %c0_53 = arith.constant 0 : index
    %c0_54 = arith.constant 0 : index
    %54 = vector.load %arg3[%c8_52, %c0_53, %c0_54] : memref<9x64x64xbf16, #tpu.memory_space<vmem>>, vector<1x64x64xbf16>
    %55 = vector.shape_cast %54 : vector<1x64x64xbf16> to vector<64x64xbf16>
    %cst_55 = arith.constant dense<0.000000e+00> : vector<256x64xf32>
    %56 = tpu.matmul %53, %55, %cst_55 {dimension_numbers = #tpu.dot_dimension_numbers<[1], [0], [0], [1], [0, 0, 1, 1], [], []>} : vector<256x64xbf16>, vector<64x64xbf16>, vector<256x64xf32> -> vector<256x64xf32>
    %57 = arith.addf %51, %56 : vector<256x64xf32>
    %c0_56 = arith.constant 0 : index
    %c0_57 = arith.constant 0 : index
    %58 = vector.load %arg7[%c0_56, %c0_57] : memref<256x64xf32, #tpu.memory_space<vmem>>, vector<256x64xf32>
    tpu.vector_store %arg7[%c0_56, %c0_57], %57 {strides = array<i32>} : memref<256x64xf32, #tpu.memory_space<vmem>>, vector<256x64xf32>,
    %c2_i32 = arith.constant 2 : i32
    %59 = arith.cmpi eq, %arg1, %c2_i32 : i32
    %60 = arith.extui %59 : i1 to i32
    %c0_i32_58 = arith.constant 0 : i32
    %61 = arith.cmpi ne, %60, %c0_i32_58 : i32
    scf.if %61 {
      %c0_59 = arith.constant 0 : index
      %c0_60 = arith.constant 0 : index
      %62 = vector.load %arg7[%c0_59, %c0_60] : memref<256x64xf32, #tpu.memory_space<vmem>>, vector<256x64xf32>
      %c0_61 = arith.constant 0 : index
      %c0_62 = arith.constant 0 : index
      %63 = vector.load %arg4[%c0_61, %c0_62] : memref<1x64xf32, #tpu.memory_space<vmem>>, vector<1x64xf32>
      %64 = vector.broadcast %63 : vector<1x64xf32> to vector<256x64xf32>
      %65 = arith.addf %62, %64 : vector<256x64xf32>
      %c0_63 = arith.constant 0 : index
      %c0_64 = arith.constant 0 : index
      %66 = vector.load %arg5[%c0_63, %c0_64] : memref<256x64xbf16, #tpu.memory_space<vmem>>, vector<256x64xbf16>
      %67 = arith.extf %66 : vector<256x64xbf16> to vector<256x64xf32>
      %68 = arith.addf %65, %67 : vector<256x64xf32>
      %cst_65 = arith.constant 0.000000e+00 : f32
      %69 = vector.broadcast %cst_65 : f32 to vector<256x64xf32>
      %70 = arith.maximumf %68, %69 : vector<256x64xf32>
      %71 = arith.truncf %70 : vector<256x64xf32> to vector<256x64xbf16>
      %c0_66 = arith.constant 0 : index
      %c0_67 = arith.constant 0 : index
      %72 = vector.load %arg6[%c0_66, %c0_67] : memref<256x64xbf16, #tpu.memory_space<vmem>>, vector<256x64xbf16>
      tpu.vector_store %arg6[%c0_66, %c0_67], %71 {strides = array<i32>} : memref<256x64xbf16, #tpu.memory_space<vmem>>, vector<256x64xbf16>,
    } else {
    }
    return
  }
  func.func @transform_0(%arg0: i32, %arg1: i32) -> (i32, i32, i32) {
    %c0_i32 = arith.constant 0 : i32
    %c0_i32_0 = arith.constant 0 : i32
    return %arg1, %arg0, %c0_i32 : i32, i32, i32
  }
  func.func @transform_1(%arg0: i32, %arg1: i32) -> (i32, i32, i32) {
    %c0_i32 = arith.constant 0 : i32
    %c0_i32_0 = arith.constant 0 : i32
    %c0_i32_1 = arith.constant 0 : i32
    return %arg1, %c0_i32, %c0_i32_0 : i32, i32, i32
  }
  func.func @transform_2(%arg0: i32, %arg1: i32) -> (i32, i32) {
    %c0_i32 = arith.constant 0 : i32
    %c0_i32_0 = arith.constant 0 : i32
    %c0_i32_1 = arith.constant 0 : i32
    return %c0_i32, %c0_i32_0 : i32, i32
  }
  func.func @transform_3(%arg0: i32, %arg1: i32) -> (i32, i32) {
    %c0_i32 = arith.constant 0 : i32
    %c0_i32_0 = arith.constant 0 : i32
    return %arg0, %c0_i32 : i32, i32
  }
  func.func @transform_4(%arg0: i32, %arg1: i32) -> (i32, i32) {
    %c0_i32 = arith.constant 0 : i32
    %c0_i32_0 = arith.constant 0 : i32
    return %arg0, %c0_i32 : i32, i32
  }
}

module attributes {stable_mosaic.version = 11 : i64} {
  func.func @_pool_avg_kernel(%arg0: i32, %arg1: memref<3x32x128xbf16, #tpu.memory_space<vmem>>, %arg2: memref<32x128xbf16, #tpu.memory_space<vmem>>) attributes {dimension_semantics = [#tpu.dimension_semantics<parallel>], iteration_bounds = array<i64: 1>, scalar_prefetch = 0 : i64, scratch_operands = 0 : i64, tpu.core_type = #tpu.core_type<tc>, window_params = [{transform_indices = @transform_0, window_bounds = array<i64: 3, 32, 128>}, {transform_indices = @transform_1, window_bounds = array<i64: 32, 128>}]} {
    %c0 = arith.constant 0 : index
    %c0_0 = arith.constant 0 : index
    %c0_1 = arith.constant 0 : index
    %0 = vector.load %arg1[%c0, %c0_0, %c0_1] : memref<3x32x128xbf16, #tpu.memory_space<vmem>>, vector<3x32x128xbf16>
    %1 = arith.extf %0 : vector<3x32x128xbf16> to vector<3x32x128xf32>
    %cst = arith.constant dense<0.000000e+00> : vector<32x128xf32>
    %2 = vector.multi_reduction <add>, %1, %cst [0] : vector<3x32x128xf32> to vector<32x128xf32>
    %cst_2 = arith.constant 3.000000e+00 : f32
    %3 = vector.broadcast %cst_2 : f32 to vector<32x128xf32>
    %4 = arith.divf %2, %3 : vector<32x128xf32>
    %5 = arith.truncf %4 : vector<32x128xf32> to vector<32x128xbf16>
    %c0_3 = arith.constant 0 : index
    %c0_4 = arith.constant 0 : index
    %6 = vector.load %arg2[%c0_3, %c0_4] : memref<32x128xbf16, #tpu.memory_space<vmem>>, vector<32x128xbf16>
    tpu.vector_store %arg2[%c0_3, %c0_4], %5 {strides = array<i32>} : memref<32x128xbf16, #tpu.memory_space<vmem>>, vector<32x128xbf16>,
    return
  }
  func.func @transform_0(%arg0: i32) -> (i32, i32, i32) {
    %c0_i32 = arith.constant 0 : i32
    %c0_i32_0 = arith.constant 0 : i32
    %c0_i32_1 = arith.constant 0 : i32
    return %c0_i32, %arg0, %c0_i32_0 : i32, i32, i32
  }
  func.func @transform_1(%arg0: i32) -> (i32, i32) {
    %c0_i32 = arith.constant 0 : i32
    %c0_i32_0 = arith.constant 0 : i32
    return %arg0, %c0_i32 : i32, i32
  }
}

module attributes {stable_mosaic.version = 11 : i64} {
  func.func @_pool_avg_kernel(%arg0: i32, %arg1: memref<3x8x128xbf16, #tpu.memory_space<vmem>>, %arg2: memref<8x128xbf16, #tpu.memory_space<vmem>>) attributes {dimension_semantics = [#tpu.dimension_semantics<parallel>], iteration_bounds = array<i64: 1>, scalar_prefetch = 0 : i64, scratch_operands = 0 : i64, tpu.core_type = #tpu.core_type<tc>, window_params = [{transform_indices = @transform_0, window_bounds = array<i64: 3, 8, 128>}, {transform_indices = @transform_1, window_bounds = array<i64: 8, 128>}]} {
    %c0 = arith.constant 0 : index
    %c0_0 = arith.constant 0 : index
    %c0_1 = arith.constant 0 : index
    %0 = vector.load %arg1[%c0, %c0_0, %c0_1] : memref<3x8x128xbf16, #tpu.memory_space<vmem>>, vector<3x8x128xbf16>
    %1 = arith.extf %0 : vector<3x8x128xbf16> to vector<3x8x128xf32>
    %cst = arith.constant dense<0.000000e+00> : vector<8x128xf32>
    %2 = vector.multi_reduction <add>, %1, %cst [0] : vector<3x8x128xf32> to vector<8x128xf32>
    %cst_2 = arith.constant 3.000000e+00 : f32
    %3 = vector.broadcast %cst_2 : f32 to vector<8x128xf32>
    %4 = arith.divf %2, %3 : vector<8x128xf32>
    %5 = arith.truncf %4 : vector<8x128xf32> to vector<8x128xbf16>
    %c0_3 = arith.constant 0 : index
    %c0_4 = arith.constant 0 : index
    %6 = vector.load %arg2[%c0_3, %c0_4] : memref<8x128xbf16, #tpu.memory_space<vmem>>, vector<8x128xbf16>
    tpu.vector_store %arg2[%c0_3, %c0_4], %5 {strides = array<i32>} : memref<8x128xbf16, #tpu.memory_space<vmem>>, vector<8x128xbf16>,
    return
  }
  func.func @transform_0(%arg0: i32) -> (i32, i32, i32) {
    %c0_i32 = arith.constant 0 : i32
    %c0_i32_0 = arith.constant 0 : i32
    %c0_i32_1 = arith.constant 0 : i32
    return %c0_i32, %arg0, %c0_i32_0 : i32, i32, i32
  }
  func.func @transform_1(%arg0: i32) -> (i32, i32) {
    %c0_i32 = arith.constant 0 : i32
    %c0_i32_0 = arith.constant 0 : i32
    return %arg0, %c0_i32 : i32, i32
  }
}

module attributes {stable_mosaic.version = 11 : i64} {
  func.func @kernel(%arg0: i32, %arg1: i32, %arg2: memref<8x64xbf16, #tpu.memory_space<vmem>>, %arg3: memref<64x512xbf16, #tpu.memory_space<vmem>>, %arg4: memref<1x512xf32, #tpu.memory_space<vmem>>, %arg5: memref<8x512xf32, #tpu.memory_space<vmem>>, %arg6: memref<8x512xf32, #tpu.memory_space<vmem>>) attributes {dimension_semantics = [#tpu.dimension_semantics<parallel>, #tpu.dimension_semantics<arbitrary>], iteration_bounds = array<i64: 1, 1>, scalar_prefetch = 0 : i64, scratch_operands = 1 : i64, tpu.core_type = #tpu.core_type<tc>, window_params = [{transform_indices = @transform_0, window_bounds = array<i64: 8, 64>}, {transform_indices = @transform_1, window_bounds = array<i64: 64, 512>}, {pipeline_mode = #tpu.pipeline_mode<synchronous>, transform_indices = @transform_2, window_bounds = array<i64: 1, 512>}, {transform_indices = @transform_3, window_bounds = array<i64: 8, 512>}]} {
    %c0_i32 = arith.constant 0 : i32
    %0 = arith.cmpi eq, %arg1, %c0_i32 : i32
    %1 = arith.extui %0 : i1 to i32
    %c0_i32_0 = arith.constant 0 : i32
    %2 = arith.cmpi ne, %1, %c0_i32_0 : i32
    scf.if %2 {
      %cst_10 = arith.constant 0.000000e+00 : f32
      %12 = vector.broadcast %cst_10 : f32 to vector<8x512xf32>
      %c0_11 = arith.constant 0 : index
      %c0_12 = arith.constant 0 : index
      %13 = vector.load %arg6[%c0_11, %c0_12] : memref<8x512xf32, #tpu.memory_space<vmem>>, vector<8x512xf32>
      tpu.vector_store %arg6[%c0_11, %c0_12], %12 {strides = array<i32>} : memref<8x512xf32, #tpu.memory_space<vmem>>, vector<8x512xf32>,
    } else {
    }
    %c0 = arith.constant 0 : index
    %c0_1 = arith.constant 0 : index
    %3 = vector.load %arg6[%c0, %c0_1] : memref<8x512xf32, #tpu.memory_space<vmem>>, vector<8x512xf32>
    %c0_2 = arith.constant 0 : index
    %c0_3 = arith.constant 0 : index
    %4 = vector.load %arg2[%c0_2, %c0_3] : memref<8x64xbf16, #tpu.memory_space<vmem>>, vector<8x64xbf16>
    %c0_4 = arith.constant 0 : index
    %c0_5 = arith.constant 0 : index
    %5 = vector.load %arg3[%c0_4, %c0_5] : memref<64x512xbf16, #tpu.memory_space<vmem>>, vector<64x512xbf16>
    %cst = arith.constant dense<0.000000e+00> : vector<8x512xf32>
    %6 = tpu.matmul %4, %5, %cst {dimension_numbers = #tpu.dot_dimension_numbers<[1], [0], [0], [1], [0, 0, 1, 1], [], []>} : vector<8x64xbf16>, vector<64x512xbf16>, vector<8x512xf32> -> vector<8x512xf32>
    %7 = arith.addf %3, %6 : vector<8x512xf32>
    %c0_6 = arith.constant 0 : index
    %c0_7 = arith.constant 0 : index
    %8 = vector.load %arg6[%c0_6, %c0_7] : memref<8x512xf32, #tpu.memory_space<vmem>>, vector<8x512xf32>
    tpu.vector_store %arg6[%c0_6, %c0_7], %7 {strides = array<i32>} : memref<8x512xf32, #tpu.memory_space<vmem>>, vector<8x512xf32>,
    %c0_i32_8 = arith.constant 0 : i32
    %9 = arith.cmpi eq, %arg1, %c0_i32_8 : i32
    %10 = arith.extui %9 : i1 to i32
    %c0_i32_9 = arith.constant 0 : i32
    %11 = arith.cmpi ne, %10, %c0_i32_9 : i32
    scf.if %11 {
      %c0_10 = arith.constant 0 : index
      %c0_11 = arith.constant 0 : index
      %12 = vector.load %arg6[%c0_10, %c0_11] : memref<8x512xf32, #tpu.memory_space<vmem>>, vector<8x512xf32>
      %c0_12 = arith.constant 0 : index
      %c0_13 = arith.constant 0 : index
      %13 = vector.load %arg4[%c0_12, %c0_13] : memref<1x512xf32, #tpu.memory_space<vmem>>, vector<1x512xf32>
      %14 = vector.broadcast %13 : vector<1x512xf32> to vector<8x512xf32>
      %15 = arith.addf %12, %14 : vector<8x512xf32>
      %c0_14 = arith.constant 0 : index
      %c0_15 = arith.constant 0 : index
      %16 = vector.load %arg5[%c0_14, %c0_15] : memref<8x512xf32, #tpu.memory_space<vmem>>, vector<8x512xf32>
      tpu.vector_store %arg5[%c0_14, %c0_15], %15 {strides = array<i32>} : memref<8x512xf32, #tpu.memory_space<vmem>>, vector<8x512xf32>,
    } else {
    }
    return
  }
  func.func @transform_0(%arg0: i32, %arg1: i32) -> (i32, i32) {
    %c0_i32 = arith.constant 0 : i32
    return %arg0, %arg1 : i32, i32
  }
  func.func @transform_1(%arg0: i32, %arg1: i32) -> (i32, i32) {
    %c0_i32 = arith.constant 0 : i32
    %c0_i32_0 = arith.constant 0 : i32
    return %arg1, %c0_i32 : i32, i32
  }
  func.func @transform_2(%arg0: i32, %arg1: i32) -> (i32, i32) {
    %c0_i32 = arith.constant 0 : i32
    %c0_i32_0 = arith.constant 0 : i32
    %c0_i32_1 = arith.constant 0 : i32
    return %c0_i32, %c0_i32_0 : i32, i32
  }
  func.func @transform_3(%arg0: i32, %arg1: i32) -> (i32, i32) {
    %c0_i32 = arith.constant 0 : i32
    %c0_i32_0 = arith.constant 0 : i32
    return %arg0, %c0_i32 : i32, i32
  }
}

</mosaic_0001>

<bundles_post_ra>
// kernel: resnet_l1_forward.10
= control target key start
LH: loop header
LB: loop body
LE: loop exit
PB: predicated region body
PF: predicated region fallthrough
CT: control target
= control target key end

     0   :  { %s2140_s12 = smov 0   ;;  %s2142_s13 = smov 0   ;;  %s2665_s0 = inlined_call_operand.vmem [shape: bf16[2048,27], index: 0, kind: input, shape index: {}]   ;;  %s2666_s1 = inlined_call_operand.vmem [shape: bf16[27,64], index: 1, kind: input, shape index: {}]   ;;  %s2667_s2 = inlined_call_operand.vmem [shape: f32[1,64], index: 2, kind: input, shape index: {}]   ;;  %s2668_s3 = inlined_call_operand.vmem [shape: bf16[2048,64], index: 3, kind: output, shape index: {}]  }
   0x1   :  { %s2144_s14 = smov 0  }
   0x2 LB: > { %s25_s15 = sadd.s32 1, %s2112_s13  ;;  %p1725_p0 = scmp.ge.s32.totalorder %s2116_s14, 1  ;;  %s2116_s14 = sphi %s2144_s14, %s13_s14   ;;  %s2112_s13 = sphi %s2142_s13, %s2671_s13   ;;  %s2108_s12 = sphi %s2140_s12, %s2670_s12  }
   0x3   : > { %p27_p1 = scmp.ge.s32.totalorder %s25_s15, 4  ;;  %p166_p2 = scmp.lt.s32.totalorder %s2116_s14, 5 }
   0x5   : > { %s2673_s15 = smov (%p27_p1, %s25_s15), 0  ;;  %p167_p3 = pnand %p1725_p0, %p166_p2 }
   0x6   : > { %s1726_s18 = sshll.u32 (!%p167_p3), %s2108_s12, 6 }
   0x7   : > { %170 = sbr.rel (%p167_p3) target bundleno = 308 (0x134), region = 32  ;;  %p2166_p4 = scmp.lt.s32.totalorder (!%p167_p3), %s1726_s18, 255 }
   0xc   : > { %v2059_v0 = vld [vmem:[%s2666_s1 + $0x8] sm:$0x3f]   ;;  %vm689_vm0 = vcmask 1044480   ;;  %vm690_vm1 = vcmask 1045504   ;;  %v2118_v1 = vmov 65535   ;;  %vm224_vm2 = vcmask 523264  }
   0xd   : > { %v691_v2 = vsel %vm689_vm0, 4294967295, %v2118_v1  ;;  %v2175_v5 = vld [vmem:[%s2666_s1] sm:$0xff]   ;;  %v2119_v6 = vmov 0.0   ;;  %s2675_s18 = smov (!%p2166_p4, %s1726_s18), 255  ;;  %vm592_vm3 = vcmask 220160   ;;  %vm1572_vm4 = vcmask 519168  }
   0xe   : > { %v692_v3 = vsel %vm690_vm1, %v691_v2, 0  ;;  %227 = vst.msk [vmem:[#allocation2 + $0x10] sm:$0xff] %vm224_vm2, %v2119_v6  ;;  %225 = vst.msk [vmem:[#allocation2] sm:$0xff] %vm224_vm2, %v2119_v6  ;;  %s1727_s22 = sshll.u32 %s2675_s18, 2  ;;  %v2400_v1 = vld [vmem:[%s2667_s2] ss:$0 sm:$0xff] }
   0xf   : > { %v2170_v4 = vand.u32 %v2059_v0, %v692_v3  ;;  %226 = vst.msk [vmem:[#allocation2 + $0x8] sm:$0xff] %vm224_vm2, %v2119_v6  ;;  %228 = vst.msk [vmem:[#allocation2 + $0x18] sm:$0xff] %vm224_vm2, %v2119_v6  ;;  %s2323_s25 = scalar_lea.vmem %s2665_s0, %s1727_s22  ;;  %s2417_s30 = scalar_lea.vmem %s2668_s3, %s1727_s22 }
  0x10   : > { %229 = vst.msk [vmem:[#allocation2 + $0x20] sm:$0xff] %vm224_vm2, %v2119_v6  ;;  %230 = vst.msk [vmem:[#allocation2 + $0x28] sm:$0xff] %vm224_vm2, %v2119_v6  ;;  %v2061_v7 = vld [vmem:[%s2323_s25] sm:$0xff]   ;;  %v2063_v9 = vld [vmem:[%s2323_s25 + $0x8] sm:$0xff]  }
  0x11   : > { %231 = vst.msk [vmem:[#allocation2 + $0x30] sm:$0xff] %vm224_vm2, %v2119_v6  ;;  %232 = vst.msk [vmem:[#allocation2 + $0x38] sm:$0xff] %vm224_vm2, %v2119_v6  ;;  %1961 = vmatprep.subr.bf16.mxu0 %v2170_v4  ;;  %2029 = vmatprep.subr.bf16.mxu1 %v2170_v4  ;;  %v2062_v8 = vld [vmem:[%s2323_s25 + $0x80] sm:$0xff]   ;;  %v2064_v10 = vld [vmem:[%s2323_s25 + $0x88] sm:$0xff]  }
  0x12   : > { %233 = vst.msk [vmem:[#allocation2 + $0x40] sm:$0xff] %vm224_vm2, %v2119_v6  ;;  %234 = vst.msk [vmem:[#allocation2 + $0x48] sm:$0xff] %vm224_vm2, %v2119_v6  ;;  %1962 = vmatpush3.bf16.msra.mxu0 %v2170_v4  ;;  %2031 = vmatpush3.bf16.msra.mxu1 %v2170_v4  ;;  %v2065_v11 = vld [vmem:[%s2323_s25 + $0x10] sm:$0xff]   ;;  %v2067_v13 = vld [vmem:[%s2323_s25 + $0x18] sm:$0xff]  }
  0x13   : > { %235 = vst.msk [vmem:[#allocation2 + $0x50] sm:$0xff] %vm224_vm2, %v2119_v6  ;;  %236 = vst.msk [vmem:[#allocation2 + $0x58] sm:$0xff] %vm224_vm2, %v2119_v6  ;;  %1963 = vmatprep.subr.bf16.mxu0 %v2175_v5  ;;  %2030 = vmatprep.subr.bf16.mxu1 %v2175_v5  ;;  %v2066_v12 = vld [vmem:[%s2323_s25 + $0x90] sm:$0xff]   ;;  %v2068_v14 = vld [vmem:[%s2323_s25 + $0x98] sm:$0xff]  }
  0x14   : > { %237 = vst.msk [vmem:[#allocation2 + $0x60] sm:$0xff] %vm224_vm2, %v2119_v6  ;;  %238 = vst.msk [vmem:[#allocation2 + $0x68] sm:$0xff] %vm224_vm2, %v2119_v6  ;;  %1965 = vmatprep.mubr.msk.bf16.mxu0 %vm592_vm3, %v2061_v7  ;;  %1997 = vmatprep.mubr.msk.bf16.mxu1 %vm592_vm3, %v2062_v8  ;;  %v2069_v15 = vld [vmem:[%s2323_s25 + $0x20] sm:$0xff]   ;;  %v2071_v17 = vld [vmem:[%s2323_s25 + $0x28] sm:$0xff]  }
  0x15   : > { %239 = vst.msk [vmem:[#allocation2 + $0x70] sm:$0xff] %vm224_vm2, %v2119_v6  ;;  %240 = vst.msk [vmem:[#allocation2 + $0x78] sm:$0xff] %vm224_vm2, %v2119_v6  ;;  %v2070_v16 = vld [vmem:[%s2323_s25 + $0xa0] sm:$0xff]   ;;  %v2072_v18 = vld [vmem:[%s2323_s25 + $0xa8] sm:$0xff]  }
  0x16   : > { %241 = vst.msk [vmem:[#allocation2 + $0x80] sm:$0xff] %vm224_vm2, %v2119_v6  ;;  %242 = vst.msk [vmem:[#allocation2 + $0x88] sm:$0xff] %vm224_vm2, %v2119_v6  ;;  %1964 = vmatpush3.bf16.msra.mxu0 %v2175_v5  ;;  %2032 = vmatpush3.bf16.msra.mxu1 %v2175_v5  ;;  %v2073_v19 = vld [vmem:[%s2323_s25 + $0x30] sm:$0xff]   ;;  %v2075_v21 = vld [vmem:[%s2323_s25 + $0x38] sm:$0xff]  }
  0x17   : > { %243 = vst.msk [vmem:[#allocation2 + $0x90] sm:$0xff] %vm224_vm2, %v2119_v6  ;;  %244 = vst.msk [vmem:[#allocation2 + $0x98] sm:$0xff] %vm224_vm2, %v2119_v6  ;;  %v2074_v20 = vld [vmem:[%s2323_s25 + $0xb0] sm:$0xff]   ;;  %v2076_v22 = vld [vmem:[%s2323_s25 + $0xb8] sm:$0xff]  }
  0x18   : > { %245 = vst.msk [vmem:[#allocation2 + $0xa0] sm:$0xff] %vm224_vm2, %v2119_v6  ;;  %246 = vst.msk [vmem:[#allocation2 + $0xa8] sm:$0xff] %vm224_vm2, %v2119_v6  ;;  %v2077_v23 = vld [vmem:[%s2323_s25 + $0x40] sm:$0xff]   ;;  %v2079_v25 = vld [vmem:[%s2323_s25 + $0x48] sm:$0xff]  }
  0x19   : > { %247 = vst.msk [vmem:[#allocation2 + $0xb0] sm:$0xff] %vm224_vm2, %v2119_v6  ;;  %248 = vst.msk [vmem:[#allocation2 + $0xb8] sm:$0xff] %vm224_vm2, %v2119_v6  ;;  %1966 = vmatmul.mubr.msk.bf16.vlgmr.msra.gmra.mxu0 %vm592_vm3, %v2063_v9  ;;  %1998 = vmatmul.mubr.msk.bf16.vlgmr.msra.gmra.mxu1 %vm592_vm3, %v2064_v10  ;;  %v2078_v24 = vld [vmem:[%s2323_s25 + $0xc0] sm:$0xff]   ;;  %v2080_v26 = vld [vmem:[%s2323_s25 + $0xc8] sm:$0xff]  }
  0x1a   : > { %249 = vst.msk [vmem:[#allocation2 + $0xc0] sm:$0xff] %vm224_vm2, %v2119_v6  ;;  %250 = vst.msk [vmem:[#allocation2 + $0xc8] sm:$0xff] %vm224_vm2, %v2119_v6  ;;  %1969 = vmatprep.mubr.msk.bf16.mxu0 %vm592_vm3, %v2065_v11  ;;  %2001 = vmatprep.mubr.msk.bf16.mxu1 %vm592_vm3, %v2066_v12  ;;  %v2081_v27 = vld [vmem:[%s2323_s25 + $0x50] sm:$0xff]   ;;  %v2083_v29 = vld [vmem:[%s2323_s25 + $0x58] sm:$0xff]  }
  0x1b   : > { %251 = vst.msk [vmem:[#allocation2 + $0xd0] sm:$0xff] %vm224_vm2, %v2119_v6  ;;  %252 = vst.msk [vmem:[#allocation2 + $0xd8] sm:$0xff] %vm224_vm2, %v2119_v6  ;;  %v2082_v28 = vld [vmem:[%s2323_s25 + $0xd0] sm:$0xff]   ;;  %v2084_v30 = vld [vmem:[%s2323_s25 + $0xd8] sm:$0xff]  }
  0x1c   : > { %253 = vst.msk [vmem:[#allocation2 + $0xe0] sm:$0xff] %vm224_vm2, %v2119_v6  ;;  %254 = vst.msk [vmem:[#allocation2 + $0xe8] sm:$0xff] %vm224_vm2, %v2119_v6  ;;  %v2085_v31 = vld [vmem:[%s2323_s25 + $0x60] sm:$0xff]   ;;  %v2087_v33 = vld [vmem:[%s2323_s25 + $0x68] sm:$0xff]  }
  0x1d   : > { %255 = vst.msk [vmem:[#allocation2 + $0xf0] sm:$0xff] %vm224_vm2, %v2119_v6  ;;  %256 = vst.msk [vmem:[#allocation2 + $0xf8] sm:$0xff] %vm224_vm2, %v2119_v6  ;;  %v2086_v32 = vld [vmem:[%s2323_s25 + $0xe0] sm:$0xff]   ;;  %v2088_v34 = vld [vmem:[%s2323_s25 + $0xe8] sm:$0xff]  }
  0x1e   : > { %257 = vst.msk [vmem:[#allocation2 + $0x100] sm:$0xff] %vm224_vm2, %v2119_v6  ;;  %258 = vst.msk [vmem:[#allocation2 + $0x108] sm:$0xff] %vm224_vm2, %v2119_v6  ;;  %v2089_v35 = vld [vmem:[%s2323_s25 + $0x70] sm:$0xff]   ;;  %v2091_v37 = vld [vmem:[%s2323_s25 + $0x78] sm:$0xff]  }
  0x1f   : > { %259 = vst.msk [vmem:[#allocation2 + $0x110] sm:$0xff] %vm224_vm2, %v2119_v6  ;;  %260 = vst.msk [vmem:[#allocation2 + $0x118] sm:$0xff] %vm224_vm2, %v2119_v6  ;;  %v2090_v36 = vld [vmem:[%s2323_s25 + $0xf0] sm:$0xff]   ;;  %v2092_v38 = vld [vmem:[%s2323_s25 + $0xf8] sm:$0xff]  }
  0x20   : > { %261 = vst.msk [vmem:[#allocation2 + $0x120] sm:$0xff] %vm224_vm2, %v2119_v6  ;;  %262 = vst.msk [vmem:[#allocation2 + $0x128] sm:$0xff] %vm224_vm2, %v2119_v6  ;;  %v291_v39 = vld [vmem:[#allocation2 + $0x10] sm:$0xff]  ;;  %v289_v43 = vld [vmem:[#allocation2] sm:$0xff] }
  0x21   : > { %263 = vst.msk [vmem:[#allocation2 + $0x130] sm:$0xff] %vm224_vm2, %v2119_v6  ;;  %264 = vst.msk [vmem:[#allocation2 + $0x138] sm:$0xff] %vm224_vm2, %v2119_v6  ;;  %1970 = vmatmul.mubr.msk.bf16.gmra.mxu0 %vm592_vm3, %v2067_v13  ;;  %2002 = vmatmul.mubr.msk.bf16.gmra.mxu1 %vm592_vm3, %v2068_v14  ;;  %v292_v49 = vld [vmem:[#allocation2 + $0x18] sm:$0xff]  ;;  %v290_v55 = vld [vmem:[#allocation2 + $0x8] sm:$0xff] }
  0x22   : > { %265 = vst.msk [vmem:[#allocation2 + $0x140] sm:$0xff] %vm224_vm2, %v2119_v6  ;;  %266 = vst.msk [vmem:[#allocation2 + $0x148] sm:$0xff] %vm224_vm2, %v2119_v6  ;;  %1973 = vmatprep.mubr.msk.bf16.mxu0 %vm592_vm3, %v2069_v15  ;;  %2005 = vmatprep.mubr.msk.bf16.mxu1 %vm592_vm3, %v2070_v16  ;;  %v295_v61 = vld [vmem:[#allocation2 + $0x30] sm:$0xff]  ;;  %v293_v4 = vld [vmem:[#allocation2 + $0x20] sm:$0xff] }
  0x23   : > { %267 = vst.msk [vmem:[#allocation2 + $0x150] sm:$0xff] %vm224_vm2, %v2119_v6  ;;  %268 = vst.msk [vmem:[#allocation2 + $0x158] sm:$0xff] %vm224_vm2, %v2119_v6  ;;  %v296_v16 = vld [vmem:[#allocation2 + $0x38] sm:$0xff] }
  0x24   : > { %269 = vst.msk [vmem:[#allocation2 + $0x160] sm:$0xff] %vm224_vm2, %v2119_v6  ;;  %270 = vst.msk [vmem:[#allocation2 + $0x168] sm:$0xff] %vm224_vm2, %v2119_v6 }
  0x25   : > { %271 = vst.msk [vmem:[#allocation2 + $0x170] sm:$0xff] %vm224_vm2, %v2119_v6  ;;  %272 = vst.msk [vmem:[#allocation2 + $0x178] sm:$0xff] %vm224_vm2, %v2119_v6  ;;  %v321_v44 = vld [vmem:[#allocation2 + $0x100] sm:$0xff]  ;;  %v322_v56 = vld [vmem:[#allocation2 + $0x108] sm:$0xff] }
  0x26   : > { %273 = vst.msk [vmem:[#allocation2 + $0x180] sm:$0xff] %vm224_vm2, %v2119_v6  ;;  %274 = vst.msk [vmem:[#allocation2 + $0x188] sm:$0xff] %vm224_vm2, %v2119_v6  ;;  %v323_v40 = vld [vmem:[#allocation2 + $0x110] sm:$0xff]  ;;  %v324_v50 = vld [vmem:[#allocation2 + $0x118] sm:$0xff] }
  0x27   : > { %275 = vst.msk [vmem:[#allocation2 + $0x190] sm:$0xff] %vm224_vm2, %v2119_v6  ;;  %276 = vst.msk [vmem:[#allocation2 + $0x198] sm:$0xff] %vm224_vm2, %v2119_v6  ;;  %v325_v5 = vld [vmem:[#allocation2 + $0x120] sm:$0xff] }
  0x28   : > { %277 = vst.msk [vmem:[#allocation2 + $0x1a0] sm:$0xff] %vm224_vm2, %v2119_v6  ;;  %278 = vst.msk [vmem:[#allocation2 + $0x1a8] sm:$0xff] %vm224_vm2, %v2119_v6  ;;  %v327_v62 = vld [vmem:[#allocation2 + $0x130] sm:$0xff] }
  0x29   : > { %279 = vst.msk [vmem:[#allocation2 + $0x1b0] sm:$0xff] %vm224_vm2, %v2119_v6  ;;  %280 = vst.msk [vmem:[#allocation2 + $0x1b8] sm:$0xff] %vm224_vm2, %v2119_v6  ;;  %1974 = vmatmul.mubr.msk.bf16.gmra.mxu0 %vm592_vm3, %v2071_v17  ;;  %2006 = vmatmul.mubr.msk.bf16.gmra.mxu1 %vm592_vm3, %v2072_v18  ;;  %v328_v17 = vld [vmem:[#allocation2 + $0x138] sm:$0xff] }
  0x2a   : > { %281 = vst.msk [vmem:[#allocation2 + $0x1c0] sm:$0xff] %vm224_vm2, %v2119_v6  ;;  %282 = vst.msk [vmem:[#allocation2 + $0x1c8] sm:$0xff] %vm224_vm2, %v2119_v6  ;;  %1977 = vmatprep.mubr.msk.bf16.mxu0 %vm592_vm3, %v2073_v19  ;;  %2009 = vmatprep.mubr.msk.bf16.mxu1 %vm592_vm3, %v2074_v20 }
  0x2b   : > { %283 = vst.msk [vmem:[#allocation2 + $0x1d0] sm:$0xff] %vm224_vm2, %v2119_v6  ;;  %284 = vst.msk [vmem:[#allocation2 + $0x1d8] sm:$0xff] %vm224_vm2, %v2119_v6 }
  0x2c   : > { %285 = vst.msk [vmem:[#allocation2 + $0x1e0] sm:$0xff] %vm224_vm2, %v2119_v6  ;;  %286 = vst.msk [vmem:[#allocation2 + $0x1e8] sm:$0xff] %vm224_vm2, %v2119_v6 }
  0x2d   : > { %287 = vst.msk [vmem:[#allocation2 + $0x1f0] sm:$0xff] %vm224_vm2, %v2119_v6  ;;  %288 = vst.msk [vmem:[#allocation2 + $0x1f8] sm:$0xff] %vm224_vm2, %v2119_v6 }
  0x31   : > { %1978 = vmatmul.mubr.msk.bf16.gmra.mxu0 %vm592_vm3, %v2075_v21  ;;  %2010 = vmatmul.mubr.msk.bf16.gmra.mxu1 %vm592_vm3, %v2076_v22 }
  0x32   : > { %1981 = vmatprep.mubr.msk.bf16.mxu0 %vm592_vm3, %v2077_v23  ;;  %2013 = vmatprep.mubr.msk.bf16.mxu1 %vm592_vm3, %v2078_v24 }
  0x39   : > { %1982 = vmatmul.mubr.msk.bf16.gmra.mxu0 %vm592_vm3, %v2079_v25  ;;  %2014 = vmatmul.mubr.msk.bf16.gmra.mxu1 %vm592_vm3, %v2080_v26  ;;  %v294_v26 = vld [vmem:[#allocation2 + $0x28] sm:$0xff] }
  0x3a   : > { %1985 = vmatprep.mubr.msk.bf16.mxu0 %vm592_vm3, %v2081_v27  ;;  %2017 = vmatprep.mubr.msk.bf16.mxu1 %vm592_vm3, %v2082_v28  ;;  %v326_v27 = vld [vmem:[#allocation2 + $0x128] sm:$0xff] }
  0x41   : > { %1986 = vmatmul.mubr.msk.bf16.gmra.mxu0 %vm592_vm3, %v2083_v29  ;;  %2018 = vmatmul.mubr.msk.bf16.gmra.mxu1 %vm592_vm3, %v2084_v30 }
  0x42   : > { %1989 = vmatprep.mubr.msk.bf16.mxu0 %vm592_vm3, %v2085_v31  ;;  %2021 = vmatprep.mubr.msk.bf16.mxu1 %vm592_vm3, %v2086_v32 }
  0x49   : > { %1990 = vmatmul.mubr.msk.bf16.gmra.mxu0 %vm592_vm3, %v2087_v33  ;;  %2022 = vmatmul.mubr.msk.bf16.gmra.mxu1 %vm592_vm3, %v2088_v34 }
  0x4a   : > { %1993 = vmatprep.mubr.msk.bf16.mxu0 %vm592_vm3, %v2089_v35  ;;  %2025 = vmatprep.mubr.msk.bf16.mxu1 %vm592_vm3, %v2090_v36 }
  0x51   : > { %1994 = vmatmul.mubr.msk.bf16.gmra.mxu0 %vm592_vm3, %v2091_v37  ;;  %2026 = vmatmul.mubr.msk.bf16.gmra.mxu1 %vm592_vm3, %v2092_v38  ;;  %v299_v38 = vld [vmem:[#allocation2 + $0x50] sm:$0xff] }
  0xd9   : > { %v1967_v41 = vpop.f32.mrf.mxu0  ;;  %v1999_v42 = vpop.f32.mrf.mxu1 }
  0xda   : > { %v987_v45 = vadd.f32 %v1967_v41, %v291_v39  ;;  %v1019_v46 = vadd.f32 %v1999_v42, %v323_v40  ;;  %v331_v39 = vld [vmem:[#allocation2 + $0x150] sm:$0xff] }
  0xdb   : > { %v730_v47 = vpop.f32.mrf.mxu0  ;;  %v858_v48 = vpop.f32.mrf.mxu1 }
  0xdc   : > { %1052 = vst.msk [vmem:[#allocation2 + $0x10] sm:$0xff] %vm224_vm2, %v987_v45  ;;  %1084 = vst.msk [vmem:[#allocation2 + $0x110] sm:$0xff] %vm224_vm2, %v1019_v46  ;;  %v985_v51 = vadd.f32 %v730_v47, %v289_v43  ;;  %v1017_v52 = vadd.f32 %v858_v48, %v321_v44 }
  0xdd   : > { %v1968_v53 = vpop.f32.mrf.mxu0  ;;  %v2000_v54 = vpop.f32.mrf.mxu1 }
  0xde   : > { %1050 = vst.msk [vmem:[#allocation2] sm:$0xff] %vm224_vm2, %v985_v51  ;;  %1082 = vst.msk [vmem:[#allocation2 + $0x100] sm:$0xff] %vm224_vm2, %v1017_v52  ;;  %v988_v57 = vadd.f32 %v1968_v53, %v292_v49  ;;  %v1020_v58 = vadd.f32 %v2000_v54, %v324_v50  ;;  %v297_v52 = vld [vmem:[#allocation2 + $0x40] sm:$0xff] }
  0xdf   : > { %v733_v59 = vpop.f32.mrf.mxu0  ;;  %v861_v60 = vpop.f32.mrf.mxu1  ;;  %v329_v53 = vld [vmem:[#allocation2 + $0x140] sm:$0xff] }
  0xe0   : > { %1053 = vst.msk [vmem:[#allocation2 + $0x18] sm:$0xff] %vm224_vm2, %v988_v57  ;;  %1085 = vst.msk [vmem:[#allocation2 + $0x118] sm:$0xff] %vm224_vm2, %v1020_v58  ;;  %v986_v63 = vadd.f32 %v733_v59, %v290_v55  ;;  %v1018_v0 = vadd.f32 %v861_v60, %v322_v56 }
  0xe1   : > { %v1971_v2 = vpop.f32.mrf.mxu0  ;;  %v2003_v3 = vpop.f32.mrf.mxu1 }
  0xe2   : > { %1051 = vst.msk [vmem:[#allocation2 + $0x8] sm:$0xff] %vm224_vm2, %v986_v63  ;;  %1083 = vst.msk [vmem:[#allocation2 + $0x108] sm:$0xff] %vm224_vm2, %v1018_v0  ;;  %v991_v6 = vadd.f32 %v1971_v2, %v295_v61  ;;  %v1023_v7 = vadd.f32 %v2003_v3, %v327_v62  ;;  %v300_v3 = vld [vmem:[#allocation2 + $0x58] sm:$0xff] }
  0xe3   : > { %v1119_v8 = vld [vmem:[#allocation2 + $0x10] sm:$0xff]  ;;  %v746_v10 = vpop.f32.mrf.mxu0  ;;  %v874_v11 = vpop.f32.mrf.mxu1 }
  0xe4   : > { %v1151_v9 = vld [vmem:[#allocation2 + $0x110] sm:$0xff]  ;;  %v1190_v12 = vadd.f32 %v2400_v1, %v1119_v8  ;;  %1056 = vst.msk [vmem:[#allocation2 + $0x30] sm:$0xff] %vm224_vm2, %v991_v6  ;;  %1088 = vst.msk [vmem:[#allocation2 + $0x130] sm:$0xff] %vm224_vm2, %v1023_v7  ;;  %v989_v14 = vadd.f32 %v746_v10, %v293_v4  ;;  %v1021_v15 = vadd.f32 %v874_v11, %v325_v5  ;;  %v332_v4 = vld [vmem:[#allocation2 + $0x158] sm:$0xff] }
  0xe5   : > { %v1222_v13 = vadd.f32 %v2400_v1, %v1151_v9  ;;  %v1117_v18 = vld [vmem:[#allocation2] sm:$0xff]  ;;  %v1972_v20 = vpop.f32.mrf.mxu0  ;;  %v2004_v21 = vpop.f32.mrf.mxu1  ;;  %v298_v5 = vld [vmem:[#allocation2 + $0x48] sm:$0xff] }
  0xe6   : > { %v1149_v19 = vld [vmem:[#allocation2 + $0x100] sm:$0xff]  ;;  %v1254_v22 = vmax.f32 %v1190_v12, 0.0  ;;  %v1188_v24 = vadd.f32 %v2400_v1, %v1117_v18  ;;  %1054 = vst.msk [vmem:[#allocation2 + $0x20] sm:$0xff] %vm224_vm2, %v989_v14  ;;  %1086 = vst.msk [vmem:[#allocation2 + $0x120] sm:$0xff] %vm224_vm2, %v1021_v15  ;;  %v992_v30 = vadd.f32 %v1972_v20, %v296_v16  ;;  %v1024_v31 = vadd.f32 %v2004_v21, %v328_v17  ;;  %v330_v14 = vld [vmem:[#allocation2 + $0x148] sm:$0xff] }
  0xe7   : > { %v1286_v23 = vmax.f32 %v1222_v13, 0.0  ;;  %v1220_v25 = vadd.f32 %v2400_v1, %v1149_v19  ;;  %v1120_v28 = vld [vmem:[#allocation2 + $0x18] sm:$0xff]  ;;  %v749_v32 = vpop.f32.mrf.mxu0  ;;  %v877_v33 = vpop.f32.mrf.mxu1 }
  0xe8   : > { %v1152_v29 = vld [vmem:[#allocation2 + $0x118] sm:$0xff]  ;;  %v1865_v34 = vpack.c.bf16 %v1254_v22, %v1254_v22  ;;  %v1252_v36 = vmax.f32 %v1188_v24, 0.0  ;;  %v1191_v40 = vadd.f32 %v2400_v1, %v1120_v28  ;;  %1057 = vst.msk [vmem:[#allocation2 + $0x38] sm:$0xff] %vm224_vm2, %v992_v30  ;;  %1089 = vst.msk [vmem:[#allocation2 + $0x138] sm:$0xff] %vm224_vm2, %v1024_v31  ;;  %v990_v44 = vadd.f32 %v749_v32, %v294_v26  ;;  %v335_v26 = vld [vmem:[#allocation2 + $0x170] sm:$0xff] }
  0xe9   : > { %v1897_v35 = vpack.c.bf16 %v1286_v23, %v1286_v23  ;;  %v1284_v37 = vmax.f32 %v1220_v25, 0.0  ;;  %v1223_v41 = vadd.f32 %v2400_v1, %v1152_v29  ;;  %v1118_v42 = vld [vmem:[#allocation2 + $0x8] sm:$0xff]  ;;  %v1022_v45 = vadd.f32 %v877_v33, %v326_v27  ;;  %v1975_v46 = vpop.f32.mrf.mxu0  ;;  %v2007_v47 = vpop.f32.mrf.mxu1  ;;  %v303_v25 = vld [vmem:[#allocation2 + $0x70] sm:$0xff] }
  0xea   : > { %v1150_v43 = vld [vmem:[#allocation2 + $0x108] sm:$0xff]  ;;  %1575 = vst.msk [vmem:[%s2417_s30 + $0x8] sm:$0xf] %vm1572_vm4, %v1865_v34  ;;  %v1863_v48 = vpack.c.bf16 %v1252_v36, %v1252_v36  ;;  %v1189_v50 = vadd.f32 %v2400_v1, %v1118_v42  ;;  %v1255_v54 = vmax.f32 %v1191_v40, 0.0  ;;  %v995_v58 = vadd.f32 %v1975_v46, %v299_v38  ;;  %v333_v40 = vld [vmem:[#allocation2 + $0x160] sm:$0xff] }
  0xeb   : > { %1607 = vst.msk [vmem:[%s2417_s30 + $0x88] sm:$0xf] %vm1572_vm4, %v1897_v35  ;;  %v1895_v49 = vpack.c.bf16 %v1284_v37, %v1284_v37  ;;  %v1221_v51 = vadd.f32 %v2400_v1, %v1150_v43  ;;  %v1287_v55 = vmax.f32 %v1223_v41, 0.0  ;;  %v1123_v56 = vld [vmem:[#allocation2 + $0x30] sm:$0xff]  ;;  %v1027_v59 = vadd.f32 %v2007_v47, %v331_v39  ;;  %v762_v60 = vpop.f32.mrf.mxu0  ;;  %v890_v61 = vpop.f32.mrf.mxu1  ;;  %v301_v39 = vld [vmem:[#allocation2 + $0x60] sm:$0xff] }
  0xec   : > { %v1155_v57 = vld [vmem:[#allocation2 + $0x130] sm:$0xff]  ;;  %1055 = vst.msk [vmem:[#allocation2 + $0x28] sm:$0xff] %vm224_vm2, %v990_v44  ;;  %1087 = vst.msk [vmem:[#allocation2 + $0x128] sm:$0xff] %vm224_vm2, %v1022_v45  ;;  %v1253_v62 = vmax.f32 %v1189_v50, 0.0  ;;  %v1194_v0 = vadd.f32 %v2400_v1, %v1123_v56  ;;  %v1866_v6 = vpack.c.bf16 %v1255_v54, %v1255_v54  ;;  %v993_v10 = vadd.f32 %v762_v60, %v297_v52  ;;  %v336_v52 = vld [vmem:[#allocation2 + $0x178] sm:$0xff] }
  0xed   : > { %1573 = vst.msk [vmem:[%s2417_s30] sm:$0xf] %vm1572_vm4, %v1863_v48  ;;  %1605 = vst.msk [vmem:[%s2417_s30 + $0x80] sm:$0xf] %vm1572_vm4, %v1895_v49  ;;  %v1285_v63 = vmax.f32 %v1221_v51, 0.0  ;;  %v1226_v2 = vadd.f32 %v2400_v1, %v1155_v57  ;;  %v1898_v7 = vpack.c.bf16 %v1287_v55, %v1287_v55  ;;  %v1121_v8 = vld [vmem:[#allocation2 + $0x20] sm:$0xff]  ;;  %v1025_v11 = vadd.f32 %v890_v61, %v329_v53  ;;  %v1976_v12 = vpop.f32.mrf.mxu0  ;;  %v2008_v13 = vpop.f32.mrf.mxu1 }
  0xee   : > { %v1153_v9 = vld [vmem:[#allocation2 + $0x120] sm:$0xff]  ;;  %1060 = vst.msk [vmem:[#allocation2 + $0x50] sm:$0xff] %vm224_vm2, %v995_v58  ;;  %1092 = vst.msk [vmem:[#allocation2 + $0x150] sm:$0xff] %vm224_vm2, %v1027_v59  ;;  %v1864_v15 = vpack.c.bf16 %v1253_v62, %v1253_v62  ;;  %v1258_v17 = vmax.f32 %v1194_v0, 0.0  ;;  %v1192_v19 = vadd.f32 %v2400_v1, %v1121_v8  ;;  %v996_v21 = vadd.f32 %v1976_v12, %v300_v3  ;;  %v304_v51 = vld [vmem:[#allocation2 + $0x78] sm:$0xff] }
  0xef   : > { %v1896_v16 = vpack.c.bf16 %v1285_v63, %v1285_v63  ;;  %v1290_v18 = vmax.f32 %v1226_v2, 0.0  ;;  %1576 = vst.msk [vmem:[%s2417_s30 + $0xc] sm:$0xf] %vm1572_vm4, %v1866_v6  ;;  %1608 = vst.msk [vmem:[%s2417_s30 + $0x8c] sm:$0xf] %vm1572_vm4, %v1898_v7  ;;  %v1224_v20 = vadd.f32 %v2400_v1, %v1153_v9  ;;  %v1028_v22 = vadd.f32 %v2008_v13, %v332_v4  ;;  %v765_v23 = vpop.f32.mrf.mxu0  ;;  %v893_v24 = vpop.f32.mrf.mxu1  ;;  %v1124_v29 = vld [vmem:[#allocation2 + $0x38] sm:$0xff] }
  0xf0   : > { %1058 = vst.msk [vmem:[#allocation2 + $0x40] sm:$0xff] %vm224_vm2, %v993_v10  ;;  %1090 = vst.msk [vmem:[#allocation2 + $0x140] sm:$0xff] %vm224_vm2, %v1025_v11  ;;  %v1869_v27 = vpack.c.bf16 %v1258_v17, %v1258_v17  ;;  %v1156_v30 = vld [vmem:[#allocation2 + $0x138] sm:$0xff]  ;;  %v994_v31 = vadd.f32 %v765_v23, %v298_v5  ;;  %v1026_v32 = vadd.f32 %v893_v24, %v330_v14  ;;  %v1256_v33 = vmax.f32 %v1192_v19, 0.0  ;;  %v302_v2 = vld [vmem:[#allocation2 + $0x68] sm:$0xff] }
  0xf1   : > { %1574 = vst.msk [vmem:[%s2417_s30 + $0x4] sm:$0xf] %vm1572_vm4, %v1864_v15  ;;  %1606 = vst.msk [vmem:[%s2417_s30 + $0x84] sm:$0xf] %vm1572_vm4, %v1896_v16  ;;  %v1901_v28 = vpack.c.bf16 %v1290_v18, %v1290_v18  ;;  %v1288_v34 = vmax.f32 %v1224_v20, 0.0  ;;  %v1195_v35 = vadd.f32 %v2400_v1, %v1124_v29  ;;  %v1227_v36 = vadd.f32 %v2400_v1, %v1156_v30  ;;  %v1979_v37 = vpop.f32.mrf.mxu0  ;;  %v2011_v38 = vpop.f32.mrf.mxu1  ;;  %v334_v3 = vld [vmem:[#allocation2 + $0x168] sm:$0xff] }
  0xf2   : > { %1061 = vst.msk [vmem:[#allocation2 + $0x58] sm:$0xff] %vm224_vm2, %v996_v21  ;;  %1093 = vst.msk [vmem:[#allocation2 + $0x158] sm:$0xff] %vm224_vm2, %v1028_v22  ;;  %v999_v43 = vadd.f32 %v1979_v37, %v303_v25  ;;  %v1031_v44 = vadd.f32 %v2011_v38, %v335_v26  ;;  %v1867_v45 = vpack.c.bf16 %v1256_v33, %v1256_v33  ;;  %v307_v16 = vld [vmem:[#allocation2 + $0x90] sm:$0xff]  ;;  %v337_v37 = vld [vmem:[#allocation2 + $0x180] sm:$0xff] }
  0xf3   : > { %1579 = vst.msk [vmem:[%s2417_s30 + $0x18] sm:$0xf] %vm1572_vm4, %v1869_v27  ;;  %1611 = vst.msk [vmem:[%s2417_s30 + $0x98] sm:$0xf] %vm1572_vm4, %v1901_v28  ;;  %v1122_v41 = vld [vmem:[#allocation2 + $0x28] sm:$0xff]  ;;  %v1899_v46 = vpack.c.bf16 %v1288_v34, %v1288_v34  ;;  %v1259_v47 = vmax.f32 %v1195_v35, 0.0  ;;  %v778_v49 = vpop.f32.mrf.mxu0  ;;  %v906_v50 = vpop.f32.mrf.mxu1 }
  0xf4   : > { %v1154_v42 = vld [vmem:[#allocation2 + $0x128] sm:$0xff]  ;;  %1059 = vst.msk [vmem:[#allocation2 + $0x48] sm:$0xff] %vm224_vm2, %v994_v31  ;;  %1091 = vst.msk [vmem:[#allocation2 + $0x148] sm:$0xff] %vm224_vm2, %v1026_v32  ;;  %v1291_v48 = vmax.f32 %v1227_v36, 0.0  ;;  %v1193_v53 = vadd.f32 %v2400_v1, %v1122_v41  ;;  %v997_v57 = vadd.f32 %v778_v49, %v301_v39  ;;  %v1029_v58 = vadd.f32 %v906_v50, %v333_v40  ;;  %v339_v23 = vld [vmem:[#allocation2 + $0x190] sm:$0xff] }
  0xf5   : > { %v1225_v54 = vadd.f32 %v2400_v1, %v1154_v42  ;;  %v1127_v55 = vld [vmem:[#allocation2 + $0x50] sm:$0xff]  ;;  %1064 = vst.msk [vmem:[#allocation2 + $0x70] sm:$0xff] %vm224_vm2, %v999_v43  ;;  %1096 = vst.msk [vmem:[#allocation2 + $0x170] sm:$0xff] %vm224_vm2, %v1031_v44  ;;  %v1870_v59 = vpack.c.bf16 %v1259_v47, %v1259_v47  ;;  %v1980_v63 = vpop.f32.mrf.mxu0  ;;  %v2012_v0 = vpop.f32.mrf.mxu1  ;;  %v305_v36 = vld [vmem:[#allocation2 + $0x80] sm:$0xff] }
  0xf6   : > { %v1159_v56 = vld [vmem:[#allocation2 + $0x150] sm:$0xff]  ;;  %1577 = vst.msk [vmem:[%s2417_s30 + $0x10] sm:$0xf] %vm1572_vm4, %v1867_v45  ;;  %1609 = vst.msk [vmem:[%s2417_s30 + $0x90] sm:$0xf] %vm1572_vm4, %v1899_v46  ;;  %v1902_v60 = vpack.c.bf16 %v1291_v48, %v1291_v48  ;;  %v1198_v61 = vadd.f32 %v2400_v1, %v1127_v55  ;;  %v1257_v4 = vmax.f32 %v1193_v53, 0.0  ;;  %v1000_v8 = vadd.f32 %v1980_v63, %v304_v51 }
  0xf7   : > { %v1230_v62 = vadd.f32 %v2400_v1, %v1159_v56  ;;  %v1289_v5 = vmax.f32 %v1225_v54, 0.0  ;;  %v1125_v6 = vld [vmem:[#allocation2 + $0x40] sm:$0xff]  ;;  %1062 = vst.msk [vmem:[#allocation2 + $0x60] sm:$0xff] %vm224_vm2, %v997_v57  ;;  %1094 = vst.msk [vmem:[#allocation2 + $0x160] sm:$0xff] %vm224_vm2, %v1029_v58  ;;  %v1032_v9 = vadd.f32 %v2012_v0, %v336_v52  ;;  %v781_v14 = vpop.f32.mrf.mxu0  ;;  %v909_v15 = vpop.f32.mrf.mxu1  ;;  %v308_v50 = vld [vmem:[#allocation2 + $0x98] sm:$0xff] }
  0xf8   : > { %v1157_v7 = vld [vmem:[#allocation2 + $0x140] sm:$0xff]  ;;  %1580 = vst.msk [vmem:[%s2417_s30 + $0x1c] sm:$0xf] %vm1572_vm4, %v1870_v59  ;;  %1612 = vst.msk [vmem:[%s2417_s30 + $0x9c] sm:$0xf] %vm1572_vm4, %v1902_v60  ;;  %v1262_v10 = vmax.f32 %v1198_v61, 0.0  ;;  %v1196_v12 = vadd.f32 %v2400_v1, %v1125_v6  ;;  %v1868_v17 = vpack.c.bf16 %v1257_v4, %v1257_v4  ;;  %v998_v21 = vadd.f32 %v781_v14, %v302_v2 }
  0xf9   : > { %v1294_v11 = vmax.f32 %v1230_v62, 0.0  ;;  %v1228_v13 = vadd.f32 %v2400_v1, %v1157_v7  ;;  %v1900_v18 = vpack.c.bf16 %v1289_v5, %v1289_v5  ;;  %v1128_v19 = vld [vmem:[#allocation2 + $0x58] sm:$0xff]  ;;  %1065 = vst.msk [vmem:[#allocation2 + $0x78] sm:$0xff] %vm224_vm2, %v1000_v8  ;;  %1097 = vst.msk [vmem:[#allocation2 + $0x178] sm:$0xff] %vm224_vm2, %v1032_v9  ;;  %v1030_v22 = vadd.f32 %v909_v15, %v334_v3  ;;  %v1983_v30 = vpop.f32.mrf.mxu0  ;;  %v2015_v31 = vpop.f32.mrf.mxu1  ;;  %v338_v14 = vld [vmem:[#allocation2 + $0x188] sm:$0xff] }
  0xfa   : > { %v1160_v20 = vld [vmem:[#allocation2 + $0x158] sm:$0xff]  ;;  %v1873_v24 = vpack.c.bf16 %v1262_v10, %v1262_v10  ;;  %v1260_v26 = vmax.f32 %v1196_v12, 0.0  ;;  %1578 = vst.msk [vmem:[%s2417_s30 + $0x14] sm:$0xf] %vm1572_vm4, %v1868_v17  ;;  %v1199_v32 = vadd.f32 %v2400_v1, %v1128_v19  ;;  %v1003_v42 = vadd.f32 %v1983_v30, %v307_v16 }
  0xfb   : > { %v1905_v25 = vpack.c.bf16 %v1294_v11, %v1294_v11  ;;  %v1292_v27 = vmax.f32 %v1228_v13, 0.0  ;;  %v1126_v28 = vld [vmem:[#allocation2 + $0x48] sm:$0xff]  ;;  %1610 = vst.msk [vmem:[%s2417_s30 + $0x94] sm:$0xf] %vm1572_vm4, %v1900_v18  ;;  %v1231_v33 = vadd.f32 %v2400_v1, %v1160_v20  ;;  %v1035_v43 = vadd.f32 %v2015_v31, %v339_v23  ;;  %v794_v44 = vpop.f32.mrf.mxu0  ;;  %v922_v45 = vpop.f32.mrf.mxu1  ;;  %v340_v58 = vld [vmem:[#allocation2 + $0x198] sm:$0xff] }
  0xfc   : > { %v1158_v29 = vld [vmem:[#allocation2 + $0x148] sm:$0xff]  ;;  %v1197_v34 = vadd.f32 %v2400_v1, %v1126_v28  ;;  %1063 = vst.msk [vmem:[#allocation2 + $0x68] sm:$0xff] %vm224_vm2, %v998_v21  ;;  %1095 = vst.msk [vmem:[#allocation2 + $0x168] sm:$0xff] %vm224_vm2, %v1030_v22  ;;  %v1871_v38 = vpack.c.bf16 %v1260_v26, %v1260_v26  ;;  %v1131_v40 = vld [vmem:[#allocation2 + $0x70] sm:$0xff]  ;;  %v1263_v46 = vmax.f32 %v1199_v32, 0.0  ;;  %v1001_v55 = vadd.f32 %v794_v44, %v305_v36 }
  0xfd   : > { %v1229_v35 = vadd.f32 %v2400_v1, %v1158_v29  ;;  %1583 = vst.msk [vmem:[%s2417_s30 + $0x28] sm:$0xf] %vm1572_vm4, %v1873_v24  ;;  %1615 = vst.msk [vmem:[%s2417_s30 + $0xa8] sm:$0xf] %vm1572_vm4, %v1905_v25  ;;  %v1903_v39 = vpack.c.bf16 %v1292_v27, %v1292_v27  ;;  %v1163_v41 = vld [vmem:[#allocation2 + $0x170] sm:$0xff]  ;;  %v1295_v47 = vmax.f32 %v1231_v33, 0.0  ;;  %v1202_v51 = vadd.f32 %v2400_v1, %v1131_v40  ;;  %v1984_v57 = vpop.f32.mrf.mxu0  ;;  %v2016_v59 = vpop.f32.mrf.mxu1 }
  0xfe   : > { %v1261_v48 = vmax.f32 %v1197_v34, 0.0  ;;  %1581 = vst.msk [vmem:[%s2417_s30 + $0x20] sm:$0xf] %vm1572_vm4, %v1871_v38  ;;  %v1234_v52 = vadd.f32 %v2400_v1, %v1163_v41  ;;  %v1129_v53 = vld [vmem:[#allocation2 + $0x60] sm:$0xff]  ;;  %v1033_v56 = vadd.f32 %v922_v45, %v337_v37  ;;  %v1874_v60 = vpack.c.bf16 %v1263_v46, %v1263_v46  ;;  %v306_v13 = vld [vmem:[#allocation2 + $0x88] sm:$0xff]  ;;  %v311_v27 = vld [vmem:[#allocation2 + $0xb0] sm:$0xff] }
  0xff   : > { %v1293_v49 = vmax.f32 %v1229_v35, 0.0  ;;  %1613 = vst.msk [vmem:[%s2417_s30 + $0xa0] sm:$0xf] %vm1572_vm4, %v1903_v39  ;;  %v1161_v54 = vld [vmem:[#allocation2 + $0x160] sm:$0xff]  ;;  %v1906_v61 = vpack.c.bf16 %v1295_v47, %v1295_v47  ;;  %v1266_v0 = vmax.f32 %v1202_v51, 0.0  ;;  %v1200_v3 = vadd.f32 %v2400_v1, %v1129_v53  ;;  %v797_v7 = vpop.f32.mrf.mxu0  ;;  %v925_v8 = vpop.f32.mrf.mxu1  ;;  %v343_v28 = vld [vmem:[#allocation2 + $0x1b0] sm:$0xff] }
 0x100   : > { %1068 = vst.msk [vmem:[#allocation2 + $0x90] sm:$0xff] %vm224_vm2, %v1003_v42  ;;  %1100 = vst.msk [vmem:[#allocation2 + $0x190] sm:$0xff] %vm224_vm2, %v1035_v43  ;;  %v1872_v62 = vpack.c.bf16 %v1261_v48, %v1261_v48  ;;  %v1298_v2 = vmax.f32 %v1234_v52, 0.0  ;;  %v1232_v4 = vadd.f32 %v2400_v1, %v1161_v54  ;;  %v1132_v5 = vld [vmem:[#allocation2 + $0x78] sm:$0xff]  ;;  %v1004_v11 = vadd.f32 %v1984_v57, %v308_v50  ;;  %v309_v33 = vld [vmem:[#allocation2 + $0xa0] sm:$0xff] }
 0x101   : > { %v1904_v63 = vpack.c.bf16 %v1293_v49, %v1293_v49  ;;  %v1164_v6 = vld [vmem:[#allocation2 + $0x178] sm:$0xff]  ;;  %1066 = vst.msk [vmem:[#allocation2 + $0x80] sm:$0xff] %vm224_vm2, %v1001_v55  ;;  %1098 = vst.msk [vmem:[#allocation2 + $0x180] sm:$0xff] %vm224_vm2, %v1033_v56  ;;  %v1203_v9 = vadd.f32 %v2400_v1, %v1132_v5  ;;  %v1036_v12 = vadd.f32 %v2016_v59, %v340_v58  ;;  %v1264_v17 = vmax.f32 %v1200_v3, 0.0  ;;  %v1987_v21 = vpop.f32.mrf.mxu0  ;;  %v2019_v22 = vpop.f32.mrf.mxu1  ;;  %v341_v35 = vld [vmem:[#allocation2 + $0x1a0] sm:$0xff] }
 0x102   : > { %1584 = vst.msk [vmem:[%s2417_s30 + $0x2c] sm:$0xf] %vm1572_vm4, %v1874_v60  ;;  %1616 = vst.msk [vmem:[%s2417_s30 + $0xac] sm:$0xf] %vm1572_vm4, %v1906_v61  ;;  %v1235_v10 = vadd.f32 %v2400_v1, %v1164_v6  ;;  %v1877_v15 = vpack.c.bf16 %v1266_v0, %v1266_v0  ;;  %v1909_v16 = vpack.c.bf16 %v1298_v2, %v1298_v2  ;;  %v1296_v18 = vmax.f32 %v1232_v4, 0.0  ;;  %v312_v43 = vld [vmem:[#allocation2 + $0xb8] sm:$0xff] }
 0x103   : > { %1582 = vst.msk [vmem:[%s2417_s30 + $0x24] sm:$0xf] %vm1572_vm4, %v1872_v62  ;;  %1614 = vst.msk [vmem:[%s2417_s30 + $0xa4] sm:$0xf] %vm1572_vm4, %v1904_v63  ;;  %v1130_v19 = vld [vmem:[#allocation2 + $0x68] sm:$0xff]  ;;  %v1267_v23 = vmax.f32 %v1203_v9, 0.0  ;;  %v1875_v29 = vpack.c.bf16 %v1264_v17, %v1264_v17  ;;  %v1002_v31 = vadd.f32 %v797_v7, %v306_v13  ;;  %v1034_v32 = vadd.f32 %v925_v8, %v338_v14  ;;  %v810_v34 = vpop.f32.mrf.mxu0  ;;  %v938_v36 = vpop.f32.mrf.mxu1 }
 0x104   : > { %v1162_v20 = vld [vmem:[#allocation2 + $0x168] sm:$0xff]  ;;  %v1299_v24 = vmax.f32 %v1235_v10, 0.0  ;;  %v1201_v25 = vadd.f32 %v2400_v1, %v1130_v19  ;;  %1069 = vst.msk [vmem:[#allocation2 + $0x98] sm:$0xff] %vm224_vm2, %v1004_v11  ;;  %1101 = vst.msk [vmem:[#allocation2 + $0x198] sm:$0xff] %vm224_vm2, %v1036_v12  ;;  %v1907_v30 = vpack.c.bf16 %v1296_v18, %v1296_v18  ;;  %v1007_v46 = vadd.f32 %v1987_v21, %v311_v27  ;;  %v344_v49 = vld [vmem:[#allocation2 + $0x1b8] sm:$0xff] }
 0x105   : > { %v1233_v26 = vadd.f32 %v2400_v1, %v1162_v20  ;;  %1587 = vst.msk [vmem:[%s2417_s30 + $0x38] sm:$0xf] %vm1572_vm4, %v1877_v15  ;;  %1619 = vst.msk [vmem:[%s2417_s30 + $0xb8] sm:$0xf] %vm1572_vm4, %v1909_v16  ;;  %v1878_v37 = vpack.c.bf16 %v1267_v23, %v1267_v23  ;;  %v1039_v47 = vadd.f32 %v2019_v22, %v343_v28  ;;  %v1988_v48 = vpop.f32.mrf.mxu0  ;;  %v2020_v50 = vpop.f32.mrf.mxu1  ;;  %v310_v51 = vld [vmem:[#allocation2 + $0xa8] sm:$0xff]  ;;  %v315_v2 = vld [vmem:[#allocation2 + $0xd0] sm:$0xff] }
 0x106   : > { %v1910_v38 = vpack.c.bf16 %v1299_v24, %v1299_v24  ;;  %v1265_v39 = vmax.f32 %v1201_v25, 0.0  ;;  %1585 = vst.msk [vmem:[%s2417_s30 + $0x30] sm:$0xf] %vm1572_vm4, %v1875_v29  ;;  %1617 = vst.msk [vmem:[%s2417_s30 + $0xb0] sm:$0xf] %vm1572_vm4, %v1907_v30  ;;  %v342_v52 = vld [vmem:[#allocation2 + $0x1a8] sm:$0xff]  ;;  %v1005_v57 = vadd.f32 %v810_v34, %v309_v33  ;;  %v1037_v58 = vadd.f32 %v938_v36, %v341_v35 }
 0x107   : > { %v1297_v40 = vmax.f32 %v1233_v26, 0.0  ;;  %v1135_v41 = vld [vmem:[#allocation2 + $0x90] sm:$0xff]  ;;  %1067 = vst.msk [vmem:[#allocation2 + $0x88] sm:$0xff] %vm224_vm2, %v1002_v31  ;;  %1099 = vst.msk [vmem:[#allocation2 + $0x188] sm:$0xff] %vm224_vm2, %v1034_v32  ;;  %v813_v63 = vpop.f32.mrf.mxu0  ;;  %v941_v0 = vpop.f32.mrf.mxu1  ;;  %v1008_v4 = vadd.f32 %v1988_v48, %v312_v43  ;;  %v1040_v5 = vadd.f32 %v2020_v50, %v344_v49  ;;  %v313_v8 = vld [vmem:[#allocation2 + $0xc0] sm:$0xff] }
 0x108   : > { %v1167_v42 = vld [vmem:[#allocation2 + $0x190] sm:$0xff]  ;;  %v1206_v44 = vadd.f32 %v2400_v1, %v1135_v41  ;;  %1588 = vst.msk [vmem:[%s2417_s30 + $0x3c] sm:$0xf] %vm1572_vm4, %v1878_v37  ;;  %1620 = vst.msk [vmem:[%s2417_s30 + $0xbc] sm:$0xf] %vm1572_vm4, %v1910_v38  ;;  %v1876_v53 = vpack.c.bf16 %v1265_v39, %v1265_v39  ;;  %v1133_v55 = vld [vmem:[#allocation2 + $0x80] sm:$0xff]  ;;  %v1006_v6 = vadd.f32 %v813_v63, %v310_v51 }
 0x109   : > { %v1238_v45 = vadd.f32 %v2400_v1, %v1167_v42  ;;  %v1908_v54 = vpack.c.bf16 %v1297_v40, %v1297_v40  ;;  %v1165_v56 = vld [vmem:[#allocation2 + $0x180] sm:$0xff]  ;;  %v1204_v61 = vadd.f32 %v2400_v1, %v1133_v55  ;;  %1072 = vst.msk [vmem:[#allocation2 + $0xb0] sm:$0xff] %vm224_vm2, %v1007_v46  ;;  %1104 = vst.msk [vmem:[#allocation2 + $0x1b0] sm:$0xff] %vm224_vm2, %v1039_v47  ;;  %v347_v3 = vld [vmem:[#allocation2 + $0x1d0] sm:$0xff]  ;;  %v1991_v15 = vpop.f32.mrf.mxu0  ;;  %v2023_v16 = vpop.f32.mrf.mxu1 }
 0x10a   : > { %v1270_v59 = vmax.f32 %v1206_v44, 0.0  ;;  %v1236_v62 = vadd.f32 %v2400_v1, %v1165_v56  ;;  %1586 = vst.msk [vmem:[%s2417_s30 + $0x34] sm:$0xf] %vm1572_vm4, %v1876_v53  ;;  %v1038_v7 = vadd.f32 %v941_v0, %v342_v52  ;;  %v345_v17 = vld [vmem:[#allocation2 + $0x1c0] sm:$0xff]  ;;  %v1011_v20 = vadd.f32 %v1991_v15, %v315_v2  ;;  %v316_v26 = vld [vmem:[#allocation2 + $0xd8] sm:$0xff]  ;;  %v314_v38 = vld [vmem:[#allocation2 + $0xc8] sm:$0xff] }
 0x10b   : > { %v1302_v60 = vmax.f32 %v1238_v45, 0.0  ;;  %1618 = vst.msk [vmem:[%s2417_s30 + $0xb4] sm:$0xf] %vm1572_vm4, %v1908_v54  ;;  %v1268_v11 = vmax.f32 %v1204_v61, 0.0  ;;  %v1136_v13 = vld [vmem:[#allocation2 + $0x98] sm:$0xff]  ;;  %v1043_v21 = vadd.f32 %v2023_v16, %v347_v3  ;;  %v826_v24 = vpop.f32.mrf.mxu0  ;;  %v954_v25 = vpop.f32.mrf.mxu1  ;;  %v346_v39 = vld [vmem:[#allocation2 + $0x1c8] sm:$0xff] }
 0x10c   : > { %1070 = vst.msk [vmem:[#allocation2 + $0xa0] sm:$0xff] %vm224_vm2, %v1005_v57  ;;  %1102 = vst.msk [vmem:[#allocation2 + $0x1a0] sm:$0xff] %vm224_vm2, %v1037_v58  ;;  %v1881_v9 = vpack.c.bf16 %v1270_v59, %v1270_v59  ;;  %v1300_v12 = vmax.f32 %v1236_v62, 0.0  ;;  %v1168_v14 = vld [vmem:[#allocation2 + $0x198] sm:$0xff]  ;;  %v1207_v18 = vadd.f32 %v2400_v1, %v1136_v13  ;;  %v1009_v32 = vadd.f32 %v826_v24, %v313_v8 }
 0x10d   : > { %v1913_v10 = vpack.c.bf16 %v1302_v60, %v1302_v60  ;;  %v1239_v19 = vadd.f32 %v2400_v1, %v1168_v14  ;;  %1073 = vst.msk [vmem:[#allocation2 + $0xb8] sm:$0xff] %vm224_vm2, %v1008_v4  ;;  %1105 = vst.msk [vmem:[#allocation2 + $0x1b8] sm:$0xff] %vm224_vm2, %v1040_v5  ;;  %v1879_v22 = vpack.c.bf16 %v1268_v11, %v1268_v11  ;;  %v348_v27 = vld [vmem:[#allocation2 + $0x1d8] sm:$0xff]  ;;  %v1992_v36 = vpop.f32.mrf.mxu0  ;;  %v2024_v37 = vpop.f32.mrf.mxu1 }
 0x10e   : > { %1071 = vst.msk [vmem:[#allocation2 + $0xa8] sm:$0xff] %vm224_vm2, %v1006_v6  ;;  %1103 = vst.msk [vmem:[#allocation2 + $0x1a8] sm:$0xff] %vm224_vm2, %v1038_v7  ;;  %v1911_v23 = vpack.c.bf16 %v1300_v12, %v1300_v12  ;;  %v1271_v28 = vmax.f32 %v1207_v18, 0.0  ;;  %v1134_v30 = vld [vmem:[#allocation2 + $0x88] sm:$0xff]  ;;  %v1041_v33 = vadd.f32 %v954_v25, %v345_v17  ;;  %v1012_v44 = vadd.f32 %v1992_v36, %v316_v26 }
 0x10f   : > { %1591 = vst.msk [vmem:[%s2417_s30 + $0x48] sm:$0xf] %vm1572_vm4, %v1881_v9  ;;  %1623 = vst.msk [vmem:[%s2417_s30 + $0xc8] sm:$0xf] %vm1572_vm4, %v1913_v10  ;;  %v1303_v29 = vmax.f32 %v1239_v19, 0.0  ;;  %v1166_v31 = vld [vmem:[#allocation2 + $0x188] sm:$0xff]  ;;  %v1205_v34 = vadd.f32 %v2400_v1, %v1134_v30  ;;  %v1044_v45 = vadd.f32 %v2024_v37, %v348_v27  ;;  %v829_v52 = vpop.f32.mrf.mxu0  ;;  %v957_v53 = vpop.f32.mrf.mxu1 }
 0x110   : > { %1076 = vst.msk [vmem:[#allocation2 + $0xd0] sm:$0xff] %vm224_vm2, %v1011_v20  ;;  %1108 = vst.msk [vmem:[#allocation2 + $0x1d0] sm:$0xff] %vm224_vm2, %v1043_v21  ;;  %v1237_v35 = vadd.f32 %v2400_v1, %v1166_v31  ;;  %v1882_v40 = vpack.c.bf16 %v1271_v28, %v1271_v28  ;;  %v1139_v42 = vld [vmem:[#allocation2 + $0xb0] sm:$0xff]  ;;  %v1010_v56 = vadd.f32 %v829_v52, %v314_v38 }
 0x111   : > { %1589 = vst.msk [vmem:[%s2417_s30 + $0x40] sm:$0xf] %vm1572_vm4, %v1879_v22  ;;  %1621 = vst.msk [vmem:[%s2417_s30 + $0xc0] sm:$0xf] %vm1572_vm4, %v1911_v23  ;;  %v1914_v41 = vpack.c.bf16 %v1303_v29, %v1303_v29  ;;  %v1171_v43 = vld [vmem:[#allocation2 + $0x1b0] sm:$0xff]  ;;  %v1269_v46 = vmax.f32 %v1205_v34, 0.0  ;;  %v1210_v48 = vadd.f32 %v2400_v1, %v1139_v42  ;;  %v1042_v57 = vadd.f32 %v957_v53, %v346_v39  ;;  %v1995_v2 = vpop.f32.mrf.mxu0  ;;  %v2027_v3 = vpop.f32.mrf.mxu1 }
 0x112   : > { %1074 = vst.msk [vmem:[#allocation2 + $0xc0] sm:$0xff] %vm224_vm2, %v1009_v32  ;;  %1106 = vst.msk [vmem:[#allocation2 + $0x1c0] sm:$0xff] %vm224_vm2, %v1041_v33  ;;  %v1301_v47 = vmax.f32 %v1237_v35, 0.0  ;;  %v1242_v49 = vadd.f32 %v2400_v1, %v1171_v43  ;;  %v319_v31 = vld [vmem:[#allocation2 + $0xf0] sm:$0xff] }
 0x113   : > { %v1137_v50 = vld [vmem:[#allocation2 + $0xa0] sm:$0xff]  ;;  %1592 = vst.msk [vmem:[%s2417_s30 + $0x4c] sm:$0xf] %vm1572_vm4, %v1882_v40  ;;  %1624 = vst.msk [vmem:[%s2417_s30 + $0xcc] sm:$0xf] %vm1572_vm4, %v1914_v41  ;;  %v1880_v58 = vpack.c.bf16 %v1269_v46, %v1269_v46  ;;  %v1274_v60 = vmax.f32 %v1210_v48, 0.0  ;;  %v842_v15 = vpop.f32.mrf.mxu0  ;;  %v970_v16 = vpop.f32.mrf.mxu1  ;;  %v1015_v52 = vadd.f32 %v1995_v2, %v319_v31 }
 0x114   : > { %v1169_v51 = vld [vmem:[#allocation2 + $0x1a0] sm:$0xff]  ;;  %v1208_v54 = vadd.f32 %v2400_v1, %v1137_v50  ;;  %1077 = vst.msk [vmem:[#allocation2 + $0xd8] sm:$0xff] %vm224_vm2, %v1012_v44  ;;  %1109 = vst.msk [vmem:[#allocation2 + $0x1d8] sm:$0xff] %vm224_vm2, %v1044_v45  ;;  %v1912_v59 = vpack.c.bf16 %v1301_v47, %v1301_v47  ;;  %v1306_v61 = vmax.f32 %v1242_v49, 0.0  ;;  %v1140_v62 = vld [vmem:[#allocation2 + $0xb8] sm:$0xff] }
 0x115   : > { %v1240_v55 = vadd.f32 %v2400_v1, %v1169_v51  ;;  %v1172_v63 = vld [vmem:[#allocation2 + $0x1b8] sm:$0xff]  ;;  %v1138_v0 = vld [vmem:[#allocation2 + $0xa8] sm:$0xff]  ;;  %v1211_v6 = vadd.f32 %v2400_v1, %v1140_v62  ;;  %1075 = vst.msk [vmem:[#allocation2 + $0xc8] sm:$0xff] %vm224_vm2, %v1010_v56  ;;  %1107 = vst.msk [vmem:[#allocation2 + $0x1c8] sm:$0xff] %vm224_vm2, %v1042_v57  ;;  %v1885_v9 = vpack.c.bf16 %v1274_v60, %v1274_v60  ;;  %v1996_v33 = vpop.f32.mrf.mxu0  ;;  %v2028_v34 = vpop.f32.mrf.mxu1 }
 0x116   : > { %v1272_v4 = vmax.f32 %v1208_v54, 0.0  ;;  %v1243_v7 = vadd.f32 %v2400_v1, %v1172_v63  ;;  %v1170_v8 = vld [vmem:[#allocation2 + $0x1a8] sm:$0xff]  ;;  %1590 = vst.msk [vmem:[%s2417_s30 + $0x44] sm:$0xf] %vm1572_vm4, %v1880_v58  ;;  %1622 = vst.msk [vmem:[%s2417_s30 + $0xc4] sm:$0xf] %vm1572_vm4, %v1912_v59  ;;  %v1917_v10 = vpack.c.bf16 %v1306_v61, %v1306_v61  ;;  %v1209_v11 = vadd.f32 %v2400_v1, %v1138_v0 }
 0x117   : > { %v1304_v5 = vmax.f32 %v1240_v55, 0.0  ;;  %v1241_v12 = vadd.f32 %v2400_v1, %v1170_v8  ;;  %v1143_v13 = vld [vmem:[#allocation2 + $0xd0] sm:$0xff]  ;;  %v1275_v19 = vmax.f32 %v1211_v6, 0.0  ;;  %1595 = vst.msk [vmem:[%s2417_s30 + $0x58] sm:$0xf] %vm1572_vm4, %v1885_v9  ;;  %v317_v45 = vld [vmem:[#allocation2 + $0xe0] sm:$0xff]  ;;  %v845_v60 = vpop.f32.mrf.mxu0  ;;  %v973_v62 = vpop.f32.mrf.mxu1 }
 0x118   : > { %v1175_v14 = vld [vmem:[#allocation2 + $0x1d0] sm:$0xff]  ;;  %v1883_v17 = vpack.c.bf16 %v1272_v4, %v1272_v4  ;;  %v1307_v20 = vmax.f32 %v1243_v7, 0.0  ;;  %1627 = vst.msk [vmem:[%s2417_s30 + $0xd8] sm:$0xf] %vm1572_vm4, %v1917_v10  ;;  %v1273_v21 = vmax.f32 %v1209_v11, 0.0  ;;  %v1214_v23 = vadd.f32 %v2400_v1, %v1143_v13  ;;  %v349_v46 = vld [vmem:[#allocation2 + $0x1e0] sm:$0xff] }
 0x119   : > { %v1915_v18 = vpack.c.bf16 %v1304_v5, %v1304_v5  ;;  %v1305_v22 = vmax.f32 %v1241_v12, 0.0  ;;  %v1246_v24 = vadd.f32 %v2400_v1, %v1175_v14  ;;  %v1141_v25 = vld [vmem:[#allocation2 + $0xc0] sm:$0xff]  ;;  %v1886_v27 = vpack.c.bf16 %v1275_v19, %v1275_v19  ;;  %v351_v32 = vld [vmem:[#allocation2 + $0x1f0] sm:$0xff]  ;;  %v320_v47 = vld [vmem:[#allocation2 + $0xf8] sm:$0xff]  ;;  %1080 = vst.msk [vmem:[#allocation2 + $0xf0] sm:$0xff] %vm224_vm2, %v1015_v52 }
 0x11a   : > { %v1173_v26 = vld [vmem:[#allocation2 + $0x1c0] sm:$0xff]  ;;  %1593 = vst.msk [vmem:[%s2417_s30 + $0x50] sm:$0xf] %vm1572_vm4, %v1883_v17  ;;  %v1918_v28 = vpack.c.bf16 %v1307_v20, %v1307_v20  ;;  %v1212_v29 = vadd.f32 %v2400_v1, %v1141_v25  ;;  %v1884_v35 = vpack.c.bf16 %v1273_v21, %v1273_v21  ;;  %v1278_v37 = vmax.f32 %v1214_v23, 0.0  ;;  %v352_v54 = vld [vmem:[#allocation2 + $0x1f8] sm:$0xff]  ;;  %v318_v59 = vld [vmem:[#allocation2 + $0xe8] sm:$0xff] }
 0x11b   : > { %1625 = vst.msk [vmem:[%s2417_s30 + $0xd0] sm:$0xf] %vm1572_vm4, %v1915_v18  ;;  %v1244_v30 = vadd.f32 %v2400_v1, %v1173_v26  ;;  %v1916_v36 = vpack.c.bf16 %v1305_v22, %v1305_v22  ;;  %v1310_v38 = vmax.f32 %v1246_v24, 0.0  ;;  %v1144_v39 = vld [vmem:[#allocation2 + $0xd8] sm:$0xff]  ;;  %1596 = vst.msk [vmem:[%s2417_s30 + $0x5c] sm:$0xf] %vm1572_vm4, %v1886_v27  ;;  %v1047_v53 = vadd.f32 %v2027_v3, %v351_v32 }
 0x11c   : > { %v1176_v40 = vld [vmem:[#allocation2 + $0x1d8] sm:$0xff]  ;;  %1628 = vst.msk [vmem:[%s2417_s30 + $0xdc] sm:$0xf] %vm1572_vm4, %v1918_v28  ;;  %v1276_v41 = vmax.f32 %v1212_v29, 0.0  ;;  %v1215_v43 = vadd.f32 %v2400_v1, %v1144_v39  ;;  %1594 = vst.msk [vmem:[%s2417_s30 + $0x54] sm:$0xf] %vm1572_vm4, %v1884_v35  ;;  %v1889_v48 = vpack.c.bf16 %v1278_v37, %v1278_v37  ;;  %v1013_v2 = vadd.f32 %v842_v15, %v317_v45 }
 0x11d   : > { %v1308_v42 = vmax.f32 %v1244_v30, 0.0  ;;  %v1247_v44 = vadd.f32 %v2400_v1, %v1176_v40  ;;  %1626 = vst.msk [vmem:[%s2417_s30 + $0xd4] sm:$0xf] %vm1572_vm4, %v1916_v36  ;;  %v1921_v49 = vpack.c.bf16 %v1310_v38, %v1310_v38  ;;  %v1142_v50 = vld [vmem:[#allocation2 + $0xc8] sm:$0xff]  ;;  %v1045_v3 = vadd.f32 %v970_v16, %v349_v46  ;;  %v2093_v22 = vld [vmem:[%s2667_s2] ss:$0 sm:$0xff] }
 0x11e   : > { %v1174_v51 = vld [vmem:[#allocation2 + $0x1c8] sm:$0xff]  ;;  %v1887_v55 = vpack.c.bf16 %v1276_v41, %v1276_v41  ;;  %v1279_v57 = vmax.f32 %v1215_v43, 0.0  ;;  %1599 = vst.msk [vmem:[%s2417_s30 + $0x68] sm:$0xf] %vm1572_vm4, %v1889_v48  ;;  %v1213_v63 = vadd.f32 %v2400_v1, %v1142_v50  ;;  %v1016_v6 = vadd.f32 %v1996_v33, %v320_v47 }
 0x11f   : > { %v1919_v56 = vpack.c.bf16 %v1308_v42, %v1308_v42  ;;  %v1311_v58 = vmax.f32 %v1247_v44, 0.0  ;;  %v350_v61 = vld [vmem:[#allocation2 + $0x1e8] sm:$0xff]  ;;  %1631 = vst.msk [vmem:[%s2417_s30 + $0xe8] sm:$0xf] %vm1572_vm4, %v1921_v49  ;;  %v1245_v0 = vadd.f32 %v2400_v1, %v1174_v51  ;;  %v1048_v7 = vadd.f32 %v2028_v34, %v352_v54 }
 0x120   : > { %1112 = vst.msk [vmem:[#allocation2 + $0x1f0] sm:$0xff] %vm224_vm2, %v1047_v53  ;;  %v1890_v4 = vpack.c.bf16 %v1279_v57, %v1279_v57  ;;  %v1277_v8 = vmax.f32 %v1213_v63, 0.0  ;;  %1078 = vst.msk [vmem:[#allocation2 + $0xe0] sm:$0xff] %vm224_vm2, %v1013_v2  ;;  %v1014_v10 = vadd.f32 %v845_v60, %v318_v59  ;;  %v1046_v11 = vadd.f32 %v973_v62, %v350_v61  ;;  %v1147_v14 = vld [vmem:[#allocation2 + $0xf0] sm:$0xff] }
 0x121   : > { %1597 = vst.msk [vmem:[%s2417_s30 + $0x60] sm:$0xf] %vm1572_vm4, %v1887_v55  ;;  %1629 = vst.msk [vmem:[%s2417_s30 + $0xe0] sm:$0xf] %vm1572_vm4, %v1919_v56  ;;  %v1922_v5 = vpack.c.bf16 %v1311_v58, %v1311_v58  ;;  %v1309_v9 = vmax.f32 %v1245_v0, 0.0  ;;  %v1218_v16 = vadd.f32 %v2400_v1, %v1147_v14 }
 0x122   : > { %1110 = vst.msk [vmem:[#allocation2 + $0x1e0] sm:$0xff] %vm224_vm2, %v1045_v3  ;;  %1081 = vst.msk [vmem:[#allocation2 + $0xf8] sm:$0xff] %vm224_vm2, %v1016_v6  ;;  %v1888_v12 = vpack.c.bf16 %v1277_v8, %v1277_v8 }
 0x123   : > { %1600 = vst.msk [vmem:[%s2417_s30 + $0x6c] sm:$0xf] %vm1572_vm4, %v1890_v4  ;;  %1632 = vst.msk [vmem:[%s2417_s30 + $0xec] sm:$0xf] %vm1572_vm4, %v1922_v5  ;;  %v1920_v13 = vpack.c.bf16 %v1309_v9, %v1309_v9  ;;  %v1282_v20 = vmax.f32 %v1218_v16, 0.0 }
 0x124   : > { %1113 = vst.msk [vmem:[#allocation2 + $0x1f8] sm:$0xff] %vm224_vm2, %v1048_v7  ;;  %1079 = vst.msk [vmem:[#allocation2 + $0xe8] sm:$0xff] %vm224_vm2, %v1014_v10 }
 0x125   : > { %1111 = vst.msk [vmem:[#allocation2 + $0x1e8] sm:$0xff] %vm224_vm2, %v1046_v11  ;;  %v1893_v31 = vpack.c.bf16 %v1282_v20, %v1282_v20 }
 0x126   : > { %1598 = vst.msk [vmem:[%s2417_s30 + $0x64] sm:$0xf] %vm1572_vm4, %v1888_v12  ;;  %1630 = vst.msk [vmem:[%s2417_s30 + $0xe4] sm:$0xf] %vm1572_vm4, %v1920_v13 }
 0x127   : > { %v1179_v15 = vld [vmem:[#allocation2 + $0x1f0] sm:$0xff]  ;;  %v1145_v18 = vld [vmem:[#allocation2 + $0xe0] sm:$0xff]  ;;  %1603 = vst.msk [vmem:[%s2417_s30 + $0x78] sm:$0xf] %vm1572_vm4, %v1893_v31 }
 0x128   : > { %v1250_v17 = vadd.f32 %v2400_v1, %v1179_v15  ;;  %v1216_v23 = vadd.f32 %v2093_v22, %v1145_v18 }
 0x129   : > { %v1177_v19 = vld [vmem:[#allocation2 + $0x1e0] sm:$0xff]  ;;  %v1148_v25 = vld [vmem:[#allocation2 + $0xf8] sm:$0xff] }
 0x12a   : > { %v1314_v21 = vmax.f32 %v1250_v17, 0.0  ;;  %v1248_v24 = vadd.f32 %v2093_v22, %v1177_v19  ;;  %v1219_v27 = vadd.f32 %v2093_v22, %v1148_v25  ;;  %v1280_v32 = vmax.f32 %v1216_v23, 0.0 }
 0x12b   : > { %v1180_v26 = vld [vmem:[#allocation2 + $0x1f8] sm:$0xff]  ;;  %v1146_v29 = vld [vmem:[#allocation2 + $0xe8] sm:$0xff] }
 0x12c   : > { %v1251_v28 = vadd.f32 %v2093_v22, %v1180_v26  ;;  %v1178_v30 = vld [vmem:[#allocation2 + $0x1e8] sm:$0xff]  ;;  %v1925_v1 = vpack.c.bf16 %v1314_v21, %v1314_v21  ;;  %v1312_v33 = vmax.f32 %v1248_v24, 0.0  ;;  %v1283_v34 = vmax.f32 %v1219_v27, 0.0 }
 0x12d   : > { %v1217_v36 = vadd.f32 %v2093_v22, %v1146_v29  ;;  %v1249_v37 = vadd.f32 %v2093_v22, %v1178_v30  ;;  %v1891_v38 = vpack.c.bf16 %v1280_v32, %v1280_v32 }
 0x12e   : > { %v1315_v35 = vmax.f32 %v1251_v28, 0.0  ;;  %1635 = vst.msk [vmem:[%s2417_s30 + $0xf8] sm:$0xf] %vm1572_vm4, %v1925_v1  ;;  %v1923_v39 = vpack.c.bf16 %v1312_v33, %v1312_v33  ;;  %v1894_v40 = vpack.c.bf16 %v1283_v34, %v1283_v34 }
 0x12f   : > { %v1281_v42 = vmax.f32 %v1217_v36, 0.0  ;;  %v1313_v43 = vmax.f32 %v1249_v37, 0.0  ;;  %1601 = vst.msk [vmem:[%s2417_s30 + $0x70] sm:$0xf] %vm1572_vm4, %v1891_v38 }
 0x130   : > { %v1926_v41 = vpack.c.bf16 %v1315_v35, %v1315_v35  ;;  %1633 = vst.msk [vmem:[%s2417_s30 + $0xf0] sm:$0xf] %vm1572_vm4, %v1923_v39  ;;  %1604 = vst.msk [vmem:[%s2417_s30 + $0x7c] sm:$0xf] %vm1572_vm4, %v1894_v40 }
 0x131   : > { %v1892_v44 = vpack.c.bf16 %v1281_v42, %v1281_v42  ;;  %v1924_v45 = vpack.c.bf16 %v1313_v43, %v1313_v43 }
 0x132   : > { %1636 = vst.msk [vmem:[%s2417_s30 + $0xfc] sm:$0xf] %vm1572_vm4, %v1926_v41 }
 0x133   : > { %1602 = vst.msk [vmem:[%s2417_s30 + $0x74] sm:$0xf] %vm1572_vm4, %v1892_v44  ;;  %1634 = vst.msk [vmem:[%s2417_s30 + $0xf4] sm:$0xf] %vm1572_vm4, %v1924_v45 }
 0x134 PF: > { %s13_s14 = sadd.s32 1, %s2116_s14   ;;  %s2670_s12 = smov %s2112_s13 }
 0x135   : > { %p10_p5 = scmp.ge.s32.totalorder %s13_s14, 6   ;;  %s2671_s13 = smov %s2673_s15 }
 0x137   :  { %12 = sbr.rel (!%p10_p5) target bundleno = 2 (0x2), region = 73 }

// kernel: resnet_l1_forward.11
= control target key start
LH: loop header
LB: loop body
LE: loop exit
PB: predicated region body
PF: predicated region fallthrough
CT: control target
= control target key end

     0   :  { %vm198_vm0 = vcmask 1043456   ;;  %s2038_s0 = inlined_call_operand.vmem [shape: bf16[3,504,128], index: 0, kind: input, shape index: {}]   ;;  %s2039_s1 = inlined_call_operand.vmem [shape: bf16[504,128], index: 1, kind: output, shape index: {}]  }
   0x1   :  { %v9_v0 = vld [vmem:[%s2038_s0] sm:$0xf]  ;;  %v10_v1 = vld [vmem:[%s2038_s0 + $0x4] sm:$0xf]  ;;  %v72_v2 = vld [vmem:[%s2038_s0 + $0xfc] sm:$0xf] }
   0x2   :  { %v73_v3 = vld [vmem:[%s2038_s0 + $0x100] sm:$0xf]  ;;  %v135_v4 = vld [vmem:[%s2038_s0 + $0x1f8] sm:$0xf]  ;;  %v136_v5 = vld [vmem:[%s2038_s0 + $0x1fc] sm:$0xf] }
   0x3   :  { %v201_v6 = vsel %vm198_vm0, %v9_v0, 4286644096  ;;  %v204_v7 = vsel %vm198_vm0, %v72_v2, 4286644096  ;;  %v208_v8 = vsel %vm198_vm0, %v135_v4, 4286644096 }
   0x4   :  { %v206_v9 = vmax.bf16 %v204_v7, %v201_v6  ;;  %v212_v10 = vsel %vm198_vm0, %v10_v1, 4286644096  ;;  %v215_v11 = vsel %vm198_vm0, %v73_v3, 4286644096  ;;  %v219_v12 = vsel %vm198_vm0, %v136_v5, 4286644096 }
   0x5   :  { %v217_v13 = vmax.bf16 %v215_v11, %v212_v10  ;;  %v11_v14 = vld [vmem:[%s2038_s0 + $0x8] sm:$0xf]  ;;  %v12_v15 = vld [vmem:[%s2038_s0 + $0xc] sm:$0xf]  ;;  %v74_v16 = vld [vmem:[%s2038_s0 + $0x104] sm:$0xf] }
   0x6   :  { %v210_v17 = vmax.bf16 %v208_v8, %v206_v9  ;;  %v75_v18 = vld [vmem:[%s2038_s0 + $0x108] sm:$0xf]  ;;  %v137_v19 = vld [vmem:[%s2038_s0 + $0x200] sm:$0xf]  ;;  %v138_v20 = vld [vmem:[%s2038_s0 + $0x204] sm:$0xf] }
   0x7   :  { %v221_v21 = vmax.bf16 %v219_v12, %v217_v13  ;;  %v223_v22 = vsel %vm198_vm0, %v11_v14, 4286644096  ;;  %v226_v23 = vsel %vm198_vm0, %v74_v16, 4286644096  ;;  %v230_v24 = vsel %vm198_vm0, %v137_v19, 4286644096 }
   0x8   :  { %v228_v25 = vmax.bf16 %v226_v23, %v223_v22  ;;  %v234_v26 = vsel %vm198_vm0, %v12_v15, 4286644096  ;;  %v237_v27 = vsel %vm198_vm0, %v75_v18, 4286644096  ;;  %v241_v28 = vsel %vm198_vm0, %v138_v20, 4286644096 }
   0x9   :  { %v1115_v29 = vcombine.low %v210_v17, %v221_v21  ;;  %v239_v30 = vmax.bf16 %v237_v27, %v234_v26  ;;  %v13_v31 = vld [vmem:[%s2038_s0 + $0x10] sm:$0xf]  ;;  %v14_v32 = vld [vmem:[%s2038_s0 + $0x14] sm:$0xf]  ;;  %v76_v33 = vld [vmem:[%s2038_s0 + $0x10c] sm:$0xf] }
   0xa   :  { %v232_v34 = vmax.bf16 %v230_v24, %v228_v25  ;;  %v77_v35 = vld [vmem:[%s2038_s0 + $0x110] sm:$0xf]  ;;  %v139_v36 = vld [vmem:[%s2038_s0 + $0x208] sm:$0xf]  ;;  %v140_v37 = vld [vmem:[%s2038_s0 + $0x20c] sm:$0xf] }
   0xb   :  { %964 = vst [vmem:[%s2039_s1] sm:$0xff] %v1115_v29   ;;  %v243_v38 = vmax.bf16 %v241_v28, %v239_v30  ;;  %v245_v39 = vsel %vm198_vm0, %v13_v31, 4286644096  ;;  %v248_v40 = vsel %vm198_vm0, %v76_v33, 4286644096  ;;  %v252_v41 = vsel %vm198_vm0, %v139_v36, 4286644096 }
   0xc   :  { %v250_v42 = vmax.bf16 %v248_v40, %v245_v39  ;;  %v256_v43 = vsel %vm198_vm0, %v14_v32, 4286644096  ;;  %v259_v44 = vsel %vm198_vm0, %v77_v35, 4286644096  ;;  %v263_v45 = vsel %vm198_vm0, %v140_v37, 4286644096 }
   0xd   :  { %v1116_v46 = vcombine.low %v232_v34, %v243_v38  ;;  %v261_v47 = vmax.bf16 %v259_v44, %v256_v43  ;;  %v15_v48 = vld [vmem:[%s2038_s0 + $0x18] sm:$0xf]  ;;  %v16_v49 = vld [vmem:[%s2038_s0 + $0x1c] sm:$0xf]  ;;  %v78_v50 = vld [vmem:[%s2038_s0 + $0x114] sm:$0xf] }
   0xe   :  { %v254_v51 = vmax.bf16 %v252_v41, %v250_v42  ;;  %v79_v52 = vld [vmem:[%s2038_s0 + $0x118] sm:$0xf]  ;;  %v141_v53 = vld [vmem:[%s2038_s0 + $0x210] sm:$0xf]  ;;  %v142_v54 = vld [vmem:[%s2038_s0 + $0x214] sm:$0xf] }
   0xf   :  { %1117 = vst [vmem:[%s2039_s1 + $0x8] sm:$0xff] %v1116_v46   ;;  %v265_v55 = vmax.bf16 %v263_v45, %v261_v47  ;;  %v267_v56 = vsel %vm198_vm0, %v15_v48, 4286644096  ;;  %v270_v57 = vsel %vm198_vm0, %v78_v50, 4286644096 }
  0x10   :  { %v274_v58 = vsel %vm198_vm0, %v141_v53, 4286644096  ;;  %v272_v59 = vmax.bf16 %v270_v57, %v267_v56  ;;  %v278_v60 = vsel %vm198_vm0, %v16_v49, 4286644096  ;;  %v281_v61 = vsel %vm198_vm0, %v79_v52, 4286644096 }
  0x11   :  { %v285_v62 = vsel %vm198_vm0, %v142_v54, 4286644096  ;;  %v1118_v63 = vcombine.low %v254_v51, %v265_v55  ;;  %v283_v0 = vmax.bf16 %v281_v61, %v278_v60  ;;  %v17_v1 = vld [vmem:[%s2038_s0 + $0x20] sm:$0xf]  ;;  %v18_v2 = vld [vmem:[%s2038_s0 + $0x24] sm:$0xf] }
  0x12   :  { %v80_v3 = vld [vmem:[%s2038_s0 + $0x11c] sm:$0xf]  ;;  %v276_v4 = vmax.bf16 %v274_v58, %v272_v59  ;;  %v81_v5 = vld [vmem:[%s2038_s0 + $0x120] sm:$0xf]  ;;  %v143_v6 = vld [vmem:[%s2038_s0 + $0x218] sm:$0xf] }
  0x13   :  { %v144_v7 = vld [vmem:[%s2038_s0 + $0x21c] sm:$0xf]  ;;  %1119 = vst [vmem:[%s2039_s1 + $0x10] sm:$0xff] %v1118_v63   ;;  %v287_v8 = vmax.bf16 %v285_v62, %v283_v0  ;;  %v289_v9 = vsel %vm198_vm0, %v17_v1, 4286644096 }
  0x14   :  { %v292_v10 = vsel %vm198_vm0, %v80_v3, 4286644096  ;;  %v296_v11 = vsel %vm198_vm0, %v143_v6, 4286644096  ;;  %v300_v13 = vsel %vm198_vm0, %v18_v2, 4286644096 }
  0x15   :  { %v294_v12 = vmax.bf16 %v292_v10, %v289_v9  ;;  %v303_v14 = vsel %vm198_vm0, %v81_v5, 4286644096  ;;  %v307_v15 = vsel %vm198_vm0, %v144_v7, 4286644096  ;;  %v1120_v16 = vcombine.low %v276_v4, %v287_v8  ;;  %v19_v18 = vld [vmem:[%s2038_s0 + $0x28] sm:$0xf] }
  0x16   :  { %v305_v17 = vmax.bf16 %v303_v14, %v300_v13  ;;  %v20_v19 = vld [vmem:[%s2038_s0 + $0x2c] sm:$0xf]  ;;  %v82_v20 = vld [vmem:[%s2038_s0 + $0x124] sm:$0xf]  ;;  %v83_v22 = vld [vmem:[%s2038_s0 + $0x128] sm:$0xf] }
  0x17   :  { %v298_v21 = vmax.bf16 %v296_v11, %v294_v12  ;;  %v145_v23 = vld [vmem:[%s2038_s0 + $0x220] sm:$0xf]  ;;  %v146_v24 = vld [vmem:[%s2038_s0 + $0x224] sm:$0xf]  ;;  %1121 = vst [vmem:[%s2039_s1 + $0x18] sm:$0xff] %v1120_v16  }
  0x18   :  { %v309_v25 = vmax.bf16 %v307_v15, %v305_v17  ;;  %v311_v26 = vsel %vm198_vm0, %v19_v18, 4286644096  ;;  %v314_v27 = vsel %vm198_vm0, %v82_v20, 4286644096  ;;  %v318_v28 = vsel %vm198_vm0, %v145_v23, 4286644096 }
  0x19   :  { %v316_v29 = vmax.bf16 %v314_v27, %v311_v26  ;;  %v322_v30 = vsel %vm198_vm0, %v20_v19, 4286644096  ;;  %v325_v31 = vsel %vm198_vm0, %v83_v22, 4286644096  ;;  %v329_v32 = vsel %vm198_vm0, %v146_v24, 4286644096 }
  0x1a   :  { %v1122_v33 = vcombine.low %v298_v21, %v309_v25  ;;  %v327_v34 = vmax.bf16 %v325_v31, %v322_v30  ;;  %v21_v35 = vld [vmem:[%s2038_s0 + $0x30] sm:$0xf]  ;;  %v22_v36 = vld [vmem:[%s2038_s0 + $0x34] sm:$0xf]  ;;  %v84_v37 = vld [vmem:[%s2038_s0 + $0x12c] sm:$0xf] }
  0x1b   :  { %v320_v38 = vmax.bf16 %v318_v28, %v316_v29  ;;  %v85_v39 = vld [vmem:[%s2038_s0 + $0x130] sm:$0xf]  ;;  %v147_v40 = vld [vmem:[%s2038_s0 + $0x228] sm:$0xf]  ;;  %v148_v41 = vld [vmem:[%s2038_s0 + $0x22c] sm:$0xf] }
  0x1c   :  { %1123 = vst [vmem:[%s2039_s1 + $0x20] sm:$0xff] %v1122_v33   ;;  %v331_v42 = vmax.bf16 %v329_v32, %v327_v34  ;;  %v333_v43 = vsel %vm198_vm0, %v21_v35, 4286644096  ;;  %v336_v44 = vsel %vm198_vm0, %v84_v37, 4286644096 }
  0x1d   :  { %v340_v45 = vsel %vm198_vm0, %v147_v40, 4286644096  ;;  %v338_v46 = vmax.bf16 %v336_v44, %v333_v43  ;;  %v344_v47 = vsel %vm198_vm0, %v22_v36, 4286644096  ;;  %v347_v48 = vsel %vm198_vm0, %v85_v39, 4286644096 }
  0x1e   :  { %v351_v49 = vsel %vm198_vm0, %v148_v41, 4286644096  ;;  %v1124_v50 = vcombine.low %v320_v38, %v331_v42  ;;  %v349_v51 = vmax.bf16 %v347_v48, %v344_v47  ;;  %v23_v52 = vld [vmem:[%s2038_s0 + $0x38] sm:$0xf]  ;;  %v24_v53 = vld [vmem:[%s2038_s0 + $0x3c] sm:$0xf] }
  0x1f   :  { %v86_v54 = vld [vmem:[%s2038_s0 + $0x134] sm:$0xf]  ;;  %v342_v55 = vmax.bf16 %v340_v45, %v338_v46  ;;  %v87_v56 = vld [vmem:[%s2038_s0 + $0x138] sm:$0xf]  ;;  %v149_v57 = vld [vmem:[%s2038_s0 + $0x230] sm:$0xf] }
  0x20   :  { %v150_v58 = vld [vmem:[%s2038_s0 + $0x234] sm:$0xf]  ;;  %1125 = vst [vmem:[%s2039_s1 + $0x28] sm:$0xff] %v1124_v50   ;;  %v353_v59 = vmax.bf16 %v351_v49, %v349_v51  ;;  %v355_v60 = vsel %vm198_vm0, %v23_v52, 4286644096 }
  0x21   :  { %v358_v61 = vsel %vm198_vm0, %v86_v54, 4286644096  ;;  %v362_v62 = vsel %vm198_vm0, %v149_v57, 4286644096  ;;  %v366_v0 = vsel %vm198_vm0, %v24_v53, 4286644096 }
  0x22   :  { %v360_v63 = vmax.bf16 %v358_v61, %v355_v60  ;;  %v369_v1 = vsel %vm198_vm0, %v87_v56, 4286644096  ;;  %v373_v2 = vsel %vm198_vm0, %v150_v58, 4286644096  ;;  %v1126_v3 = vcombine.low %v342_v55, %v353_v59  ;;  %v25_v5 = vld [vmem:[%s2038_s0 + $0x40] sm:$0xf] }
  0x23   :  { %v371_v4 = vmax.bf16 %v369_v1, %v366_v0  ;;  %v26_v6 = vld [vmem:[%s2038_s0 + $0x44] sm:$0xf]  ;;  %v88_v7 = vld [vmem:[%s2038_s0 + $0x13c] sm:$0xf]  ;;  %v89_v9 = vld [vmem:[%s2038_s0 + $0x140] sm:$0xf] }
  0x24   :  { %v364_v8 = vmax.bf16 %v362_v62, %v360_v63  ;;  %v151_v10 = vld [vmem:[%s2038_s0 + $0x238] sm:$0xf]  ;;  %v152_v11 = vld [vmem:[%s2038_s0 + $0x23c] sm:$0xf]  ;;  %1127 = vst [vmem:[%s2039_s1 + $0x30] sm:$0xff] %v1126_v3  }
  0x25   :  { %v375_v12 = vmax.bf16 %v373_v2, %v371_v4  ;;  %v377_v13 = vsel %vm198_vm0, %v25_v5, 4286644096  ;;  %v380_v14 = vsel %vm198_vm0, %v88_v7, 4286644096  ;;  %v384_v15 = vsel %vm198_vm0, %v151_v10, 4286644096 }
  0x26   :  { %v382_v16 = vmax.bf16 %v380_v14, %v377_v13  ;;  %v388_v17 = vsel %vm198_vm0, %v26_v6, 4286644096  ;;  %v391_v18 = vsel %vm198_vm0, %v89_v9, 4286644096  ;;  %v395_v19 = vsel %vm198_vm0, %v152_v11, 4286644096 }
  0x27   :  { %v1128_v20 = vcombine.low %v364_v8, %v375_v12  ;;  %v393_v21 = vmax.bf16 %v391_v18, %v388_v17  ;;  %v27_v22 = vld [vmem:[%s2038_s0 + $0x48] sm:$0xf]  ;;  %v28_v23 = vld [vmem:[%s2038_s0 + $0x4c] sm:$0xf]  ;;  %v90_v24 = vld [vmem:[%s2038_s0 + $0x144] sm:$0xf] }
  0x28   :  { %v386_v25 = vmax.bf16 %v384_v15, %v382_v16  ;;  %v91_v26 = vld [vmem:[%s2038_s0 + $0x148] sm:$0xf]  ;;  %v153_v27 = vld [vmem:[%s2038_s0 + $0x240] sm:$0xf]  ;;  %v154_v28 = vld [vmem:[%s2038_s0 + $0x244] sm:$0xf] }
  0x29   :  { %1129 = vst [vmem:[%s2039_s1 + $0x38] sm:$0xff] %v1128_v20   ;;  %v397_v29 = vmax.bf16 %v395_v19, %v393_v21  ;;  %v399_v30 = vsel %vm198_vm0, %v27_v22, 4286644096  ;;  %v402_v31 = vsel %vm198_vm0, %v90_v24, 4286644096 }
  0x2a   :  { %v406_v32 = vsel %vm198_vm0, %v153_v27, 4286644096  ;;  %v404_v33 = vmax.bf16 %v402_v31, %v399_v30  ;;  %v410_v34 = vsel %vm198_vm0, %v28_v23, 4286644096  ;;  %v413_v35 = vsel %vm198_vm0, %v91_v26, 4286644096 }
  0x2b   :  { %v417_v36 = vsel %vm198_vm0, %v154_v28, 4286644096  ;;  %v1130_v37 = vcombine.low %v386_v25, %v397_v29  ;;  %v415_v38 = vmax.bf16 %v413_v35, %v410_v34  ;;  %v29_v39 = vld [vmem:[%s2038_s0 + $0x50] sm:$0xf]  ;;  %v30_v40 = vld [vmem:[%s2038_s0 + $0x54] sm:$0xf] }
  0x2c   :  { %v92_v41 = vld [vmem:[%s2038_s0 + $0x14c] sm:$0xf]  ;;  %v408_v42 = vmax.bf16 %v406_v32, %v404_v33  ;;  %v93_v43 = vld [vmem:[%s2038_s0 + $0x150] sm:$0xf]  ;;  %v155_v44 = vld [vmem:[%s2038_s0 + $0x248] sm:$0xf] }
  0x2d   :  { %v156_v45 = vld [vmem:[%s2038_s0 + $0x24c] sm:$0xf]  ;;  %1131 = vst [vmem:[%s2039_s1 + $0x40] sm:$0xff] %v1130_v37   ;;  %v419_v46 = vmax.bf16 %v417_v36, %v415_v38  ;;  %v421_v47 = vsel %vm198_vm0, %v29_v39, 4286644096 }
  0x2e   :  { %v424_v48 = vsel %vm198_vm0, %v92_v41, 4286644096  ;;  %v428_v49 = vsel %vm198_vm0, %v155_v44, 4286644096  ;;  %v432_v51 = vsel %vm198_vm0, %v30_v40, 4286644096 }
  0x2f   :  { %v426_v50 = vmax.bf16 %v424_v48, %v421_v47  ;;  %v435_v52 = vsel %vm198_vm0, %v93_v43, 4286644096  ;;  %v439_v53 = vsel %vm198_vm0, %v156_v45, 4286644096  ;;  %v1132_v54 = vcombine.low %v408_v42, %v419_v46  ;;  %v31_v56 = vld [vmem:[%s2038_s0 + $0x58] sm:$0xf] }
  0x30   :  { %v437_v55 = vmax.bf16 %v435_v52, %v432_v51  ;;  %v32_v57 = vld [vmem:[%s2038_s0 + $0x5c] sm:$0xf]  ;;  %v94_v58 = vld [vmem:[%s2038_s0 + $0x154] sm:$0xf]  ;;  %v95_v60 = vld [vmem:[%s2038_s0 + $0x158] sm:$0xf] }
  0x31   :  { %v430_v59 = vmax.bf16 %v428_v49, %v426_v50  ;;  %v157_v61 = vld [vmem:[%s2038_s0 + $0x250] sm:$0xf]  ;;  %v158_v62 = vld [vmem:[%s2038_s0 + $0x254] sm:$0xf]  ;;  %1133 = vst [vmem:[%s2039_s1 + $0x48] sm:$0xff] %v1132_v54  }
  0x32   :  { %v441_v63 = vmax.bf16 %v439_v53, %v437_v55  ;;  %v443_v0 = vsel %vm198_vm0, %v31_v56, 4286644096  ;;  %v446_v1 = vsel %vm198_vm0, %v94_v58, 4286644096  ;;  %v450_v2 = vsel %vm198_vm0, %v157_v61, 4286644096 }
  0x33   :  { %v448_v3 = vmax.bf16 %v446_v1, %v443_v0  ;;  %v454_v4 = vsel %vm198_vm0, %v32_v57, 4286644096  ;;  %v457_v5 = vsel %vm198_vm0, %v95_v60, 4286644096  ;;  %v461_v6 = vsel %vm198_vm0, %v158_v62, 4286644096 }
  0x34   :  { %v1134_v7 = vcombine.low %v430_v59, %v441_v63  ;;  %v459_v8 = vmax.bf16 %v457_v5, %v454_v4  ;;  %v33_v9 = vld [vmem:[%s2038_s0 + $0x60] sm:$0xf]  ;;  %v34_v10 = vld [vmem:[%s2038_s0 + $0x64] sm:$0xf]  ;;  %v96_v11 = vld [vmem:[%s2038_s0 + $0x15c] sm:$0xf] }
  0x35   :  { %v452_v12 = vmax.bf16 %v450_v2, %v448_v3  ;;  %v97_v13 = vld [vmem:[%s2038_s0 + $0x160] sm:$0xf]  ;;  %v159_v14 = vld [vmem:[%s2038_s0 + $0x258] sm:$0xf]  ;;  %v160_v15 = vld [vmem:[%s2038_s0 + $0x25c] sm:$0xf] }
  0x36   :  { %1135 = vst [vmem:[%s2039_s1 + $0x50] sm:$0xff] %v1134_v7   ;;  %v463_v16 = vmax.bf16 %v461_v6, %v459_v8  ;;  %v465_v17 = vsel %vm198_vm0, %v33_v9, 4286644096  ;;  %v468_v18 = vsel %vm198_vm0, %v96_v11, 4286644096 }
  0x37   :  { %v472_v19 = vsel %vm198_vm0, %v159_v14, 4286644096  ;;  %v470_v20 = vmax.bf16 %v468_v18, %v465_v17  ;;  %v476_v21 = vsel %vm198_vm0, %v34_v10, 4286644096  ;;  %v479_v22 = vsel %vm198_vm0, %v97_v13, 4286644096 }
  0x38   :  { %v483_v23 = vsel %vm198_vm0, %v160_v15, 4286644096  ;;  %v1136_v24 = vcombine.low %v452_v12, %v463_v16  ;;  %v481_v25 = vmax.bf16 %v479_v22, %v476_v21  ;;  %v35_v26 = vld [vmem:[%s2038_s0 + $0x68] sm:$0xf]  ;;  %v36_v27 = vld [vmem:[%s2038_s0 + $0x6c] sm:$0xf] }
  0x39   :  { %v98_v28 = vld [vmem:[%s2038_s0 + $0x164] sm:$0xf]  ;;  %v474_v29 = vmax.bf16 %v472_v19, %v470_v20  ;;  %v99_v30 = vld [vmem:[%s2038_s0 + $0x168] sm:$0xf]  ;;  %v161_v31 = vld [vmem:[%s2038_s0 + $0x260] sm:$0xf] }
  0x3a   :  { %v162_v32 = vld [vmem:[%s2038_s0 + $0x264] sm:$0xf]  ;;  %1137 = vst [vmem:[%s2039_s1 + $0x58] sm:$0xff] %v1136_v24   ;;  %v485_v33 = vmax.bf16 %v483_v23, %v481_v25  ;;  %v487_v34 = vsel %vm198_vm0, %v35_v26, 4286644096 }
  0x3b   :  { %v490_v35 = vsel %vm198_vm0, %v98_v28, 4286644096  ;;  %v494_v36 = vsel %vm198_vm0, %v161_v31, 4286644096  ;;  %v498_v38 = vsel %vm198_vm0, %v36_v27, 4286644096 }
  0x3c   :  { %v492_v37 = vmax.bf16 %v490_v35, %v487_v34  ;;  %v501_v39 = vsel %vm198_vm0, %v99_v30, 4286644096  ;;  %v505_v40 = vsel %vm198_vm0, %v162_v32, 4286644096  ;;  %v1138_v41 = vcombine.low %v474_v29, %v485_v33  ;;  %v37_v43 = vld [vmem:[%s2038_s0 + $0x70] sm:$0xf] }
  0x3d   :  { %v503_v42 = vmax.bf16 %v501_v39, %v498_v38  ;;  %v38_v44 = vld [vmem:[%s2038_s0 + $0x74] sm:$0xf]  ;;  %v100_v45 = vld [vmem:[%s2038_s0 + $0x16c] sm:$0xf]  ;;  %v101_v47 = vld [vmem:[%s2038_s0 + $0x170] sm:$0xf] }
  0x3e   :  { %v496_v46 = vmax.bf16 %v494_v36, %v492_v37  ;;  %v163_v48 = vld [vmem:[%s2038_s0 + $0x268] sm:$0xf]  ;;  %v164_v49 = vld [vmem:[%s2038_s0 + $0x26c] sm:$0xf]  ;;  %1139 = vst [vmem:[%s2039_s1 + $0x60] sm:$0xff] %v1138_v41  }
  0x3f   :  { %v507_v50 = vmax.bf16 %v505_v40, %v503_v42  ;;  %v509_v51 = vsel %vm198_vm0, %v37_v43, 4286644096  ;;  %v512_v52 = vsel %vm198_vm0, %v100_v45, 4286644096  ;;  %v516_v53 = vsel %vm198_vm0, %v163_v48, 4286644096 }
  0x40   :  { %v514_v54 = vmax.bf16 %v512_v52, %v509_v51  ;;  %v520_v55 = vsel %vm198_vm0, %v38_v44, 4286644096  ;;  %v523_v56 = vsel %vm198_vm0, %v101_v47, 4286644096  ;;  %v527_v57 = vsel %vm198_vm0, %v164_v49, 4286644096 }
  0x41   :  { %v1140_v58 = vcombine.low %v496_v46, %v507_v50  ;;  %v525_v59 = vmax.bf16 %v523_v56, %v520_v55  ;;  %v39_v60 = vld [vmem:[%s2038_s0 + $0x78] sm:$0xf]  ;;  %v40_v61 = vld [vmem:[%s2038_s0 + $0x7c] sm:$0xf]  ;;  %v102_v62 = vld [vmem:[%s2038_s0 + $0x174] sm:$0xf] }
  0x42   :  { %v518_v63 = vmax.bf16 %v516_v53, %v514_v54  ;;  %v103_v0 = vld [vmem:[%s2038_s0 + $0x178] sm:$0xf]  ;;  %v165_v1 = vld [vmem:[%s2038_s0 + $0x270] sm:$0xf]  ;;  %v166_v2 = vld [vmem:[%s2038_s0 + $0x274] sm:$0xf] }
  0x43   :  { %1141 = vst [vmem:[%s2039_s1 + $0x68] sm:$0xff] %v1140_v58   ;;  %v529_v3 = vmax.bf16 %v527_v57, %v525_v59  ;;  %v531_v4 = vsel %vm198_vm0, %v39_v60, 4286644096  ;;  %v534_v5 = vsel %vm198_vm0, %v102_v62, 4286644096 }
  0x44   :  { %v538_v6 = vsel %vm198_vm0, %v165_v1, 4286644096  ;;  %v536_v7 = vmax.bf16 %v534_v5, %v531_v4  ;;  %v542_v8 = vsel %vm198_vm0, %v40_v61, 4286644096  ;;  %v545_v9 = vsel %vm198_vm0, %v103_v0, 4286644096 }
  0x45   :  { %v549_v10 = vsel %vm198_vm0, %v166_v2, 4286644096  ;;  %v1142_v11 = vcombine.low %v518_v63, %v529_v3  ;;  %v547_v12 = vmax.bf16 %v545_v9, %v542_v8  ;;  %v41_v13 = vld [vmem:[%s2038_s0 + $0x80] sm:$0xf]  ;;  %v42_v14 = vld [vmem:[%s2038_s0 + $0x84] sm:$0xf] }
  0x46   :  { %v104_v15 = vld [vmem:[%s2038_s0 + $0x17c] sm:$0xf]  ;;  %v540_v16 = vmax.bf16 %v538_v6, %v536_v7  ;;  %v105_v17 = vld [vmem:[%s2038_s0 + $0x180] sm:$0xf]  ;;  %v167_v18 = vld [vmem:[%s2038_s0 + $0x278] sm:$0xf] }
  0x47   :  { %v168_v19 = vld [vmem:[%s2038_s0 + $0x27c] sm:$0xf]  ;;  %1143 = vst [vmem:[%s2039_s1 + $0x70] sm:$0xff] %v1142_v11   ;;  %v551_v20 = vmax.bf16 %v549_v10, %v547_v12  ;;  %v553_v21 = vsel %vm198_vm0, %v41_v13, 4286644096 }
  0x48   :  { %v556_v22 = vsel %vm198_vm0, %v104_v15, 4286644096  ;;  %v560_v23 = vsel %vm198_vm0, %v167_v18, 4286644096  ;;  %v564_v25 = vsel %vm198_vm0, %v42_v14, 4286644096 }
  0x49   :  { %v558_v24 = vmax.bf16 %v556_v22, %v553_v21  ;;  %v567_v26 = vsel %vm198_vm0, %v105_v17, 4286644096  ;;  %v571_v27 = vsel %vm198_vm0, %v168_v19, 4286644096  ;;  %v1144_v28 = vcombine.low %v540_v16, %v551_v20  ;;  %v43_v30 = vld [vmem:[%s2038_s0 + $0x88] sm:$0xf] }
  0x4a   :  { %v569_v29 = vmax.bf16 %v567_v26, %v564_v25  ;;  %v44_v31 = vld [vmem:[%s2038_s0 + $0x8c] sm:$0xf]  ;;  %v106_v32 = vld [vmem:[%s2038_s0 + $0x184] sm:$0xf]  ;;  %v107_v34 = vld [vmem:[%s2038_s0 + $0x188] sm:$0xf] }
  0x4b   :  { %v562_v33 = vmax.bf16 %v560_v23, %v558_v24  ;;  %v169_v35 = vld [vmem:[%s2038_s0 + $0x280] sm:$0xf]  ;;  %v170_v36 = vld [vmem:[%s2038_s0 + $0x284] sm:$0xf]  ;;  %1145 = vst [vmem:[%s2039_s1 + $0x78] sm:$0xff] %v1144_v28  }
  0x4c   :  { %v573_v37 = vmax.bf16 %v571_v27, %v569_v29  ;;  %v575_v38 = vsel %vm198_vm0, %v43_v30, 4286644096  ;;  %v578_v39 = vsel %vm198_vm0, %v106_v32, 4286644096  ;;  %v582_v40 = vsel %vm198_vm0, %v169_v35, 4286644096 }
  0x4d   :  { %v580_v41 = vmax.bf16 %v578_v39, %v575_v38  ;;  %v586_v42 = vsel %vm198_vm0, %v44_v31, 4286644096  ;;  %v589_v43 = vsel %vm198_vm0, %v107_v34, 4286644096  ;;  %v593_v44 = vsel %vm198_vm0, %v170_v36, 4286644096 }
  0x4e   :  { %v1146_v45 = vcombine.low %v562_v33, %v573_v37  ;;  %v591_v46 = vmax.bf16 %v589_v43, %v586_v42  ;;  %v45_v47 = vld [vmem:[%s2038_s0 + $0x90] sm:$0xf]  ;;  %v46_v48 = vld [vmem:[%s2038_s0 + $0x94] sm:$0xf]  ;;  %v108_v49 = vld [vmem:[%s2038_s0 + $0x18c] sm:$0xf] }
  0x4f   :  { %v584_v50 = vmax.bf16 %v582_v40, %v580_v41  ;;  %v109_v51 = vld [vmem:[%s2038_s0 + $0x190] sm:$0xf]  ;;  %v171_v52 = vld [vmem:[%s2038_s0 + $0x288] sm:$0xf]  ;;  %v172_v53 = vld [vmem:[%s2038_s0 + $0x28c] sm:$0xf] }
  0x50   :  { %1147 = vst [vmem:[%s2039_s1 + $0x80] sm:$0xff] %v1146_v45   ;;  %v595_v54 = vmax.bf16 %v593_v44, %v591_v46  ;;  %v597_v55 = vsel %vm198_vm0, %v45_v47, 4286644096  ;;  %v600_v56 = vsel %vm198_vm0, %v108_v49, 4286644096 }
  0x51   :  { %v604_v57 = vsel %vm198_vm0, %v171_v52, 4286644096  ;;  %v602_v58 = vmax.bf16 %v600_v56, %v597_v55  ;;  %v608_v59 = vsel %vm198_vm0, %v46_v48, 4286644096  ;;  %v611_v60 = vsel %vm198_vm0, %v109_v51, 4286644096 }
  0x52   :  { %v615_v61 = vsel %vm198_vm0, %v172_v53, 4286644096  ;;  %v1148_v62 = vcombine.low %v584_v50, %v595_v54  ;;  %v613_v63 = vmax.bf16 %v611_v60, %v608_v59  ;;  %v47_v0 = vld [vmem:[%s2038_s0 + $0x98] sm:$0xf]  ;;  %v48_v1 = vld [vmem:[%s2038_s0 + $0x9c] sm:$0xf] }
  0x53   :  { %v110_v2 = vld [vmem:[%s2038_s0 + $0x194] sm:$0xf]  ;;  %v606_v3 = vmax.bf16 %v604_v57, %v602_v58  ;;  %v111_v4 = vld [vmem:[%s2038_s0 + $0x198] sm:$0xf]  ;;  %v173_v5 = vld [vmem:[%s2038_s0 + $0x290] sm:$0xf] }
  0x54   :  { %v174_v6 = vld [vmem:[%s2038_s0 + $0x294] sm:$0xf]  ;;  %1149 = vst [vmem:[%s2039_s1 + $0x88] sm:$0xff] %v1148_v62   ;;  %v617_v7 = vmax.bf16 %v615_v61, %v613_v63  ;;  %v619_v8 = vsel %vm198_vm0, %v47_v0, 4286644096 }
  0x55   :  { %v622_v9 = vsel %vm198_vm0, %v110_v2, 4286644096  ;;  %v626_v10 = vsel %vm198_vm0, %v173_v5, 4286644096  ;;  %v630_v12 = vsel %vm198_vm0, %v48_v1, 4286644096 }
  0x56   :  { %v624_v11 = vmax.bf16 %v622_v9, %v619_v8  ;;  %v633_v13 = vsel %vm198_vm0, %v111_v4, 4286644096  ;;  %v637_v14 = vsel %vm198_vm0, %v174_v6, 4286644096  ;;  %v1150_v15 = vcombine.low %v606_v3, %v617_v7  ;;  %v49_v17 = vld [vmem:[%s2038_s0 + $0xa0] sm:$0xf] }
  0x57   :  { %v635_v16 = vmax.bf16 %v633_v13, %v630_v12  ;;  %v50_v18 = vld [vmem:[%s2038_s0 + $0xa4] sm:$0xf]  ;;  %v112_v19 = vld [vmem:[%s2038_s0 + $0x19c] sm:$0xf]  ;;  %v113_v21 = vld [vmem:[%s2038_s0 + $0x1a0] sm:$0xf] }
  0x58   :  { %v628_v20 = vmax.bf16 %v626_v10, %v624_v11  ;;  %v175_v22 = vld [vmem:[%s2038_s0 + $0x298] sm:$0xf]  ;;  %v176_v23 = vld [vmem:[%s2038_s0 + $0x29c] sm:$0xf]  ;;  %1151 = vst [vmem:[%s2039_s1 + $0x90] sm:$0xff] %v1150_v15  }
  0x59   :  { %v639_v24 = vmax.bf16 %v637_v14, %v635_v16  ;;  %v641_v25 = vsel %vm198_vm0, %v49_v17, 4286644096  ;;  %v644_v26 = vsel %vm198_vm0, %v112_v19, 4286644096  ;;  %v648_v27 = vsel %vm198_vm0, %v175_v22, 4286644096 }
  0x5a   :  { %v646_v28 = vmax.bf16 %v644_v26, %v641_v25  ;;  %v652_v29 = vsel %vm198_vm0, %v50_v18, 4286644096  ;;  %v655_v30 = vsel %vm198_vm0, %v113_v21, 4286644096  ;;  %v659_v31 = vsel %vm198_vm0, %v176_v23, 4286644096 }
  0x5b   :  { %v1152_v32 = vcombine.low %v628_v20, %v639_v24  ;;  %v657_v33 = vmax.bf16 %v655_v30, %v652_v29  ;;  %v51_v34 = vld [vmem:[%s2038_s0 + $0xa8] sm:$0xf]  ;;  %v52_v35 = vld [vmem:[%s2038_s0 + $0xac] sm:$0xf]  ;;  %v114_v36 = vld [vmem:[%s2038_s0 + $0x1a4] sm:$0xf] }
  0x5c   :  { %v650_v37 = vmax.bf16 %v648_v27, %v646_v28  ;;  %v115_v38 = vld [vmem:[%s2038_s0 + $0x1a8] sm:$0xf]  ;;  %v177_v39 = vld [vmem:[%s2038_s0 + $0x2a0] sm:$0xf]  ;;  %v178_v40 = vld [vmem:[%s2038_s0 + $0x2a4] sm:$0xf] }
  0x5d   :  { %1153 = vst [vmem:[%s2039_s1 + $0x98] sm:$0xff] %v1152_v32   ;;  %v661_v41 = vmax.bf16 %v659_v31, %v657_v33  ;;  %v663_v42 = vsel %vm198_vm0, %v51_v34, 4286644096  ;;  %v666_v43 = vsel %vm198_vm0, %v114_v36, 4286644096 }
  0x5e   :  { %v670_v44 = vsel %vm198_vm0, %v177_v39, 4286644096  ;;  %v668_v45 = vmax.bf16 %v666_v43, %v663_v42  ;;  %v674_v46 = vsel %vm198_vm0, %v52_v35, 4286644096  ;;  %v677_v47 = vsel %vm198_vm0, %v115_v38, 4286644096 }
  0x5f   :  { %v681_v48 = vsel %vm198_vm0, %v178_v40, 4286644096  ;;  %v1154_v49 = vcombine.low %v650_v37, %v661_v41  ;;  %v679_v50 = vmax.bf16 %v677_v47, %v674_v46  ;;  %v53_v51 = vld [vmem:[%s2038_s0 + $0xb0] sm:$0xf]  ;;  %v54_v52 = vld [vmem:[%s2038_s0 + $0xb4] sm:$0xf] }
  0x60   :  { %v116_v53 = vld [vmem:[%s2038_s0 + $0x1ac] sm:$0xf]  ;;  %v672_v54 = vmax.bf16 %v670_v44, %v668_v45  ;;  %v117_v55 = vld [vmem:[%s2038_s0 + $0x1b0] sm:$0xf]  ;;  %v179_v56 = vld [vmem:[%s2038_s0 + $0x2a8] sm:$0xf] }
  0x61   :  { %v180_v57 = vld [vmem:[%s2038_s0 + $0x2ac] sm:$0xf]  ;;  %1155 = vst [vmem:[%s2039_s1 + $0xa0] sm:$0xff] %v1154_v49   ;;  %v683_v58 = vmax.bf16 %v681_v48, %v679_v50  ;;  %v685_v59 = vsel %vm198_vm0, %v53_v51, 4286644096 }
  0x62   :  { %v688_v60 = vsel %vm198_vm0, %v116_v53, 4286644096  ;;  %v692_v61 = vsel %vm198_vm0, %v179_v56, 4286644096  ;;  %v696_v63 = vsel %vm198_vm0, %v54_v52, 4286644096 }
  0x63   :  { %v690_v62 = vmax.bf16 %v688_v60, %v685_v59  ;;  %v699_v0 = vsel %vm198_vm0, %v117_v55, 4286644096  ;;  %v703_v1 = vsel %vm198_vm0, %v180_v57, 4286644096  ;;  %v1156_v2 = vcombine.low %v672_v54, %v683_v58  ;;  %v55_v4 = vld [vmem:[%s2038_s0 + $0xb8] sm:$0xf] }
  0x64   :  { %v701_v3 = vmax.bf16 %v699_v0, %v696_v63  ;;  %v56_v5 = vld [vmem:[%s2038_s0 + $0xbc] sm:$0xf]  ;;  %v118_v6 = vld [vmem:[%s2038_s0 + $0x1b4] sm:$0xf]  ;;  %v119_v8 = vld [vmem:[%s2038_s0 + $0x1b8] sm:$0xf] }
  0x65   :  { %v694_v7 = vmax.bf16 %v692_v61, %v690_v62  ;;  %v181_v9 = vld [vmem:[%s2038_s0 + $0x2b0] sm:$0xf]  ;;  %v182_v10 = vld [vmem:[%s2038_s0 + $0x2b4] sm:$0xf]  ;;  %1157 = vst [vmem:[%s2039_s1 + $0xa8] sm:$0xff] %v1156_v2  }
  0x66   :  { %v705_v11 = vmax.bf16 %v703_v1, %v701_v3  ;;  %v707_v12 = vsel %vm198_vm0, %v55_v4, 4286644096  ;;  %v710_v13 = vsel %vm198_vm0, %v118_v6, 4286644096  ;;  %v714_v14 = vsel %vm198_vm0, %v181_v9, 4286644096 }
  0x67   :  { %v712_v15 = vmax.bf16 %v710_v13, %v707_v12  ;;  %v718_v16 = vsel %vm198_vm0, %v56_v5, 4286644096  ;;  %v721_v17 = vsel %vm198_vm0, %v119_v8, 4286644096  ;;  %v725_v18 = vsel %vm198_vm0, %v182_v10, 4286644096 }
  0x68   :  { %v1158_v19 = vcombine.low %v694_v7, %v705_v11  ;;  %v723_v20 = vmax.bf16 %v721_v17, %v718_v16  ;;  %v57_v21 = vld [vmem:[%s2038_s0 + $0xc0] sm:$0xf]  ;;  %v58_v22 = vld [vmem:[%s2038_s0 + $0xc4] sm:$0xf]  ;;  %v120_v23 = vld [vmem:[%s2038_s0 + $0x1bc] sm:$0xf] }
  0x69   :  { %v716_v24 = vmax.bf16 %v714_v14, %v712_v15  ;;  %v121_v25 = vld [vmem:[%s2038_s0 + $0x1c0] sm:$0xf]  ;;  %v183_v26 = vld [vmem:[%s2038_s0 + $0x2b8] sm:$0xf]  ;;  %v184_v27 = vld [vmem:[%s2038_s0 + $0x2bc] sm:$0xf] }
  0x6a   :  { %1159 = vst [vmem:[%s2039_s1 + $0xb0] sm:$0xff] %v1158_v19   ;;  %v727_v28 = vmax.bf16 %v725_v18, %v723_v20  ;;  %v729_v29 = vsel %vm198_vm0, %v57_v21, 4286644096  ;;  %v732_v30 = vsel %vm198_vm0, %v120_v23, 4286644096 }
  0x6b   :  { %v736_v31 = vsel %vm198_vm0, %v183_v26, 4286644096  ;;  %v734_v32 = vmax.bf16 %v732_v30, %v729_v29  ;;  %v740_v33 = vsel %vm198_vm0, %v58_v22, 4286644096  ;;  %v743_v34 = vsel %vm198_vm0, %v121_v25, 4286644096 }
  0x6c   :  { %v747_v35 = vsel %vm198_vm0, %v184_v27, 4286644096  ;;  %v1160_v36 = vcombine.low %v716_v24, %v727_v28  ;;  %v745_v37 = vmax.bf16 %v743_v34, %v740_v33  ;;  %v59_v38 = vld [vmem:[%s2038_s0 + $0xc8] sm:$0xf]  ;;  %v60_v39 = vld [vmem:[%s2038_s0 + $0xcc] sm:$0xf] }
  0x6d   :  { %v122_v40 = vld [vmem:[%s2038_s0 + $0x1c4] sm:$0xf]  ;;  %v738_v41 = vmax.bf16 %v736_v31, %v734_v32  ;;  %v123_v42 = vld [vmem:[%s2038_s0 + $0x1c8] sm:$0xf]  ;;  %v185_v43 = vld [vmem:[%s2038_s0 + $0x2c0] sm:$0xf] }
  0x6e   :  { %v186_v44 = vld [vmem:[%s2038_s0 + $0x2c4] sm:$0xf]  ;;  %1161 = vst [vmem:[%s2039_s1 + $0xb8] sm:$0xff] %v1160_v36   ;;  %v749_v45 = vmax.bf16 %v747_v35, %v745_v37  ;;  %v751_v46 = vsel %vm198_vm0, %v59_v38, 4286644096 }
  0x6f   :  { %v754_v47 = vsel %vm198_vm0, %v122_v40, 4286644096  ;;  %v758_v48 = vsel %vm198_vm0, %v185_v43, 4286644096  ;;  %v762_v50 = vsel %vm198_vm0, %v60_v39, 4286644096 }
  0x70   :  { %v756_v49 = vmax.bf16 %v754_v47, %v751_v46  ;;  %v765_v51 = vsel %vm198_vm0, %v123_v42, 4286644096  ;;  %v769_v52 = vsel %vm198_vm0, %v186_v44, 4286644096  ;;  %v1162_v53 = vcombine.low %v738_v41, %v749_v45  ;;  %v61_v55 = vld [vmem:[%s2038_s0 + $0xd0] sm:$0xf] }
  0x71   :  { %v767_v54 = vmax.bf16 %v765_v51, %v762_v50  ;;  %v62_v56 = vld [vmem:[%s2038_s0 + $0xd4] sm:$0xf]  ;;  %v124_v57 = vld [vmem:[%s2038_s0 + $0x1cc] sm:$0xf]  ;;  %v125_v59 = vld [vmem:[%s2038_s0 + $0x1d0] sm:$0xf] }
  0x72   :  { %v760_v58 = vmax.bf16 %v758_v48, %v756_v49  ;;  %v187_v60 = vld [vmem:[%s2038_s0 + $0x2c8] sm:$0xf]  ;;  %v188_v61 = vld [vmem:[%s2038_s0 + $0x2cc] sm:$0xf]  ;;  %1163 = vst [vmem:[%s2039_s1 + $0xc0] sm:$0xff] %v1162_v53  }
  0x73   :  { %v771_v62 = vmax.bf16 %v769_v52, %v767_v54  ;;  %v773_v63 = vsel %vm198_vm0, %v61_v55, 4286644096  ;;  %v776_v0 = vsel %vm198_vm0, %v124_v57, 4286644096  ;;  %v780_v1 = vsel %vm198_vm0, %v187_v60, 4286644096 }
  0x74   :  { %v778_v2 = vmax.bf16 %v776_v0, %v773_v63  ;;  %v784_v3 = vsel %vm198_vm0, %v62_v56, 4286644096  ;;  %v787_v4 = vsel %vm198_vm0, %v125_v59, 4286644096  ;;  %v791_v5 = vsel %vm198_vm0, %v188_v61, 4286644096 }
  0x75   :  { %v1164_v6 = vcombine.low %v760_v58, %v771_v62  ;;  %v789_v7 = vmax.bf16 %v787_v4, %v784_v3  ;;  %v63_v8 = vld [vmem:[%s2038_s0 + $0xd8] sm:$0xf]  ;;  %v64_v9 = vld [vmem:[%s2038_s0 + $0xdc] sm:$0xf]  ;;  %v126_v10 = vld [vmem:[%s2038_s0 + $0x1d4] sm:$0xf] }
  0x76   :  { %v782_v11 = vmax.bf16 %v780_v1, %v778_v2  ;;  %v127_v12 = vld [vmem:[%s2038_s0 + $0x1d8] sm:$0xf]  ;;  %v189_v13 = vld [vmem:[%s2038_s0 + $0x2d0] sm:$0xf]  ;;  %v190_v14 = vld [vmem:[%s2038_s0 + $0x2d4] sm:$0xf] }
  0x77   :  { %1165 = vst [vmem:[%s2039_s1 + $0xc8] sm:$0xff] %v1164_v6   ;;  %v793_v15 = vmax.bf16 %v791_v5, %v789_v7  ;;  %v795_v16 = vsel %vm198_vm0, %v63_v8, 4286644096  ;;  %v798_v17 = vsel %vm198_vm0, %v126_v10, 4286644096 }
  0x78   :  { %v802_v18 = vsel %vm198_vm0, %v189_v13, 4286644096  ;;  %v800_v19 = vmax.bf16 %v798_v17, %v795_v16  ;;  %v806_v20 = vsel %vm198_vm0, %v64_v9, 4286644096  ;;  %v809_v21 = vsel %vm198_vm0, %v127_v12, 4286644096 }
  0x79   :  { %v813_v22 = vsel %vm198_vm0, %v190_v14, 4286644096  ;;  %v1166_v23 = vcombine.low %v782_v11, %v793_v15  ;;  %v811_v24 = vmax.bf16 %v809_v21, %v806_v20  ;;  %v65_v25 = vld [vmem:[%s2038_s0 + $0xe0] sm:$0xf]  ;;  %v66_v26 = vld [vmem:[%s2038_s0 + $0xe4] sm:$0xf] }
  0x7a   :  { %v128_v27 = vld [vmem:[%s2038_s0 + $0x1dc] sm:$0xf]  ;;  %v804_v28 = vmax.bf16 %v802_v18, %v800_v19  ;;  %v129_v29 = vld [vmem:[%s2038_s0 + $0x1e0] sm:$0xf]  ;;  %v191_v30 = vld [vmem:[%s2038_s0 + $0x2d8] sm:$0xf] }
  0x7b   :  { %v192_v31 = vld [vmem:[%s2038_s0 + $0x2dc] sm:$0xf]  ;;  %1167 = vst [vmem:[%s2039_s1 + $0xd0] sm:$0xff] %v1166_v23   ;;  %v815_v32 = vmax.bf16 %v813_v22, %v811_v24  ;;  %v817_v33 = vsel %vm198_vm0, %v65_v25, 4286644096 }
  0x7c   :  { %v820_v34 = vsel %vm198_vm0, %v128_v27, 4286644096  ;;  %v824_v35 = vsel %vm198_vm0, %v191_v30, 4286644096  ;;  %v828_v37 = vsel %vm198_vm0, %v66_v26, 4286644096 }
  0x7d   :  { %v822_v36 = vmax.bf16 %v820_v34, %v817_v33  ;;  %v831_v38 = vsel %vm198_vm0, %v129_v29, 4286644096  ;;  %v835_v39 = vsel %vm198_vm0, %v192_v31, 4286644096  ;;  %v1168_v40 = vcombine.low %v804_v28, %v815_v32  ;;  %v67_v42 = vld [vmem:[%s2038_s0 + $0xe8] sm:$0xf] }
  0x7e   :  { %v833_v41 = vmax.bf16 %v831_v38, %v828_v37  ;;  %v68_v43 = vld [vmem:[%s2038_s0 + $0xec] sm:$0xf]  ;;  %v130_v44 = vld [vmem:[%s2038_s0 + $0x1e4] sm:$0xf]  ;;  %v131_v46 = vld [vmem:[%s2038_s0 + $0x1e8] sm:$0xf] }
  0x7f   :  { %v826_v45 = vmax.bf16 %v824_v35, %v822_v36  ;;  %v193_v47 = vld [vmem:[%s2038_s0 + $0x2e0] sm:$0xf]  ;;  %v194_v48 = vld [vmem:[%s2038_s0 + $0x2e4] sm:$0xf]  ;;  %1169 = vst [vmem:[%s2039_s1 + $0xd8] sm:$0xff] %v1168_v40  }
  0x80   :  { %v837_v49 = vmax.bf16 %v835_v39, %v833_v41  ;;  %v839_v50 = vsel %vm198_vm0, %v67_v42, 4286644096  ;;  %v842_v51 = vsel %vm198_vm0, %v130_v44, 4286644096  ;;  %v846_v52 = vsel %vm198_vm0, %v193_v47, 4286644096 }
  0x81   :  { %v844_v53 = vmax.bf16 %v842_v51, %v839_v50  ;;  %v850_v54 = vsel %vm198_vm0, %v68_v43, 4286644096  ;;  %v853_v55 = vsel %vm198_vm0, %v131_v46, 4286644096  ;;  %v857_v56 = vsel %vm198_vm0, %v194_v48, 4286644096 }
  0x82   :  { %v1170_v57 = vcombine.low %v826_v45, %v837_v49  ;;  %v855_v58 = vmax.bf16 %v853_v55, %v850_v54  ;;  %v69_v59 = vld [vmem:[%s2038_s0 + $0xf0] sm:$0xf]  ;;  %v70_v60 = vld [vmem:[%s2038_s0 + $0xf4] sm:$0xf]  ;;  %v132_v61 = vld [vmem:[%s2038_s0 + $0x1ec] sm:$0xf] }
  0x83   :  { %v848_v62 = vmax.bf16 %v846_v52, %v844_v53  ;;  %v133_v63 = vld [vmem:[%s2038_s0 + $0x1f0] sm:$0xf]  ;;  %v195_v0 = vld [vmem:[%s2038_s0 + $0x2e8] sm:$0xf]  ;;  %v196_v1 = vld [vmem:[%s2038_s0 + $0x2ec] sm:$0xf] }
  0x84   :  { %1171 = vst [vmem:[%s2039_s1 + $0xe0] sm:$0xff] %v1170_v57   ;;  %v859_v2 = vmax.bf16 %v857_v56, %v855_v58  ;;  %v861_v3 = vsel %vm198_vm0, %v69_v59, 4286644096  ;;  %v864_v4 = vsel %vm198_vm0, %v132_v61, 4286644096 }
  0x85   :  { %v868_v5 = vsel %vm198_vm0, %v195_v0, 4286644096  ;;  %v866_v6 = vmax.bf16 %v864_v4, %v861_v3  ;;  %v872_v7 = vsel %vm198_vm0, %v70_v60, 4286644096  ;;  %v875_v8 = vsel %vm198_vm0, %v133_v63, 4286644096 }
  0x86   :  { %v879_v9 = vsel %vm198_vm0, %v196_v1, 4286644096  ;;  %v1172_v10 = vcombine.low %v848_v62, %v859_v2  ;;  %v877_v11 = vmax.bf16 %v875_v8, %v872_v7  ;;  %v71_v12 = vld [vmem:[%s2038_s0 + $0xf8] sm:$0xf]  ;;  %v134_v13 = vld [vmem:[%s2038_s0 + $0x1f4] sm:$0xf] }
  0x87   :  { %v197_v14 = vld [vmem:[%s2038_s0 + $0x2f0] sm:$0xf]  ;;  %v870_v15 = vmax.bf16 %v868_v5, %v866_v6  ;;  %v883_v16 = vsel %vm198_vm0, %v71_v12, 4286644096  ;;  %v886_v17 = vsel %vm198_vm0, %v134_v13, 4286644096 }
  0x88   :  { %v890_v18 = vsel %vm198_vm0, %v197_v14, 4286644096  ;;  %1173 = vst [vmem:[%s2039_s1 + $0xe8] sm:$0xff] %v1172_v10   ;;  %v881_v19 = vmax.bf16 %v879_v9, %v877_v11  ;;  %v888_v20 = vmax.bf16 %v886_v17, %v883_v16 }
  0x8a   :  { %v1174_v21 = vcombine.low %v870_v15, %v881_v19  ;;  %v892_v22 = vmax.bf16 %v890_v18, %v888_v20 }
  0x8c   :  { %1175 = vst [vmem:[%s2039_s1 + $0xf0] sm:$0xff] %v1174_v21   ;;  %955 = vst [vmem:[%s2039_s1 + $0xf8] sm:$0xf] %v892_v22 }

// kernel: resnet_l1_forward.12
= control target key start
LH: loop header
LB: loop body
LE: loop exit
PB: predicated region body
PF: predicated region fallthrough
CT: control target
= control target key end

     0   :  { %vm105_vm0 = vcmask 1043456   ;;  %s1048_s0 = inlined_call_operand.vmem [shape: bf16[3,256,128], index: 0, kind: input, shape index: {}]   ;;  %s1049_s1 = inlined_call_operand.vmem [shape: bf16[256,128], index: 1, kind: output, shape index: {}]  }
   0x1   :  { %v9_v0 = vld [vmem:[%s1048_s0] sm:$0xf]  ;;  %v10_v1 = vld [vmem:[%s1048_s0 + $0x4] sm:$0xf]  ;;  %v11_v14 = vld [vmem:[%s1048_s0 + $0x8] sm:$0xf] }
   0x2   :  { %v41_v2 = vld [vmem:[%s1048_s0 + $0x80] sm:$0xf]  ;;  %v42_v3 = vld [vmem:[%s1048_s0 + $0x84] sm:$0xf]  ;;  %v108_v6 = vsel %vm105_vm0, %v9_v0, 4286644096 }
   0x3   :  { %v73_v4 = vld [vmem:[%s1048_s0 + $0x100] sm:$0xf]  ;;  %v74_v5 = vld [vmem:[%s1048_s0 + $0x104] sm:$0xf]  ;;  %v111_v7 = vsel %vm105_vm0, %v41_v2, 4286644096 }
   0x4   :  { %v115_v8 = vsel %vm105_vm0, %v73_v4, 4286644096  ;;  %v113_v9 = vmax.bf16 %v111_v7, %v108_v6  ;;  %v119_v10 = vsel %vm105_vm0, %v10_v1, 4286644096  ;;  %v122_v11 = vsel %vm105_vm0, %v42_v3, 4286644096 }
   0x5   :  { %v126_v12 = vsel %vm105_vm0, %v74_v5, 4286644096  ;;  %v124_v13 = vmax.bf16 %v122_v11, %v119_v10  ;;  %v12_v15 = vld [vmem:[%s1048_s0 + $0xc] sm:$0xf]  ;;  %v43_v16 = vld [vmem:[%s1048_s0 + $0x88] sm:$0xf] }
   0x6   :  { %v117_v17 = vmax.bf16 %v115_v8, %v113_v9  ;;  %v44_v18 = vld [vmem:[%s1048_s0 + $0x8c] sm:$0xf]  ;;  %v75_v19 = vld [vmem:[%s1048_s0 + $0x108] sm:$0xf]  ;;  %v130_v22 = vsel %vm105_vm0, %v11_v14, 4286644096 }
   0x7   :  { %v76_v20 = vld [vmem:[%s1048_s0 + $0x10c] sm:$0xf]  ;;  %v128_v21 = vmax.bf16 %v126_v12, %v124_v13  ;;  %v133_v23 = vsel %vm105_vm0, %v43_v16, 4286644096  ;;  %v137_v24 = vsel %vm105_vm0, %v75_v19, 4286644096 }
   0x8   :  { %v135_v25 = vmax.bf16 %v133_v23, %v130_v22  ;;  %v141_v26 = vsel %vm105_vm0, %v12_v15, 4286644096  ;;  %v144_v27 = vsel %vm105_vm0, %v44_v18, 4286644096  ;;  %v148_v28 = vsel %vm105_vm0, %v76_v20, 4286644096 }
   0x9   :  { %v575_v29 = vcombine.low %v117_v17, %v128_v21  ;;  %v146_v30 = vmax.bf16 %v144_v27, %v141_v26  ;;  %v13_v31 = vld [vmem:[%s1048_s0 + $0x10] sm:$0xf]  ;;  %v14_v32 = vld [vmem:[%s1048_s0 + $0x14] sm:$0xf]  ;;  %v15_v48 = vld [vmem:[%s1048_s0 + $0x18] sm:$0xf] }
   0xa   :  { %v45_v33 = vld [vmem:[%s1048_s0 + $0x90] sm:$0xf]  ;;  %v139_v34 = vmax.bf16 %v137_v24, %v135_v25  ;;  %v46_v35 = vld [vmem:[%s1048_s0 + $0x94] sm:$0xf]  ;;  %v152_v39 = vsel %vm105_vm0, %v13_v31, 4286644096 }
   0xb   :  { %v77_v36 = vld [vmem:[%s1048_s0 + $0x110] sm:$0xf]  ;;  %v78_v37 = vld [vmem:[%s1048_s0 + $0x114] sm:$0xf]  ;;  %499 = vst [vmem:[%s1049_s1] sm:$0xff] %v575_v29   ;;  %v150_v38 = vmax.bf16 %v148_v28, %v146_v30  ;;  %v155_v40 = vsel %vm105_vm0, %v45_v33, 4286644096 }
   0xc   :  { %v159_v41 = vsel %vm105_vm0, %v77_v36, 4286644096  ;;  %v157_v42 = vmax.bf16 %v155_v40, %v152_v39  ;;  %v163_v43 = vsel %vm105_vm0, %v14_v32, 4286644096  ;;  %v166_v44 = vsel %vm105_vm0, %v46_v35, 4286644096 }
   0xd   :  { %v170_v45 = vsel %vm105_vm0, %v78_v37, 4286644096  ;;  %v576_v46 = vcombine.low %v139_v34, %v150_v38  ;;  %v168_v47 = vmax.bf16 %v166_v44, %v163_v43  ;;  %v16_v49 = vld [vmem:[%s1048_s0 + $0x1c] sm:$0xf]  ;;  %v47_v50 = vld [vmem:[%s1048_s0 + $0x98] sm:$0xf] }
   0xe   :  { %v161_v51 = vmax.bf16 %v159_v41, %v157_v42  ;;  %v48_v52 = vld [vmem:[%s1048_s0 + $0x9c] sm:$0xf]  ;;  %v79_v53 = vld [vmem:[%s1048_s0 + $0x118] sm:$0xf]  ;;  %v174_v56 = vsel %vm105_vm0, %v15_v48, 4286644096 }
   0xf   :  { %v80_v54 = vld [vmem:[%s1048_s0 + $0x11c] sm:$0xf]  ;;  %577 = vst [vmem:[%s1049_s1 + $0x8] sm:$0xff] %v576_v46   ;;  %v172_v55 = vmax.bf16 %v170_v45, %v168_v47  ;;  %v177_v57 = vsel %vm105_vm0, %v47_v50, 4286644096 }
  0x10   :  { %v181_v58 = vsel %vm105_vm0, %v79_v53, 4286644096  ;;  %v179_v59 = vmax.bf16 %v177_v57, %v174_v56  ;;  %v185_v60 = vsel %vm105_vm0, %v16_v49, 4286644096  ;;  %v188_v61 = vsel %vm105_vm0, %v48_v52, 4286644096 }
  0x11   :  { %v192_v62 = vsel %vm105_vm0, %v80_v54, 4286644096  ;;  %v578_v63 = vcombine.low %v161_v51, %v172_v55  ;;  %v190_v0 = vmax.bf16 %v188_v61, %v185_v60  ;;  %v17_v1 = vld [vmem:[%s1048_s0 + $0x20] sm:$0xf]  ;;  %v18_v2 = vld [vmem:[%s1048_s0 + $0x24] sm:$0xf] }
  0x12   :  { %v49_v3 = vld [vmem:[%s1048_s0 + $0xa0] sm:$0xf]  ;;  %v183_v4 = vmax.bf16 %v181_v58, %v179_v59  ;;  %v50_v5 = vld [vmem:[%s1048_s0 + $0xa4] sm:$0xf]  ;;  %v196_v9 = vsel %vm105_vm0, %v17_v1, 4286644096 }
  0x13   :  { %v81_v6 = vld [vmem:[%s1048_s0 + $0x120] sm:$0xf]  ;;  %v82_v7 = vld [vmem:[%s1048_s0 + $0x124] sm:$0xf]  ;;  %579 = vst [vmem:[%s1049_s1 + $0x10] sm:$0xff] %v578_v63   ;;  %v194_v8 = vmax.bf16 %v192_v62, %v190_v0 }
  0x14   :  { %v199_v10 = vsel %vm105_vm0, %v49_v3, 4286644096  ;;  %v203_v11 = vsel %vm105_vm0, %v81_v6, 4286644096  ;;  %v207_v13 = vsel %vm105_vm0, %v18_v2, 4286644096 }
  0x15   :  { %v201_v12 = vmax.bf16 %v199_v10, %v196_v9  ;;  %v210_v14 = vsel %vm105_vm0, %v50_v5, 4286644096  ;;  %v214_v15 = vsel %vm105_vm0, %v82_v7, 4286644096  ;;  %v580_v16 = vcombine.low %v183_v4, %v194_v8  ;;  %v19_v18 = vld [vmem:[%s1048_s0 + $0x28] sm:$0xf] }
  0x16   :  { %v212_v17 = vmax.bf16 %v210_v14, %v207_v13  ;;  %v20_v19 = vld [vmem:[%s1048_s0 + $0x2c] sm:$0xf]  ;;  %v51_v20 = vld [vmem:[%s1048_s0 + $0xa8] sm:$0xf]  ;;  %v218_v26 = vsel %vm105_vm0, %v19_v18, 4286644096 }
  0x17   :  { %v205_v21 = vmax.bf16 %v203_v11, %v201_v12  ;;  %v52_v22 = vld [vmem:[%s1048_s0 + $0xac] sm:$0xf]  ;;  %v83_v23 = vld [vmem:[%s1048_s0 + $0x128] sm:$0xf]  ;;  %581 = vst [vmem:[%s1049_s1 + $0x18] sm:$0xff] %v580_v16  }
  0x18   :  { %v84_v24 = vld [vmem:[%s1048_s0 + $0x12c] sm:$0xf]  ;;  %v216_v25 = vmax.bf16 %v214_v15, %v212_v17  ;;  %v221_v27 = vsel %vm105_vm0, %v51_v20, 4286644096  ;;  %v225_v28 = vsel %vm105_vm0, %v83_v23, 4286644096 }
  0x19   :  { %v223_v29 = vmax.bf16 %v221_v27, %v218_v26  ;;  %v229_v30 = vsel %vm105_vm0, %v20_v19, 4286644096  ;;  %v232_v31 = vsel %vm105_vm0, %v52_v22, 4286644096  ;;  %v236_v32 = vsel %vm105_vm0, %v84_v24, 4286644096 }
  0x1a   :  { %v582_v33 = vcombine.low %v205_v21, %v216_v25  ;;  %v234_v34 = vmax.bf16 %v232_v31, %v229_v30  ;;  %v21_v35 = vld [vmem:[%s1048_s0 + $0x30] sm:$0xf]  ;;  %v22_v36 = vld [vmem:[%s1048_s0 + $0x34] sm:$0xf]  ;;  %v23_v52 = vld [vmem:[%s1048_s0 + $0x38] sm:$0xf] }
  0x1b   :  { %v53_v37 = vld [vmem:[%s1048_s0 + $0xb0] sm:$0xf]  ;;  %v227_v38 = vmax.bf16 %v225_v28, %v223_v29  ;;  %v54_v39 = vld [vmem:[%s1048_s0 + $0xb4] sm:$0xf]  ;;  %v240_v43 = vsel %vm105_vm0, %v21_v35, 4286644096 }
  0x1c   :  { %v85_v40 = vld [vmem:[%s1048_s0 + $0x130] sm:$0xf]  ;;  %v86_v41 = vld [vmem:[%s1048_s0 + $0x134] sm:$0xf]  ;;  %583 = vst [vmem:[%s1049_s1 + $0x20] sm:$0xff] %v582_v33   ;;  %v238_v42 = vmax.bf16 %v236_v32, %v234_v34 }
  0x1d   :  { %v243_v44 = vsel %vm105_vm0, %v53_v37, 4286644096  ;;  %v247_v45 = vsel %vm105_vm0, %v85_v40, 4286644096  ;;  %v251_v47 = vsel %vm105_vm0, %v22_v36, 4286644096 }
  0x1e   :  { %v245_v46 = vmax.bf16 %v243_v44, %v240_v43  ;;  %v254_v48 = vsel %vm105_vm0, %v54_v39, 4286644096  ;;  %v258_v49 = vsel %vm105_vm0, %v86_v41, 4286644096  ;;  %v584_v50 = vcombine.low %v227_v38, %v238_v42  ;;  %v24_v53 = vld [vmem:[%s1048_s0 + $0x3c] sm:$0xf] }
  0x1f   :  { %v256_v51 = vmax.bf16 %v254_v48, %v251_v47  ;;  %v55_v54 = vld [vmem:[%s1048_s0 + $0xb8] sm:$0xf]  ;;  %v56_v56 = vld [vmem:[%s1048_s0 + $0xbc] sm:$0xf]  ;;  %v262_v60 = vsel %vm105_vm0, %v23_v52, 4286644096 }
  0x20   :  { %v249_v55 = vmax.bf16 %v247_v45, %v245_v46  ;;  %v87_v57 = vld [vmem:[%s1048_s0 + $0x138] sm:$0xf]  ;;  %v88_v58 = vld [vmem:[%s1048_s0 + $0x13c] sm:$0xf]  ;;  %585 = vst [vmem:[%s1049_s1 + $0x28] sm:$0xff] %v584_v50  }
  0x21   :  { %v260_v59 = vmax.bf16 %v258_v49, %v256_v51  ;;  %v265_v61 = vsel %vm105_vm0, %v55_v54, 4286644096  ;;  %v269_v62 = vsel %vm105_vm0, %v87_v57, 4286644096  ;;  %v273_v0 = vsel %vm105_vm0, %v24_v53, 4286644096 }
  0x22   :  { %v267_v63 = vmax.bf16 %v265_v61, %v262_v60  ;;  %v276_v1 = vsel %vm105_vm0, %v56_v56, 4286644096  ;;  %v280_v2 = vsel %vm105_vm0, %v88_v58, 4286644096  ;;  %v25_v5 = vld [vmem:[%s1048_s0 + $0x40] sm:$0xf] }
  0x23   :  { %v586_v3 = vcombine.low %v249_v55, %v260_v59  ;;  %v278_v4 = vmax.bf16 %v276_v1, %v273_v0  ;;  %v26_v6 = vld [vmem:[%s1048_s0 + $0x44] sm:$0xf]  ;;  %v57_v7 = vld [vmem:[%s1048_s0 + $0xc0] sm:$0xf]  ;;  %v284_v13 = vsel %vm105_vm0, %v25_v5, 4286644096 }
  0x24   :  { %v271_v8 = vmax.bf16 %v269_v62, %v267_v63  ;;  %v58_v9 = vld [vmem:[%s1048_s0 + $0xc4] sm:$0xf]  ;;  %v89_v10 = vld [vmem:[%s1048_s0 + $0x140] sm:$0xf]  ;;  %v287_v14 = vsel %vm105_vm0, %v57_v7, 4286644096 }
  0x25   :  { %v90_v11 = vld [vmem:[%s1048_s0 + $0x144] sm:$0xf]  ;;  %587 = vst [vmem:[%s1049_s1 + $0x30] sm:$0xff] %v586_v3   ;;  %v282_v12 = vmax.bf16 %v280_v2, %v278_v4  ;;  %v291_v15 = vsel %vm105_vm0, %v89_v10, 4286644096  ;;  %v289_v16 = vmax.bf16 %v287_v14, %v284_v13 }
  0x26   :  { %v295_v17 = vsel %vm105_vm0, %v26_v6, 4286644096  ;;  %v298_v18 = vsel %vm105_vm0, %v58_v9, 4286644096  ;;  %v302_v19 = vsel %vm105_vm0, %v90_v11, 4286644096 }
  0x27   :  { %v588_v20 = vcombine.low %v271_v8, %v282_v12  ;;  %v300_v21 = vmax.bf16 %v298_v18, %v295_v17  ;;  %v27_v22 = vld [vmem:[%s1048_s0 + $0x48] sm:$0xf]  ;;  %v28_v23 = vld [vmem:[%s1048_s0 + $0x4c] sm:$0xf]  ;;  %v293_v25 = vmax.bf16 %v291_v15, %v289_v16  ;;  %v29_v39 = vld [vmem:[%s1048_s0 + $0x50] sm:$0xf] }
  0x28   :  { %v59_v24 = vld [vmem:[%s1048_s0 + $0xc8] sm:$0xf]  ;;  %v60_v26 = vld [vmem:[%s1048_s0 + $0xcc] sm:$0xf]  ;;  %v306_v30 = vsel %vm105_vm0, %v27_v22, 4286644096 }
  0x29   :  { %v91_v27 = vld [vmem:[%s1048_s0 + $0x148] sm:$0xf]  ;;  %v92_v28 = vld [vmem:[%s1048_s0 + $0x14c] sm:$0xf]  ;;  %589 = vst [vmem:[%s1049_s1 + $0x38] sm:$0xff] %v588_v20   ;;  %v304_v29 = vmax.bf16 %v302_v19, %v300_v21 }
  0x2a   :  { %v309_v31 = vsel %vm105_vm0, %v59_v24, 4286644096  ;;  %v313_v32 = vsel %vm105_vm0, %v91_v27, 4286644096  ;;  %v317_v34 = vsel %vm105_vm0, %v28_v23, 4286644096 }
  0x2b   :  { %v311_v33 = vmax.bf16 %v309_v31, %v306_v30  ;;  %v320_v35 = vsel %vm105_vm0, %v60_v26, 4286644096  ;;  %v324_v36 = vsel %vm105_vm0, %v92_v28, 4286644096  ;;  %v590_v37 = vcombine.low %v293_v25, %v304_v29  ;;  %v30_v40 = vld [vmem:[%s1048_s0 + $0x54] sm:$0xf] }
  0x2c   :  { %v322_v38 = vmax.bf16 %v320_v35, %v317_v34  ;;  %v61_v41 = vld [vmem:[%s1048_s0 + $0xd0] sm:$0xf]  ;;  %v62_v43 = vld [vmem:[%s1048_s0 + $0xd4] sm:$0xf]  ;;  %v328_v47 = vsel %vm105_vm0, %v29_v39, 4286644096 }
  0x2d   :  { %v315_v42 = vmax.bf16 %v313_v32, %v311_v33  ;;  %v93_v44 = vld [vmem:[%s1048_s0 + $0x150] sm:$0xf]  ;;  %v94_v45 = vld [vmem:[%s1048_s0 + $0x154] sm:$0xf]  ;;  %591 = vst [vmem:[%s1049_s1 + $0x40] sm:$0xff] %v590_v37  }
  0x2e   :  { %v326_v46 = vmax.bf16 %v324_v36, %v322_v38  ;;  %v331_v48 = vsel %vm105_vm0, %v61_v41, 4286644096  ;;  %v335_v49 = vsel %vm105_vm0, %v93_v44, 4286644096  ;;  %v339_v51 = vsel %vm105_vm0, %v30_v40, 4286644096 }
  0x2f   :  { %v333_v50 = vmax.bf16 %v331_v48, %v328_v47  ;;  %v342_v52 = vsel %vm105_vm0, %v62_v43, 4286644096  ;;  %v346_v53 = vsel %vm105_vm0, %v94_v45, 4286644096  ;;  %v31_v56 = vld [vmem:[%s1048_s0 + $0x58] sm:$0xf] }
  0x30   :  { %v592_v54 = vcombine.low %v315_v42, %v326_v46  ;;  %v344_v55 = vmax.bf16 %v342_v52, %v339_v51  ;;  %v32_v57 = vld [vmem:[%s1048_s0 + $0x5c] sm:$0xf]  ;;  %v63_v58 = vld [vmem:[%s1048_s0 + $0xd8] sm:$0xf]  ;;  %v350_v0 = vsel %vm105_vm0, %v31_v56, 4286644096 }
  0x31   :  { %v337_v59 = vmax.bf16 %v335_v49, %v333_v50  ;;  %v64_v60 = vld [vmem:[%s1048_s0 + $0xdc] sm:$0xf]  ;;  %v95_v61 = vld [vmem:[%s1048_s0 + $0x158] sm:$0xf]  ;;  %v353_v1 = vsel %vm105_vm0, %v63_v58, 4286644096 }
  0x32   :  { %v96_v62 = vld [vmem:[%s1048_s0 + $0x15c] sm:$0xf]  ;;  %593 = vst [vmem:[%s1049_s1 + $0x48] sm:$0xff] %v592_v54   ;;  %v348_v63 = vmax.bf16 %v346_v53, %v344_v55  ;;  %v357_v2 = vsel %vm105_vm0, %v95_v61, 4286644096  ;;  %v355_v3 = vmax.bf16 %v353_v1, %v350_v0 }
  0x33   :  { %v361_v4 = vsel %vm105_vm0, %v32_v57, 4286644096  ;;  %v364_v5 = vsel %vm105_vm0, %v64_v60, 4286644096  ;;  %v368_v6 = vsel %vm105_vm0, %v96_v62, 4286644096 }
  0x34   :  { %v594_v7 = vcombine.low %v337_v59, %v348_v63  ;;  %v366_v8 = vmax.bf16 %v364_v5, %v361_v4  ;;  %v33_v9 = vld [vmem:[%s1048_s0 + $0x60] sm:$0xf]  ;;  %v34_v10 = vld [vmem:[%s1048_s0 + $0x64] sm:$0xf]  ;;  %v359_v12 = vmax.bf16 %v357_v2, %v355_v3  ;;  %v35_v26 = vld [vmem:[%s1048_s0 + $0x68] sm:$0xf] }
  0x35   :  { %v65_v11 = vld [vmem:[%s1048_s0 + $0xe0] sm:$0xf]  ;;  %v66_v13 = vld [vmem:[%s1048_s0 + $0xe4] sm:$0xf]  ;;  %v372_v17 = vsel %vm105_vm0, %v33_v9, 4286644096 }
  0x36   :  { %v97_v14 = vld [vmem:[%s1048_s0 + $0x160] sm:$0xf]  ;;  %v98_v15 = vld [vmem:[%s1048_s0 + $0x164] sm:$0xf]  ;;  %595 = vst [vmem:[%s1049_s1 + $0x50] sm:$0xff] %v594_v7   ;;  %v370_v16 = vmax.bf16 %v368_v6, %v366_v8 }
  0x37   :  { %v375_v18 = vsel %vm105_vm0, %v65_v11, 4286644096  ;;  %v379_v19 = vsel %vm105_vm0, %v97_v14, 4286644096  ;;  %v383_v21 = vsel %vm105_vm0, %v34_v10, 4286644096 }
  0x38   :  { %v377_v20 = vmax.bf16 %v375_v18, %v372_v17  ;;  %v386_v22 = vsel %vm105_vm0, %v66_v13, 4286644096  ;;  %v390_v23 = vsel %vm105_vm0, %v98_v15, 4286644096  ;;  %v596_v24 = vcombine.low %v359_v12, %v370_v16  ;;  %v36_v27 = vld [vmem:[%s1048_s0 + $0x6c] sm:$0xf] }
  0x39   :  { %v388_v25 = vmax.bf16 %v386_v22, %v383_v21  ;;  %v67_v28 = vld [vmem:[%s1048_s0 + $0xe8] sm:$0xf]  ;;  %v68_v30 = vld [vmem:[%s1048_s0 + $0xec] sm:$0xf]  ;;  %v394_v34 = vsel %vm105_vm0, %v35_v26, 4286644096 }
  0x3a   :  { %v381_v29 = vmax.bf16 %v379_v19, %v377_v20  ;;  %v99_v31 = vld [vmem:[%s1048_s0 + $0x168] sm:$0xf]  ;;  %v100_v32 = vld [vmem:[%s1048_s0 + $0x16c] sm:$0xf]  ;;  %597 = vst [vmem:[%s1049_s1 + $0x58] sm:$0xff] %v596_v24  }
  0x3b   :  { %v392_v33 = vmax.bf16 %v390_v23, %v388_v25  ;;  %v397_v35 = vsel %vm105_vm0, %v67_v28, 4286644096  ;;  %v401_v36 = vsel %vm105_vm0, %v99_v31, 4286644096  ;;  %v405_v38 = vsel %vm105_vm0, %v36_v27, 4286644096 }
  0x3c   :  { %v399_v37 = vmax.bf16 %v397_v35, %v394_v34  ;;  %v408_v39 = vsel %vm105_vm0, %v68_v30, 4286644096  ;;  %v412_v40 = vsel %vm105_vm0, %v100_v32, 4286644096  ;;  %v37_v43 = vld [vmem:[%s1048_s0 + $0x70] sm:$0xf] }
  0x3d   :  { %v598_v41 = vcombine.low %v381_v29, %v392_v33  ;;  %v410_v42 = vmax.bf16 %v408_v39, %v405_v38  ;;  %v38_v44 = vld [vmem:[%s1048_s0 + $0x74] sm:$0xf]  ;;  %v69_v45 = vld [vmem:[%s1048_s0 + $0xf0] sm:$0xf]  ;;  %v416_v51 = vsel %vm105_vm0, %v37_v43, 4286644096 }
  0x3e   :  { %v403_v46 = vmax.bf16 %v401_v36, %v399_v37  ;;  %v70_v47 = vld [vmem:[%s1048_s0 + $0xf4] sm:$0xf]  ;;  %v101_v48 = vld [vmem:[%s1048_s0 + $0x170] sm:$0xf]  ;;  %v419_v52 = vsel %vm105_vm0, %v69_v45, 4286644096 }
  0x3f   :  { %v102_v49 = vld [vmem:[%s1048_s0 + $0x174] sm:$0xf]  ;;  %599 = vst [vmem:[%s1049_s1 + $0x60] sm:$0xff] %v598_v41   ;;  %v414_v50 = vmax.bf16 %v412_v40, %v410_v42  ;;  %v423_v53 = vsel %vm105_vm0, %v101_v48, 4286644096  ;;  %v421_v54 = vmax.bf16 %v419_v52, %v416_v51 }
  0x40   :  { %v427_v55 = vsel %vm105_vm0, %v38_v44, 4286644096  ;;  %v430_v56 = vsel %vm105_vm0, %v70_v47, 4286644096  ;;  %v434_v57 = vsel %vm105_vm0, %v102_v49, 4286644096 }
  0x41   :  { %v600_v58 = vcombine.low %v403_v46, %v414_v50  ;;  %v432_v59 = vmax.bf16 %v430_v56, %v427_v55  ;;  %v39_v60 = vld [vmem:[%s1048_s0 + $0x78] sm:$0xf]  ;;  %v40_v61 = vld [vmem:[%s1048_s0 + $0x7c] sm:$0xf]  ;;  %v425_v63 = vmax.bf16 %v423_v53, %v421_v54 }
  0x42   :  { %v71_v62 = vld [vmem:[%s1048_s0 + $0xf8] sm:$0xf]  ;;  %v72_v0 = vld [vmem:[%s1048_s0 + $0xfc] sm:$0xf]  ;;  %v438_v4 = vsel %vm105_vm0, %v39_v60, 4286644096 }
  0x43   :  { %v103_v1 = vld [vmem:[%s1048_s0 + $0x178] sm:$0xf]  ;;  %v104_v2 = vld [vmem:[%s1048_s0 + $0x17c] sm:$0xf]  ;;  %601 = vst [vmem:[%s1049_s1 + $0x68] sm:$0xff] %v600_v58   ;;  %v436_v3 = vmax.bf16 %v434_v57, %v432_v59 }
  0x44   :  { %v441_v5 = vsel %vm105_vm0, %v71_v62, 4286644096  ;;  %v445_v6 = vsel %vm105_vm0, %v103_v1, 4286644096  ;;  %v449_v8 = vsel %vm105_vm0, %v40_v61, 4286644096 }
  0x45   :  { %v443_v7 = vmax.bf16 %v441_v5, %v438_v4  ;;  %v452_v9 = vsel %vm105_vm0, %v72_v0, 4286644096  ;;  %v456_v10 = vsel %vm105_vm0, %v104_v2, 4286644096  ;;  %v602_v11 = vcombine.low %v425_v63, %v436_v3 }
  0x46   :  { %v454_v12 = vmax.bf16 %v452_v9, %v449_v8 }
  0x47   :  { %v447_v13 = vmax.bf16 %v445_v6, %v443_v7  ;;  %603 = vst [vmem:[%s1049_s1 + $0x70] sm:$0xff] %v602_v11  }
  0x48   :  { %v458_v14 = vmax.bf16 %v456_v10, %v454_v12 }
  0x4a   :  { %v604_v15 = vcombine.low %v447_v13, %v458_v14 }
  0x4c   :  { %605 = vst [vmem:[%s1049_s1 + $0x78] sm:$0xff] %v604_v15  }

// kernel: resnet_l1_forward.13
= control target key start
LH: loop header
LB: loop body
LE: loop exit
PB: predicated region body
PF: predicated region fallthrough
CT: control target
= control target key end

     0   :  { %vm57_vm0 = vcmask 1043456   ;;  %s536_s0 = inlined_call_operand.vmem [shape: bf16[3,128,128], index: 0, kind: input, shape index: {}]   ;;  %s537_s1 = inlined_call_operand.vmem [shape: bf16[128,128], index: 1, kind: output, shape index: {}]  }
   0x1   :  { %v9_v0 = vld [vmem:[%s536_s0] sm:$0xf]  ;;  %v10_v1 = vld [vmem:[%s536_s0 + $0x4] sm:$0xf]  ;;  %v11_v14 = vld [vmem:[%s536_s0 + $0x8] sm:$0xf] }
   0x2   :  { %v25_v2 = vld [vmem:[%s536_s0 + $0x40] sm:$0xf]  ;;  %v26_v3 = vld [vmem:[%s536_s0 + $0x44] sm:$0xf]  ;;  %v60_v6 = vsel %vm57_vm0, %v9_v0, 4286644096 }
   0x3   :  { %v41_v4 = vld [vmem:[%s536_s0 + $0x80] sm:$0xf]  ;;  %v42_v5 = vld [vmem:[%s536_s0 + $0x84] sm:$0xf]  ;;  %v63_v7 = vsel %vm57_vm0, %v25_v2, 4286644096 }
   0x4   :  { %v67_v8 = vsel %vm57_vm0, %v41_v4, 4286644096  ;;  %v65_v9 = vmax.bf16 %v63_v7, %v60_v6  ;;  %v71_v10 = vsel %vm57_vm0, %v10_v1, 4286644096  ;;  %v74_v11 = vsel %vm57_vm0, %v26_v3, 4286644096 }
   0x5   :  { %v78_v12 = vsel %vm57_vm0, %v42_v5, 4286644096  ;;  %v76_v13 = vmax.bf16 %v74_v11, %v71_v10  ;;  %v12_v15 = vld [vmem:[%s536_s0 + $0xc] sm:$0xf]  ;;  %v27_v16 = vld [vmem:[%s536_s0 + $0x48] sm:$0xf] }
   0x6   :  { %v69_v17 = vmax.bf16 %v67_v8, %v65_v9  ;;  %v28_v18 = vld [vmem:[%s536_s0 + $0x4c] sm:$0xf]  ;;  %v43_v19 = vld [vmem:[%s536_s0 + $0x88] sm:$0xf]  ;;  %v82_v22 = vsel %vm57_vm0, %v11_v14, 4286644096 }
   0x7   :  { %v44_v20 = vld [vmem:[%s536_s0 + $0x8c] sm:$0xf]  ;;  %v80_v21 = vmax.bf16 %v78_v12, %v76_v13  ;;  %v85_v23 = vsel %vm57_vm0, %v27_v16, 4286644096  ;;  %v89_v24 = vsel %vm57_vm0, %v43_v19, 4286644096 }
   0x8   :  { %v87_v25 = vmax.bf16 %v85_v23, %v82_v22  ;;  %v93_v26 = vsel %vm57_vm0, %v12_v15, 4286644096  ;;  %v96_v27 = vsel %vm57_vm0, %v28_v18, 4286644096  ;;  %v100_v28 = vsel %vm57_vm0, %v44_v20, 4286644096 }
   0x9   :  { %v295_v29 = vcombine.low %v69_v17, %v80_v21  ;;  %v98_v30 = vmax.bf16 %v96_v27, %v93_v26  ;;  %v13_v31 = vld [vmem:[%s536_s0 + $0x10] sm:$0xf]  ;;  %v14_v32 = vld [vmem:[%s536_s0 + $0x14] sm:$0xf]  ;;  %v15_v48 = vld [vmem:[%s536_s0 + $0x18] sm:$0xf] }
   0xa   :  { %v29_v33 = vld [vmem:[%s536_s0 + $0x50] sm:$0xf]  ;;  %v91_v34 = vmax.bf16 %v89_v24, %v87_v25  ;;  %v30_v35 = vld [vmem:[%s536_s0 + $0x54] sm:$0xf]  ;;  %v104_v39 = vsel %vm57_vm0, %v13_v31, 4286644096 }
   0xb   :  { %v45_v36 = vld [vmem:[%s536_s0 + $0x90] sm:$0xf]  ;;  %v46_v37 = vld [vmem:[%s536_s0 + $0x94] sm:$0xf]  ;;  %259 = vst [vmem:[%s537_s1] sm:$0xff] %v295_v29   ;;  %v102_v38 = vmax.bf16 %v100_v28, %v98_v30  ;;  %v107_v40 = vsel %vm57_vm0, %v29_v33, 4286644096 }
   0xc   :  { %v111_v41 = vsel %vm57_vm0, %v45_v36, 4286644096  ;;  %v109_v42 = vmax.bf16 %v107_v40, %v104_v39  ;;  %v115_v43 = vsel %vm57_vm0, %v14_v32, 4286644096  ;;  %v118_v44 = vsel %vm57_vm0, %v30_v35, 4286644096 }
   0xd   :  { %v122_v45 = vsel %vm57_vm0, %v46_v37, 4286644096  ;;  %v296_v46 = vcombine.low %v91_v34, %v102_v38  ;;  %v120_v47 = vmax.bf16 %v118_v44, %v115_v43  ;;  %v16_v49 = vld [vmem:[%s536_s0 + $0x1c] sm:$0xf]  ;;  %v31_v50 = vld [vmem:[%s536_s0 + $0x58] sm:$0xf] }
   0xe   :  { %v113_v51 = vmax.bf16 %v111_v41, %v109_v42  ;;  %v32_v52 = vld [vmem:[%s536_s0 + $0x5c] sm:$0xf]  ;;  %v47_v53 = vld [vmem:[%s536_s0 + $0x98] sm:$0xf]  ;;  %v126_v56 = vsel %vm57_vm0, %v15_v48, 4286644096 }
   0xf   :  { %v48_v54 = vld [vmem:[%s536_s0 + $0x9c] sm:$0xf]  ;;  %297 = vst [vmem:[%s537_s1 + $0x8] sm:$0xff] %v296_v46   ;;  %v124_v55 = vmax.bf16 %v122_v45, %v120_v47  ;;  %v129_v57 = vsel %vm57_vm0, %v31_v50, 4286644096 }
  0x10   :  { %v133_v58 = vsel %vm57_vm0, %v47_v53, 4286644096  ;;  %v131_v59 = vmax.bf16 %v129_v57, %v126_v56  ;;  %v137_v60 = vsel %vm57_vm0, %v16_v49, 4286644096  ;;  %v140_v61 = vsel %vm57_vm0, %v32_v52, 4286644096 }
  0x11   :  { %v144_v62 = vsel %vm57_vm0, %v48_v54, 4286644096  ;;  %v298_v63 = vcombine.low %v113_v51, %v124_v55  ;;  %v142_v0 = vmax.bf16 %v140_v61, %v137_v60  ;;  %v17_v1 = vld [vmem:[%s536_s0 + $0x20] sm:$0xf]  ;;  %v18_v2 = vld [vmem:[%s536_s0 + $0x24] sm:$0xf] }
  0x12   :  { %v33_v3 = vld [vmem:[%s536_s0 + $0x60] sm:$0xf]  ;;  %v135_v4 = vmax.bf16 %v133_v58, %v131_v59  ;;  %v34_v5 = vld [vmem:[%s536_s0 + $0x64] sm:$0xf]  ;;  %v148_v9 = vsel %vm57_vm0, %v17_v1, 4286644096 }
  0x13   :  { %v49_v6 = vld [vmem:[%s536_s0 + $0xa0] sm:$0xf]  ;;  %v50_v7 = vld [vmem:[%s536_s0 + $0xa4] sm:$0xf]  ;;  %299 = vst [vmem:[%s537_s1 + $0x10] sm:$0xff] %v298_v63   ;;  %v146_v8 = vmax.bf16 %v144_v62, %v142_v0 }
  0x14   :  { %v151_v10 = vsel %vm57_vm0, %v33_v3, 4286644096  ;;  %v155_v11 = vsel %vm57_vm0, %v49_v6, 4286644096  ;;  %v159_v13 = vsel %vm57_vm0, %v18_v2, 4286644096 }
  0x15   :  { %v153_v12 = vmax.bf16 %v151_v10, %v148_v9  ;;  %v162_v14 = vsel %vm57_vm0, %v34_v5, 4286644096  ;;  %v166_v15 = vsel %vm57_vm0, %v50_v7, 4286644096  ;;  %v300_v16 = vcombine.low %v135_v4, %v146_v8  ;;  %v19_v18 = vld [vmem:[%s536_s0 + $0x28] sm:$0xf] }
  0x16   :  { %v164_v17 = vmax.bf16 %v162_v14, %v159_v13  ;;  %v20_v19 = vld [vmem:[%s536_s0 + $0x2c] sm:$0xf]  ;;  %v35_v20 = vld [vmem:[%s536_s0 + $0x68] sm:$0xf]  ;;  %v170_v26 = vsel %vm57_vm0, %v19_v18, 4286644096 }
  0x17   :  { %v157_v21 = vmax.bf16 %v155_v11, %v153_v12  ;;  %v36_v22 = vld [vmem:[%s536_s0 + $0x6c] sm:$0xf]  ;;  %v51_v23 = vld [vmem:[%s536_s0 + $0xa8] sm:$0xf]  ;;  %301 = vst [vmem:[%s537_s1 + $0x18] sm:$0xff] %v300_v16  }
  0x18   :  { %v52_v24 = vld [vmem:[%s536_s0 + $0xac] sm:$0xf]  ;;  %v168_v25 = vmax.bf16 %v166_v15, %v164_v17  ;;  %v173_v27 = vsel %vm57_vm0, %v35_v20, 4286644096  ;;  %v177_v28 = vsel %vm57_vm0, %v51_v23, 4286644096 }
  0x19   :  { %v175_v29 = vmax.bf16 %v173_v27, %v170_v26  ;;  %v181_v30 = vsel %vm57_vm0, %v20_v19, 4286644096  ;;  %v184_v31 = vsel %vm57_vm0, %v36_v22, 4286644096  ;;  %v188_v32 = vsel %vm57_vm0, %v52_v24, 4286644096 }
  0x1a   :  { %v302_v33 = vcombine.low %v157_v21, %v168_v25  ;;  %v186_v34 = vmax.bf16 %v184_v31, %v181_v30  ;;  %v21_v35 = vld [vmem:[%s536_s0 + $0x30] sm:$0xf]  ;;  %v22_v36 = vld [vmem:[%s536_s0 + $0x34] sm:$0xf]  ;;  %v23_v52 = vld [vmem:[%s536_s0 + $0x38] sm:$0xf] }
  0x1b   :  { %v37_v37 = vld [vmem:[%s536_s0 + $0x70] sm:$0xf]  ;;  %v179_v38 = vmax.bf16 %v177_v28, %v175_v29  ;;  %v38_v39 = vld [vmem:[%s536_s0 + $0x74] sm:$0xf]  ;;  %v192_v43 = vsel %vm57_vm0, %v21_v35, 4286644096 }
  0x1c   :  { %v53_v40 = vld [vmem:[%s536_s0 + $0xb0] sm:$0xf]  ;;  %v54_v41 = vld [vmem:[%s536_s0 + $0xb4] sm:$0xf]  ;;  %303 = vst [vmem:[%s537_s1 + $0x20] sm:$0xff] %v302_v33   ;;  %v190_v42 = vmax.bf16 %v188_v32, %v186_v34 }
  0x1d   :  { %v195_v44 = vsel %vm57_vm0, %v37_v37, 4286644096  ;;  %v199_v45 = vsel %vm57_vm0, %v53_v40, 4286644096  ;;  %v203_v47 = vsel %vm57_vm0, %v22_v36, 4286644096 }
  0x1e   :  { %v197_v46 = vmax.bf16 %v195_v44, %v192_v43  ;;  %v206_v48 = vsel %vm57_vm0, %v38_v39, 4286644096  ;;  %v210_v49 = vsel %vm57_vm0, %v54_v41, 4286644096  ;;  %v304_v50 = vcombine.low %v179_v38, %v190_v42  ;;  %v24_v53 = vld [vmem:[%s536_s0 + $0x3c] sm:$0xf] }
  0x1f   :  { %v208_v51 = vmax.bf16 %v206_v48, %v203_v47  ;;  %v39_v54 = vld [vmem:[%s536_s0 + $0x78] sm:$0xf]  ;;  %v40_v56 = vld [vmem:[%s536_s0 + $0x7c] sm:$0xf]  ;;  %v214_v60 = vsel %vm57_vm0, %v23_v52, 4286644096 }
  0x20   :  { %v201_v55 = vmax.bf16 %v199_v45, %v197_v46  ;;  %v55_v57 = vld [vmem:[%s536_s0 + $0xb8] sm:$0xf]  ;;  %v56_v58 = vld [vmem:[%s536_s0 + $0xbc] sm:$0xf]  ;;  %305 = vst [vmem:[%s537_s1 + $0x28] sm:$0xff] %v304_v50  }
  0x21   :  { %v212_v59 = vmax.bf16 %v210_v49, %v208_v51  ;;  %v217_v61 = vsel %vm57_vm0, %v39_v54, 4286644096  ;;  %v221_v62 = vsel %vm57_vm0, %v55_v57, 4286644096  ;;  %v225_v0 = vsel %vm57_vm0, %v24_v53, 4286644096 }
  0x22   :  { %v219_v63 = vmax.bf16 %v217_v61, %v214_v60  ;;  %v228_v1 = vsel %vm57_vm0, %v40_v56, 4286644096  ;;  %v232_v2 = vsel %vm57_vm0, %v56_v58, 4286644096 }
  0x23   :  { %v306_v3 = vcombine.low %v201_v55, %v212_v59  ;;  %v230_v4 = vmax.bf16 %v228_v1, %v225_v0 }
  0x24   :  { %v223_v5 = vmax.bf16 %v221_v62, %v219_v63 }
  0x25   :  { %307 = vst [vmem:[%s537_s1 + $0x30] sm:$0xff] %v306_v3   ;;  %v234_v6 = vmax.bf16 %v232_v2, %v230_v4 }
  0x27   :  { %v308_v7 = vcombine.low %v223_v5, %v234_v6 }
  0x29   :  { %309 = vst [vmem:[%s537_s1 + $0x38] sm:$0xff] %v308_v7  }

// kernel: resnet_l1_forward.14
= control target key start
LH: loop header
LB: loop body
LE: loop exit
PB: predicated region body
PF: predicated region fallthrough
CT: control target
= control target key end

     0   :  { %s5685_s12 = smov 0   ;;  %s5687_s13 = smov 0   ;;  %s6754_s0 = inlined_call_operand.vmem [shape: bf16[27,256,64], index: 0, kind: input, shape index: {}]   ;;  %s6755_s1 = inlined_call_operand.vmem [shape: bf16[27,64,64], index: 1, kind: input, shape index: {}]   ;;  %s6756_s2 = inlined_call_operand.vmem [shape: f32[1,64], index: 2, kind: input, shape index: {}]   ;;  %s6757_s3 = inlined_call_operand.vmem [shape: bf16[256,64], index: 3, kind: output, shape index: {}]  }
   0x1   :  { %s5689_s14 = smov 0  }
   0x2 LB: > { %s22_s15 = sadd.s32 1, %s5658_s13  ;;  %p4165_p0 = scmp.ge.s32.totalorder %s5662_s14, 1  ;;  %s5662_s14 = sphi %s5689_s14, %s13_s14   ;;  %s5658_s13 = sphi %s5687_s13, %s6845_s13   ;;  %s5654_s12 = sphi %s5685_s12, %s6844_s12  }
   0x3   : > { %p23_p1 = scmp.ge.s32.totalorder %s22_s15, 3  ;;  %p170_p2 = scmp.lt.s32.totalorder %s5662_s14, 4 }
   0x5   : > { %s6847_s15 = smov (%p23_p1, %s22_s15), 0  ;;  %p171_p3 = pnand %p4165_p0, %p170_p2 }
   0x7   : > { %174 = sbr.rel (%p171_p3) target bundleno = 567 (0x237), region = 32 }
   0xc   : > { %s205_s16 = smul.u32 9, %s5654_s12  ;;  %p4170_p5 = scmp.ne.s32.totalorder %s5654_s12, 0 }
   0xe   : > { %p207_p4 = scmp.lt.s32.totalorder %s205_s16, 26  ;;  %234 = sbr.rel (%p4170_p5) target bundleno = 36 (0x24), region = 36 }
  0x10   : > { %s6849_s16 = smov (!%p207_p4, %s205_s16), 26 }
  0x11   : > { %s4853_s17 = sshll.u32 %s6849_s16, 7  ;;  %s4854_s18 = sshll.u32 %s6849_s16, 5 }
  0x12   : > { %s5709_s21 = scalar_lea.vmem %s6754_s0, %s4853_s17  ;;  %s5714_s24 = scalar_lea.vmem %s6755_s1, %s4854_s18 }
  0x13   : > { %vm235_vm0 = vcmask 523264   ;;  %v5664_v0 = vmov 0.0  }
  0x14   : > { %236 = vst.msk [vmem:[#allocation2] sm:$0xff] %vm235_vm0, %v5664_v0  ;;  %237 = vst.msk [vmem:[#allocation2 + $0x8] sm:$0xff] %vm235_vm0, %v5664_v0 }
  0x15   : > { %238 = vst.msk [vmem:[#allocation2 + $0x10] sm:$0xff] %vm235_vm0, %v5664_v0  ;;  %239 = vst.msk [vmem:[#allocation2 + $0x18] sm:$0xff] %vm235_vm0, %v5664_v0 }
  0x16   : > { %240 = vst.msk [vmem:[#allocation2 + $0x20] sm:$0xff] %vm235_vm0, %v5664_v0  ;;  %241 = vst.msk [vmem:[#allocation2 + $0x28] sm:$0xff] %vm235_vm0, %v5664_v0 }
  0x17   : > { %242 = vst.msk [vmem:[#allocation2 + $0x30] sm:$0xff] %vm235_vm0, %v5664_v0  ;;  %243 = vst.msk [vmem:[#allocation2 + $0x38] sm:$0xff] %vm235_vm0, %v5664_v0 }
  0x18   : > { %244 = vst.msk [vmem:[#allocation2 + $0x40] sm:$0xff] %vm235_vm0, %v5664_v0  ;;  %245 = vst.msk [vmem:[#allocation2 + $0x48] sm:$0xff] %vm235_vm0, %v5664_v0 }
  0x19   : > { %246 = vst.msk [vmem:[#allocation2 + $0x50] sm:$0xff] %vm235_vm0, %v5664_v0  ;;  %247 = vst.msk [vmem:[#allocation2 + $0x58] sm:$0xff] %vm235_vm0, %v5664_v0 }
  0x1a   : > { %248 = vst.msk [vmem:[#allocation2 + $0x60] sm:$0xff] %vm235_vm0, %v5664_v0  ;;  %249 = vst.msk [vmem:[#allocation2 + $0x68] sm:$0xff] %vm235_vm0, %v5664_v0 }
  0x1b   : > { %250 = vst.msk [vmem:[#allocation2 + $0x70] sm:$0xff] %vm235_vm0, %v5664_v0  ;;  %251 = vst.msk [vmem:[#allocation2 + $0x78] sm:$0xff] %vm235_vm0, %v5664_v0 }
  0x1c   : > { %252 = vst.msk [vmem:[#allocation2 + $0x80] sm:$0xff] %vm235_vm0, %v5664_v0  ;;  %253 = vst.msk [vmem:[#allocation2 + $0x88] sm:$0xff] %vm235_vm0, %v5664_v0 }
  0x1d   : > { %254 = vst.msk [vmem:[#allocation2 + $0x90] sm:$0xff] %vm235_vm0, %v5664_v0  ;;  %255 = vst.msk [vmem:[#allocation2 + $0x98] sm:$0xff] %vm235_vm0, %v5664_v0 }
  0x1e   : > { %256 = vst.msk [vmem:[#allocation2 + $0xa0] sm:$0xff] %vm235_vm0, %v5664_v0  ;;  %257 = vst.msk [vmem:[#allocation2 + $0xa8] sm:$0xff] %vm235_vm0, %v5664_v0 }
  0x1f   : > { %258 = vst.msk [vmem:[#allocation2 + $0xb0] sm:$0xff] %vm235_vm0, %v5664_v0  ;;  %259 = vst.msk [vmem:[#allocation2 + $0xb8] sm:$0xff] %vm235_vm0, %v5664_v0 }
  0x20   : > { %260 = vst.msk [vmem:[#allocation2 + $0xc0] sm:$0xff] %vm235_vm0, %v5664_v0  ;;  %261 = vst.msk [vmem:[#allocation2 + $0xc8] sm:$0xff] %vm235_vm0, %v5664_v0 }
  0x21   : > { %262 = vst.msk [vmem:[#allocation2 + $0xd0] sm:$0xff] %vm235_vm0, %v5664_v0  ;;  %263 = vst.msk [vmem:[#allocation2 + $0xd8] sm:$0xff] %vm235_vm0, %v5664_v0 }
  0x22   : > { %264 = vst.msk [vmem:[#allocation2 + $0xe0] sm:$0xff] %vm235_vm0, %v5664_v0  ;;  %265 = vst.msk [vmem:[#allocation2 + $0xe8] sm:$0xff] %vm235_vm0, %v5664_v0 }
  0x23   : > { %266 = vst.msk [vmem:[#allocation2 + $0xf0] sm:$0xff] %vm235_vm0, %v5664_v0  ;;  %267 = vst.msk [vmem:[#allocation2 + $0xf8] sm:$0xff] %vm235_vm0, %v5664_v0 }
  0x24 PF: > { %v5460_v1 = vld [vmem:[%s5714_s24 + $0x18] sm:$0xff]   ;;  %v5461_v2 = vld [vmem:[%s5714_s24 + $0x10] sm:$0xff]   ;;  %v5462_v3 = vld [vmem:[%s5714_s24 + $0x8] sm:$0xff]   ;;  %vm444_vm1 = vcmask 523264   ;;  %p4815_p6 = scmp.ne.s32.totalorder %s5654_s12, 2 }
  0x25   : > { %5067 = vmatprep.subr.bf16.mxu0 %v5460_v1  ;;  %5427 = vmatprep.subr.bf16.mxu1 %v5460_v1  ;;  %v5464_v4 = vld [vmem:[%s5709_s21] sm:$0xff]   ;;  %v5468_v7 = vld [vmem:[%s5714_s24 + $0x38] sm:$0xff]   ;;  %v5466_v8 = vld [vmem:[%s5709_s21 + $0x8] sm:$0xff]  }
  0x26   : > { %5068 = vmatpush3.bf16.msra.mxu0 %v5460_v1  ;;  %5431 = vmatpush3.bf16.msra.mxu1 %v5460_v1  ;;  %v5465_v5 = vld [vmem:[%s5709_s21 + $0x40] sm:$0xff]   ;;  %v5469_v9 = vld [vmem:[%s5714_s24 + $0x58] sm:$0xff]   ;;  %v5467_v10 = vld [vmem:[%s5709_s21 + $0x48] sm:$0xff]  }
  0x27   : > { %5069 = vmatprep.subr.bf16.mxu0 %v5461_v2  ;;  %5428 = vmatprep.subr.bf16.mxu1 %v5461_v2  ;;  %v5463_v6 = vld [vmem:[%s5714_s24] sm:$0xff]   ;;  %v5470_v11 = vld [vmem:[%s5709_s21 + $0x10] sm:$0xff]   ;;  %v5472_v15 = vld [vmem:[%s5709_s21 + $0x18] sm:$0xff]  }
  0x28   : > { %5075 = vmatprep.mubr.msk.bf16.mxu0 %vm444_vm1, %v5464_v4  ;;  %5091 = vmatprep.mubr.msk.bf16.mxu1 %vm444_vm1, %v5465_v5  ;;  %v5471_v12 = vld [vmem:[%s5709_s21 + $0x50] sm:$0xff]   ;;  %v5473_v16 = vld [vmem:[%s5709_s21 + $0x58] sm:$0xff]   ;;  %v5480_v17 = vld [vmem:[%s5714_s24 + $0x28] sm:$0xff]  }
  0x29   : > { %v5474_v13 = vld [vmem:[%s5714_s24 + $0x30] sm:$0xff]   ;;  %v5481_v18 = vld [vmem:[%s5714_s24 + $0x48] sm:$0xff]   ;;  %v5476_v19 = vld [vmem:[%s5709_s21 + $0x20] sm:$0xff]  }
  0x2a   : > { %5070 = vmatpush3.bf16.msra.mxu0 %v5461_v2  ;;  %5432 = vmatpush3.bf16.msra.mxu1 %v5461_v2  ;;  %v5475_v14 = vld [vmem:[%s5714_s24 + $0x50] sm:$0xff]   ;;  %v5477_v20 = vld [vmem:[%s5709_s21 + $0x60] sm:$0xff]   ;;  %v5478_v23 = vld [vmem:[%s5709_s21 + $0x28] sm:$0xff]  }
  0x2b   : > { %5071 = vmatprep.subr.bf16.mxu0 %v5462_v3  ;;  %5429 = vmatprep.subr.bf16.mxu1 %v5462_v3  ;;  %v5486_v21 = vld [vmem:[%s5714_s24 + $0x20] sm:$0xff]   ;;  %v5479_v24 = vld [vmem:[%s5709_s21 + $0x68] sm:$0xff]   ;;  %v5482_v25 = vld [vmem:[%s5709_s21 + $0x30] sm:$0xff]  }
  0x2c   : > { %v5487_v22 = vld [vmem:[%s5714_s24 + $0x40] sm:$0xff]   ;;  %v5483_v26 = vld [vmem:[%s5709_s21 + $0x70] sm:$0xff]   ;;  %v5492_v27 = vld [vmem:[%s5714_s24 + $0x78] sm:$0xff]  }
  0x2d   : > { %v5493_v28 = vld [vmem:[%s5714_s24 + $0x98] sm:$0xff]   ;;  %v5488_v31 = vld [vmem:[%s5709_s21 + $0x80] sm:$0xff]   ;;  %v5490_v33 = vld [vmem:[%s5709_s21 + $0x88] sm:$0xff]  }
  0x2e   : > { %5072 = vmatpush3.bf16.msra.mxu0 %v5462_v3  ;;  %5433 = vmatpush3.bf16.msra.mxu1 %v5462_v3  ;;  %v5484_v29 = vld [vmem:[%s5709_s21 + $0x38] sm:$0xff]   ;;  %v5489_v32 = vld [vmem:[%s5709_s21 + $0x100] sm:$0xff]   ;;  %v5491_v34 = vld [vmem:[%s5709_s21 + $0x108] sm:$0xff]  }
  0x2f   : > { %5073 = vmatprep.subr.bf16.mxu0 %v5463_v6  ;;  %5430 = vmatprep.subr.bf16.mxu1 %v5463_v6  ;;  %v5485_v30 = vld [vmem:[%s5709_s21 + $0x78] sm:$0xff]   ;;  %v5494_v35 = vld [vmem:[%s5709_s21 + $0x90] sm:$0xff]   ;;  %v5512_v41 = vld [vmem:[%s5714_s24 + $0x68] sm:$0xff]  }
  0x30   : > { %v5495_v36 = vld [vmem:[%s5709_s21 + $0x110] sm:$0xff]   ;;  %v5496_v39 = vld [vmem:[%s5709_s21 + $0x98] sm:$0xff]   ;;  %v5513_v42 = vld [vmem:[%s5714_s24 + $0x88] sm:$0xff]  }
  0x31   : > { %v5502_v37 = vld [vmem:[%s5714_s24 + $0x70] sm:$0xff]   ;;  %v5497_v40 = vld [vmem:[%s5709_s21 + $0x118] sm:$0xff]   ;;  %v5498_v43 = vld [vmem:[%s5709_s21 + $0xa0] sm:$0xff]  }
  0x32   : > { %5074 = vmatpush3.bf16.msra.mxu0 %v5463_v6  ;;  %5434 = vmatpush3.bf16.msra.mxu1 %v5463_v6  ;;  %v5503_v38 = vld [vmem:[%s5714_s24 + $0x90] sm:$0xff]   ;;  %v5499_v44 = vld [vmem:[%s5709_s21 + $0x120] sm:$0xff]   ;;  %v5500_v45 = vld [vmem:[%s5709_s21 + $0xa8] sm:$0xff]  }
  0x33   : > { %5107 = vmatprep.subr.bf16.mxu1 %v5468_v7  ;;  %5147 = vmatprep.subr.bf16.mxu0 %v5469_v9  ;;  %v5501_v46 = vld [vmem:[%s5709_s21 + $0x128] sm:$0xff]   ;;  %v5504_v47 = vld [vmem:[%s5709_s21 + $0xb0] sm:$0xff]   ;;  %v5522_v49 = vld [vmem:[%s5714_s24 + $0x60] sm:$0xff]  }
  0x34   : > { %v5505_v48 = vld [vmem:[%s5709_s21 + $0x130] sm:$0xff]   ;;  %v5523_v50 = vld [vmem:[%s5714_s24 + $0x80] sm:$0xff]   ;;  %v5506_v51 = vld [vmem:[%s5709_s21 + $0xb8] sm:$0xff]  }
  0x35   : > { %5076 = vmatmul.mubr.msk.bf16.vlgmr.msra.gmra.mxu0 %vm444_vm1, %v5466_v8  ;;  %5092 = vmatmul.mubr.msk.bf16.vlgmr.msra.gmra.mxu1 %vm444_vm1, %v5467_v10  ;;  %v5507_v52 = vld [vmem:[%s5709_s21 + $0x138] sm:$0xff]   ;;  %v5508_v53 = vld [vmem:[%s5709_s21 + $0xc0] sm:$0xff]   ;;  %v5510_v57 = vld [vmem:[%s5709_s21 + $0xc8] sm:$0xff]  }
  0x36   : > { %5108 = vmatpush3.bf16.msra.mxu1 %v5468_v7  ;;  %5148 = vmatpush3.bf16.msra.mxu0 %v5469_v9  ;;  %v5509_v54 = vld [vmem:[%s5709_s21 + $0x140] sm:$0xff]   ;;  %v5532_v55 = vld [vmem:[%s5714_s24 + $0xb8] sm:$0xff]   ;;  %v5511_v58 = vld [vmem:[%s5709_s21 + $0x148] sm:$0xff]  }
  0x37   : > { %5079 = vmatprep.mubr.msk.bf16.mxu0 %vm444_vm1, %v5470_v11  ;;  %5095 = vmatprep.mubr.msk.bf16.mxu1 %vm444_vm1, %v5471_v12  ;;  %v5533_v56 = vld [vmem:[%s5714_s24 + $0xd8] sm:$0xff]   ;;  %v5514_v59 = vld [vmem:[%s5709_s21 + $0xd0] sm:$0xff]   ;;  %v5518_v63 = vld [vmem:[%s5709_s21 + $0xe0] sm:$0xff]  }
  0x38   : > { %5109 = vmatprep.subr.bf16.mxu1 %v5474_v13  ;;  %5149 = vmatprep.subr.bf16.mxu0 %v5475_v14  ;;  %v5515_v60 = vld [vmem:[%s5709_s21 + $0x150] sm:$0xff]   ;;  %v5516_v61 = vld [vmem:[%s5709_s21 + $0xd8] sm:$0xff]   ;;  %v5519_v0 = vld [vmem:[%s5709_s21 + $0x160] sm:$0xff]  }
  0x39   : > { %v5517_v62 = vld [vmem:[%s5709_s21 + $0x158] sm:$0xff]   ;;  %v5520_v1 = vld [vmem:[%s5709_s21 + $0xe8] sm:$0xff]   ;;  %v5524_v3 = vld [vmem:[%s5709_s21 + $0xf0] sm:$0xff]  }
  0x3a   : > { %5110 = vmatpush3.bf16.msra.mxu1 %v5474_v13  ;;  %5150 = vmatpush3.bf16.msra.mxu0 %v5475_v14  ;;  %v5521_v2 = vld [vmem:[%s5709_s21 + $0x168] sm:$0xff]   ;;  %v5525_v4 = vld [vmem:[%s5709_s21 + $0x170] sm:$0xff]   ;;  %v5526_v5 = vld [vmem:[%s5709_s21 + $0xf8] sm:$0xff]  }
  0x3b   : > { %5111 = vmatprep.subr.bf16.mxu1 %v5480_v17  ;;  %5151 = vmatprep.subr.bf16.mxu0 %v5481_v18  ;;  %v5527_v6 = vld [vmem:[%s5709_s21 + $0x178] sm:$0xff]   ;;  %v5528_v7 = vld [vmem:[%s5709_s21 + $0x180] sm:$0xff]   ;;  %v5530_v9 = vld [vmem:[%s5709_s21 + $0x188] sm:$0xff]  }
  0x3c   : > { %v5529_v8 = vld [vmem:[%s5709_s21 + $0x200] sm:$0xff]   ;;  %v5531_v10 = vld [vmem:[%s5709_s21 + $0x208] sm:$0xff]   ;;  %v5534_v11 = vld [vmem:[%s5709_s21 + $0x190] sm:$0xff]  }
  0x3d   : > { %5080 = vmatmul.mubr.msk.bf16.gmra.mxu0 %vm444_vm1, %v5472_v15  ;;  %5096 = vmatmul.mubr.msk.bf16.gmra.mxu1 %vm444_vm1, %v5473_v16  ;;  %v5535_v12 = vld [vmem:[%s5709_s21 + $0x210] sm:$0xff]   ;;  %v5552_v15 = vld [vmem:[%s5714_s24 + $0xa8] sm:$0xff]   ;;  %v5536_v16 = vld [vmem:[%s5709_s21 + $0x198] sm:$0xff]  }
  0x3e   : > { %5083 = vmatprep.mubr.msk.bf16.mxu0 %vm444_vm1, %v5476_v19  ;;  %5099 = vmatprep.mubr.msk.bf16.mxu1 %vm444_vm1, %v5477_v20  ;;  %v5542_v13 = vld [vmem:[%s5714_s24 + $0xb0] sm:$0xff]   ;;  %v5538_v19 = vld [vmem:[%s5709_s21 + $0x1a0] sm:$0xff]  }
  0x3f   : > { %5112 = vmatpush3.bf16.msra.mxu1 %v5480_v17  ;;  %5152 = vmatpush3.bf16.msra.mxu0 %v5481_v18  ;;  %v5543_v14 = vld [vmem:[%s5714_s24 + $0xd0] sm:$0xff]   ;;  %v5553_v17 = vld [vmem:[%s5714_s24 + $0xc8] sm:$0xff]   ;;  %v5537_v18 = vld [vmem:[%s5709_s21 + $0x218] sm:$0xff]  }
  0x40   : > { %5113 = vmatprep.subr.bf16.mxu1 %v5486_v21  ;;  %5153 = vmatprep.subr.bf16.mxu0 %v5487_v22  ;;  %v5539_v20 = vld [vmem:[%s5709_s21 + $0x220] sm:$0xff]  }
  0x43   : > { %5114 = vmatpush3.bf16.msra.mxu1 %v5486_v21  ;;  %5154 = vmatpush3.bf16.msra.mxu0 %v5487_v22  ;;  %v5562_v21 = vld [vmem:[%s5714_s24 + $0xa0] sm:$0xff]  }
  0x44   : > { %5187 = vmatprep.subr.bf16.mxu1 %v5492_v27  ;;  %5227 = vmatprep.subr.bf16.mxu0 %v5493_v28  ;;  %v5563_v22 = vld [vmem:[%s5714_s24 + $0xc0] sm:$0xff]  }
  0x45   : > { %5084 = vmatmul.mubr.msk.bf16.gmra.mxu0 %vm444_vm1, %v5478_v23  ;;  %5100 = vmatmul.mubr.msk.bf16.gmra.mxu1 %vm444_vm1, %v5479_v24  ;;  %v5540_v23 = vld [vmem:[%s5709_s21 + $0x1a8] sm:$0xff]  }
  0x46   : > { %5087 = vmatprep.mubr.msk.bf16.mxu0 %vm444_vm1, %v5482_v25  ;;  %5103 = vmatprep.mubr.msk.bf16.mxu1 %vm444_vm1, %v5483_v26  ;;  %v5541_v24 = vld [vmem:[%s5709_s21 + $0x228] sm:$0xff]   ;;  %v5572_v25 = vld [vmem:[%s5714_s24 + $0xf8] sm:$0xff]  }
  0x47   : > { %v5573_v26 = vld [vmem:[%s5714_s24 + $0x118] sm:$0xff]  }
  0x4d   : > { %5088 = vmatmul.mubr.msk.bf16.gmra.mxu0 %vm444_vm1, %v5484_v29  ;;  %5104 = vmatmul.mubr.msk.bf16.gmra.mxu1 %vm444_vm1, %v5485_v30  ;;  %v5546_v29 = vld [vmem:[%s5709_s21 + $0x1b8] sm:$0xff]  }
  0x4e   : > { %5115 = vmatprep.mubr.msk.bf16.mxu1 %vm444_vm1, %v5488_v31  ;;  %5155 = vmatprep.mubr.msk.bf16.mxu0 %vm444_vm1, %v5489_v32  ;;  %v5547_v30 = vld [vmem:[%s5709_s21 + $0x238] sm:$0xff]   ;;  %v5548_v31 = vld [vmem:[%s5709_s21 + $0x1c0] sm:$0xff]  }
  0x4f   : > { %v5549_v32 = vld [vmem:[%s5709_s21 + $0x240] sm:$0xff]  }
  0x55   : > { %5116 = vmatmul.mubr.msk.bf16.vlgmr.msra.gmra.mxu1 %vm444_vm1, %v5490_v33  ;;  %5156 = vmatmul.mubr.msk.bf16.vlgmr.msra.gmra.mxu0 %vm444_vm1, %v5491_v34  ;;  %v5550_v33 = vld [vmem:[%s5709_s21 + $0x1c8] sm:$0xff]  }
  0x56   : > { %5188 = vmatpush3.bf16.msra.mxu1 %v5492_v27  ;;  %5228 = vmatpush3.bf16.msra.mxu0 %v5493_v28  ;;  %v5544_v27 = vld [vmem:[%s5709_s21 + $0x1b0] sm:$0xff]   ;;  %v5551_v34 = vld [vmem:[%s5709_s21 + $0x248] sm:$0xff]  }
  0x57   : > { %5119 = vmatprep.mubr.msk.bf16.mxu1 %vm444_vm1, %v5494_v35  ;;  %5159 = vmatprep.mubr.msk.bf16.mxu0 %vm444_vm1, %v5495_v36  ;;  %v5545_v28 = vld [vmem:[%s5709_s21 + $0x230] sm:$0xff]  }
  0x58   : > { %5189 = vmatprep.subr.bf16.mxu1 %v5502_v37  ;;  %5229 = vmatprep.subr.bf16.mxu0 %v5503_v38  ;;  %v5554_v35 = vld [vmem:[%s5709_s21 + $0x1d0] sm:$0xff]  }
  0x59   : > { %v5555_v36 = vld [vmem:[%s5709_s21 + $0x250] sm:$0xff]  }
  0x5a   : > { %5190 = vmatpush3.bf16.msra.mxu1 %v5502_v37  ;;  %5230 = vmatpush3.bf16.msra.mxu0 %v5503_v38  ;;  %v5556_v37 = vld [vmem:[%s5709_s21 + $0x1d8] sm:$0xff]  }
  0x5b   : > { %5191 = vmatprep.subr.bf16.mxu1 %v5512_v41  ;;  %5231 = vmatprep.subr.bf16.mxu0 %v5513_v42  ;;  %v5557_v38 = vld [vmem:[%s5709_s21 + $0x258] sm:$0xff]  }
  0x5d   : > { %5120 = vmatmul.mubr.msk.bf16.gmra.mxu1 %vm444_vm1, %v5496_v39  ;;  %5160 = vmatmul.mubr.msk.bf16.gmra.mxu0 %vm444_vm1, %v5497_v40  ;;  %v5558_v39 = vld [vmem:[%s5709_s21 + $0x1e0] sm:$0xff]  }
  0x5e   : > { %5123 = vmatprep.mubr.msk.bf16.mxu1 %vm444_vm1, %v5498_v43  ;;  %5163 = vmatprep.mubr.msk.bf16.mxu0 %vm444_vm1, %v5499_v44  ;;  %v5559_v40 = vld [vmem:[%s5709_s21 + $0x260] sm:$0xff]   ;;  %v5564_v43 = vld [vmem:[%s5709_s21 + $0x1f0] sm:$0xff]  }
  0x5f   : > { %5192 = vmatpush3.bf16.msra.mxu1 %v5512_v41  ;;  %5232 = vmatpush3.bf16.msra.mxu0 %v5513_v42  ;;  %v5560_v41 = vld [vmem:[%s5709_s21 + $0x1e8] sm:$0xff]   ;;  %v5565_v44 = vld [vmem:[%s5709_s21 + $0x270] sm:$0xff]  }
  0x60   : > { %5193 = vmatprep.subr.bf16.mxu1 %v5522_v49  ;;  %5233 = vmatprep.subr.bf16.mxu0 %v5523_v50  ;;  %v5561_v42 = vld [vmem:[%s5709_s21 + $0x268] sm:$0xff]  }
  0x63   : > { %5194 = vmatpush3.bf16.msra.mxu1 %v5522_v49  ;;  %5234 = vmatpush3.bf16.msra.mxu0 %v5523_v50  ;;  %v5570_v49 = vld [vmem:[%s5709_s21 + $0x288] sm:$0xff]  }
  0x64   : > { %5267 = vmatprep.subr.bf16.mxu1 %v5532_v55  ;;  %5307 = vmatprep.subr.bf16.mxu0 %v5533_v56  ;;  %v5571_v50 = vld [vmem:[%s5709_s21 + $0x308] sm:$0xff]  }
  0x65   : > { %5124 = vmatmul.mubr.msk.bf16.gmra.mxu1 %vm444_vm1, %v5500_v45  ;;  %5164 = vmatmul.mubr.msk.bf16.gmra.mxu0 %vm444_vm1, %v5501_v46  ;;  %v5566_v45 = vld [vmem:[%s5709_s21 + $0x1f8] sm:$0xff]  }
  0x66   : > { %5127 = vmatprep.mubr.msk.bf16.mxu1 %vm444_vm1, %v5504_v47  ;;  %5167 = vmatprep.mubr.msk.bf16.mxu0 %vm444_vm1, %v5505_v48  ;;  %v5567_v46 = vld [vmem:[%s5709_s21 + $0x278] sm:$0xff]   ;;  %v5568_v47 = vld [vmem:[%s5709_s21 + $0x280] sm:$0xff]  }
  0x67   : > { %v5569_v48 = vld [vmem:[%s5709_s21 + $0x300] sm:$0xff]  }
  0x6d   : > { %5128 = vmatmul.mubr.msk.bf16.gmra.mxu1 %vm444_vm1, %v5506_v51  ;;  %5168 = vmatmul.mubr.msk.bf16.gmra.mxu0 %vm444_vm1, %v5507_v52  ;;  %v5574_v51 = vld [vmem:[%s5709_s21 + $0x290] sm:$0xff]  }
  0x6e   : > { %5131 = vmatprep.mubr.msk.bf16.mxu1 %vm444_vm1, %v5508_v53  ;;  %5171 = vmatprep.mubr.msk.bf16.mxu0 %vm444_vm1, %v5509_v54  ;;  %v5575_v52 = vld [vmem:[%s5709_s21 + $0x310] sm:$0xff]  }
  0x6f   : > { %v5582_v53 = vld [vmem:[%s5714_s24 + $0xf0] sm:$0xff]  }
  0x70   : > { %v5583_v54 = vld [vmem:[%s5714_s24 + $0x110] sm:$0xff]  }
  0x75   : > { %5132 = vmatmul.mubr.msk.bf16.gmra.mxu1 %vm444_vm1, %v5510_v57  ;;  %5172 = vmatmul.mubr.msk.bf16.gmra.mxu0 %vm444_vm1, %v5511_v58  ;;  %v5593_v57 = vld [vmem:[%s5714_s24 + $0x108] sm:$0xff]   ;;  %v5577_v58 = vld [vmem:[%s5709_s21 + $0x318] sm:$0xff]  }
  0x76   : > { %5135 = vmatprep.mubr.msk.bf16.mxu1 %vm444_vm1, %v5514_v59  ;;  %5175 = vmatprep.mubr.msk.bf16.mxu0 %vm444_vm1, %v5515_v60  ;;  %v5578_v59 = vld [vmem:[%s5709_s21 + $0x2a0] sm:$0xff]  }
  0x77   : > { %v5579_v60 = vld [vmem:[%s5709_s21 + $0x320] sm:$0xff]  }
  0x7d   : > { %5136 = vmatmul.mubr.msk.bf16.gmra.mxu1 %vm444_vm1, %v5516_v61  ;;  %5176 = vmatmul.mubr.msk.bf16.gmra.mxu0 %vm444_vm1, %v5517_v62  ;;  %v5602_v61 = vld [vmem:[%s5714_s24 + $0xe0] sm:$0xff]  }
  0x7e   : > { %5139 = vmatprep.mubr.msk.bf16.mxu1 %vm444_vm1, %v5518_v63  ;;  %5179 = vmatprep.mubr.msk.bf16.mxu0 %vm444_vm1, %v5519_v0  ;;  %v5603_v62 = vld [vmem:[%s5714_s24 + $0x100] sm:$0xff]   ;;  %v5580_v63 = vld [vmem:[%s5709_s21 + $0x2a8] sm:$0xff]  }
  0x7f   : > { %v5581_v0 = vld [vmem:[%s5709_s21 + $0x328] sm:$0xff]  }
  0x85   : > { %5140 = vmatmul.mubr.msk.bf16.gmra.mxu1 %vm444_vm1, %v5520_v1  ;;  %5180 = vmatmul.mubr.msk.bf16.gmra.mxu0 %vm444_vm1, %v5521_v2  ;;  %v5584_v1 = vld [vmem:[%s5709_s21 + $0x2b0] sm:$0xff]  }
  0x86   : > { %5143 = vmatprep.mubr.msk.bf16.mxu1 %vm444_vm1, %v5524_v3  ;;  %5183 = vmatprep.mubr.msk.bf16.mxu0 %vm444_vm1, %v5525_v4  ;;  %v5585_v2 = vld [vmem:[%s5709_s21 + $0x330] sm:$0xff]   ;;  %v5586_v3 = vld [vmem:[%s5709_s21 + $0x2b8] sm:$0xff]  }
  0x87   : > { %v5587_v4 = vld [vmem:[%s5709_s21 + $0x338] sm:$0xff]  }
  0x8d   : > { %5144 = vmatmul.mubr.msk.bf16.gmra.mxu1 %vm444_vm1, %v5526_v5  ;;  %5184 = vmatmul.mubr.msk.bf16.gmra.mxu0 %vm444_vm1, %v5527_v6  ;;  %v5588_v5 = vld [vmem:[%s5709_s21 + $0x2c0] sm:$0xff]  }
  0x8e   : > { %5195 = vmatprep.mubr.msk.bf16.mxu1 %vm444_vm1, %v5528_v7  ;;  %5235 = vmatprep.mubr.msk.bf16.mxu0 %vm444_vm1, %v5529_v8  ;;  %v5589_v6 = vld [vmem:[%s5709_s21 + $0x340] sm:$0xff]   ;;  %v5590_v7 = vld [vmem:[%s5709_s21 + $0x2c8] sm:$0xff]  }
  0x8f   : > { %v5591_v8 = vld [vmem:[%s5709_s21 + $0x348] sm:$0xff]  }
  0x95   : > { %5196 = vmatmul.mubr.msk.bf16.vlgmr.msra.gmra.mxu1 %vm444_vm1, %v5530_v9  ;;  %5236 = vmatmul.mubr.msk.bf16.vlgmr.msra.gmra.mxu0 %vm444_vm1, %v5531_v10  ;;  %v5594_v9 = vld [vmem:[%s5709_s21 + $0x2d0] sm:$0xff]  }
  0x96   : > { %5268 = vmatpush3.bf16.msra.mxu1 %v5532_v55  ;;  %5308 = vmatpush3.bf16.msra.mxu0 %v5533_v56  ;;  %v5592_v55 = vld [vmem:[%s5714_s24 + $0xe8] sm:$0xff]   ;;  %v5576_v56 = vld [vmem:[%s5709_s21 + $0x298] sm:$0xff]   ;;  %v5595_v10 = vld [vmem:[%s5709_s21 + $0x350] sm:$0xff]  }
  0x97   : > { %5199 = vmatprep.mubr.msk.bf16.mxu1 %vm444_vm1, %v5534_v11  ;;  %5239 = vmatprep.mubr.msk.bf16.mxu0 %vm444_vm1, %v5535_v12 }
  0x98   : > { %5269 = vmatprep.subr.bf16.mxu1 %v5542_v13  ;;  %5309 = vmatprep.subr.bf16.mxu0 %v5543_v14 }
  0x9a   : > { %5270 = vmatpush3.bf16.msra.mxu1 %v5542_v13  ;;  %5310 = vmatpush3.bf16.msra.mxu0 %v5543_v14 }
  0x9b   : > { %5271 = vmatprep.subr.bf16.mxu1 %v5552_v15  ;;  %5311 = vmatprep.subr.bf16.mxu0 %v5553_v17 }
  0x9d   : > { %5200 = vmatmul.mubr.msk.bf16.gmra.mxu1 %vm444_vm1, %v5536_v16  ;;  %5240 = vmatmul.mubr.msk.bf16.gmra.mxu0 %vm444_vm1, %v5537_v18  ;;  %v5597_v18 = vld [vmem:[%s5709_s21 + $0x358] sm:$0xff]  }
  0x9e   : > { %5203 = vmatprep.mubr.msk.bf16.mxu1 %vm444_vm1, %v5538_v19  ;;  %5243 = vmatprep.mubr.msk.bf16.mxu0 %vm444_vm1, %v5539_v20  ;;  %v5598_v19 = vld [vmem:[%s5709_s21 + $0x2e0] sm:$0xff]  }
  0x9f   : > { %5272 = vmatpush3.bf16.msra.mxu1 %v5552_v15  ;;  %5312 = vmatpush3.bf16.msra.mxu0 %v5553_v17  ;;  %v5596_v17 = vld [vmem:[%s5709_s21 + $0x2d8] sm:$0xff]   ;;  %v5599_v20 = vld [vmem:[%s5709_s21 + $0x360] sm:$0xff]  }
  0xa0   : > { %5273 = vmatprep.subr.bf16.mxu1 %v5562_v21  ;;  %5313 = vmatprep.subr.bf16.mxu0 %v5563_v22 }
  0xa3   : > { %5274 = vmatpush3.bf16.msra.mxu1 %v5562_v21  ;;  %5314 = vmatpush3.bf16.msra.mxu0 %v5563_v22 }
  0xa4   : > { %5347 = vmatprep.subr.bf16.mxu1 %v5572_v25  ;;  %5387 = vmatprep.subr.bf16.mxu0 %v5573_v26 }
  0xa5   : > { %5204 = vmatmul.mubr.msk.bf16.gmra.mxu1 %vm444_vm1, %v5540_v23  ;;  %5244 = vmatmul.mubr.msk.bf16.gmra.mxu0 %vm444_vm1, %v5541_v24 }
  0xa6   : > { %5207 = vmatprep.mubr.msk.bf16.mxu1 %vm444_vm1, %v5544_v27  ;;  %5247 = vmatprep.mubr.msk.bf16.mxu0 %vm444_vm1, %v5545_v28 }
  0xad   : > { %5208 = vmatmul.mubr.msk.bf16.gmra.mxu1 %vm444_vm1, %v5546_v29  ;;  %5248 = vmatmul.mubr.msk.bf16.gmra.mxu0 %vm444_vm1, %v5547_v30  ;;  %v5600_v29 = vld [vmem:[%s5709_s21 + $0x2e8] sm:$0xff]  }
  0xae   : > { %5211 = vmatprep.mubr.msk.bf16.mxu1 %vm444_vm1, %v5548_v31  ;;  %5251 = vmatprep.mubr.msk.bf16.mxu0 %vm444_vm1, %v5549_v32  ;;  %v5601_v30 = vld [vmem:[%s5709_s21 + $0x368] sm:$0xff]   ;;  %v5604_v31 = vld [vmem:[%s5709_s21 + $0x2f0] sm:$0xff]  }
  0xaf   : > { %v5605_v32 = vld [vmem:[%s5709_s21 + $0x370] sm:$0xff]  }
  0xb5   : > { %5212 = vmatmul.mubr.msk.bf16.gmra.mxu1 %vm444_vm1, %v5550_v33  ;;  %5252 = vmatmul.mubr.msk.bf16.gmra.mxu0 %vm444_vm1, %v5551_v34 }
  0xb6   : > { %5215 = vmatprep.mubr.msk.bf16.mxu1 %vm444_vm1, %v5554_v35  ;;  %5255 = vmatprep.mubr.msk.bf16.mxu0 %vm444_vm1, %v5555_v36 }
  0xbd   : > { %5216 = vmatmul.mubr.msk.bf16.gmra.mxu1 %vm444_vm1, %v5556_v37  ;;  %5256 = vmatmul.mubr.msk.bf16.gmra.mxu0 %vm444_vm1, %v5557_v38 }
  0xbe   : > { %5219 = vmatprep.mubr.msk.bf16.mxu1 %vm444_vm1, %v5558_v39  ;;  %5259 = vmatprep.mubr.msk.bf16.mxu0 %vm444_vm1, %v5559_v40 }
  0xc5   : > { %5220 = vmatmul.mubr.msk.bf16.gmra.mxu1 %vm444_vm1, %v5560_v41  ;;  %5260 = vmatmul.mubr.msk.bf16.gmra.mxu0 %vm444_vm1, %v5561_v42  ;;  %v5606_v41 = vld [vmem:[%s5709_s21 + $0x2f8] sm:$0xff]  }
  0xc6   : > { %5223 = vmatprep.mubr.msk.bf16.mxu1 %vm444_vm1, %v5564_v43  ;;  %5263 = vmatprep.mubr.msk.bf16.mxu0 %vm444_vm1, %v5565_v44  ;;  %v5607_v42 = vld [vmem:[%s5709_s21 + $0x378] sm:$0xff]   ;;  %v5608_v43 = vld [vmem:[%s5709_s21 + $0x380] sm:$0xff]  }
  0xc7   : > { %v5609_v44 = vld [vmem:[%s5709_s21 + $0x400] sm:$0xff]  }
  0xcd   : > { %5224 = vmatmul.mubr.msk.bf16.gmra.mxu1 %vm444_vm1, %v5566_v45  ;;  %5264 = vmatmul.mubr.msk.bf16.gmra.mxu0 %vm444_vm1, %v5567_v46 }
  0xce   : > { %5275 = vmatprep.mubr.msk.bf16.mxu1 %vm444_vm1, %v5568_v47  ;;  %5315 = vmatprep.mubr.msk.bf16.mxu0 %vm444_vm1, %v5569_v48 }
  0xd5   : > { %5276 = vmatmul.mubr.msk.bf16.vlgmr.msra.gmra.mxu1 %vm444_vm1, %v5570_v49  ;;  %5316 = vmatmul.mubr.msk.bf16.vlgmr.msra.gmra.mxu0 %vm444_vm1, %v5571_v50 }
  0xd6   : > { %5348 = vmatpush3.bf16.msra.mxu1 %v5572_v25  ;;  %5388 = vmatpush3.bf16.msra.mxu0 %v5573_v26 }
  0xd7   : > { %5279 = vmatprep.mubr.msk.bf16.mxu1 %vm444_vm1, %v5574_v51  ;;  %5319 = vmatprep.mubr.msk.bf16.mxu0 %vm444_vm1, %v5575_v52  ;;  %v270_v51 = vld [vmem:[#allocation2 + $0x10] sm:$0xff] }
  0xd8   : > { %5349 = vmatprep.subr.bf16.mxu1 %v5582_v53  ;;  %5389 = vmatprep.subr.bf16.mxu0 %v5583_v54 }
  0xda   : > { %5350 = vmatpush3.bf16.msra.mxu1 %v5582_v53  ;;  %5390 = vmatpush3.bf16.msra.mxu0 %v5583_v54  ;;  %v5610_v54 = vld [vmem:[%s5709_s21 + $0x388] sm:$0xff]  }
  0xdb   : > { %5351 = vmatprep.subr.bf16.mxu1 %v5592_v55  ;;  %5391 = vmatprep.subr.bf16.mxu0 %v5593_v57 }
  0xdd   : > { %5280 = vmatmul.mubr.msk.bf16.gmra.mxu1 %vm444_vm1, %v5576_v56  ;;  %5320 = vmatmul.mubr.msk.bf16.gmra.mxu0 %vm444_vm1, %v5577_v58  ;;  %v5612_v56 = vld [vmem:[%s5709_s21 + $0x390] sm:$0xff]   ;;  %v268_v58 = vld [vmem:[#allocation2] sm:$0xff] }
  0xde   : > { %5283 = vmatprep.mubr.msk.bf16.mxu1 %vm444_vm1, %v5578_v59  ;;  %5323 = vmatprep.mubr.msk.bf16.mxu0 %vm444_vm1, %v5579_v60 }
  0xdf   : > { %5352 = vmatpush3.bf16.msra.mxu1 %v5592_v55  ;;  %5392 = vmatpush3.bf16.msra.mxu0 %v5593_v57  ;;  %v5611_v55 = vld [vmem:[%s5709_s21 + $0x408] sm:$0xff]   ;;  %v5613_v57 = vld [vmem:[%s5709_s21 + $0x410] sm:$0xff]  }
  0xe0   : > { %5353 = vmatprep.subr.bf16.mxu1 %v5602_v61  ;;  %5393 = vmatprep.subr.bf16.mxu0 %v5603_v62 }
  0xe3   : > { %5354 = vmatpush3.bf16.msra.mxu1 %v5602_v61  ;;  %5394 = vmatpush3.bf16.msra.mxu0 %v5603_v62  ;;  %v271_v62 = vld [vmem:[#allocation2 + $0x18] sm:$0xff] }
  0xe5   : > { %5284 = vmatmul.mubr.msk.bf16.gmra.mxu1 %vm444_vm1, %v5580_v63  ;;  %5324 = vmatmul.mubr.msk.bf16.gmra.mxu0 %vm444_vm1, %v5581_v0 }
  0xe6   : > { %5287 = vmatprep.mubr.msk.bf16.mxu1 %vm444_vm1, %v5584_v1  ;;  %5327 = vmatprep.mubr.msk.bf16.mxu0 %vm444_vm1, %v5585_v2 }
  0xed   : > { %5288 = vmatmul.mubr.msk.bf16.gmra.mxu1 %vm444_vm1, %v5586_v3  ;;  %5328 = vmatmul.mubr.msk.bf16.gmra.mxu0 %vm444_vm1, %v5587_v4  ;;  %v269_v3 = vld [vmem:[#allocation2 + $0x8] sm:$0xff] }
  0xee   : > { %5291 = vmatprep.mubr.msk.bf16.mxu1 %vm444_vm1, %v5588_v5  ;;  %5331 = vmatprep.mubr.msk.bf16.mxu0 %vm444_vm1, %v5589_v6 }
  0xf5   : > { %v5985_v11 = vpop.f32.mrf.mxu0  ;;  %v5987_v12 = vpop.f32.mrf.mxu1  ;;  %5292 = vmatmul.mubr.msk.bf16.gmra.mxu1 %vm444_vm1, %v5590_v7  ;;  %5332 = vmatmul.mubr.msk.bf16.gmra.mxu0 %vm444_vm1, %v5591_v8 }
  0xf6   : > { %5295 = vmatprep.mubr.msk.bf16.mxu1 %vm444_vm1, %v5594_v9  ;;  %5335 = vmatprep.mubr.msk.bf16.mxu0 %vm444_vm1, %v5595_v10  ;;  %v656_v61 = vadd.f32 %v5985_v11, %v270_v51  ;;  %v274_v9 = vld [vmem:[#allocation2 + $0x30] sm:$0xff] }
  0xf7   : > { %v5993_v13 = vpop.f32.mrf.mxu0  ;;  %v5995_v14 = vpop.f32.mrf.mxu1 }
  0xf8   : > { %v654_v1 = vadd.f32 %v5993_v13, %v268_v58  ;;  %v5615_v13 = vld [vmem:[%s5709_s21 + $0x418] sm:$0xff]  }
  0xf9   : > { %v5997_v15 = vpop.f32.mrf.mxu0  ;;  %v5999_v16 = vpop.f32.mrf.mxu1 }
  0xfa   : > { %v657_v6 = vadd.f32 %v5997_v15, %v271_v62 }
  0xfb   : > { %v6005_v21 = vpop.f32.mrf.mxu0  ;;  %v6007_v22 = vpop.f32.mrf.mxu1 }
  0xfd   : > { %v6009_v23 = vpop.f32.mrf.mxu0  ;;  %v6011_v24 = vpop.f32.mrf.mxu1  ;;  %5296 = vmatmul.mubr.msk.bf16.gmra.mxu1 %vm444_vm1, %v5596_v17  ;;  %5336 = vmatmul.mubr.msk.bf16.gmra.mxu0 %vm444_vm1, %v5597_v18  ;;  %v5614_v17 = vld [vmem:[%s5709_s21 + $0x398] sm:$0xff]   ;;  %v655_v18 = vadd.f32 %v6005_v21, %v269_v3  ;;  %v5619_v3 = vld [vmem:[%s5709_s21 + $0x428] sm:$0xff]  }
  0xfe   : > { %5299 = vmatprep.mubr.msk.bf16.mxu1 %vm444_vm1, %v5598_v19  ;;  %5339 = vmatprep.mubr.msk.bf16.mxu0 %vm444_vm1, %v5599_v20  ;;  %v660_v15 = vadd.f32 %v6009_v23, %v274_v9  ;;  %v273_v23 = vld [vmem:[#allocation2 + $0x28] sm:$0xff]  ;;  %v5621_v9 = vld [vmem:[%s5709_s21 + $0x430] sm:$0xff]  }
  0xff   : > { %v6017_v25 = vpop.f32.mrf.mxu0  ;;  %v6019_v26 = vpop.f32.mrf.mxu1 }
 0x101   : > { %v6021_v27 = vpop.f32.mrf.mxu0  ;;  %v6023_v28 = vpop.f32.mrf.mxu1 }
 0x103   : > { %v6029_v33 = vpop.f32.mrf.mxu0  ;;  %v6031_v34 = vpop.f32.mrf.mxu1 }
 0x105   : > { %v6033_v35 = vpop.f32.mrf.mxu0  ;;  %v6035_v36 = vpop.f32.mrf.mxu1  ;;  %5300 = vmatmul.mubr.msk.bf16.gmra.mxu1 %vm444_vm1, %v5600_v29  ;;  %5340 = vmatmul.mubr.msk.bf16.gmra.mxu0 %vm444_vm1, %v5601_v30  ;;  %v5616_v29 = vld [vmem:[%s5709_s21 + $0x3a0] sm:$0xff]  }
 0x106   : > { %5303 = vmatprep.mubr.msk.bf16.mxu1 %vm444_vm1, %v5604_v31  ;;  %5343 = vmatprep.mubr.msk.bf16.mxu0 %vm444_vm1, %v5605_v32  ;;  %v5617_v30 = vld [vmem:[%s5709_s21 + $0x420] sm:$0xff]  }
 0x107   : > { %v6041_v37 = vpop.f32.mrf.mxu0  ;;  %v6043_v38 = vpop.f32.mrf.mxu1  ;;  %v272_v31 = vld [vmem:[#allocation2 + $0x20] sm:$0xff] }
 0x108   : > { %v658_v21 = vadd.f32 %v6017_v25, %v272_v31 }
 0x109   : > { %v6045_v39 = vpop.f32.mrf.mxu0  ;;  %v6047_v40 = vpop.f32.mrf.mxu1 }
 0x10b   : > { %v6053_v45 = vpop.f32.mrf.mxu0  ;;  %v6055_v46 = vpop.f32.mrf.mxu1 }
 0x10d   : > { %v6057_v47 = vpop.f32.mrf.mxu0  ;;  %v6059_v48 = vpop.f32.mrf.mxu1  ;;  %5304 = vmatmul.mubr.msk.bf16.gmra.mxu1 %vm444_vm1, %v5606_v41  ;;  %5344 = vmatmul.mubr.msk.bf16.gmra.mxu0 %vm444_vm1, %v5607_v42 }
 0x10e   : > { %5355 = vmatprep.mubr.msk.bf16.mxu1 %vm444_vm1, %v5608_v43  ;;  %5395 = vmatprep.mubr.msk.bf16.mxu0 %vm444_vm1, %v5609_v44  ;;  %v275_v44 = vld [vmem:[#allocation2 + $0x38] sm:$0xff] }
 0x10f   : > { %v6065_v49 = vpop.f32.mrf.mxu0  ;;  %v6067_v50 = vpop.f32.mrf.mxu1 }
 0x111   : > { %v6069_v52 = vpop.f32.mrf.mxu0  ;;  %v6071_v53 = vpop.f32.mrf.mxu1 }
 0x113   : > { %v6077_v59 = vpop.f32.mrf.mxu0  ;;  %v6079_v60 = vpop.f32.mrf.mxu1 }
 0x115   : > { %v5117_v63 = vpop.f32.mrf.mxu1  ;;  %v5157_v0 = vpop.f32.mrf.mxu0  ;;  %5356 = vmatmul.mubr.msk.bf16.vlgmr.msra.gmra.mxu1 %vm444_vm1, %v5610_v54  ;;  %5396 = vmatmul.mubr.msk.bf16.vlgmr.msra.gmra.mxu0 %vm444_vm1, %v5611_v55 }
 0x116   : > { %v1043_v2 = vadd.f32 %v5117_v63, %v656_v61  ;;  %5359 = vmatprep.mubr.msk.bf16.mxu1 %vm444_vm1, %v5612_v56  ;;  %5399 = vmatprep.mubr.msk.bf16.mxu0 %vm444_vm1, %v5613_v57  ;;  %v661_v61 = vadd.f32 %v6021_v27, %v275_v44 }
 0x117   : > { %v914_v4 = vpop.f32.mrf.mxu1  ;;  %v1301_v5 = vpop.f32.mrf.mxu0 }
 0x118   : > { %v6088_v7 = vadd.f32 %v5157_v0, %v1043_v2  ;;  %v1041_v8 = vadd.f32 %v914_v4, %v654_v1  ;;  %v278_v0 = vld [vmem:[#allocation2 + $0x50] sm:$0xff]  ;;  %v5618_v2 = vld [vmem:[%s5709_s21 + $0x3a8] sm:$0xff]   ;;  %v659_v4 = vadd.f32 %v6029_v33, %v273_v23  ;;  %v5623_v23 = vld [vmem:[%s5709_s21 + $0x438] sm:$0xff]  }
 0x119   : > { %v5118_v10 = vpop.f32.mrf.mxu1  ;;  %v5158_v11 = vpop.f32.mrf.mxu0  ;;  %v664_v27 = vadd.f32 %v6033_v35, %v278_v0  ;;  %v277_v35 = vld [vmem:[#allocation2 + $0x48] sm:$0xff]  ;;  %v5625_v0 = vld [vmem:[%s5709_s21 + $0x440] sm:$0xff]  }
 0x11a   : > { %v6093_v19 = vadd.f32 %v1301_v5, %v1041_v8  ;;  %v1044_v20 = vadd.f32 %v5118_v10, %v657_v6  ;;  %v5620_v8 = vld [vmem:[%s5709_s21 + $0x3b0] sm:$0xff]   ;;  %v276_v10 = vld [vmem:[#allocation2 + $0x40] sm:$0xff] }
 0x11b   : > { %v917_v32 = vpop.f32.mrf.mxu1  ;;  %v1304_v41 = vpop.f32.mrf.mxu0  ;;  %v662_v33 = vadd.f32 %v6041_v37, %v276_v10 }
 0x11c   : > { %v6098_v42 = vadd.f32 %v5158_v11, %v1044_v20  ;;  %v1042_v43 = vadd.f32 %v917_v32, %v655_v18  ;;  %v279_v20 = vld [vmem:[#allocation2 + $0x58] sm:$0xff] }
 0x11d   : > { %v5121_v51 = vpop.f32.mrf.mxu1  ;;  %v5161_v54 = vpop.f32.mrf.mxu0  ;;  %5360 = vmatmul.mubr.msk.bf16.gmra.mxu1 %vm444_vm1, %v5614_v17  ;;  %5400 = vmatmul.mubr.msk.bf16.gmra.mxu0 %vm444_vm1, %v5615_v13 }
 0x11e   : > { %v6103_v55 = vadd.f32 %v1304_v41, %v1042_v43  ;;  %v1047_v56 = vadd.f32 %v5121_v51, %v660_v15  ;;  %5363 = vmatprep.mubr.msk.bf16.mxu1 %vm444_vm1, %v5616_v29  ;;  %5403 = vmatprep.mubr.msk.bf16.mxu0 %vm444_vm1, %v5617_v30  ;;  %v665_v43 = vadd.f32 %v6045_v39, %v279_v20 }
 0x11f   : > { %v930_v57 = vpop.f32.mrf.mxu1  ;;  %v1317_v58 = vpop.f32.mrf.mxu0 }
 0x120   : > { %v6108_v62 = vadd.f32 %v5161_v54, %v1047_v56  ;;  %v1045_v63 = vadd.f32 %v930_v57, %v658_v21  ;;  %v282_v54 = vld [vmem:[#allocation2 + $0x70] sm:$0xff]  ;;  %v5622_v56 = vld [vmem:[%s5709_s21 + $0x3b8] sm:$0xff]   ;;  %v663_v57 = vadd.f32 %v6053_v45, %v277_v35  ;;  %v5627_v35 = vld [vmem:[%s5709_s21 + $0x448] sm:$0xff]  }
 0x121   : > { %v5122_v1 = vpop.f32.mrf.mxu1  ;;  %v5162_v25 = vpop.f32.mrf.mxu0  ;;  %v668_v39 = vadd.f32 %v6057_v47, %v282_v54  ;;  %v281_v47 = vld [vmem:[#allocation2 + $0x68] sm:$0xff]  ;;  %v5629_v54 = vld [vmem:[%s5709_s21 + $0x450] sm:$0xff]  }
 0x122   : > { %v6113_v5 = vadd.f32 %v1317_v58, %v1045_v63  ;;  %v1048_v6 = vadd.f32 %v5122_v1, %v661_v61  ;;  %v5624_v63 = vld [vmem:[%s5709_s21 + $0x3c0] sm:$0xff]  }
 0x123   : > { %v933_v11 = vpop.f32.mrf.mxu1  ;;  %v1320_v17 = vpop.f32.mrf.mxu0  ;;  %v280_v1 = vld [vmem:[#allocation2 + $0x60] sm:$0xff] }
 0x124   : > { %v6118_v13 = vadd.f32 %v5162_v25, %v1048_v6  ;;  %v1046_v18 = vadd.f32 %v933_v11, %v659_v4  ;;  %v283_v6 = vld [vmem:[#allocation2 + $0x78] sm:$0xff]  ;;  %v666_v45 = vadd.f32 %v6065_v49, %v280_v1 }
 0x125   : > { %v5125_v29 = vpop.f32.mrf.mxu1  ;;  %v5165_v30 = vpop.f32.mrf.mxu0  ;;  %5364 = vmatmul.mubr.msk.bf16.gmra.mxu1 %vm444_vm1, %v5618_v2  ;;  %5404 = vmatmul.mubr.msk.bf16.gmra.mxu0 %vm444_vm1, %v5619_v3 }
 0x126   : > { %v6123_v31 = vadd.f32 %v1320_v17, %v1046_v18  ;;  %v1051_v32 = vadd.f32 %v5125_v29, %v664_v27  ;;  %5367 = vmatprep.mubr.msk.bf16.mxu1 %vm444_vm1, %v5620_v8  ;;  %5407 = vmatprep.mubr.msk.bf16.mxu0 %vm444_vm1, %v5621_v9  ;;  %v669_v18 = vadd.f32 %v6069_v52, %v283_v6 }
 0x127   : > { %v946_v41 = vpop.f32.mrf.mxu1  ;;  %v1333_v15 = vpop.f32.mrf.mxu0 }
 0x128   : > { %v6128_v44 = vadd.f32 %v5165_v30, %v1051_v32  ;;  %v1049_v51 = vadd.f32 %v946_v41, %v662_v33  ;;  %v286_v30 = vld [vmem:[#allocation2 + $0x90] sm:$0xff]  ;;  %v5626_v32 = vld [vmem:[%s5709_s21 + $0x3c8] sm:$0xff]   ;;  %v667_v41 = vadd.f32 %v6077_v59, %v281_v47  ;;  %v5631_v47 = vld [vmem:[%s5709_s21 + $0x458] sm:$0xff]  }
 0x129   : > { %v5126_v21 = vpop.f32.mrf.mxu1  ;;  %v5166_v37 = vpop.f32.mrf.mxu0  ;;  %v672_v52 = vadd.f32 %v5987_v12, %v286_v30  ;;  %v285_v12 = vld [vmem:[#allocation2 + $0x88] sm:$0xff]  ;;  %v5633_v30 = vld [vmem:[%s5709_s21 + $0x460] sm:$0xff]  }
 0x12a   : > { %v6133_v58 = vadd.f32 %v1333_v15, %v1049_v51  ;;  %v1052_v61 = vadd.f32 %v5126_v21, %v665_v43  ;;  %v5628_v51 = vld [vmem:[%s5709_s21 + $0x3d0] sm:$0xff]   ;;  %v284_v21 = vld [vmem:[#allocation2 + $0x80] sm:$0xff] }
 0x12b   : > { %v949_v25 = vpop.f32.mrf.mxu1  ;;  %v1336_v2 = vpop.f32.mrf.mxu0  ;;  %v670_v59 = vadd.f32 %v5995_v14, %v284_v21 }
 0x12c   : > { %v6138_v3 = vadd.f32 %v5166_v37, %v1052_v61  ;;  %v1050_v4 = vadd.f32 %v949_v25, %v663_v57  ;;  %v287_v61 = vld [vmem:[#allocation2 + $0x98] sm:$0xff] }
 0x12d   : > { %v5129_v8 = vpop.f32.mrf.mxu1  ;;  %v5169_v9 = vpop.f32.mrf.mxu0  ;;  %5368 = vmatmul.mubr.msk.bf16.gmra.mxu1 %vm444_vm1, %v5622_v56  ;;  %5408 = vmatmul.mubr.msk.bf16.gmra.mxu0 %vm444_vm1, %v5623_v23 }
 0x12e   : > { %v6143_v10 = vadd.f32 %v1336_v2, %v1050_v4  ;;  %v1055_v11 = vadd.f32 %v5129_v8, %v668_v39  ;;  %5371 = vmatprep.mubr.msk.bf16.mxu1 %vm444_vm1, %v5624_v63  ;;  %5411 = vmatprep.mubr.msk.bf16.mxu0 %vm444_vm1, %v5625_v0  ;;  %v673_v4 = vadd.f32 %v5999_v16, %v287_v61 }
 0x12f   : > { %v962_v17 = vpop.f32.mrf.mxu1  ;;  %v1349_v27 = vpop.f32.mrf.mxu0 }
 0x130   : > { %v6148_v20 = vadd.f32 %v5169_v9, %v1055_v11  ;;  %v1053_v29 = vadd.f32 %v962_v17, %v666_v45  ;;  %v290_v9 = vld [vmem:[#allocation2 + $0xb0] sm:$0xff]  ;;  %v5630_v11 = vld [vmem:[%s5709_s21 + $0x3d8] sm:$0xff]   ;;  %v671_v17 = vadd.f32 %v6007_v22, %v285_v12  ;;  %v5635_v12 = vld [vmem:[%s5709_s21 + $0x468] sm:$0xff]  }
 0x131   : > { %v5130_v33 = vpop.f32.mrf.mxu1  ;;  %v5170_v49 = vpop.f32.mrf.mxu0  ;;  %v676_v16 = vadd.f32 %v6011_v24, %v290_v9  ;;  %v289_v24 = vld [vmem:[#allocation2 + $0xa8] sm:$0xff]  ;;  %v5637_v9 = vld [vmem:[%s5709_s21 + $0x470] sm:$0xff]  }
 0x132   : > { %v6153_v15 = vadd.f32 %v1349_v27, %v1053_v29  ;;  %v1056_v43 = vadd.f32 %v5130_v33, %v669_v18  ;;  %v5632_v29 = vld [vmem:[%s5709_s21 + $0x3e0] sm:$0xff]  }
 0x133   : > { %v965_v37 = vpop.f32.mrf.mxu1  ;;  %v1352_v56 = vpop.f32.mrf.mxu0  ;;  %v288_v33 = vld [vmem:[#allocation2 + $0xa0] sm:$0xff] }
 0x134   : > { %v6158_v23 = vadd.f32 %v5170_v49, %v1056_v43  ;;  %v1054_v57 = vadd.f32 %v965_v37, %v667_v41  ;;  %v291_v43 = vld [vmem:[#allocation2 + $0xb8] sm:$0xff]  ;;  %v674_v22 = vadd.f32 %v6019_v26, %v288_v33 }
 0x135   : > { %v5133_v63 = vpop.f32.mrf.mxu1  ;;  %v5173_v0 = vpop.f32.mrf.mxu0  ;;  %5372 = vmatmul.mubr.msk.bf16.gmra.mxu1 %vm444_vm1, %v5626_v32  ;;  %5412 = vmatmul.mubr.msk.bf16.gmra.mxu0 %vm444_vm1, %v5627_v35 }
 0x136   : > { %v6163_v1 = vadd.f32 %v1352_v56, %v1054_v57  ;;  %v1059_v25 = vadd.f32 %v5133_v63, %v672_v52  ;;  %5375 = vmatprep.mubr.msk.bf16.mxu1 %vm444_vm1, %v5628_v51  ;;  %5415 = vmatprep.mubr.msk.bf16.mxu0 %vm444_vm1, %v5629_v54  ;;  %v677_v57 = vadd.f32 %v6023_v28, %v291_v43 }
 0x137   : > { %v978_v2 = vpop.f32.mrf.mxu1  ;;  %v1365_v39 = vpop.f32.mrf.mxu0 }
 0x138   : > { %v6168_v6 = vadd.f32 %v5173_v0, %v1059_v25  ;;  %v1057_v8 = vadd.f32 %v978_v2, %v670_v59  ;;  %v294_v0 = vld [vmem:[#allocation2 + $0xd0] sm:$0xff]  ;;  %v5634_v25 = vld [vmem:[%s5709_s21 + $0x3e8] sm:$0xff]   ;;  %v675_v2 = vadd.f32 %v6031_v34, %v289_v24  ;;  %v5638_v24 = vld [vmem:[%s5709_s21 + $0x3f8] sm:$0xff]  }
 0x139   : > { %v5134_v45 = vpop.f32.mrf.mxu1  ;;  %v5174_v14 = vpop.f32.mrf.mxu0  ;;  %v680_v28 = vadd.f32 %v6035_v36, %v294_v0  ;;  %v293_v36 = vld [vmem:[#allocation2 + $0xc8] sm:$0xff] }
 0x13a   : > { %v6173_v27 = vadd.f32 %v1365_v39, %v1057_v8  ;;  %v1060_v18 = vadd.f32 %v5134_v45, %v673_v4  ;;  %v5636_v8 = vld [vmem:[%s5709_s21 + $0x3f0] sm:$0xff]   ;;  %v292_v45 = vld [vmem:[#allocation2 + $0xc0] sm:$0xff] }
 0x13b   : > { %v981_v49 = vpop.f32.mrf.mxu1  ;;  %v1368_v32 = vpop.f32.mrf.mxu0  ;;  %v678_v34 = vadd.f32 %v6043_v38, %v292_v45  ;;  %v5639_v38 = vld [vmem:[%s5709_s21 + $0x478] sm:$0xff]   ;;  %v297_v45 = vld [vmem:[#allocation2 + $0xe8] sm:$0xff] }
 0x13c   : > { %v6178_v35 = vadd.f32 %v5174_v14, %v1060_v18  ;;  %v1058_v41 = vadd.f32 %v981_v49, %v671_v17  ;;  %v295_v18 = vld [vmem:[#allocation2 + $0xd8] sm:$0xff] }
 0x13d   : > { %v5137_v51 = vpop.f32.mrf.mxu1  ;;  %v5177_v54 = vpop.f32.mrf.mxu0  ;;  %5376 = vmatmul.mubr.msk.bf16.gmra.mxu1 %vm444_vm1, %v5630_v11  ;;  %5416 = vmatmul.mubr.msk.bf16.gmra.mxu0 %vm444_vm1, %v5631_v47 }
 0x13e   : > { %v6183_v21 = vadd.f32 %v1368_v32, %v1058_v41  ;;  %v1063_v37 = vadd.f32 %v5137_v51, %v676_v16  ;;  %5379 = vmatprep.mubr.msk.bf16.mxu1 %vm444_vm1, %v5632_v29  ;;  %5419 = vmatprep.mubr.msk.bf16.mxu0 %vm444_vm1, %v5633_v30  ;;  %v681_v41 = vadd.f32 %v6047_v40, %v295_v18 }
 0x13f   : > { %v994_v56 = vpop.f32.mrf.mxu1  ;;  %v1381_v52 = vpop.f32.mrf.mxu0 }
 0x140   : > { %v6188_v61 = vadd.f32 %v5177_v54, %v1063_v37  ;;  %v1061_v63 = vadd.f32 %v994_v56, %v674_v22  ;;  %v298_v54 = vld [vmem:[#allocation2 + $0xf0] sm:$0xff]  ;;  %v679_v56 = vadd.f32 %v6055_v46, %v293_v36 }
 0x141   : > { %v5138_v59 = vpop.f32.mrf.mxu1  ;;  %v5178_v26 = vpop.f32.mrf.mxu0 }
 0x142   : > { %v6193_v39 = vadd.f32 %v1381_v52, %v1061_v63  ;;  %v1064_v4 = vadd.f32 %v5138_v59, %v677_v57  ;;  %v296_v63 = vld [vmem:[#allocation2 + $0xe0] sm:$0xff] }
 0x143   : > { %v997_v14 = vpop.f32.mrf.mxu1  ;;  %v1384_v11 = vpop.f32.mrf.mxu0  ;;  %v682_v46 = vadd.f32 %v6067_v50, %v296_v63 }
 0x144   : > { %v6198_v47 = vadd.f32 %v5178_v26, %v1064_v4  ;;  %v1062_v17 = vadd.f32 %v997_v14, %v675_v2  ;;  %v684_v26 = vadd.f32 %v6059_v48, %v298_v54 }
 0x145   : > { %v5141_v29 = vpop.f32.mrf.mxu1  ;;  %v5181_v30 = vpop.f32.mrf.mxu0  ;;  %5380 = vmatmul.mubr.msk.bf16.gmra.mxu1 %vm444_vm1, %v5634_v25  ;;  %5420 = vmatmul.mubr.msk.bf16.gmra.mxu0 %vm444_vm1, %v5635_v12  ;;  %v299_v12 = vld [vmem:[#allocation2 + $0xf8] sm:$0xff] }
 0x146   : > { %v6203_v33 = vadd.f32 %v1384_v11, %v1062_v17  ;;  %v1067_v49 = vadd.f32 %v5141_v29, %v680_v28  ;;  %5383 = vmatprep.mubr.msk.bf16.mxu1 %vm444_vm1, %v5636_v8  ;;  %5423 = vmatprep.mubr.msk.bf16.mxu0 %vm444_vm1, %v5637_v9  ;;  %v685_v48 = vadd.f32 %v6071_v53, %v299_v12 }
 0x147   : > { %v1010_v32 = vpop.f32.mrf.mxu1  ;;  %v1397_v16 = vpop.f32.mrf.mxu0 }
 0x148   : > { %v6208_v43 = vadd.f32 %v5181_v30, %v1067_v49  ;;  %v1065_v51 = vadd.f32 %v1010_v32, %v678_v34  ;;  %v683_v30 = vadd.f32 %v6079_v60, %v297_v45 }
 0x149   : > { %v5142_v22 = vpop.f32.mrf.mxu1  ;;  %v5182_v37 = vpop.f32.mrf.mxu0 }
 0x14a   : > { %v6213_v52 = vadd.f32 %v1397_v16, %v1065_v51  ;;  %v1068_v57 = vadd.f32 %v5142_v22, %v681_v41 }
 0x14b   : > { %v1013_v0 = vpop.f32.mrf.mxu1  ;;  %v1400_v59 = vpop.f32.mrf.mxu0 }
 0x14c   : > { %v6216_v25 = vadd.f32 %v5182_v37, %v1068_v57  ;;  %v1066_v40 = vadd.f32 %v1013_v0, %v679_v56 }
 0x14d   : > { %v5145_v2 = vpop.f32.mrf.mxu1  ;;  %v5185_v4 = vpop.f32.mrf.mxu0  ;;  %5384 = vmatmul.mubr.msk.bf16.gmra.mxu1 %vm444_vm1, %v5638_v24  ;;  %5424 = vmatmul.mubr.msk.bf16.gmra.mxu0 %vm444_vm1, %v5639_v38 }
 0x14e   : > { %v6221_v8 = vadd.f32 %v1400_v59, %v1066_v40  ;;  %v1071_v9 = vadd.f32 %v5145_v2, %v684_v26 }
 0x14f   : > { %v1026_v14 = vpop.f32.mrf.mxu1  ;;  %v1413_v11 = vpop.f32.mrf.mxu0 }
 0x150   : > { %v6224_v28 = vadd.f32 %v5185_v4, %v1071_v9  ;;  %v1069_v17 = vadd.f32 %v1026_v14, %v682_v46 }
 0x151   : > { %v5146_v18 = vpop.f32.mrf.mxu1  ;;  %v5186_v29 = vpop.f32.mrf.mxu0 }
 0x152   : > { %v6227_v34 = vadd.f32 %v1413_v11, %v1069_v17  ;;  %v1072_v49 = vadd.f32 %v5146_v18, %v685_v48 }
 0x153   : > { %v1029_v36 = vpop.f32.mrf.mxu1  ;;  %v1416_v50 = vpop.f32.mrf.mxu0 }
 0x154   : > { %v6229_v32 = vadd.f32 %v5186_v29, %v1072_v49  ;;  %v1070_v16 = vadd.f32 %v1029_v36, %v683_v30 }
 0x155   : > { %v5197_v41 = vpop.f32.mrf.mxu1  ;;  %v5237_v51 = vpop.f32.mrf.mxu0 }
 0x156   : > { %v6231_v54 = vadd.f32 %v1416_v50, %v1070_v16  ;;  %v1817_v53 = vadd.f32 %v5197_v41, %v6088_v7 }
 0x157   : > { %v1688_v22 = vpop.f32.mrf.mxu1  ;;  %v2075_v37 = vpop.f32.mrf.mxu0 }
 0x158   : > { %v6234_v24 = vadd.f32 %v5237_v51, %v1817_v53  ;;  %v1815_v60 = vadd.f32 %v1688_v22, %v6093_v19 }
 0x159   : > { %v5198_v38 = vpop.f32.mrf.mxu1  ;;  %v5238_v56 = vpop.f32.mrf.mxu0 }
 0x15a   : > { %v6237_v57 = vadd.f32 %v2075_v37, %v1815_v60  ;;  %v1818_v63 = vadd.f32 %v5198_v38, %v6098_v42 }
 0x15b   : > { %v1691_v0 = vpop.f32.mrf.mxu1  ;;  %v2078_v59 = vpop.f32.mrf.mxu0 }
 0x15c   : > { %v6240_v26 = vadd.f32 %v5238_v56, %v1818_v63  ;;  %v1816_v40 = vadd.f32 %v1691_v0, %v6103_v55 }
 0x15d   : > { %v5201_v12 = vpop.f32.mrf.mxu1  ;;  %v5241_v7 = vpop.f32.mrf.mxu0 }
 0x15e   : > { %v6243_v2 = vadd.f32 %v2078_v59, %v1816_v40  ;;  %v1821_v4 = vadd.f32 %v5201_v12, %v6108_v62 }
 0x15f   : > { %v1704_v46 = vpop.f32.mrf.mxu1  ;;  %v2091_v19 = vpop.f32.mrf.mxu0 }
 0x160   : > { %v6246_v9 = vadd.f32 %v5241_v7, %v1821_v4  ;;  %v1819_v45 = vadd.f32 %v1704_v46, %v6113_v5 }
 0x161   : > { %v5202_v14 = vpop.f32.mrf.mxu1  ;;  %v5242_v42 = vpop.f32.mrf.mxu0 }
 0x162   : > { %v6249_v11 = vadd.f32 %v2091_v19, %v1819_v45  ;;  %v1822_v48 = vadd.f32 %v5202_v14, %v6118_v13 }
 0x163   : > { %v1707_v17 = vpop.f32.mrf.mxu1  ;;  %v2094_v55 = vpop.f32.mrf.mxu0 }
 0x164   : > { %v6252_v18 = vadd.f32 %v5242_v42, %v1822_v48  ;;  %v1820_v29 = vadd.f32 %v1707_v17, %v6123_v31 }
 0x165   : > { %v5205_v30 = vpop.f32.mrf.mxu1  ;;  %v5245_v62 = vpop.f32.mrf.mxu0 }
 0x166   : > { %v6255_v49 = vadd.f32 %v2094_v55, %v1820_v29  ;;  %v1825_v36 = vadd.f32 %v5205_v30, %v6128_v44 }
 0x167   : > { %v1720_v50 = vpop.f32.mrf.mxu1  ;;  %v2107_v5 = vpop.f32.mrf.mxu0 }
 0x168   : > { %v6258_v16 = vadd.f32 %v5245_v62, %v1825_v36  ;;  %v1823_v41 = vadd.f32 %v1720_v50, %v6133_v58 }
 0x169   : > { %v5206_v51 = vpop.f32.mrf.mxu1  ;;  %v5246_v13 = vpop.f32.mrf.mxu0 }
 0x16a   : > { %v6261_v53 = vadd.f32 %v2107_v5, %v1823_v41  ;;  %v1826_v22 = vadd.f32 %v5206_v51, %v6138_v3 }
 0x16b   : > { %v1723_v37 = vpop.f32.mrf.mxu1  ;;  %v2110_v31 = vpop.f32.mrf.mxu0 }
 0x16c   : > { %v6264_v60 = vadd.f32 %v5246_v13, %v1826_v22  ;;  %v1824_v38 = vadd.f32 %v1723_v37, %v6143_v10 }
 0x16d   : > { %v5209_v56 = vpop.f32.mrf.mxu1  ;;  %v5249_v44 = vpop.f32.mrf.mxu0 }
 0x16e   : > { %v6267_v63 = vadd.f32 %v2110_v31, %v1824_v38  ;;  %v1829_v0 = vadd.f32 %v5209_v56, %v6148_v20 }
 0x16f   : > { %v1736_v59 = vpop.f32.mrf.mxu1  ;;  %v2123_v58 = vpop.f32.mrf.mxu0 }
 0x170   : > { %v6270_v40 = vadd.f32 %v5249_v44, %v1829_v0  ;;  %v1827_v12 = vadd.f32 %v1736_v59, %v6153_v15 }
 0x171   : > { %v5210_v7 = vpop.f32.mrf.mxu1  ;;  %v5250_v3 = vpop.f32.mrf.mxu0 }
 0x172   : > { %v6273_v4 = vadd.f32 %v2123_v58, %v1827_v12  ;;  %v1830_v46 = vadd.f32 %v5210_v7, %v6158_v23 }
 0x173   : > { %v1739_v19 = vpop.f32.mrf.mxu1  ;;  %v2126_v10 = vpop.f32.mrf.mxu0 }
 0x174   : > { %v6276_v45 = vadd.f32 %v5250_v3, %v1830_v46  ;;  %v1828_v14 = vadd.f32 %v1739_v19, %v6163_v1 }
 0x175   : > { %v5213_v42 = vpop.f32.mrf.mxu1  ;;  %v5253_v20 = vpop.f32.mrf.mxu0 }
 0x176   : > { %v6279_v48 = vadd.f32 %v2126_v10, %v1828_v14  ;;  %v1833_v17 = vadd.f32 %v5213_v42, %v6168_v6 }
 0x177   : > { %v1752_v55 = vpop.f32.mrf.mxu1  ;;  %v2139_v15 = vpop.f32.mrf.mxu0 }
 0x178   : > { %v6282_v29 = vadd.f32 %v5253_v20, %v1833_v17  ;;  %v1831_v30 = vadd.f32 %v1752_v55, %v6173_v27 }
 0x179   : > { %v5214_v62 = vpop.f32.mrf.mxu1  ;;  %v5254_v23 = vpop.f32.mrf.mxu0 }
 0x17a   : > { %v6285_v36 = vadd.f32 %v2139_v15, %v1831_v30  ;;  %v1834_v50 = vadd.f32 %v5214_v62, %v6178_v35 }
 0x17b   : > { %v1755_v5 = vpop.f32.mrf.mxu1  ;;  %v2142_v1 = vpop.f32.mrf.mxu0 }
 0x17c   : > { %v6288_v41 = vadd.f32 %v5254_v23, %v1834_v50  ;;  %v1832_v51 = vadd.f32 %v1755_v5, %v6183_v21 }
 0x17d   : > { %v5217_v13 = vpop.f32.mrf.mxu1  ;;  %v5257_v6 = vpop.f32.mrf.mxu0 }
 0x17e   : > { %6758 = vst [vmem:[#allocation3_spill] sm:$0xff] %v6288_v41  ;;  %v6291_v22 = vadd.f32 %v2142_v1, %v1832_v51  ;;  %v1837_v37 = vadd.f32 %v5217_v13, %v6188_v61 }
 0x17f   : > { %v1768_v31 = vpop.f32.mrf.mxu1  ;;  %v2155_v27 = vpop.f32.mrf.mxu0 }
 0x180   : > { %6759 = vst [vmem:[#allocation4_spill] sm:$0xff] %v6291_v22  ;;  %v6294_v38 = vadd.f32 %v5257_v6, %v1837_v37  ;;  %v1835_v56 = vadd.f32 %v1768_v31, %v6193_v39 }
 0x181   : > { %v5218_v44 = vpop.f32.mrf.mxu1  ;;  %v5258_v35 = vpop.f32.mrf.mxu0 }
 0x182   : > { %6760 = vst [vmem:[#allocation5_spill] sm:$0xff] %v6294_v38  ;;  %v6297_v0 = vadd.f32 %v2155_v27, %v1835_v56  ;;  %v1838_v59 = vadd.f32 %v5218_v44, %v6198_v47 }
 0x183   : > { %v1771_v58 = vpop.f32.mrf.mxu1  ;;  %v2158_v21 = vpop.f32.mrf.mxu0 }
 0x184   : > { %6761 = vst [vmem:[#allocation6_spill] sm:$0xff] %v6297_v0  ;;  %v6300_v12 = vadd.f32 %v5258_v35, %v1838_v59  ;;  %v1836_v7 = vadd.f32 %v1771_v58, %v6203_v33 }
 0x185   : > { %v5221_v3 = vpop.f32.mrf.mxu1  ;;  %v5261_v61 = vpop.f32.mrf.mxu0 }
 0x186   : > { %6762 = vst [vmem:[#allocation7_spill] sm:$0xff] %v6300_v12  ;;  %v6303_v46 = vadd.f32 %v2158_v21, %v1836_v7  ;;  %v1841_v19 = vadd.f32 %v5221_v3, %v6208_v43 }
 0x187   : > { %v1784_v10 = vpop.f32.mrf.mxu1  ;;  %v2171_v39 = vpop.f32.mrf.mxu0 }
 0x188   : > { %6763 = vst [vmem:[#allocation8_spill] sm:$0xff] %v6303_v46  ;;  %v6306_v14 = vadd.f32 %v5261_v61, %v1841_v19  ;;  %v1839_v42 = vadd.f32 %v1784_v10, %v6213_v52 }
 0x189   : > { %v5222_v20 = vpop.f32.mrf.mxu1  ;;  %v5262_v47 = vpop.f32.mrf.mxu0 }
 0x18a   : > { %6764 = vst [vmem:[#allocation9_spill] sm:$0xff] %v6306_v14  ;;  %v6309_v17 = vadd.f32 %v2171_v39, %v1839_v42  ;;  %v1842_v55 = vadd.f32 %v5222_v20, %v6216_v25 }
 0x18b   : > { %v1787_v15 = vpop.f32.mrf.mxu1  ;;  %v2174_v33 = vpop.f32.mrf.mxu0 }
 0x18c   : > { %6765 = vst [vmem:[#allocation10_spill] sm:$0xff] %v6309_v17  ;;  %v6312_v30 = vadd.f32 %v5262_v47, %v1842_v55  ;;  %v1840_v62 = vadd.f32 %v1787_v15, %v6221_v8 }
 0x18d   : > { %v5225_v23 = vpop.f32.mrf.mxu1  ;;  %v5265_v43 = vpop.f32.mrf.mxu0 }
 0x18e   : > { %6766 = vst [vmem:[#allocation11_spill] sm:$0xff] %v6312_v30  ;;  %v6315_v50 = vadd.f32 %v2174_v33, %v1840_v62  ;;  %v1845_v5 = vadd.f32 %v5225_v23, %v6224_v28 }
 0x18f   : > { %v1800_v1 = vpop.f32.mrf.mxu1  ;;  %v2187_v52 = vpop.f32.mrf.mxu0 }
 0x190   : > { %6767 = vst [vmem:[#allocation12_spill] sm:$0xff] %v6315_v50  ;;  %v6318_v51 = vadd.f32 %v5265_v43, %v1845_v5  ;;  %v1843_v13 = vadd.f32 %v1800_v1, %v6227_v34 }
 0x191   : > { %v5226_v6 = vpop.f32.mrf.mxu1  ;;  %v5266_v25 = vpop.f32.mrf.mxu0 }
 0x192   : > { %6768 = vst [vmem:[#allocation13_spill] sm:$0xff] %v6318_v51  ;;  %v6321_v37 = vadd.f32 %v2187_v52, %v1843_v13  ;;  %v1846_v31 = vadd.f32 %v5226_v6, %v6229_v32 }
 0x193   : > { %v1803_v27 = vpop.f32.mrf.mxu1  ;;  %v2190_v8 = vpop.f32.mrf.mxu0 }
 0x194   : > { %6769 = vst [vmem:[#allocation14_spill] sm:$0xff] %v6321_v37  ;;  %v6324_v56 = vadd.f32 %v5266_v25, %v1846_v31  ;;  %v1844_v44 = vadd.f32 %v1803_v27, %v6231_v54 }
 0x195   : > { %v5277_v35 = vpop.f32.mrf.mxu1  ;;  %v6327_v28 = vpop.f32.mrf.mxu0 }
 0x196   : > { %6770 = vst [vmem:[#allocation15_spill] sm:$0xff] %v6324_v56  ;;  %v6329_v59 = vadd.f32 %v2190_v8, %v1844_v44 }
 0x197   : > { %v2462_v58 = vpop.f32.mrf.mxu1  ;;  %v6331_v21 = vpop.f32.mrf.mxu0 }
 0x198   : > { %6771 = vst [vmem:[#allocation16_spill] sm:$0xff] %v6329_v59 }
 0x199   : > { %v6333_v34 = vpop.f32.mrf.mxu1  ;;  %v6335_v7 = vpop.f32.mrf.mxu0 }
 0x19b   : > { %v6337_v3 = vpop.f32.mrf.mxu1  ;;  %v6339_v32 = vpop.f32.mrf.mxu0 }
 0x19d   : > { %v6341_v61 = vpop.f32.mrf.mxu1  ;;  %v6343_v19 = vpop.f32.mrf.mxu0 }
 0x19f   : > { %v6345_v54 = vpop.f32.mrf.mxu1  ;;  %v6347_v10 = vpop.f32.mrf.mxu0 }
 0x1a1   : > { %v6349_v39 = vpop.f32.mrf.mxu1  ;;  %v6351_v42 = vpop.f32.mrf.mxu0 }
 0x1a3   : > { %v6353_v20 = vpop.f32.mrf.mxu1  ;;  %v6355_v47 = vpop.f32.mrf.mxu0 }
 0x1a5   : > { %v6357_v55 = vpop.f32.mrf.mxu1  ;;  %v6359_v15 = vpop.f32.mrf.mxu0 }
 0x1a7   : > { %v6361_v33 = vpop.f32.mrf.mxu1  ;;  %v6363_v62 = vpop.f32.mrf.mxu0 }
 0x1a9   : > { %v6365_v23 = vpop.f32.mrf.mxu1  ;;  %v6367_v43 = vpop.f32.mrf.mxu0 }
 0x1ab   : > { %v6369_v5 = vpop.f32.mrf.mxu1  ;;  %v6371_v1 = vpop.f32.mrf.mxu0 }
 0x1ad   : > { %v6373_v52 = vpop.f32.mrf.mxu1  ;;  %v6375_v13 = vpop.f32.mrf.mxu0 }
 0x1af   : > { %v6377_v6 = vpop.f32.mrf.mxu1  ;;  %v6379_v25 = vpop.f32.mrf.mxu0 }
 0x1b1   : > { %v6381_v31 = vpop.f32.mrf.mxu1  ;;  %v6383_v27 = vpop.f32.mrf.mxu0 }
 0x1b3   : > { %v6385_v8 = vpop.f32.mrf.mxu1  ;;  %v6387_v44 = vpop.f32.mrf.mxu0 }
 0x1b5   : > { %v6389_v59 = vpop.f32.mrf.mxu1  ;;  %v6391_v56 = vpop.f32.mrf.mxu0 }
 0x1b7   : > { %v6393_v37 = vpop.f32.mrf.mxu1  ;;  %v6395_v51 = vpop.f32.mrf.mxu0 }
 0x1b8   : > { %6772 = vst [vmem:[#allocation17_spill] sm:$0xff] %v6395_v51 }
 0x1b9   : > { %v6397_v50 = vpop.f32.mrf.mxu1  ;;  %v6399_v30 = vpop.f32.mrf.mxu0 }
 0x1ba   : > { %6773 = vst [vmem:[#allocation18_spill] sm:$0xff] %v6397_v50  ;;  %6774 = vst [vmem:[#allocation19_spill] sm:$0xff] %v6399_v30 }
 0x1bb   : > { %v6401_v17 = vpop.f32.mrf.mxu1  ;;  %v6403_v14 = vpop.f32.mrf.mxu0 }
 0x1bc   : > { %6775 = vst [vmem:[#allocation20_spill] sm:$0xff] %v6401_v17  ;;  %6776 = vst [vmem:[#allocation21_spill] sm:$0xff] %v6403_v14 }
 0x1bd   : > { %v6405_v46 = vpop.f32.mrf.mxu1  ;;  %v6407_v12 = vpop.f32.mrf.mxu0 }
 0x1be   : > { %6777 = vst [vmem:[#allocation22_spill] sm:$0xff] %v6405_v46  ;;  %6778 = vst [vmem:[#allocation23_spill] sm:$0xff] %v6407_v12 }
 0x1bf   : > { %v6409_v0 = vpop.f32.mrf.mxu1  ;;  %v6411_v38 = vpop.f32.mrf.mxu0 }
 0x1c0   : > { %6779 = vst [vmem:[#allocation24_spill] sm:$0xff] %v6409_v0  ;;  %6780 = vst [vmem:[#allocation25_spill] sm:$0xff] %v6411_v38 }
 0x1c1   : > { %v6413_v22 = vpop.f32.mrf.mxu1  ;;  %v6415_v41 = vpop.f32.mrf.mxu0 }
 0x1c2   : > { %6781 = vst [vmem:[#allocation26_spill] sm:$0xff] %v6413_v22  ;;  %6782 = vst [vmem:[#allocation27_spill] sm:$0xff] %v6415_v41 }
 0x1c3   : > { %v6417_v51 = vpop.f32.mrf.mxu1  ;;  %v6419_v50 = vpop.f32.mrf.mxu0 }
 0x1c4   : > { %6783 = vst [vmem:[#allocation28_spill] sm:$0xff] %v6417_v51  ;;  %6784 = vst [vmem:[#allocation29_spill] sm:$0xff] %v6419_v50 }
 0x1c5   : > { %v6421_v30 = vpop.f32.mrf.mxu1  ;;  %v6423_v17 = vpop.f32.mrf.mxu0 }
 0x1c6   : > { %6785 = vst [vmem:[#allocation30_spill] sm:$0xff] %v6421_v30  ;;  %6786 = vst [vmem:[#allocation31_spill] sm:$0xff] %v6423_v17  ;;  %v2591_v17 = vadd.f32 %v5277_v35, %v6234_v24  ;;  %v2590_v24 = vadd.f32 %v6337_v3, %v6243_v2 }
 0x1c7   : > { %v6425_v14 = vpop.f32.mrf.mxu1  ;;  %v6427_v46 = vpop.f32.mrf.mxu0 }
 0x1c8   : > { %6787 = vst [vmem:[#allocation32_spill] sm:$0xff] %v6425_v14  ;;  %6788 = vst [vmem:[#allocation33_spill] sm:$0xff] %v6427_v46 }
 0x1c9   : > { %v6429_v12 = vpop.f32.mrf.mxu1  ;;  %v6431_v0 = vpop.f32.mrf.mxu0 }
 0x1ca   : > { %6789 = vst [vmem:[#allocation34_spill] sm:$0xff] %v6429_v12  ;;  %6790 = vst [vmem:[#allocation35_spill] sm:$0xff] %v6431_v0  ;;  %v2589_v0 = vadd.f32 %v2462_v58, %v6237_v57  ;;  %v2595_v58 = vadd.f32 %v6341_v61, %v6246_v9  ;;  %v2596_v9 = vadd.f32 %v6349_v39, %v6252_v18 }
 0x1cb   : > { %v6433_v38 = vpop.f32.mrf.mxu1  ;;  %v6435_v22 = vpop.f32.mrf.mxu0  ;;  %v2599_v18 = vadd.f32 %v6357_v55, %v6258_v16  ;;  %v2600_v16 = vadd.f32 %v6365_v23, %v6264_v60  ;;  %v2603_v60 = vadd.f32 %v6373_v52, %v6270_v40  ;;  %v2604_v40 = vadd.f32 %v6381_v31, %v6276_v45 }
 0x1cc   : > { %6791 = vst [vmem:[#allocation36_spill] sm:$0xff] %v6433_v38  ;;  %6792 = vst [vmem:[#allocation37_spill] sm:$0xff] %v6435_v22  ;;  %v2978_v22 = vadd.f32 %v6327_v28, %v2591_v17  ;;  %v2983_v61 = vadd.f32 %v6351_v42, %v2596_v9  ;;  %v2607_v45 = vadd.f32 %v6389_v59, %v6282_v29  ;;  %v6801_v29 = vld [vmem:[#allocation3_spill] sm:$0xff]  ;;  %v6802_v59 = vld [vmem:[#allocation18_spill] sm:$0xff] }
 0x1cd   : > { %v6437_v41 = vpop.f32.mrf.mxu1  ;;  %v6439_v51 = vpop.f32.mrf.mxu0 }
 0x1ce   : > { %6793 = vst [vmem:[#allocation38_spill] sm:$0xff] %v6437_v41  ;;  %6794 = vst [vmem:[#allocation39_spill] sm:$0xff] %v6439_v51  ;;  %v2592_v51 = vadd.f32 %v6333_v34, %v6240_v26  ;;  %v2977_v26 = vadd.f32 %v6339_v32, %v2590_v24 }
 0x1cf   : > { %v6441_v50 = vpop.f32.mrf.mxu1  ;;  %v6443_v30 = vpop.f32.mrf.mxu0 }
 0x1d0   : > { %6795 = vst [vmem:[#allocation40_spill] sm:$0xff] %v6441_v50  ;;  %6796 = vst [vmem:[#allocation41_spill] sm:$0xff] %v6443_v30  ;;  %v2976_v30 = vadd.f32 %v6331_v21, %v2589_v0  ;;  %v2979_v57 = vadd.f32 %v6335_v7, %v2592_v51  ;;  %v2593_v0 = vadd.f32 %v6345_v54, %v6249_v11 }
 0x1d1   : > { %v6446_v14 = vpop.f32.mrf.mxu1  ;;  %v6448_v46 = vpop.f32.mrf.mxu0  ;;  %v2982_v51 = vadd.f32 %v6343_v19, %v2595_v58  ;;  %v2594_v11 = vadd.f32 %v6353_v20, %v6255_v49  ;;  %v2597_v49 = vadd.f32 %v6361_v33, %v6261_v53  ;;  %v2598_v53 = vadd.f32 %v6369_v5, %v6267_v63 }
 0x1d2   : > { %6797 = vst [vmem:[#allocation42_spill] sm:$0xff] %v6446_v14  ;;  %6798 = vst [vmem:[#allocation43_spill] sm:$0xff] %v6448_v46  ;;  %v2980_v7 = vadd.f32 %v6347_v10, %v2593_v0  ;;  %v2601_v63 = vadd.f32 %v6377_v6, %v6273_v4  ;;  %v2602_v4 = vadd.f32 %v6385_v8, %v6279_v48 }
 0x1d3   : > { %v6451_v12 = vpop.f32.mrf.mxu1  ;;  %v6453_v38 = vpop.f32.mrf.mxu0  ;;  %v2981_v39 = vadd.f32 %v6355_v47, %v2594_v11  ;;  %v2605_v48 = vadd.f32 %v6393_v37, %v6285_v36  ;;  %v6804_v36 = vld [vmem:[#allocation4_spill] sm:$0xff] }
 0x1d4   : > { %6799 = vst [vmem:[#allocation44_spill] sm:$0xff] %v6451_v12  ;;  %6800 = vst [vmem:[#allocation45_spill] sm:$0xff] %v6453_v38  ;;  %v6805_v37 = vld [vmem:[#allocation20_spill] sm:$0xff] }
 0x1d5   : > { %v5357_v50 = vpop.f32.mrf.mxu1  ;;  %v5397_v41 = vpop.f32.mrf.mxu0 }
 0x1d6   : > { %v3365_v35 = vadd.f32 %v5357_v50, %v2978_v22 }
 0x1d7   : > { %v3236_v46 = vpop.f32.mrf.mxu1  ;;  %v3623_v14 = vpop.f32.mrf.mxu0 }
 0x1d8   : > { %v3752_v38 = vadd.f32 %v5397_v41, %v3365_v35  ;;  %v3363_v17 = vadd.f32 %v3236_v46, %v2976_v30 }
 0x1d9   : > { %v5358_v28 = vpop.f32.mrf.mxu1  ;;  %v5398_v12 = vpop.f32.mrf.mxu0 }
 0x1da   : > { %3784 = vst.msk [vmem:[#allocation2 + $0x10] sm:$0xff] %vm444_vm1, %v3752_v38  ;;  %v3750_v2 = vadd.f32 %v3623_v14, %v3363_v17  ;;  %v3366_v22 = vadd.f32 %v5358_v28, %v2979_v57  ;;  %v2986_v57 = vadd.f32 %v6359_v15, %v2599_v18  ;;  %v2984_v28 = vadd.f32 %v6363_v62, %v2597_v49  ;;  %v6803_v49 = vld [vmem:[#allocation17_spill] sm:$0xff] }
 0x1db   : > { %v3239_v50 = vpop.f32.mrf.mxu1  ;;  %v3626_v21 = vpop.f32.mrf.mxu0 }
 0x1dc   : > { %3782 = vst.msk [vmem:[#allocation2] sm:$0xff] %vm444_vm1, %v3750_v2  ;;  %v3753_v41 = vadd.f32 %v5398_v12, %v3366_v22  ;;  %v3364_v46 = vadd.f32 %v3239_v50, %v2977_v26  ;;  %v2987_v2 = vadd.f32 %v6367_v43, %v2600_v16  ;;  %v6806_v16 = vld [vmem:[#allocation19_spill] sm:$0xff] }
 0x1dd   : > { %v5361_v30 = vpop.f32.mrf.mxu1  ;;  %v5401_v34 = vpop.f32.mrf.mxu0 }
 0x1de   : > { %3785 = vst.msk [vmem:[#allocation2 + $0x18] sm:$0xff] %vm444_vm1, %v3753_v41  ;;  %v3751_v38 = vadd.f32 %v3626_v21, %v3364_v46  ;;  %v3369_v14 = vadd.f32 %v5361_v30, %v2982_v51  ;;  %v2985_v21 = vadd.f32 %v6371_v1, %v2598_v53  ;;  %v2990_v41 = vadd.f32 %v6375_v13, %v2603_v60  ;;  %v6811_v60 = vld [vmem:[#allocation24_spill] sm:$0xff] }
 0x1df   : > { %v3252_v3 = vpop.f32.mrf.mxu1  ;;  %v3639_v32 = vpop.f32.mrf.mxu0 }
 0x1e0   : > { %3783 = vst.msk [vmem:[#allocation2 + $0x8] sm:$0xff] %vm444_vm1, %v3751_v38  ;;  %v3756_v12 = vadd.f32 %v5401_v34, %v3369_v14  ;;  %v3367_v19 = vadd.f32 %v3252_v3, %v2980_v7  ;;  %v2988_v34 = vadd.f32 %v6379_v25, %v2601_v63  ;;  %v2991_v38 = vadd.f32 %v6383_v27, %v2604_v40  ;;  %v6812_v63 = vld [vmem:[#allocation23_spill] sm:$0xff] }
 0x1e1   : > { %v5362_v54 = vpop.f32.mrf.mxu1  ;;  %v5402_v10 = vpop.f32.mrf.mxu0 }
 0x1e2   : > { %3788 = vst.msk [vmem:[#allocation2 + $0x30] sm:$0xff] %vm444_vm1, %v3756_v12  ;;  %v3754_v20 = vadd.f32 %v3639_v32, %v3367_v19  ;;  %v3370_v24 = vadd.f32 %v5362_v54, %v2983_v61  ;;  %v2989_v32 = vadd.f32 %v6387_v44, %v2602_v4  ;;  %v2994_v12 = vadd.f32 %v6391_v56, %v2607_v45  ;;  %v6817_v4 = vld [vmem:[#allocation28_spill] sm:$0xff]  ;;  %v6818_v45 = vld [vmem:[#allocation27_spill] sm:$0xff] }
 0x1e3   : > { %v3255_v35 = vpop.f32.mrf.mxu1  ;;  %v3642_v42 = vpop.f32.mrf.mxu0  ;;  %v2608_v19 = vadd.f32 %v6802_v59, %v6801_v29  ;;  %v6823_v29 = vld [vmem:[#allocation32_spill] sm:$0xff] }
 0x1e4   : > { %3786 = vst.msk [vmem:[#allocation2 + $0x20] sm:$0xff] %vm444_vm1, %v3754_v20  ;;  %v3757_v55 = vadd.f32 %v5402_v10, %v3370_v24  ;;  %v3368_v58 = vadd.f32 %v3255_v35, %v2981_v39  ;;  %v2992_v20 = vadd.f32 %v6803_v49, %v2605_v48  ;;  %v2606_v24 = vadd.f32 %v6805_v37, %v6804_v36  ;;  %v6826_v36 = vld [vmem:[#allocation34_spill] sm:$0xff] }
 0x1e5   : > { %v5365_v17 = vpop.f32.mrf.mxu1  ;;  %v5405_v47 = vpop.f32.mrf.mxu0 }
 0x1e6   : > { %3789 = vst.msk [vmem:[#allocation2 + $0x38] sm:$0xff] %vm444_vm1, %v3757_v55  ;;  %v3755_v33 = vadd.f32 %v3642_v42, %v3368_v58  ;;  %v3373_v26 = vadd.f32 %v5365_v17, %v2986_v57  ;;  %v2995_v55 = vadd.f32 %v6806_v16, %v2608_v19  ;;  %v6807_v58 = vld [vmem:[#allocation5_spill] sm:$0xff]  ;;  %v6808_v17 = vld [vmem:[#allocation22_spill] sm:$0xff] }
 0x1e7   : > { %v3268_v0 = vpop.f32.mrf.mxu1  ;;  %v3655_v15 = vpop.f32.mrf.mxu0 }
 0x1e8   : > { %3787 = vst.msk [vmem:[#allocation2 + $0x28] sm:$0xff] %vm444_vm1, %v3755_v33  ;;  %v3760_v23 = vadd.f32 %v5405_v47, %v3373_v26  ;;  %v3371_v22 = vadd.f32 %v3268_v0, %v2984_v28  ;;  %v2611_v47 = vadd.f32 %v6808_v17, %v6807_v58  ;;  %v6809_v0 = vld [vmem:[#allocation21_spill] sm:$0xff]  ;;  %v6829_v58 = vld [vmem:[#allocation36_spill] sm:$0xff] }
 0x1e9   : > { %v5366_v50 = vpop.f32.mrf.mxu1  ;;  %v5406_v62 = vpop.f32.mrf.mxu0 }
 0x1ea   : > { %3792 = vst.msk [vmem:[#allocation2 + $0x50] sm:$0xff] %vm444_vm1, %v3760_v23  ;;  %v3758_v5 = vadd.f32 %v3655_v15, %v3371_v22  ;;  %v3374_v51 = vadd.f32 %v5366_v50, %v2987_v2  ;;  %v2993_v15 = vadd.f32 %v6809_v0, %v2606_v24  ;;  %v6810_v2 = vld [vmem:[#allocation6_spill] sm:$0xff] }
 0x1eb   : > { %v3271_v9 = vpop.f32.mrf.mxu1  ;;  %v3658_v43 = vpop.f32.mrf.mxu0  ;;  %v2609_v23 = vadd.f32 %v6811_v60, %v6810_v2  ;;  %v6832_v2 = vld [vmem:[#allocation38_spill] sm:$0xff] }
 0x1ec   : > { %3790 = vst.msk [vmem:[#allocation2 + $0x40] sm:$0xff] %vm444_vm1, %v3758_v5  ;;  %v3761_v52 = vadd.f32 %v5406_v62, %v3374_v51  ;;  %v3372_v46 = vadd.f32 %v3271_v9, %v2985_v21  ;;  %v2998_v5 = vadd.f32 %v6812_v63, %v2611_v47  ;;  %v6813_v51 = vld [vmem:[#allocation7_spill] sm:$0xff]  ;;  %v6814_v9 = vld [vmem:[#allocation26_spill] sm:$0xff] }
 0x1ed   : > { %v5369_v30 = vpop.f32.mrf.mxu1  ;;  %v5409_v1 = vpop.f32.mrf.mxu0 }
 0x1ee   : > { %3793 = vst.msk [vmem:[#allocation2 + $0x58] sm:$0xff] %vm444_vm1, %v3761_v52  ;;  %v3759_v6 = vadd.f32 %v3658_v43, %v3372_v46  ;;  %v3377_v7 = vadd.f32 %v5369_v30, %v2990_v41  ;;  %v2612_v43 = vadd.f32 %v6814_v9, %v6813_v51  ;;  %v6815_v30 = vld [vmem:[#allocation25_spill] sm:$0xff]  ;;  %v6835_v51 = vld [vmem:[#allocation40_spill] sm:$0xff] }
 0x1ef   : > { %v3284_v11 = vpop.f32.mrf.mxu1  ;;  %v3671_v13 = vpop.f32.mrf.mxu0 }
 0x1f0   : > { %3791 = vst.msk [vmem:[#allocation2 + $0x48] sm:$0xff] %vm444_vm1, %v3759_v6  ;;  %v3764_v31 = vadd.f32 %v5409_v1, %v3377_v7  ;;  %v3375_v14 = vadd.f32 %v3284_v11, %v2988_v34  ;;  %v2996_v1 = vadd.f32 %v6815_v30, %v2609_v23  ;;  %v6816_v34 = vld [vmem:[#allocation8_spill] sm:$0xff] }
 0x1f1   : > { %v5370_v3 = vpop.f32.mrf.mxu1  ;;  %v5410_v25 = vpop.f32.mrf.mxu0  ;;  %v2610_v6 = vadd.f32 %v6817_v4, %v6816_v34  ;;  %v6838_v34 = vld [vmem:[#allocation42_spill] sm:$0xff] }
 0x1f2   : > { %3796 = vst.msk [vmem:[#allocation2 + $0x70] sm:$0xff] %vm444_vm1, %v3764_v31  ;;  %v3762_v8 = vadd.f32 %v3671_v13, %v3375_v14  ;;  %v3378_v61 = vadd.f32 %v5370_v3, %v2991_v38  ;;  %v2999_v31 = vadd.f32 %v6818_v45, %v2612_v43  ;;  %v6819_v14 = vld [vmem:[#allocation9_spill] sm:$0xff]  ;;  %v6820_v3 = vld [vmem:[#allocation30_spill] sm:$0xff] }
 0x1f3   : > { %v3287_v18 = vpop.f32.mrf.mxu1  ;;  %v3674_v27 = vpop.f32.mrf.mxu0 }
 0x1f4   : > { %3794 = vst.msk [vmem:[#allocation2 + $0x60] sm:$0xff] %vm444_vm1, %v3762_v8  ;;  %v3765_v54 = vadd.f32 %v5410_v25, %v3378_v61  ;;  %v3376_v10 = vadd.f32 %v3287_v18, %v2989_v32  ;;  %v2615_v25 = vadd.f32 %v6820_v3, %v6819_v14  ;;  %v6821_v18 = vld [vmem:[#allocation29_spill] sm:$0xff]  ;;  %v6841_v14 = vld [vmem:[#allocation44_spill] sm:$0xff] }
 0x1f5   : > { %v5373_v39 = vpop.f32.mrf.mxu1  ;;  %v5413_v44 = vpop.f32.mrf.mxu0 }
 0x1f6   : > { %3797 = vst.msk [vmem:[#allocation2 + $0x78] sm:$0xff] %vm444_vm1, %v3765_v54  ;;  %v3763_v35 = vadd.f32 %v3674_v27, %v3376_v10  ;;  %v3381_v42 = vadd.f32 %v5373_v39, %v2994_v12  ;;  %v2997_v27 = vadd.f32 %v6821_v18, %v2610_v6  ;;  %v6822_v12 = vld [vmem:[#allocation10_spill] sm:$0xff] }
 0x1f7   : > { %v3300_v57 = vpop.f32.mrf.mxu1  ;;  %v3687_v56 = vpop.f32.mrf.mxu0  ;;  %v2613_v59 = vadd.f32 %v6823_v29, %v6822_v12 }
 0x1f8   : > { %3795 = vst.msk [vmem:[#allocation2 + $0x68] sm:$0xff] %vm444_vm1, %v3763_v35  ;;  %v3768_v28 = vadd.f32 %v5413_v44, %v3381_v42  ;;  %v3379_v53 = vadd.f32 %v3300_v57, %v2992_v20  ;;  %v6824_v44 = vld [vmem:[#allocation31_spill] sm:$0xff] }
 0x1f9   : > { %v5374_v33 = vpop.f32.mrf.mxu1  ;;  %v5414_v26 = vpop.f32.mrf.mxu0  ;;  %v3002_v49 = vadd.f32 %v6824_v44, %v2615_v25  ;;  %v6825_v20 = vld [vmem:[#allocation11_spill] sm:$0xff] }
 0x1fa   : > { %3800 = vst.msk [vmem:[#allocation2 + $0x90] sm:$0xff] %vm444_vm1, %v3768_v28  ;;  %v3766_v22 = vadd.f32 %v3687_v56, %v3379_v53  ;;  %v3382_v50 = vadd.f32 %v5374_v33, %v2995_v55  ;;  %v2616_v37 = vadd.f32 %v6826_v36, %v6825_v20  ;;  %v6827_v56 = vld [vmem:[#allocation33_spill] sm:$0xff]  ;;  %v6828_v55 = vld [vmem:[#allocation12_spill] sm:$0xff] }
 0x1fb   : > { %v3303_v62 = vpop.f32.mrf.mxu1  ;;  %v3690_v21 = vpop.f32.mrf.mxu0  ;;  %v3000_v16 = vadd.f32 %v6827_v56, %v2613_v59  ;;  %v2614_v17 = vadd.f32 %v6829_v58, %v6828_v55 }
 0x1fc   : > { %3798 = vst.msk [vmem:[#allocation2 + $0x80] sm:$0xff] %vm444_vm1, %v3766_v22  ;;  %v3769_v41 = vadd.f32 %v5414_v26, %v3382_v50  ;;  %v3380_v40 = vadd.f32 %v3303_v62, %v2993_v15  ;;  %v6830_v26 = vld [vmem:[#allocation35_spill] sm:$0xff]  ;;  %v6831_v15 = vld [vmem:[#allocation13_spill] sm:$0xff] }
 0x1fd   : > { %v5377_v52 = vpop.f32.mrf.mxu1  ;;  %v5417_v46 = vpop.f32.mrf.mxu0  ;;  %v3003_v0 = vadd.f32 %v6830_v26, %v2616_v37  ;;  %v2619_v60 = vadd.f32 %v6832_v2, %v6831_v15 }
 0x1fe   : > { %3801 = vst.msk [vmem:[#allocation2 + $0x98] sm:$0xff] %vm444_vm1, %v3769_v41  ;;  %v3767_v7 = vadd.f32 %v3690_v21, %v3380_v40  ;;  %v3385_v11 = vadd.f32 %v5377_v52, %v2998_v5  ;;  %v6833_v21 = vld [vmem:[#allocation37_spill] sm:$0xff]  ;;  %v6834_v5 = vld [vmem:[#allocation14_spill] sm:$0xff] }
 0x1ff   : > { %v3316_v13 = vpop.f32.mrf.mxu1  ;;  %v3703_v38 = vpop.f32.mrf.mxu0  ;;  %v3001_v63 = vadd.f32 %v6833_v21, %v2614_v17  ;;  %v2617_v9 = vadd.f32 %v6835_v51, %v6834_v5 }
 0x200   : > { %3799 = vst.msk [vmem:[#allocation2 + $0x88] sm:$0xff] %vm444_vm1, %v3767_v7  ;;  %v3772_v32 = vadd.f32 %v5417_v46, %v3385_v11  ;;  %v3383_v48 = vadd.f32 %v3316_v13, %v2996_v1  ;;  %v6836_v46 = vld [vmem:[#allocation39_spill] sm:$0xff] }
 0x201   : > { %v5378_v8 = vpop.f32.mrf.mxu1  ;;  %v5418_v61 = vpop.f32.mrf.mxu0  ;;  %v3006_v30 = vadd.f32 %v6836_v46, %v2619_v60  ;;  %v6837_v1 = vld [vmem:[#allocation15_spill] sm:$0xff] }
 0x202   : > { %3804 = vst.msk [vmem:[#allocation2 + $0xb0] sm:$0xff] %vm444_vm1, %v3772_v32  ;;  %v3770_v19 = vadd.f32 %v3703_v38, %v3383_v48  ;;  %v3386_v54 = vadd.f32 %v5378_v8, %v2999_v31  ;;  %v2620_v4 = vadd.f32 %v6838_v34, %v6837_v1  ;;  %v6839_v38 = vld [vmem:[#allocation41_spill] sm:$0xff]  ;;  %v6840_v31 = vld [vmem:[#allocation16_spill] sm:$0xff] }
 0x203   : > { %v3319_v10 = vpop.f32.mrf.mxu1  ;;  %v3706_v39 = vpop.f32.mrf.mxu0  ;;  %v3004_v45 = vadd.f32 %v6839_v38, %v2617_v9  ;;  %v2618_v3 = vadd.f32 %v6841_v14, %v6840_v31 }
 0x204   : > { %3802 = vst.msk [vmem:[#allocation2 + $0xa0] sm:$0xff] %vm444_vm1, %v3770_v19  ;;  %v3773_v24 = vadd.f32 %v5418_v61, %v3386_v54  ;;  %v3384_v35 = vadd.f32 %v3319_v10, %v2997_v27  ;;  %v6842_v61 = vld [vmem:[#allocation43_spill] sm:$0xff]  ;;  %v6843_v19 = vld [vmem:[#allocation45_spill] sm:$0xff] }
 0x205   : > { %v5381_v42 = vpop.f32.mrf.mxu1  ;;  %v5421_v57 = vpop.f32.mrf.mxu0  ;;  %v3007_v18 = vadd.f32 %v6842_v61, %v2620_v4  ;;  %v3005_v54 = vadd.f32 %v6843_v19, %v2618_v3 }
 0x206   : > { %3805 = vst.msk [vmem:[#allocation2 + $0xb8] sm:$0xff] %vm444_vm1, %v3773_v24  ;;  %v3771_v47 = vadd.f32 %v3706_v39, %v3384_v35  ;;  %v3389_v28 = vadd.f32 %v5381_v42, %v3002_v49 }
 0x207   : > { %v3332_v53 = vpop.f32.mrf.mxu1  ;;  %v3719_v33 = vpop.f32.mrf.mxu0 }
 0x208   : > { %3803 = vst.msk [vmem:[#allocation2 + $0xa8] sm:$0xff] %vm444_vm1, %v3771_v47  ;;  %v3776_v23 = vadd.f32 %v5421_v57, %v3389_v28  ;;  %v3387_v22 = vadd.f32 %v3332_v53, %v3000_v16 }
 0x209   : > { %v5382_v50 = vpop.f32.mrf.mxu1  ;;  %v5422_v62 = vpop.f32.mrf.mxu0 }
 0x20a   : > { %3808 = vst.msk [vmem:[#allocation2 + $0xd0] sm:$0xff] %vm444_vm1, %v3776_v23  ;;  %v3774_v43 = vadd.f32 %v3719_v33, %v3387_v22  ;;  %v3390_v41 = vadd.f32 %v5382_v50, %v3003_v0 }
 0x20b   : > { %v3335_v40 = vpop.f32.mrf.mxu1  ;;  %v3722_v52 = vpop.f32.mrf.mxu0 }
 0x20c   : > { %3806 = vst.msk [vmem:[#allocation2 + $0xc0] sm:$0xff] %vm444_vm1, %v3774_v43  ;;  %v3777_v6 = vadd.f32 %v5422_v62, %v3390_v41  ;;  %v3388_v7 = vadd.f32 %v3335_v40, %v3001_v63 }
 0x20d   : > { %v5385_v11 = vpop.f32.mrf.mxu1  ;;  %v5425_v13 = vpop.f32.mrf.mxu0 }
 0x20e   : > { %3809 = vst.msk [vmem:[#allocation2 + $0xd8] sm:$0xff] %vm444_vm1, %v3777_v6  ;;  %v3775_v25 = vadd.f32 %v3722_v52, %v3388_v7  ;;  %v3393_v32 = vadd.f32 %v5385_v11, %v3006_v30 }
 0x20f   : > { %v3348_v48 = vpop.f32.mrf.mxu1  ;;  %v3735_v8 = vpop.f32.mrf.mxu0 }
 0x210   : > { %3807 = vst.msk [vmem:[#allocation2 + $0xc8] sm:$0xff] %vm444_vm1, %v3775_v25  ;;  %v3780_v27 = vadd.f32 %v5425_v13, %v3393_v32  ;;  %v3391_v12 = vadd.f32 %v3348_v48, %v3004_v45 }
 0x211   : > { %v5386_v29 = vpop.f32.mrf.mxu1  ;;  %v5426_v59 = vpop.f32.mrf.mxu0 }
 0x212   : > { %3812 = vst.msk [vmem:[#allocation2 + $0xf0] sm:$0xff] %vm444_vm1, %v3780_v27  ;;  %v3778_v10 = vadd.f32 %v3735_v8, %v3391_v12  ;;  %v3394_v39 = vadd.f32 %v5386_v29, %v3007_v18 }
 0x213   : > { %v3351_v44 = vpop.f32.mrf.mxu1  ;;  %v3738_v36 = vpop.f32.mrf.mxu0 }
 0x214   : > { %3810 = vst.msk [vmem:[#allocation2 + $0xe0] sm:$0xff] %vm444_vm1, %v3778_v10  ;;  %v3781_v49 = vadd.f32 %v5426_v59, %v3394_v39  ;;  %v3392_v20 = vadd.f32 %v3351_v44, %v3005_v54  ;;  %3817 = sbr.rel (%p4815_p6) target bundleno = 567 (0x237), region = 40 }
 0x216   : > { %3813 = vst.msk [vmem:[#allocation2 + $0xf8] sm:$0xff] %vm444_vm1, %v3781_v49  ;;  %v3779_v37 = vadd.f32 %v3738_v36, %v3392_v20 }
 0x218   : > { %3811 = vst.msk [vmem:[#allocation2 + $0xe8] sm:$0xff] %vm444_vm1, %v3779_v37 }
 0x219   : > { %v3818_v24 = vld [vmem:[#allocation2] sm:$0xff]  ;;  %v3819_v42 = vld [vmem:[#allocation2 + $0x8] sm:$0xff]  ;;  %v3820_v16 = vld [vmem:[#allocation2 + $0x10] sm:$0xff]  ;;  %vm4049_vm2 = vcmask 519168  }
 0x21a   : > { %v6583_v35 = vld [vmem:[%s6756_s2] ss:$0 sm:$0xff]  ;;  %v3821_v55 = vld [vmem:[#allocation2 + $0x18] sm:$0xff]  ;;  %v3823_v53 = vld [vmem:[#allocation2 + $0x28] sm:$0xff] }
 0x21b   : > { %v3857_v57 = vadd.f32 %v6583_v35, %v3818_v24  ;;  %v3858_v56 = vadd.f32 %v6583_v35, %v3819_v42  ;;  %v3822_v58 = vld [vmem:[#allocation2 + $0x20] sm:$0xff]  ;;  %v3859_v17 = vadd.f32 %v6583_v35, %v3820_v16  ;;  %v3860_v47 = vadd.f32 %v6583_v35, %v3821_v55  ;;  %v3824_v33 = vld [vmem:[#allocation2 + $0x30] sm:$0xff]  ;;  %v3825_v26 = vld [vmem:[#allocation2 + $0x38] sm:$0xff] }
 0x21c   : > { %v3861_v28 = vadd.f32 %v6583_v35, %v3822_v58  ;;  %v3862_v2 = vadd.f32 %v6583_v35, %v3823_v53  ;;  %v3863_v60 = vadd.f32 %v6583_v35, %v3824_v33  ;;  %v3864_v62 = vadd.f32 %v6583_v35, %v3825_v26  ;;  %v3826_v21 = vld [vmem:[#allocation2 + $0x40] sm:$0xff]  ;;  %v3827_v63 = vld [vmem:[#allocation2 + $0x48] sm:$0xff]  ;;  %v3828_v41 = vld [vmem:[#allocation2 + $0x50] sm:$0xff] }
 0x21d   : > { %v3889_v0 = vmax.f32 %v3857_v57, 0.0  ;;  %v3890_v15 = vmax.f32 %v3858_v56, 0.0  ;;  %v3891_v23 = vmax.f32 %v3859_v17, 0.0  ;;  %v3892_v22 = vmax.f32 %v3860_v47, 0.0  ;;  %v3829_v40 = vld [vmem:[#allocation2 + $0x58] sm:$0xff]  ;;  %v3830_v52 = vld [vmem:[#allocation2 + $0x60] sm:$0xff] }
 0x21e   : > { %v3893_v50 = vmax.f32 %v3861_v28, 0.0  ;;  %v3894_v9 = vmax.f32 %v3862_v2, 0.0  ;;  %v3895_v43 = vmax.f32 %v3863_v60, 0.0  ;;  %v3896_v34 = vmax.f32 %v3864_v62, 0.0  ;;  %v3831_v4 = vld [vmem:[#allocation2 + $0x68] sm:$0xff]  ;;  %v3832_v6 = vld [vmem:[#allocation2 + $0x70] sm:$0xff] }
 0x21f   : > { %v4855_v5 = vpack.c.bf16 %v3889_v0, %v3889_v0  ;;  %v4856_v51 = vpack.c.bf16 %v3890_v15, %v3890_v15  ;;  %v4857_v46 = vpack.c.bf16 %v3891_v23, %v3891_v23  ;;  %v4858_v30 = vpack.c.bf16 %v3892_v22, %v3892_v22  ;;  %v3833_v45 = vld [vmem:[#allocation2 + $0x78] sm:$0xff]  ;;  %v3834_v59 = vld [vmem:[#allocation2 + $0x80] sm:$0xff]  ;;  %v3835_v19 = vld [vmem:[#allocation2 + $0x88] sm:$0xff] }
 0x220   : > { %v4859_v1 = vpack.c.bf16 %v3893_v50, %v3893_v50  ;;  %v4860_v7 = vpack.c.bf16 %v3894_v9, %v3894_v9  ;;  %v4861_v11 = vpack.c.bf16 %v3895_v43, %v3895_v43  ;;  %v3865_v13 = vadd.f32 %v6583_v35, %v3826_v21  ;;  %v3836_v49 = vld [vmem:[#allocation2 + $0x90] sm:$0xff]  ;;  %v3837_v20 = vld [vmem:[#allocation2 + $0x98] sm:$0xff]  ;;  %v3838_v36 = vld [vmem:[#allocation2 + $0xa0] sm:$0xff] }
 0x221   : > { %4050 = vst.msk [vmem:[%s6757_s3] sm:$0xf] %vm4049_vm2, %v4855_v5  ;;  %4051 = vst.msk [vmem:[%s6757_s3 + $0x4] sm:$0xf] %vm4049_vm2, %v4856_v51  ;;  %v3866_v38 = vadd.f32 %v6583_v35, %v3827_v63  ;;  %v4862_v31 = vpack.c.bf16 %v3896_v34, %v3896_v34  ;;  %v3867_v14 = vadd.f32 %v6583_v35, %v3828_v41  ;;  %v3839_v56 = vld [vmem:[#allocation2 + $0xa8] sm:$0xff]  ;;  %v3840_v16 = vld [vmem:[#allocation2 + $0xb0] sm:$0xff] }
 0x222   : > { %4052 = vst.msk [vmem:[%s6757_s3 + $0x8] sm:$0xf] %vm4049_vm2, %v4857_v46  ;;  %4053 = vst.msk [vmem:[%s6757_s3 + $0xc] sm:$0xf] %vm4049_vm2, %v4858_v30  ;;  %v3868_v3 = vadd.f32 %v6583_v35, %v3829_v40  ;;  %v3869_v25 = vadd.f32 %v6583_v35, %v3830_v52  ;;  %v3897_v32 = vmax.f32 %v3865_v13, 0.0  ;;  %v3870_v8 = vadd.f32 %v6583_v35, %v3831_v4  ;;  %v3841_v28 = vld [vmem:[#allocation2 + $0xb8] sm:$0xff] }
 0x223   : > { %4054 = vst.msk [vmem:[%s6757_s3 + $0x10] sm:$0xf] %vm4049_vm2, %v4859_v1  ;;  %4055 = vst.msk [vmem:[%s6757_s3 + $0x14] sm:$0xf] %vm4049_vm2, %v4860_v7  ;;  %v3898_v48 = vmax.f32 %v3866_v38, 0.0  ;;  %v3871_v61 = vadd.f32 %v6583_v35, %v3832_v6  ;;  %v3899_v18 = vmax.f32 %v3867_v14, 0.0  ;;  %v3872_v29 = vadd.f32 %v6583_v35, %v3833_v45 }
 0x224   : > { %4056 = vst.msk [vmem:[%s6757_s3 + $0x18] sm:$0xf] %vm4049_vm2, %v4861_v11  ;;  %4057 = vst.msk [vmem:[%s6757_s3 + $0x1c] sm:$0xf] %vm4049_vm2, %v4862_v31  ;;  %v3900_v27 = vmax.f32 %v3868_v3, 0.0  ;;  %v3901_v12 = vmax.f32 %v3869_v25, 0.0  ;;  %v4863_v54 = vpack.c.bf16 %v3897_v32, %v3897_v32  ;;  %v3873_v17 = vadd.f32 %v6583_v35, %v3834_v59 }
 0x225   : > { %v4864_v10 = vpack.c.bf16 %v3898_v48, %v3898_v48  ;;  %v3902_v39 = vmax.f32 %v3870_v8, 0.0  ;;  %v3903_v44 = vmax.f32 %v3871_v61, 0.0  ;;  %v4865_v37 = vpack.c.bf16 %v3899_v18, %v3899_v18  ;;  %v3842_v63 = vld [vmem:[#allocation2 + $0xc0] sm:$0xff]  ;;  %v3843_v5 = vld [vmem:[#allocation2 + $0xc8] sm:$0xff]  ;;  %v3844_v40 = vld [vmem:[#allocation2 + $0xd0] sm:$0xff] }
 0x226   : > { %v4866_v24 = vpack.c.bf16 %v3900_v27, %v3900_v27  ;;  %v4867_v42 = vpack.c.bf16 %v3901_v12, %v3901_v12  ;;  %v3904_v57 = vmax.f32 %v3872_v29, 0.0  ;;  %4058 = vst.msk [vmem:[%s6757_s3 + $0x20] sm:$0xf] %vm4049_vm2, %v4863_v54  ;;  %v3874_v47 = vadd.f32 %v6583_v35, %v3835_v19  ;;  %v3845_v52 = vld [vmem:[#allocation2 + $0xd8] sm:$0xff]  ;;  %v3846_v46 = vld [vmem:[#allocation2 + $0xe0] sm:$0xff]  ;;  %v3847_v6 = vld [vmem:[#allocation2 + $0xe8] sm:$0xff] }
 0x227   : > { %4059 = vst.msk [vmem:[%s6757_s3 + $0x24] sm:$0xf] %vm4049_vm2, %v4864_v10  ;;  %v4868_v55 = vpack.c.bf16 %v3902_v39, %v3902_v39  ;;  %v4869_v58 = vpack.c.bf16 %v3903_v44, %v3903_v44  ;;  %4060 = vst.msk [vmem:[%s6757_s3 + $0x28] sm:$0xf] %vm4049_vm2, %v4865_v37  ;;  %v3875_v33 = vadd.f32 %v6583_v35, %v3836_v49  ;;  %v3905_v15 = vmax.f32 %v3873_v17, 0.0  ;;  %v3848_v7 = vld [vmem:[#allocation2 + $0xf0] sm:$0xff] }
 0x228   : > { %4061 = vst.msk [vmem:[%s6757_s3 + $0x2c] sm:$0xf] %vm4049_vm2, %v4866_v24  ;;  %4062 = vst.msk [vmem:[%s6757_s3 + $0x30] sm:$0xf] %vm4049_vm2, %v4867_v42  ;;  %v4870_v53 = vpack.c.bf16 %v3904_v57, %v3904_v57  ;;  %v3876_v26 = vadd.f32 %v6583_v35, %v3837_v20  ;;  %v3877_v0 = vadd.f32 %v6583_v35, %v3838_v36  ;;  %v3906_v2 = vmax.f32 %v3874_v47, 0.0  ;;  %v3849_v31 = vld [vmem:[#allocation2 + $0xf8] sm:$0xff] }
 0x229   : > { %4063 = vst.msk [vmem:[%s6757_s3 + $0x34] sm:$0xf] %vm4049_vm2, %v4868_v55  ;;  %4064 = vst.msk [vmem:[%s6757_s3 + $0x38] sm:$0xf] %vm4049_vm2, %v4869_v58  ;;  %v3878_v60 = vadd.f32 %v6583_v35, %v3839_v56  ;;  %v3879_v23 = vadd.f32 %v6583_v35, %v3840_v16  ;;  %v3907_v22 = vmax.f32 %v3875_v33, 0.0  ;;  %v3880_v21 = vadd.f32 %v6583_v35, %v3841_v28 }
 0x22a   : > { %4065 = vst.msk [vmem:[%s6757_s3 + $0x3c] sm:$0xf] %vm4049_vm2, %v4870_v53  ;;  %v3908_v50 = vmax.f32 %v3876_v26, 0.0  ;;  %v3909_v62 = vmax.f32 %v3877_v0, 0.0  ;;  %v4871_v51 = vpack.c.bf16 %v3905_v15, %v3905_v15  ;;  %v4872_v9 = vpack.c.bf16 %v3906_v2, %v3906_v2 }
 0x22b   : > { %v3910_v43 = vmax.f32 %v3878_v60, 0.0  ;;  %v3911_v41 = vmax.f32 %v3879_v23, 0.0  ;;  %v4873_v30 = vpack.c.bf16 %v3907_v22, %v3907_v22  ;;  %v3912_v4 = vmax.f32 %v3880_v21, 0.0 }
 0x22c   : > { %v4874_v1 = vpack.c.bf16 %v3908_v50, %v3908_v50  ;;  %v4875_v34 = vpack.c.bf16 %v3909_v62, %v3909_v62  ;;  %4066 = vst.msk [vmem:[%s6757_s3 + $0x40] sm:$0xf] %vm4049_vm2, %v4871_v51  ;;  %4067 = vst.msk [vmem:[%s6757_s3 + $0x44] sm:$0xf] %vm4049_vm2, %v4872_v9  ;;  %v3881_v38 = vadd.f32 %v6583_v35, %v3842_v63 }
 0x22d   : > { %v4876_v11 = vpack.c.bf16 %v3910_v43, %v3910_v43  ;;  %v4877_v13 = vpack.c.bf16 %v3911_v41, %v3911_v41  ;;  %v3882_v45 = vadd.f32 %v6583_v35, %v3843_v5  ;;  %4068 = vst.msk [vmem:[%s6757_s3 + $0x48] sm:$0xf] %vm4049_vm2, %v4873_v30  ;;  %v4878_v14 = vpack.c.bf16 %v3912_v4, %v3912_v4 }
 0x22e   : > { %4069 = vst.msk [vmem:[%s6757_s3 + $0x4c] sm:$0xf] %vm4049_vm2, %v4874_v1  ;;  %4070 = vst.msk [vmem:[%s6757_s3 + $0x50] sm:$0xf] %vm4049_vm2, %v4875_v34  ;;  %v3883_v3 = vadd.f32 %v6583_v35, %v3844_v40  ;;  %v3884_v25 = vadd.f32 %v6583_v35, %v3845_v52  ;;  %v3885_v32 = vadd.f32 %v6583_v35, %v3846_v46  ;;  %v3913_v48 = vmax.f32 %v3881_v38, 0.0 }
 0x22f   : > { %4071 = vst.msk [vmem:[%s6757_s3 + $0x54] sm:$0xf] %vm4049_vm2, %v4876_v11  ;;  %4072 = vst.msk [vmem:[%s6757_s3 + $0x58] sm:$0xf] %vm4049_vm2, %v4877_v13  ;;  %v3914_v8 = vmax.f32 %v3882_v45, 0.0  ;;  %v3886_v61 = vadd.f32 %v6583_v35, %v3847_v6  ;;  %v3887_v18 = vadd.f32 %v6583_v35, %v3848_v7  ;;  %v3888_v59 = vadd.f32 %v6583_v35, %v3849_v31 }
 0x230   : > { %4073 = vst.msk [vmem:[%s6757_s3 + $0x5c] sm:$0xf] %vm4049_vm2, %v4878_v14  ;;  %v3915_v27 = vmax.f32 %v3883_v3, 0.0  ;;  %v3916_v12 = vmax.f32 %v3884_v25, 0.0  ;;  %v3917_v29 = vmax.f32 %v3885_v32, 0.0  ;;  %v4879_v19 = vpack.c.bf16 %v3913_v48, %v3913_v48 }
 0x231   : > { %v4880_v54 = vpack.c.bf16 %v3914_v8, %v3914_v8  ;;  %v3918_v10 = vmax.f32 %v3886_v61, 0.0  ;;  %v3919_v39 = vmax.f32 %v3887_v18, 0.0  ;;  %v3920_v36 = vmax.f32 %v3888_v59, 0.0 }
 0x232   : > { %v4881_v44 = vpack.c.bf16 %v3915_v27, %v3915_v27  ;;  %v4882_v49 = vpack.c.bf16 %v3916_v12, %v3916_v12  ;;  %v4883_v20 = vpack.c.bf16 %v3917_v29, %v3917_v29  ;;  %4074 = vst.msk [vmem:[%s6757_s3 + $0x60] sm:$0xf] %vm4049_vm2, %v4879_v19 }
 0x233   : > { %4075 = vst.msk [vmem:[%s6757_s3 + $0x64] sm:$0xf] %vm4049_vm2, %v4880_v54  ;;  %v4884_v37 = vpack.c.bf16 %v3918_v10, %v3918_v10  ;;  %v4885_v35 = vpack.c.bf16 %v3919_v39, %v3919_v39  ;;  %v4886_v24 = vpack.c.bf16 %v3920_v36, %v3920_v36 }
 0x234   : > { %4076 = vst.msk [vmem:[%s6757_s3 + $0x68] sm:$0xf] %vm4049_vm2, %v4881_v44  ;;  %4077 = vst.msk [vmem:[%s6757_s3 + $0x6c] sm:$0xf] %vm4049_vm2, %v4882_v49 }
 0x235   : > { %4078 = vst.msk [vmem:[%s6757_s3 + $0x70] sm:$0xf] %vm4049_vm2, %v4883_v20  ;;  %4079 = vst.msk [vmem:[%s6757_s3 + $0x74] sm:$0xf] %vm4049_vm2, %v4884_v37 }
 0x236   : > { %4080 = vst.msk [vmem:[%s6757_s3 + $0x78] sm:$0xf] %vm4049_vm2, %v4885_v35  ;;  %4081 = vst.msk [vmem:[%s6757_s3 + $0x7c] sm:$0xf] %vm4049_vm2, %v4886_v24 }
 0x237 PF: > { %s13_s14 = sadd.s32 1, %s5662_s14   ;;  %s6844_s12 = smov %s5658_s13 }
 0x238   : > { %p10_p7 = scmp.ge.s32.totalorder %s13_s14, 5   ;;  %s6845_s13 = smov %s6847_s15 }
 0x23a   :  { %12 = sbr.rel (!%p10_p7) target bundleno = 2 (0x2), region = 89 }

// kernel: resnet_l1_forward.15
= control target key start
LH: loop header
LB: loop body
LE: loop exit
PB: predicated region body
PF: predicated region fallthrough
CT: control target
= control target key end

     0   :  { %s5930_s15 = smov 0   ;;  %s5932_s16 = smov 0   ;;  %s7047_s0 = inlined_call_operand.vmem [shape: bf16[27,256,64], index: 0, kind: input, shape index: {}]   ;;  %s7048_s1 = inlined_call_operand.vmem [shape: bf16[27,64,64], index: 1, kind: input, shape index: {}]   ;;  %s7049_s2 = inlined_call_operand.vmem [shape: f32[1,64], index: 2, kind: input, shape index: {}]   ;;  %s7050_s3 = inlined_call_operand.vmem [shape: bf16[256,64], index: 3, kind: input, shape index: {}]   ;;  %s7051_s4 = inlined_call_operand.vmem [shape: bf16[256,64], index: 4, kind: output, shape index: {}]  }
   0x1   :  { %s5934_s17 = smov 0  }
   0x2 LB: > { %s23_s18 = sadd.s32 1, %s5898_s16  ;;  %p4326_p0 = scmp.ge.s32.totalorder %s5902_s17, 1  ;;  %s5902_s17 = sphi %s5934_s17, %s14_s17   ;;  %s5898_s16 = sphi %s5932_s16, %s7139_s16   ;;  %s5894_s15 = sphi %s5930_s15, %s7138_s15  }
   0x3   : > { %p24_p1 = scmp.ge.s32.totalorder %s23_s18, 3  ;;  %p206_p2 = scmp.lt.s32.totalorder %s5902_s17, 4 }
   0x5   : > { %s7141_s18 = smov (%p24_p1, %s23_s18), 0  ;;  %p207_p3 = pnand %p4326_p0, %p206_p2 }
   0x7   : > { %210 = sbr.rel (%p207_p3) target bundleno = 585 (0x249), region = 36 }
   0xc   : > { %s248_s19 = smul.u32 9, %s5894_s15  ;;  %p4331_p5 = scmp.ne.s32.totalorder %s5894_s15, 0 }
   0xe   : > { %p250_p4 = scmp.lt.s32.totalorder %s248_s19, 26  ;;  %283 = sbr.rel (%p4331_p5) target bundleno = 36 (0x24), region = 40 }
  0x10   : > { %s7143_s19 = smov (!%p250_p4, %s248_s19), 26 }
  0x11   : > { %s5014_s20 = sshll.u32 %s7143_s19, 7  ;;  %s5015_s21 = sshll.u32 %s7143_s19, 5 }
  0x12   : > { %s5954_s24 = scalar_lea.vmem %s7047_s0, %s5014_s20  ;;  %s5959_s27 = scalar_lea.vmem %s7048_s1, %s5015_s21 }
  0x13   : > { %vm284_vm0 = vcmask 523264   ;;  %v5904_v0 = vmov 0.0  }
  0x14   : > { %285 = vst.msk [vmem:[#allocation2] sm:$0xff] %vm284_vm0, %v5904_v0  ;;  %286 = vst.msk [vmem:[#allocation2 + $0x8] sm:$0xff] %vm284_vm0, %v5904_v0 }
  0x15   : > { %287 = vst.msk [vmem:[#allocation2 + $0x10] sm:$0xff] %vm284_vm0, %v5904_v0  ;;  %288 = vst.msk [vmem:[#allocation2 + $0x18] sm:$0xff] %vm284_vm0, %v5904_v0 }
  0x16   : > { %289 = vst.msk [vmem:[#allocation2 + $0x20] sm:$0xff] %vm284_vm0, %v5904_v0  ;;  %290 = vst.msk [vmem:[#allocation2 + $0x28] sm:$0xff] %vm284_vm0, %v5904_v0 }
  0x17   : > { %291 = vst.msk [vmem:[#allocation2 + $0x30] sm:$0xff] %vm284_vm0, %v5904_v0  ;;  %292 = vst.msk [vmem:[#allocation2 + $0x38] sm:$0xff] %vm284_vm0, %v5904_v0 }
  0x18   : > { %293 = vst.msk [vmem:[#allocation2 + $0x40] sm:$0xff] %vm284_vm0, %v5904_v0  ;;  %294 = vst.msk [vmem:[#allocation2 + $0x48] sm:$0xff] %vm284_vm0, %v5904_v0 }
  0x19   : > { %295 = vst.msk [vmem:[#allocation2 + $0x50] sm:$0xff] %vm284_vm0, %v5904_v0  ;;  %296 = vst.msk [vmem:[#allocation2 + $0x58] sm:$0xff] %vm284_vm0, %v5904_v0 }
  0x1a   : > { %297 = vst.msk [vmem:[#allocation2 + $0x60] sm:$0xff] %vm284_vm0, %v5904_v0  ;;  %298 = vst.msk [vmem:[#allocation2 + $0x68] sm:$0xff] %vm284_vm0, %v5904_v0 }
  0x1b   : > { %299 = vst.msk [vmem:[#allocation2 + $0x70] sm:$0xff] %vm284_vm0, %v5904_v0  ;;  %300 = vst.msk [vmem:[#allocation2 + $0x78] sm:$0xff] %vm284_vm0, %v5904_v0 }
  0x1c   : > { %301 = vst.msk [vmem:[#allocation2 + $0x80] sm:$0xff] %vm284_vm0, %v5904_v0  ;;  %302 = vst.msk [vmem:[#allocation2 + $0x88] sm:$0xff] %vm284_vm0, %v5904_v0 }
  0x1d   : > { %303 = vst.msk [vmem:[#allocation2 + $0x90] sm:$0xff] %vm284_vm0, %v5904_v0  ;;  %304 = vst.msk [vmem:[#allocation2 + $0x98] sm:$0xff] %vm284_vm0, %v5904_v0 }
  0x1e   : > { %305 = vst.msk [vmem:[#allocation2 + $0xa0] sm:$0xff] %vm284_vm0, %v5904_v0  ;;  %306 = vst.msk [vmem:[#allocation2 + $0xa8] sm:$0xff] %vm284_vm0, %v5904_v0 }
  0x1f   : > { %307 = vst.msk [vmem:[#allocation2 + $0xb0] sm:$0xff] %vm284_vm0, %v5904_v0  ;;  %308 = vst.msk [vmem:[#allocation2 + $0xb8] sm:$0xff] %vm284_vm0, %v5904_v0 }
  0x20   : > { %309 = vst.msk [vmem:[#allocation2 + $0xc0] sm:$0xff] %vm284_vm0, %v5904_v0  ;;  %310 = vst.msk [vmem:[#allocation2 + $0xc8] sm:$0xff] %vm284_vm0, %v5904_v0 }
  0x21   : > { %311 = vst.msk [vmem:[#allocation2 + $0xd0] sm:$0xff] %vm284_vm0, %v5904_v0  ;;  %312 = vst.msk [vmem:[#allocation2 + $0xd8] sm:$0xff] %vm284_vm0, %v5904_v0 }
  0x22   : > { %313 = vst.msk [vmem:[#allocation2 + $0xe0] sm:$0xff] %vm284_vm0, %v5904_v0  ;;  %314 = vst.msk [vmem:[#allocation2 + $0xe8] sm:$0xff] %vm284_vm0, %v5904_v0 }
  0x23   : > { %315 = vst.msk [vmem:[#allocation2 + $0xf0] sm:$0xff] %vm284_vm0, %v5904_v0  ;;  %316 = vst.msk [vmem:[#allocation2 + $0xf8] sm:$0xff] %vm284_vm0, %v5904_v0 }
  0x24 PF: > { %v5700_v1 = vld [vmem:[%s5959_s27 + $0x18] sm:$0xff]   ;;  %v5701_v2 = vld [vmem:[%s5959_s27 + $0x10] sm:$0xff]   ;;  %v5702_v3 = vld [vmem:[%s5959_s27 + $0x8] sm:$0xff]   ;;  %vm493_vm1 = vcmask 523264   ;;  %p4976_p6 = scmp.ne.s32.totalorder %s5894_s15, 2 }
  0x25   : > { %5307 = vmatprep.subr.bf16.mxu0 %v5700_v1  ;;  %5667 = vmatprep.subr.bf16.mxu1 %v5700_v1  ;;  %v5704_v4 = vld [vmem:[%s5954_s24] sm:$0xff]   ;;  %v5708_v7 = vld [vmem:[%s5959_s27 + $0x38] sm:$0xff]   ;;  %v5706_v8 = vld [vmem:[%s5954_s24 + $0x8] sm:$0xff]  }
  0x26   : > { %5308 = vmatpush3.bf16.msra.mxu0 %v5700_v1  ;;  %5671 = vmatpush3.bf16.msra.mxu1 %v5700_v1  ;;  %v5705_v5 = vld [vmem:[%s5954_s24 + $0x40] sm:$0xff]   ;;  %v5709_v9 = vld [vmem:[%s5959_s27 + $0x58] sm:$0xff]   ;;  %v5707_v10 = vld [vmem:[%s5954_s24 + $0x48] sm:$0xff]  }
  0x27   : > { %5309 = vmatprep.subr.bf16.mxu0 %v5701_v2  ;;  %5668 = vmatprep.subr.bf16.mxu1 %v5701_v2  ;;  %v5703_v6 = vld [vmem:[%s5959_s27] sm:$0xff]   ;;  %v5710_v11 = vld [vmem:[%s5954_s24 + $0x10] sm:$0xff]   ;;  %v5712_v15 = vld [vmem:[%s5954_s24 + $0x18] sm:$0xff]  }
  0x28   : > { %5315 = vmatprep.mubr.msk.bf16.mxu0 %vm493_vm1, %v5704_v4  ;;  %5331 = vmatprep.mubr.msk.bf16.mxu1 %vm493_vm1, %v5705_v5  ;;  %v5711_v12 = vld [vmem:[%s5954_s24 + $0x50] sm:$0xff]   ;;  %v5713_v16 = vld [vmem:[%s5954_s24 + $0x58] sm:$0xff]   ;;  %v5720_v17 = vld [vmem:[%s5959_s27 + $0x28] sm:$0xff]  }
  0x29   : > { %v5714_v13 = vld [vmem:[%s5959_s27 + $0x30] sm:$0xff]   ;;  %v5721_v18 = vld [vmem:[%s5959_s27 + $0x48] sm:$0xff]   ;;  %v5716_v19 = vld [vmem:[%s5954_s24 + $0x20] sm:$0xff]  }
  0x2a   : > { %5310 = vmatpush3.bf16.msra.mxu0 %v5701_v2  ;;  %5672 = vmatpush3.bf16.msra.mxu1 %v5701_v2  ;;  %v5715_v14 = vld [vmem:[%s5959_s27 + $0x50] sm:$0xff]   ;;  %v5717_v20 = vld [vmem:[%s5954_s24 + $0x60] sm:$0xff]   ;;  %v5718_v23 = vld [vmem:[%s5954_s24 + $0x28] sm:$0xff]  }
  0x2b   : > { %5311 = vmatprep.subr.bf16.mxu0 %v5702_v3  ;;  %5669 = vmatprep.subr.bf16.mxu1 %v5702_v3  ;;  %v5726_v21 = vld [vmem:[%s5959_s27 + $0x20] sm:$0xff]   ;;  %v5719_v24 = vld [vmem:[%s5954_s24 + $0x68] sm:$0xff]   ;;  %v5722_v25 = vld [vmem:[%s5954_s24 + $0x30] sm:$0xff]  }
  0x2c   : > { %v5727_v22 = vld [vmem:[%s5959_s27 + $0x40] sm:$0xff]   ;;  %v5723_v26 = vld [vmem:[%s5954_s24 + $0x70] sm:$0xff]   ;;  %v5732_v27 = vld [vmem:[%s5959_s27 + $0x78] sm:$0xff]  }
  0x2d   : > { %v5733_v28 = vld [vmem:[%s5959_s27 + $0x98] sm:$0xff]   ;;  %v5728_v31 = vld [vmem:[%s5954_s24 + $0x80] sm:$0xff]   ;;  %v5730_v33 = vld [vmem:[%s5954_s24 + $0x88] sm:$0xff]  }
  0x2e   : > { %5312 = vmatpush3.bf16.msra.mxu0 %v5702_v3  ;;  %5673 = vmatpush3.bf16.msra.mxu1 %v5702_v3  ;;  %v5724_v29 = vld [vmem:[%s5954_s24 + $0x38] sm:$0xff]   ;;  %v5729_v32 = vld [vmem:[%s5954_s24 + $0x100] sm:$0xff]   ;;  %v5731_v34 = vld [vmem:[%s5954_s24 + $0x108] sm:$0xff]  }
  0x2f   : > { %5313 = vmatprep.subr.bf16.mxu0 %v5703_v6  ;;  %5670 = vmatprep.subr.bf16.mxu1 %v5703_v6  ;;  %v5725_v30 = vld [vmem:[%s5954_s24 + $0x78] sm:$0xff]   ;;  %v5734_v35 = vld [vmem:[%s5954_s24 + $0x90] sm:$0xff]   ;;  %v5752_v41 = vld [vmem:[%s5959_s27 + $0x68] sm:$0xff]  }
  0x30   : > { %v5735_v36 = vld [vmem:[%s5954_s24 + $0x110] sm:$0xff]   ;;  %v5736_v39 = vld [vmem:[%s5954_s24 + $0x98] sm:$0xff]   ;;  %v5753_v42 = vld [vmem:[%s5959_s27 + $0x88] sm:$0xff]  }
  0x31   : > { %v5742_v37 = vld [vmem:[%s5959_s27 + $0x70] sm:$0xff]   ;;  %v5737_v40 = vld [vmem:[%s5954_s24 + $0x118] sm:$0xff]   ;;  %v5738_v43 = vld [vmem:[%s5954_s24 + $0xa0] sm:$0xff]  }
  0x32   : > { %5314 = vmatpush3.bf16.msra.mxu0 %v5703_v6  ;;  %5674 = vmatpush3.bf16.msra.mxu1 %v5703_v6  ;;  %v5743_v38 = vld [vmem:[%s5959_s27 + $0x90] sm:$0xff]   ;;  %v5739_v44 = vld [vmem:[%s5954_s24 + $0x120] sm:$0xff]   ;;  %v5740_v45 = vld [vmem:[%s5954_s24 + $0xa8] sm:$0xff]  }
  0x33   : > { %5347 = vmatprep.subr.bf16.mxu1 %v5708_v7  ;;  %5387 = vmatprep.subr.bf16.mxu0 %v5709_v9  ;;  %v5741_v46 = vld [vmem:[%s5954_s24 + $0x128] sm:$0xff]   ;;  %v5744_v47 = vld [vmem:[%s5954_s24 + $0xb0] sm:$0xff]   ;;  %v5762_v49 = vld [vmem:[%s5959_s27 + $0x60] sm:$0xff]  }
  0x34   : > { %v5745_v48 = vld [vmem:[%s5954_s24 + $0x130] sm:$0xff]   ;;  %v5763_v50 = vld [vmem:[%s5959_s27 + $0x80] sm:$0xff]   ;;  %v5746_v51 = vld [vmem:[%s5954_s24 + $0xb8] sm:$0xff]  }
  0x35   : > { %5316 = vmatmul.mubr.msk.bf16.vlgmr.msra.gmra.mxu0 %vm493_vm1, %v5706_v8  ;;  %5332 = vmatmul.mubr.msk.bf16.vlgmr.msra.gmra.mxu1 %vm493_vm1, %v5707_v10  ;;  %v5747_v52 = vld [vmem:[%s5954_s24 + $0x138] sm:$0xff]   ;;  %v5748_v53 = vld [vmem:[%s5954_s24 + $0xc0] sm:$0xff]   ;;  %v5750_v57 = vld [vmem:[%s5954_s24 + $0xc8] sm:$0xff]  }
  0x36   : > { %5348 = vmatpush3.bf16.msra.mxu1 %v5708_v7  ;;  %5388 = vmatpush3.bf16.msra.mxu0 %v5709_v9  ;;  %v5749_v54 = vld [vmem:[%s5954_s24 + $0x140] sm:$0xff]   ;;  %v5772_v55 = vld [vmem:[%s5959_s27 + $0xb8] sm:$0xff]   ;;  %v5751_v58 = vld [vmem:[%s5954_s24 + $0x148] sm:$0xff]  }
  0x37   : > { %5319 = vmatprep.mubr.msk.bf16.mxu0 %vm493_vm1, %v5710_v11  ;;  %5335 = vmatprep.mubr.msk.bf16.mxu1 %vm493_vm1, %v5711_v12  ;;  %v5773_v56 = vld [vmem:[%s5959_s27 + $0xd8] sm:$0xff]   ;;  %v5754_v59 = vld [vmem:[%s5954_s24 + $0xd0] sm:$0xff]   ;;  %v5758_v63 = vld [vmem:[%s5954_s24 + $0xe0] sm:$0xff]  }
  0x38   : > { %5349 = vmatprep.subr.bf16.mxu1 %v5714_v13  ;;  %5389 = vmatprep.subr.bf16.mxu0 %v5715_v14  ;;  %v5755_v60 = vld [vmem:[%s5954_s24 + $0x150] sm:$0xff]   ;;  %v5756_v61 = vld [vmem:[%s5954_s24 + $0xd8] sm:$0xff]   ;;  %v5759_v0 = vld [vmem:[%s5954_s24 + $0x160] sm:$0xff]  }
  0x39   : > { %v5757_v62 = vld [vmem:[%s5954_s24 + $0x158] sm:$0xff]   ;;  %v5760_v1 = vld [vmem:[%s5954_s24 + $0xe8] sm:$0xff]   ;;  %v5764_v3 = vld [vmem:[%s5954_s24 + $0xf0] sm:$0xff]  }
  0x3a   : > { %5350 = vmatpush3.bf16.msra.mxu1 %v5714_v13  ;;  %5390 = vmatpush3.bf16.msra.mxu0 %v5715_v14  ;;  %v5761_v2 = vld [vmem:[%s5954_s24 + $0x168] sm:$0xff]   ;;  %v5765_v4 = vld [vmem:[%s5954_s24 + $0x170] sm:$0xff]   ;;  %v5766_v5 = vld [vmem:[%s5954_s24 + $0xf8] sm:$0xff]  }
  0x3b   : > { %5351 = vmatprep.subr.bf16.mxu1 %v5720_v17  ;;  %5391 = vmatprep.subr.bf16.mxu0 %v5721_v18  ;;  %v5767_v6 = vld [vmem:[%s5954_s24 + $0x178] sm:$0xff]   ;;  %v5768_v7 = vld [vmem:[%s5954_s24 + $0x180] sm:$0xff]   ;;  %v5770_v9 = vld [vmem:[%s5954_s24 + $0x188] sm:$0xff]  }
  0x3c   : > { %v5769_v8 = vld [vmem:[%s5954_s24 + $0x200] sm:$0xff]   ;;  %v5771_v10 = vld [vmem:[%s5954_s24 + $0x208] sm:$0xff]   ;;  %v5774_v11 = vld [vmem:[%s5954_s24 + $0x190] sm:$0xff]  }
  0x3d   : > { %5320 = vmatmul.mubr.msk.bf16.gmra.mxu0 %vm493_vm1, %v5712_v15  ;;  %5336 = vmatmul.mubr.msk.bf16.gmra.mxu1 %vm493_vm1, %v5713_v16  ;;  %v5775_v12 = vld [vmem:[%s5954_s24 + $0x210] sm:$0xff]   ;;  %v5792_v15 = vld [vmem:[%s5959_s27 + $0xa8] sm:$0xff]   ;;  %v5776_v16 = vld [vmem:[%s5954_s24 + $0x198] sm:$0xff]  }
  0x3e   : > { %5323 = vmatprep.mubr.msk.bf16.mxu0 %vm493_vm1, %v5716_v19  ;;  %5339 = vmatprep.mubr.msk.bf16.mxu1 %vm493_vm1, %v5717_v20  ;;  %v5782_v13 = vld [vmem:[%s5959_s27 + $0xb0] sm:$0xff]   ;;  %v5778_v19 = vld [vmem:[%s5954_s24 + $0x1a0] sm:$0xff]  }
  0x3f   : > { %5352 = vmatpush3.bf16.msra.mxu1 %v5720_v17  ;;  %5392 = vmatpush3.bf16.msra.mxu0 %v5721_v18  ;;  %v5783_v14 = vld [vmem:[%s5959_s27 + $0xd0] sm:$0xff]   ;;  %v5793_v17 = vld [vmem:[%s5959_s27 + $0xc8] sm:$0xff]   ;;  %v5777_v18 = vld [vmem:[%s5954_s24 + $0x218] sm:$0xff]  }
  0x40   : > { %5353 = vmatprep.subr.bf16.mxu1 %v5726_v21  ;;  %5393 = vmatprep.subr.bf16.mxu0 %v5727_v22  ;;  %v5779_v20 = vld [vmem:[%s5954_s24 + $0x220] sm:$0xff]  }
  0x43   : > { %5354 = vmatpush3.bf16.msra.mxu1 %v5726_v21  ;;  %5394 = vmatpush3.bf16.msra.mxu0 %v5727_v22  ;;  %v5802_v21 = vld [vmem:[%s5959_s27 + $0xa0] sm:$0xff]  }
  0x44   : > { %5427 = vmatprep.subr.bf16.mxu1 %v5732_v27  ;;  %5467 = vmatprep.subr.bf16.mxu0 %v5733_v28  ;;  %v5803_v22 = vld [vmem:[%s5959_s27 + $0xc0] sm:$0xff]  }
  0x45   : > { %5324 = vmatmul.mubr.msk.bf16.gmra.mxu0 %vm493_vm1, %v5718_v23  ;;  %5340 = vmatmul.mubr.msk.bf16.gmra.mxu1 %vm493_vm1, %v5719_v24  ;;  %v5780_v23 = vld [vmem:[%s5954_s24 + $0x1a8] sm:$0xff]  }
  0x46   : > { %5327 = vmatprep.mubr.msk.bf16.mxu0 %vm493_vm1, %v5722_v25  ;;  %5343 = vmatprep.mubr.msk.bf16.mxu1 %vm493_vm1, %v5723_v26  ;;  %v5781_v24 = vld [vmem:[%s5954_s24 + $0x228] sm:$0xff]   ;;  %v5812_v25 = vld [vmem:[%s5959_s27 + $0xf8] sm:$0xff]  }
  0x47   : > { %v5813_v26 = vld [vmem:[%s5959_s27 + $0x118] sm:$0xff]  }
  0x4d   : > { %5328 = vmatmul.mubr.msk.bf16.gmra.mxu0 %vm493_vm1, %v5724_v29  ;;  %5344 = vmatmul.mubr.msk.bf16.gmra.mxu1 %vm493_vm1, %v5725_v30  ;;  %v5786_v29 = vld [vmem:[%s5954_s24 + $0x1b8] sm:$0xff]  }
  0x4e   : > { %5355 = vmatprep.mubr.msk.bf16.mxu1 %vm493_vm1, %v5728_v31  ;;  %5395 = vmatprep.mubr.msk.bf16.mxu0 %vm493_vm1, %v5729_v32  ;;  %v5787_v30 = vld [vmem:[%s5954_s24 + $0x238] sm:$0xff]   ;;  %v5788_v31 = vld [vmem:[%s5954_s24 + $0x1c0] sm:$0xff]  }
  0x4f   : > { %v5789_v32 = vld [vmem:[%s5954_s24 + $0x240] sm:$0xff]  }
  0x55   : > { %5356 = vmatmul.mubr.msk.bf16.vlgmr.msra.gmra.mxu1 %vm493_vm1, %v5730_v33  ;;  %5396 = vmatmul.mubr.msk.bf16.vlgmr.msra.gmra.mxu0 %vm493_vm1, %v5731_v34  ;;  %v5790_v33 = vld [vmem:[%s5954_s24 + $0x1c8] sm:$0xff]  }
  0x56   : > { %5428 = vmatpush3.bf16.msra.mxu1 %v5732_v27  ;;  %5468 = vmatpush3.bf16.msra.mxu0 %v5733_v28  ;;  %v5784_v27 = vld [vmem:[%s5954_s24 + $0x1b0] sm:$0xff]   ;;  %v5791_v34 = vld [vmem:[%s5954_s24 + $0x248] sm:$0xff]  }
  0x57   : > { %5359 = vmatprep.mubr.msk.bf16.mxu1 %vm493_vm1, %v5734_v35  ;;  %5399 = vmatprep.mubr.msk.bf16.mxu0 %vm493_vm1, %v5735_v36  ;;  %v5785_v28 = vld [vmem:[%s5954_s24 + $0x230] sm:$0xff]  }
  0x58   : > { %5429 = vmatprep.subr.bf16.mxu1 %v5742_v37  ;;  %5469 = vmatprep.subr.bf16.mxu0 %v5743_v38  ;;  %v5794_v35 = vld [vmem:[%s5954_s24 + $0x1d0] sm:$0xff]  }
  0x59   : > { %v5795_v36 = vld [vmem:[%s5954_s24 + $0x250] sm:$0xff]  }
  0x5a   : > { %5430 = vmatpush3.bf16.msra.mxu1 %v5742_v37  ;;  %5470 = vmatpush3.bf16.msra.mxu0 %v5743_v38  ;;  %v5796_v37 = vld [vmem:[%s5954_s24 + $0x1d8] sm:$0xff]  }
  0x5b   : > { %5431 = vmatprep.subr.bf16.mxu1 %v5752_v41  ;;  %5471 = vmatprep.subr.bf16.mxu0 %v5753_v42  ;;  %v5797_v38 = vld [vmem:[%s5954_s24 + $0x258] sm:$0xff]  }
  0x5d   : > { %5360 = vmatmul.mubr.msk.bf16.gmra.mxu1 %vm493_vm1, %v5736_v39  ;;  %5400 = vmatmul.mubr.msk.bf16.gmra.mxu0 %vm493_vm1, %v5737_v40  ;;  %v5798_v39 = vld [vmem:[%s5954_s24 + $0x1e0] sm:$0xff]  }
  0x5e   : > { %5363 = vmatprep.mubr.msk.bf16.mxu1 %vm493_vm1, %v5738_v43  ;;  %5403 = vmatprep.mubr.msk.bf16.mxu0 %vm493_vm1, %v5739_v44  ;;  %v5799_v40 = vld [vmem:[%s5954_s24 + $0x260] sm:$0xff]   ;;  %v5804_v43 = vld [vmem:[%s5954_s24 + $0x1f0] sm:$0xff]  }
  0x5f   : > { %5432 = vmatpush3.bf16.msra.mxu1 %v5752_v41  ;;  %5472 = vmatpush3.bf16.msra.mxu0 %v5753_v42  ;;  %v5800_v41 = vld [vmem:[%s5954_s24 + $0x1e8] sm:$0xff]   ;;  %v5805_v44 = vld [vmem:[%s5954_s24 + $0x270] sm:$0xff]  }
  0x60   : > { %5433 = vmatprep.subr.bf16.mxu1 %v5762_v49  ;;  %5473 = vmatprep.subr.bf16.mxu0 %v5763_v50  ;;  %v5801_v42 = vld [vmem:[%s5954_s24 + $0x268] sm:$0xff]  }
  0x63   : > { %5434 = vmatpush3.bf16.msra.mxu1 %v5762_v49  ;;  %5474 = vmatpush3.bf16.msra.mxu0 %v5763_v50  ;;  %v5810_v49 = vld [vmem:[%s5954_s24 + $0x288] sm:$0xff]  }
  0x64   : > { %5507 = vmatprep.subr.bf16.mxu1 %v5772_v55  ;;  %5547 = vmatprep.subr.bf16.mxu0 %v5773_v56  ;;  %v5811_v50 = vld [vmem:[%s5954_s24 + $0x308] sm:$0xff]  }
  0x65   : > { %5364 = vmatmul.mubr.msk.bf16.gmra.mxu1 %vm493_vm1, %v5740_v45  ;;  %5404 = vmatmul.mubr.msk.bf16.gmra.mxu0 %vm493_vm1, %v5741_v46  ;;  %v5806_v45 = vld [vmem:[%s5954_s24 + $0x1f8] sm:$0xff]  }
  0x66   : > { %5367 = vmatprep.mubr.msk.bf16.mxu1 %vm493_vm1, %v5744_v47  ;;  %5407 = vmatprep.mubr.msk.bf16.mxu0 %vm493_vm1, %v5745_v48  ;;  %v5807_v46 = vld [vmem:[%s5954_s24 + $0x278] sm:$0xff]   ;;  %v5808_v47 = vld [vmem:[%s5954_s24 + $0x280] sm:$0xff]  }
  0x67   : > { %v5809_v48 = vld [vmem:[%s5954_s24 + $0x300] sm:$0xff]  }
  0x6d   : > { %5368 = vmatmul.mubr.msk.bf16.gmra.mxu1 %vm493_vm1, %v5746_v51  ;;  %5408 = vmatmul.mubr.msk.bf16.gmra.mxu0 %vm493_vm1, %v5747_v52  ;;  %v5814_v51 = vld [vmem:[%s5954_s24 + $0x290] sm:$0xff]  }
  0x6e   : > { %5371 = vmatprep.mubr.msk.bf16.mxu1 %vm493_vm1, %v5748_v53  ;;  %5411 = vmatprep.mubr.msk.bf16.mxu0 %vm493_vm1, %v5749_v54  ;;  %v5815_v52 = vld [vmem:[%s5954_s24 + $0x310] sm:$0xff]  }
  0x6f   : > { %v5822_v53 = vld [vmem:[%s5959_s27 + $0xf0] sm:$0xff]  }
  0x70   : > { %v5823_v54 = vld [vmem:[%s5959_s27 + $0x110] sm:$0xff]  }
  0x75   : > { %5372 = vmatmul.mubr.msk.bf16.gmra.mxu1 %vm493_vm1, %v5750_v57  ;;  %5412 = vmatmul.mubr.msk.bf16.gmra.mxu0 %vm493_vm1, %v5751_v58  ;;  %v5833_v57 = vld [vmem:[%s5959_s27 + $0x108] sm:$0xff]   ;;  %v5817_v58 = vld [vmem:[%s5954_s24 + $0x318] sm:$0xff]  }
  0x76   : > { %5375 = vmatprep.mubr.msk.bf16.mxu1 %vm493_vm1, %v5754_v59  ;;  %5415 = vmatprep.mubr.msk.bf16.mxu0 %vm493_vm1, %v5755_v60  ;;  %v5818_v59 = vld [vmem:[%s5954_s24 + $0x2a0] sm:$0xff]  }
  0x77   : > { %v5819_v60 = vld [vmem:[%s5954_s24 + $0x320] sm:$0xff]  }
  0x7d   : > { %5376 = vmatmul.mubr.msk.bf16.gmra.mxu1 %vm493_vm1, %v5756_v61  ;;  %5416 = vmatmul.mubr.msk.bf16.gmra.mxu0 %vm493_vm1, %v5757_v62  ;;  %v5842_v61 = vld [vmem:[%s5959_s27 + $0xe0] sm:$0xff]  }
  0x7e   : > { %5379 = vmatprep.mubr.msk.bf16.mxu1 %vm493_vm1, %v5758_v63  ;;  %5419 = vmatprep.mubr.msk.bf16.mxu0 %vm493_vm1, %v5759_v0  ;;  %v5843_v62 = vld [vmem:[%s5959_s27 + $0x100] sm:$0xff]   ;;  %v5820_v63 = vld [vmem:[%s5954_s24 + $0x2a8] sm:$0xff]  }
  0x7f   : > { %v5821_v0 = vld [vmem:[%s5954_s24 + $0x328] sm:$0xff]  }
  0x85   : > { %5380 = vmatmul.mubr.msk.bf16.gmra.mxu1 %vm493_vm1, %v5760_v1  ;;  %5420 = vmatmul.mubr.msk.bf16.gmra.mxu0 %vm493_vm1, %v5761_v2  ;;  %v5824_v1 = vld [vmem:[%s5954_s24 + $0x2b0] sm:$0xff]  }
  0x86   : > { %5383 = vmatprep.mubr.msk.bf16.mxu1 %vm493_vm1, %v5764_v3  ;;  %5423 = vmatprep.mubr.msk.bf16.mxu0 %vm493_vm1, %v5765_v4  ;;  %v5825_v2 = vld [vmem:[%s5954_s24 + $0x330] sm:$0xff]   ;;  %v5826_v3 = vld [vmem:[%s5954_s24 + $0x2b8] sm:$0xff]  }
  0x87   : > { %v5827_v4 = vld [vmem:[%s5954_s24 + $0x338] sm:$0xff]  }
  0x8d   : > { %5384 = vmatmul.mubr.msk.bf16.gmra.mxu1 %vm493_vm1, %v5766_v5  ;;  %5424 = vmatmul.mubr.msk.bf16.gmra.mxu0 %vm493_vm1, %v5767_v6  ;;  %v5828_v5 = vld [vmem:[%s5954_s24 + $0x2c0] sm:$0xff]  }
  0x8e   : > { %5435 = vmatprep.mubr.msk.bf16.mxu1 %vm493_vm1, %v5768_v7  ;;  %5475 = vmatprep.mubr.msk.bf16.mxu0 %vm493_vm1, %v5769_v8  ;;  %v5829_v6 = vld [vmem:[%s5954_s24 + $0x340] sm:$0xff]   ;;  %v5830_v7 = vld [vmem:[%s5954_s24 + $0x2c8] sm:$0xff]  }
  0x8f   : > { %v5831_v8 = vld [vmem:[%s5954_s24 + $0x348] sm:$0xff]  }
  0x95   : > { %5436 = vmatmul.mubr.msk.bf16.vlgmr.msra.gmra.mxu1 %vm493_vm1, %v5770_v9  ;;  %5476 = vmatmul.mubr.msk.bf16.vlgmr.msra.gmra.mxu0 %vm493_vm1, %v5771_v10  ;;  %v5834_v9 = vld [vmem:[%s5954_s24 + $0x2d0] sm:$0xff]  }
  0x96   : > { %5508 = vmatpush3.bf16.msra.mxu1 %v5772_v55  ;;  %5548 = vmatpush3.bf16.msra.mxu0 %v5773_v56  ;;  %v5832_v55 = vld [vmem:[%s5959_s27 + $0xe8] sm:$0xff]   ;;  %v5816_v56 = vld [vmem:[%s5954_s24 + $0x298] sm:$0xff]   ;;  %v5835_v10 = vld [vmem:[%s5954_s24 + $0x350] sm:$0xff]  }
  0x97   : > { %5439 = vmatprep.mubr.msk.bf16.mxu1 %vm493_vm1, %v5774_v11  ;;  %5479 = vmatprep.mubr.msk.bf16.mxu0 %vm493_vm1, %v5775_v12 }
  0x98   : > { %5509 = vmatprep.subr.bf16.mxu1 %v5782_v13  ;;  %5549 = vmatprep.subr.bf16.mxu0 %v5783_v14 }
  0x9a   : > { %5510 = vmatpush3.bf16.msra.mxu1 %v5782_v13  ;;  %5550 = vmatpush3.bf16.msra.mxu0 %v5783_v14 }
  0x9b   : > { %5511 = vmatprep.subr.bf16.mxu1 %v5792_v15  ;;  %5551 = vmatprep.subr.bf16.mxu0 %v5793_v17 }
  0x9d   : > { %5440 = vmatmul.mubr.msk.bf16.gmra.mxu1 %vm493_vm1, %v5776_v16  ;;  %5480 = vmatmul.mubr.msk.bf16.gmra.mxu0 %vm493_vm1, %v5777_v18  ;;  %v5837_v18 = vld [vmem:[%s5954_s24 + $0x358] sm:$0xff]  }
  0x9e   : > { %5443 = vmatprep.mubr.msk.bf16.mxu1 %vm493_vm1, %v5778_v19  ;;  %5483 = vmatprep.mubr.msk.bf16.mxu0 %vm493_vm1, %v5779_v20  ;;  %v5838_v19 = vld [vmem:[%s5954_s24 + $0x2e0] sm:$0xff]  }
  0x9f   : > { %5512 = vmatpush3.bf16.msra.mxu1 %v5792_v15  ;;  %5552 = vmatpush3.bf16.msra.mxu0 %v5793_v17  ;;  %v5836_v17 = vld [vmem:[%s5954_s24 + $0x2d8] sm:$0xff]   ;;  %v5839_v20 = vld [vmem:[%s5954_s24 + $0x360] sm:$0xff]  }
  0xa0   : > { %5513 = vmatprep.subr.bf16.mxu1 %v5802_v21  ;;  %5553 = vmatprep.subr.bf16.mxu0 %v5803_v22 }
  0xa3   : > { %5514 = vmatpush3.bf16.msra.mxu1 %v5802_v21  ;;  %5554 = vmatpush3.bf16.msra.mxu0 %v5803_v22 }
  0xa4   : > { %5587 = vmatprep.subr.bf16.mxu1 %v5812_v25  ;;  %5627 = vmatprep.subr.bf16.mxu0 %v5813_v26 }
  0xa5   : > { %5444 = vmatmul.mubr.msk.bf16.gmra.mxu1 %vm493_vm1, %v5780_v23  ;;  %5484 = vmatmul.mubr.msk.bf16.gmra.mxu0 %vm493_vm1, %v5781_v24 }
  0xa6   : > { %5447 = vmatprep.mubr.msk.bf16.mxu1 %vm493_vm1, %v5784_v27  ;;  %5487 = vmatprep.mubr.msk.bf16.mxu0 %vm493_vm1, %v5785_v28 }
  0xad   : > { %5448 = vmatmul.mubr.msk.bf16.gmra.mxu1 %vm493_vm1, %v5786_v29  ;;  %5488 = vmatmul.mubr.msk.bf16.gmra.mxu0 %vm493_vm1, %v5787_v30  ;;  %v5840_v29 = vld [vmem:[%s5954_s24 + $0x2e8] sm:$0xff]  }
  0xae   : > { %5451 = vmatprep.mubr.msk.bf16.mxu1 %vm493_vm1, %v5788_v31  ;;  %5491 = vmatprep.mubr.msk.bf16.mxu0 %vm493_vm1, %v5789_v32  ;;  %v5841_v30 = vld [vmem:[%s5954_s24 + $0x368] sm:$0xff]   ;;  %v5844_v31 = vld [vmem:[%s5954_s24 + $0x2f0] sm:$0xff]  }
  0xaf   : > { %v5845_v32 = vld [vmem:[%s5954_s24 + $0x370] sm:$0xff]  }
  0xb5   : > { %5452 = vmatmul.mubr.msk.bf16.gmra.mxu1 %vm493_vm1, %v5790_v33  ;;  %5492 = vmatmul.mubr.msk.bf16.gmra.mxu0 %vm493_vm1, %v5791_v34 }
  0xb6   : > { %5455 = vmatprep.mubr.msk.bf16.mxu1 %vm493_vm1, %v5794_v35  ;;  %5495 = vmatprep.mubr.msk.bf16.mxu0 %vm493_vm1, %v5795_v36 }
  0xbd   : > { %5456 = vmatmul.mubr.msk.bf16.gmra.mxu1 %vm493_vm1, %v5796_v37  ;;  %5496 = vmatmul.mubr.msk.bf16.gmra.mxu0 %vm493_vm1, %v5797_v38 }
  0xbe   : > { %5459 = vmatprep.mubr.msk.bf16.mxu1 %vm493_vm1, %v5798_v39  ;;  %5499 = vmatprep.mubr.msk.bf16.mxu0 %vm493_vm1, %v5799_v40 }
  0xc5   : > { %5460 = vmatmul.mubr.msk.bf16.gmra.mxu1 %vm493_vm1, %v5800_v41  ;;  %5500 = vmatmul.mubr.msk.bf16.gmra.mxu0 %vm493_vm1, %v5801_v42  ;;  %v5846_v41 = vld [vmem:[%s5954_s24 + $0x2f8] sm:$0xff]  }
  0xc6   : > { %5463 = vmatprep.mubr.msk.bf16.mxu1 %vm493_vm1, %v5804_v43  ;;  %5503 = vmatprep.mubr.msk.bf16.mxu0 %vm493_vm1, %v5805_v44  ;;  %v5847_v42 = vld [vmem:[%s5954_s24 + $0x378] sm:$0xff]   ;;  %v5848_v43 = vld [vmem:[%s5954_s24 + $0x380] sm:$0xff]  }
  0xc7   : > { %v5849_v44 = vld [vmem:[%s5954_s24 + $0x400] sm:$0xff]  }
  0xcd   : > { %5464 = vmatmul.mubr.msk.bf16.gmra.mxu1 %vm493_vm1, %v5806_v45  ;;  %5504 = vmatmul.mubr.msk.bf16.gmra.mxu0 %vm493_vm1, %v5807_v46 }
  0xce   : > { %5515 = vmatprep.mubr.msk.bf16.mxu1 %vm493_vm1, %v5808_v47  ;;  %5555 = vmatprep.mubr.msk.bf16.mxu0 %vm493_vm1, %v5809_v48 }
  0xd5   : > { %5516 = vmatmul.mubr.msk.bf16.vlgmr.msra.gmra.mxu1 %vm493_vm1, %v5810_v49  ;;  %5556 = vmatmul.mubr.msk.bf16.vlgmr.msra.gmra.mxu0 %vm493_vm1, %v5811_v50 }
  0xd6   : > { %5588 = vmatpush3.bf16.msra.mxu1 %v5812_v25  ;;  %5628 = vmatpush3.bf16.msra.mxu0 %v5813_v26 }
  0xd7   : > { %5519 = vmatprep.mubr.msk.bf16.mxu1 %vm493_vm1, %v5814_v51  ;;  %5559 = vmatprep.mubr.msk.bf16.mxu0 %vm493_vm1, %v5815_v52  ;;  %v319_v51 = vld [vmem:[#allocation2 + $0x10] sm:$0xff] }
  0xd8   : > { %5589 = vmatprep.subr.bf16.mxu1 %v5822_v53  ;;  %5629 = vmatprep.subr.bf16.mxu0 %v5823_v54 }
  0xda   : > { %5590 = vmatpush3.bf16.msra.mxu1 %v5822_v53  ;;  %5630 = vmatpush3.bf16.msra.mxu0 %v5823_v54  ;;  %v5850_v54 = vld [vmem:[%s5954_s24 + $0x388] sm:$0xff]  }
  0xdb   : > { %5591 = vmatprep.subr.bf16.mxu1 %v5832_v55  ;;  %5631 = vmatprep.subr.bf16.mxu0 %v5833_v57 }
  0xdd   : > { %5520 = vmatmul.mubr.msk.bf16.gmra.mxu1 %vm493_vm1, %v5816_v56  ;;  %5560 = vmatmul.mubr.msk.bf16.gmra.mxu0 %vm493_vm1, %v5817_v58  ;;  %v5852_v56 = vld [vmem:[%s5954_s24 + $0x390] sm:$0xff]   ;;  %v317_v58 = vld [vmem:[#allocation2] sm:$0xff] }
  0xde   : > { %5523 = vmatprep.mubr.msk.bf16.mxu1 %vm493_vm1, %v5818_v59  ;;  %5563 = vmatprep.mubr.msk.bf16.mxu0 %vm493_vm1, %v5819_v60 }
  0xdf   : > { %5592 = vmatpush3.bf16.msra.mxu1 %v5832_v55  ;;  %5632 = vmatpush3.bf16.msra.mxu0 %v5833_v57  ;;  %v5851_v55 = vld [vmem:[%s5954_s24 + $0x408] sm:$0xff]   ;;  %v5853_v57 = vld [vmem:[%s5954_s24 + $0x410] sm:$0xff]  }
  0xe0   : > { %5593 = vmatprep.subr.bf16.mxu1 %v5842_v61  ;;  %5633 = vmatprep.subr.bf16.mxu0 %v5843_v62 }
  0xe3   : > { %5594 = vmatpush3.bf16.msra.mxu1 %v5842_v61  ;;  %5634 = vmatpush3.bf16.msra.mxu0 %v5843_v62  ;;  %v320_v62 = vld [vmem:[#allocation2 + $0x18] sm:$0xff] }
  0xe5   : > { %5524 = vmatmul.mubr.msk.bf16.gmra.mxu1 %vm493_vm1, %v5820_v63  ;;  %5564 = vmatmul.mubr.msk.bf16.gmra.mxu0 %vm493_vm1, %v5821_v0 }
  0xe6   : > { %5527 = vmatprep.mubr.msk.bf16.mxu1 %vm493_vm1, %v5824_v1  ;;  %5567 = vmatprep.mubr.msk.bf16.mxu0 %vm493_vm1, %v5825_v2 }
  0xed   : > { %5528 = vmatmul.mubr.msk.bf16.gmra.mxu1 %vm493_vm1, %v5826_v3  ;;  %5568 = vmatmul.mubr.msk.bf16.gmra.mxu0 %vm493_vm1, %v5827_v4  ;;  %v318_v3 = vld [vmem:[#allocation2 + $0x8] sm:$0xff] }
  0xee   : > { %5531 = vmatprep.mubr.msk.bf16.mxu1 %vm493_vm1, %v5828_v5  ;;  %5571 = vmatprep.mubr.msk.bf16.mxu0 %vm493_vm1, %v5829_v6 }
  0xf5   : > { %v6230_v11 = vpop.f32.mrf.mxu0  ;;  %v6232_v12 = vpop.f32.mrf.mxu1  ;;  %5532 = vmatmul.mubr.msk.bf16.gmra.mxu1 %vm493_vm1, %v5830_v7  ;;  %5572 = vmatmul.mubr.msk.bf16.gmra.mxu0 %vm493_vm1, %v5831_v8 }
  0xf6   : > { %5535 = vmatprep.mubr.msk.bf16.mxu1 %vm493_vm1, %v5834_v9  ;;  %5575 = vmatprep.mubr.msk.bf16.mxu0 %vm493_vm1, %v5835_v10  ;;  %v705_v61 = vadd.f32 %v6230_v11, %v319_v51  ;;  %v323_v9 = vld [vmem:[#allocation2 + $0x30] sm:$0xff] }
  0xf7   : > { %v6238_v13 = vpop.f32.mrf.mxu0  ;;  %v6240_v14 = vpop.f32.mrf.mxu1 }
  0xf8   : > { %v703_v1 = vadd.f32 %v6238_v13, %v317_v58  ;;  %v5855_v13 = vld [vmem:[%s5954_s24 + $0x418] sm:$0xff]  }
  0xf9   : > { %v6242_v15 = vpop.f32.mrf.mxu0  ;;  %v6244_v16 = vpop.f32.mrf.mxu1 }
  0xfa   : > { %v706_v6 = vadd.f32 %v6242_v15, %v320_v62 }
  0xfb   : > { %v6250_v21 = vpop.f32.mrf.mxu0  ;;  %v6252_v22 = vpop.f32.mrf.mxu1 }
  0xfd   : > { %v6254_v23 = vpop.f32.mrf.mxu0  ;;  %v6256_v24 = vpop.f32.mrf.mxu1  ;;  %5536 = vmatmul.mubr.msk.bf16.gmra.mxu1 %vm493_vm1, %v5836_v17  ;;  %5576 = vmatmul.mubr.msk.bf16.gmra.mxu0 %vm493_vm1, %v5837_v18  ;;  %v5854_v17 = vld [vmem:[%s5954_s24 + $0x398] sm:$0xff]   ;;  %v704_v18 = vadd.f32 %v6250_v21, %v318_v3  ;;  %v5859_v3 = vld [vmem:[%s5954_s24 + $0x428] sm:$0xff]  }
  0xfe   : > { %5539 = vmatprep.mubr.msk.bf16.mxu1 %vm493_vm1, %v5838_v19  ;;  %5579 = vmatprep.mubr.msk.bf16.mxu0 %vm493_vm1, %v5839_v20  ;;  %v709_v15 = vadd.f32 %v6254_v23, %v323_v9  ;;  %v322_v23 = vld [vmem:[#allocation2 + $0x28] sm:$0xff]  ;;  %v5861_v9 = vld [vmem:[%s5954_s24 + $0x430] sm:$0xff]  }
  0xff   : > { %v6262_v25 = vpop.f32.mrf.mxu0  ;;  %v6264_v26 = vpop.f32.mrf.mxu1 }
 0x101   : > { %v6266_v27 = vpop.f32.mrf.mxu0  ;;  %v6268_v28 = vpop.f32.mrf.mxu1 }
 0x103   : > { %v6274_v33 = vpop.f32.mrf.mxu0  ;;  %v6276_v34 = vpop.f32.mrf.mxu1 }
 0x105   : > { %v6278_v35 = vpop.f32.mrf.mxu0  ;;  %v6280_v36 = vpop.f32.mrf.mxu1  ;;  %5540 = vmatmul.mubr.msk.bf16.gmra.mxu1 %vm493_vm1, %v5840_v29  ;;  %5580 = vmatmul.mubr.msk.bf16.gmra.mxu0 %vm493_vm1, %v5841_v30  ;;  %v5856_v29 = vld [vmem:[%s5954_s24 + $0x3a0] sm:$0xff]  }
 0x106   : > { %5543 = vmatprep.mubr.msk.bf16.mxu1 %vm493_vm1, %v5844_v31  ;;  %5583 = vmatprep.mubr.msk.bf16.mxu0 %vm493_vm1, %v5845_v32  ;;  %v5857_v30 = vld [vmem:[%s5954_s24 + $0x420] sm:$0xff]  }
 0x107   : > { %v6286_v37 = vpop.f32.mrf.mxu0  ;;  %v6288_v38 = vpop.f32.mrf.mxu1  ;;  %v321_v31 = vld [vmem:[#allocation2 + $0x20] sm:$0xff] }
 0x108   : > { %v707_v21 = vadd.f32 %v6262_v25, %v321_v31 }
 0x109   : > { %v6290_v39 = vpop.f32.mrf.mxu0  ;;  %v6292_v40 = vpop.f32.mrf.mxu1 }
 0x10b   : > { %v6298_v45 = vpop.f32.mrf.mxu0  ;;  %v6300_v46 = vpop.f32.mrf.mxu1 }
 0x10d   : > { %v6302_v47 = vpop.f32.mrf.mxu0  ;;  %v6304_v48 = vpop.f32.mrf.mxu1  ;;  %5544 = vmatmul.mubr.msk.bf16.gmra.mxu1 %vm493_vm1, %v5846_v41  ;;  %5584 = vmatmul.mubr.msk.bf16.gmra.mxu0 %vm493_vm1, %v5847_v42 }
 0x10e   : > { %5595 = vmatprep.mubr.msk.bf16.mxu1 %vm493_vm1, %v5848_v43  ;;  %5635 = vmatprep.mubr.msk.bf16.mxu0 %vm493_vm1, %v5849_v44  ;;  %v324_v44 = vld [vmem:[#allocation2 + $0x38] sm:$0xff] }
 0x10f   : > { %v6310_v49 = vpop.f32.mrf.mxu0  ;;  %v6312_v50 = vpop.f32.mrf.mxu1 }
 0x111   : > { %v6314_v52 = vpop.f32.mrf.mxu0  ;;  %v6316_v53 = vpop.f32.mrf.mxu1 }
 0x113   : > { %v6322_v59 = vpop.f32.mrf.mxu0  ;;  %v6324_v60 = vpop.f32.mrf.mxu1 }
 0x115   : > { %v5357_v63 = vpop.f32.mrf.mxu1  ;;  %v5397_v0 = vpop.f32.mrf.mxu0  ;;  %5596 = vmatmul.mubr.msk.bf16.vlgmr.msra.gmra.mxu1 %vm493_vm1, %v5850_v54  ;;  %5636 = vmatmul.mubr.msk.bf16.vlgmr.msra.gmra.mxu0 %vm493_vm1, %v5851_v55 }
 0x116   : > { %v1092_v2 = vadd.f32 %v5357_v63, %v705_v61  ;;  %5599 = vmatprep.mubr.msk.bf16.mxu1 %vm493_vm1, %v5852_v56  ;;  %5639 = vmatprep.mubr.msk.bf16.mxu0 %vm493_vm1, %v5853_v57  ;;  %v710_v61 = vadd.f32 %v6266_v27, %v324_v44 }
 0x117   : > { %v963_v4 = vpop.f32.mrf.mxu1  ;;  %v1350_v5 = vpop.f32.mrf.mxu0 }
 0x118   : > { %v6333_v7 = vadd.f32 %v5397_v0, %v1092_v2  ;;  %v1090_v8 = vadd.f32 %v963_v4, %v703_v1  ;;  %v327_v0 = vld [vmem:[#allocation2 + $0x50] sm:$0xff]  ;;  %v5858_v2 = vld [vmem:[%s5954_s24 + $0x3a8] sm:$0xff]   ;;  %v708_v4 = vadd.f32 %v6274_v33, %v322_v23  ;;  %v5863_v23 = vld [vmem:[%s5954_s24 + $0x438] sm:$0xff]  }
 0x119   : > { %v5358_v10 = vpop.f32.mrf.mxu1  ;;  %v5398_v11 = vpop.f32.mrf.mxu0  ;;  %v713_v27 = vadd.f32 %v6278_v35, %v327_v0  ;;  %v326_v35 = vld [vmem:[#allocation2 + $0x48] sm:$0xff]  ;;  %v5865_v0 = vld [vmem:[%s5954_s24 + $0x440] sm:$0xff]  }
 0x11a   : > { %v6338_v19 = vadd.f32 %v1350_v5, %v1090_v8  ;;  %v1093_v20 = vadd.f32 %v5358_v10, %v706_v6  ;;  %v5860_v8 = vld [vmem:[%s5954_s24 + $0x3b0] sm:$0xff]   ;;  %v325_v10 = vld [vmem:[#allocation2 + $0x40] sm:$0xff] }
 0x11b   : > { %v966_v32 = vpop.f32.mrf.mxu1  ;;  %v1353_v41 = vpop.f32.mrf.mxu0  ;;  %v711_v33 = vadd.f32 %v6286_v37, %v325_v10 }
 0x11c   : > { %v6343_v42 = vadd.f32 %v5398_v11, %v1093_v20  ;;  %v1091_v43 = vadd.f32 %v966_v32, %v704_v18  ;;  %v328_v20 = vld [vmem:[#allocation2 + $0x58] sm:$0xff] }
 0x11d   : > { %v5361_v51 = vpop.f32.mrf.mxu1  ;;  %v5401_v54 = vpop.f32.mrf.mxu0  ;;  %5600 = vmatmul.mubr.msk.bf16.gmra.mxu1 %vm493_vm1, %v5854_v17  ;;  %5640 = vmatmul.mubr.msk.bf16.gmra.mxu0 %vm493_vm1, %v5855_v13 }
 0x11e   : > { %v6348_v55 = vadd.f32 %v1353_v41, %v1091_v43  ;;  %v1096_v56 = vadd.f32 %v5361_v51, %v709_v15  ;;  %5603 = vmatprep.mubr.msk.bf16.mxu1 %vm493_vm1, %v5856_v29  ;;  %5643 = vmatprep.mubr.msk.bf16.mxu0 %vm493_vm1, %v5857_v30  ;;  %v714_v43 = vadd.f32 %v6290_v39, %v328_v20 }
 0x11f   : > { %v979_v57 = vpop.f32.mrf.mxu1  ;;  %v1366_v58 = vpop.f32.mrf.mxu0 }
 0x120   : > { %v6353_v62 = vadd.f32 %v5401_v54, %v1096_v56  ;;  %v1094_v63 = vadd.f32 %v979_v57, %v707_v21  ;;  %v331_v54 = vld [vmem:[#allocation2 + $0x70] sm:$0xff]  ;;  %v5862_v56 = vld [vmem:[%s5954_s24 + $0x3b8] sm:$0xff]   ;;  %v712_v57 = vadd.f32 %v6298_v45, %v326_v35  ;;  %v5867_v35 = vld [vmem:[%s5954_s24 + $0x448] sm:$0xff]  }
 0x121   : > { %v5362_v1 = vpop.f32.mrf.mxu1  ;;  %v5402_v25 = vpop.f32.mrf.mxu0  ;;  %v717_v39 = vadd.f32 %v6302_v47, %v331_v54  ;;  %v330_v47 = vld [vmem:[#allocation2 + $0x68] sm:$0xff]  ;;  %v5869_v54 = vld [vmem:[%s5954_s24 + $0x450] sm:$0xff]  }
 0x122   : > { %v6358_v5 = vadd.f32 %v1366_v58, %v1094_v63  ;;  %v1097_v6 = vadd.f32 %v5362_v1, %v710_v61  ;;  %v5864_v63 = vld [vmem:[%s5954_s24 + $0x3c0] sm:$0xff]  }
 0x123   : > { %v982_v11 = vpop.f32.mrf.mxu1  ;;  %v1369_v17 = vpop.f32.mrf.mxu0  ;;  %v329_v1 = vld [vmem:[#allocation2 + $0x60] sm:$0xff] }
 0x124   : > { %v6363_v13 = vadd.f32 %v5402_v25, %v1097_v6  ;;  %v1095_v18 = vadd.f32 %v982_v11, %v708_v4  ;;  %v332_v6 = vld [vmem:[#allocation2 + $0x78] sm:$0xff]  ;;  %v715_v45 = vadd.f32 %v6310_v49, %v329_v1 }
 0x125   : > { %v5365_v29 = vpop.f32.mrf.mxu1  ;;  %v5405_v30 = vpop.f32.mrf.mxu0  ;;  %5604 = vmatmul.mubr.msk.bf16.gmra.mxu1 %vm493_vm1, %v5858_v2  ;;  %5644 = vmatmul.mubr.msk.bf16.gmra.mxu0 %vm493_vm1, %v5859_v3 }
 0x126   : > { %v6368_v31 = vadd.f32 %v1369_v17, %v1095_v18  ;;  %v1100_v32 = vadd.f32 %v5365_v29, %v713_v27  ;;  %5607 = vmatprep.mubr.msk.bf16.mxu1 %vm493_vm1, %v5860_v8  ;;  %5647 = vmatprep.mubr.msk.bf16.mxu0 %vm493_vm1, %v5861_v9  ;;  %v718_v18 = vadd.f32 %v6314_v52, %v332_v6 }
 0x127   : > { %v995_v41 = vpop.f32.mrf.mxu1  ;;  %v1382_v15 = vpop.f32.mrf.mxu0 }
 0x128   : > { %v6373_v44 = vadd.f32 %v5405_v30, %v1100_v32  ;;  %v1098_v51 = vadd.f32 %v995_v41, %v711_v33  ;;  %v335_v30 = vld [vmem:[#allocation2 + $0x90] sm:$0xff]  ;;  %v5866_v32 = vld [vmem:[%s5954_s24 + $0x3c8] sm:$0xff]   ;;  %v716_v41 = vadd.f32 %v6322_v59, %v330_v47  ;;  %v5871_v47 = vld [vmem:[%s5954_s24 + $0x458] sm:$0xff]  }
 0x129   : > { %v5366_v21 = vpop.f32.mrf.mxu1  ;;  %v5406_v37 = vpop.f32.mrf.mxu0  ;;  %v721_v52 = vadd.f32 %v6232_v12, %v335_v30  ;;  %v334_v12 = vld [vmem:[#allocation2 + $0x88] sm:$0xff]  ;;  %v5873_v30 = vld [vmem:[%s5954_s24 + $0x460] sm:$0xff]  }
 0x12a   : > { %v6378_v58 = vadd.f32 %v1382_v15, %v1098_v51  ;;  %v1101_v61 = vadd.f32 %v5366_v21, %v714_v43  ;;  %v5868_v51 = vld [vmem:[%s5954_s24 + $0x3d0] sm:$0xff]   ;;  %v333_v21 = vld [vmem:[#allocation2 + $0x80] sm:$0xff] }
 0x12b   : > { %v998_v25 = vpop.f32.mrf.mxu1  ;;  %v1385_v2 = vpop.f32.mrf.mxu0  ;;  %v719_v59 = vadd.f32 %v6240_v14, %v333_v21 }
 0x12c   : > { %v6383_v3 = vadd.f32 %v5406_v37, %v1101_v61  ;;  %v1099_v4 = vadd.f32 %v998_v25, %v712_v57  ;;  %v336_v61 = vld [vmem:[#allocation2 + $0x98] sm:$0xff] }
 0x12d   : > { %v5369_v8 = vpop.f32.mrf.mxu1  ;;  %v5409_v9 = vpop.f32.mrf.mxu0  ;;  %5608 = vmatmul.mubr.msk.bf16.gmra.mxu1 %vm493_vm1, %v5862_v56  ;;  %5648 = vmatmul.mubr.msk.bf16.gmra.mxu0 %vm493_vm1, %v5863_v23 }
 0x12e   : > { %v6388_v10 = vadd.f32 %v1385_v2, %v1099_v4  ;;  %v1104_v11 = vadd.f32 %v5369_v8, %v717_v39  ;;  %5611 = vmatprep.mubr.msk.bf16.mxu1 %vm493_vm1, %v5864_v63  ;;  %5651 = vmatprep.mubr.msk.bf16.mxu0 %vm493_vm1, %v5865_v0  ;;  %v722_v4 = vadd.f32 %v6244_v16, %v336_v61 }
 0x12f   : > { %v1011_v17 = vpop.f32.mrf.mxu1  ;;  %v1398_v27 = vpop.f32.mrf.mxu0 }
 0x130   : > { %v6393_v20 = vadd.f32 %v5409_v9, %v1104_v11  ;;  %v1102_v29 = vadd.f32 %v1011_v17, %v715_v45  ;;  %v339_v9 = vld [vmem:[#allocation2 + $0xb0] sm:$0xff]  ;;  %v5870_v11 = vld [vmem:[%s5954_s24 + $0x3d8] sm:$0xff]   ;;  %v720_v17 = vadd.f32 %v6252_v22, %v334_v12  ;;  %v5875_v12 = vld [vmem:[%s5954_s24 + $0x468] sm:$0xff]  }
 0x131   : > { %v5370_v33 = vpop.f32.mrf.mxu1  ;;  %v5410_v49 = vpop.f32.mrf.mxu0  ;;  %v725_v16 = vadd.f32 %v6256_v24, %v339_v9  ;;  %v338_v24 = vld [vmem:[#allocation2 + $0xa8] sm:$0xff]  ;;  %v5877_v9 = vld [vmem:[%s5954_s24 + $0x470] sm:$0xff]  }
 0x132   : > { %v6398_v15 = vadd.f32 %v1398_v27, %v1102_v29  ;;  %v1105_v43 = vadd.f32 %v5370_v33, %v718_v18  ;;  %v5872_v29 = vld [vmem:[%s5954_s24 + $0x3e0] sm:$0xff]  }
 0x133   : > { %v1014_v37 = vpop.f32.mrf.mxu1  ;;  %v1401_v56 = vpop.f32.mrf.mxu0  ;;  %v337_v33 = vld [vmem:[#allocation2 + $0xa0] sm:$0xff] }
 0x134   : > { %v6403_v23 = vadd.f32 %v5410_v49, %v1105_v43  ;;  %v1103_v57 = vadd.f32 %v1014_v37, %v716_v41  ;;  %v340_v43 = vld [vmem:[#allocation2 + $0xb8] sm:$0xff]  ;;  %v723_v22 = vadd.f32 %v6264_v26, %v337_v33 }
 0x135   : > { %v5373_v63 = vpop.f32.mrf.mxu1  ;;  %v5413_v0 = vpop.f32.mrf.mxu0  ;;  %5612 = vmatmul.mubr.msk.bf16.gmra.mxu1 %vm493_vm1, %v5866_v32  ;;  %5652 = vmatmul.mubr.msk.bf16.gmra.mxu0 %vm493_vm1, %v5867_v35 }
 0x136   : > { %v6408_v1 = vadd.f32 %v1401_v56, %v1103_v57  ;;  %v1108_v25 = vadd.f32 %v5373_v63, %v721_v52  ;;  %5615 = vmatprep.mubr.msk.bf16.mxu1 %vm493_vm1, %v5868_v51  ;;  %5655 = vmatprep.mubr.msk.bf16.mxu0 %vm493_vm1, %v5869_v54  ;;  %v726_v57 = vadd.f32 %v6268_v28, %v340_v43 }
 0x137   : > { %v1027_v2 = vpop.f32.mrf.mxu1  ;;  %v1414_v39 = vpop.f32.mrf.mxu0 }
 0x138   : > { %v6413_v6 = vadd.f32 %v5413_v0, %v1108_v25  ;;  %v1106_v8 = vadd.f32 %v1027_v2, %v719_v59  ;;  %v343_v0 = vld [vmem:[#allocation2 + $0xd0] sm:$0xff]  ;;  %v5874_v25 = vld [vmem:[%s5954_s24 + $0x3e8] sm:$0xff]   ;;  %v724_v2 = vadd.f32 %v6276_v34, %v338_v24  ;;  %v5878_v24 = vld [vmem:[%s5954_s24 + $0x3f8] sm:$0xff]  }
 0x139   : > { %v5374_v45 = vpop.f32.mrf.mxu1  ;;  %v5414_v14 = vpop.f32.mrf.mxu0  ;;  %v729_v28 = vadd.f32 %v6280_v36, %v343_v0  ;;  %v342_v36 = vld [vmem:[#allocation2 + $0xc8] sm:$0xff] }
 0x13a   : > { %v6418_v27 = vadd.f32 %v1414_v39, %v1106_v8  ;;  %v1109_v18 = vadd.f32 %v5374_v45, %v722_v4  ;;  %v5876_v8 = vld [vmem:[%s5954_s24 + $0x3f0] sm:$0xff]   ;;  %v341_v45 = vld [vmem:[#allocation2 + $0xc0] sm:$0xff] }
 0x13b   : > { %v1030_v49 = vpop.f32.mrf.mxu1  ;;  %v1417_v32 = vpop.f32.mrf.mxu0  ;;  %v727_v34 = vadd.f32 %v6288_v38, %v341_v45  ;;  %v5879_v38 = vld [vmem:[%s5954_s24 + $0x478] sm:$0xff]   ;;  %v346_v45 = vld [vmem:[#allocation2 + $0xe8] sm:$0xff] }
 0x13c   : > { %v6423_v35 = vadd.f32 %v5414_v14, %v1109_v18  ;;  %v1107_v41 = vadd.f32 %v1030_v49, %v720_v17  ;;  %v344_v18 = vld [vmem:[#allocation2 + $0xd8] sm:$0xff] }
 0x13d   : > { %v5377_v51 = vpop.f32.mrf.mxu1  ;;  %v5417_v54 = vpop.f32.mrf.mxu0  ;;  %5616 = vmatmul.mubr.msk.bf16.gmra.mxu1 %vm493_vm1, %v5870_v11  ;;  %5656 = vmatmul.mubr.msk.bf16.gmra.mxu0 %vm493_vm1, %v5871_v47 }
 0x13e   : > { %v6428_v21 = vadd.f32 %v1417_v32, %v1107_v41  ;;  %v1112_v37 = vadd.f32 %v5377_v51, %v725_v16  ;;  %5619 = vmatprep.mubr.msk.bf16.mxu1 %vm493_vm1, %v5872_v29  ;;  %5659 = vmatprep.mubr.msk.bf16.mxu0 %vm493_vm1, %v5873_v30  ;;  %v730_v41 = vadd.f32 %v6292_v40, %v344_v18 }
 0x13f   : > { %v1043_v56 = vpop.f32.mrf.mxu1  ;;  %v1430_v52 = vpop.f32.mrf.mxu0 }
 0x140   : > { %v6433_v61 = vadd.f32 %v5417_v54, %v1112_v37  ;;  %v1110_v63 = vadd.f32 %v1043_v56, %v723_v22  ;;  %v347_v54 = vld [vmem:[#allocation2 + $0xf0] sm:$0xff]  ;;  %v728_v56 = vadd.f32 %v6300_v46, %v342_v36 }
 0x141   : > { %v5378_v59 = vpop.f32.mrf.mxu1  ;;  %v5418_v26 = vpop.f32.mrf.mxu0 }
 0x142   : > { %v6438_v39 = vadd.f32 %v1430_v52, %v1110_v63  ;;  %v1113_v4 = vadd.f32 %v5378_v59, %v726_v57  ;;  %v345_v63 = vld [vmem:[#allocation2 + $0xe0] sm:$0xff] }
 0x143   : > { %v1046_v14 = vpop.f32.mrf.mxu1  ;;  %v1433_v11 = vpop.f32.mrf.mxu0  ;;  %v731_v46 = vadd.f32 %v6312_v50, %v345_v63 }
 0x144   : > { %v6443_v47 = vadd.f32 %v5418_v26, %v1113_v4  ;;  %v1111_v17 = vadd.f32 %v1046_v14, %v724_v2  ;;  %v733_v26 = vadd.f32 %v6304_v48, %v347_v54 }
 0x145   : > { %v5381_v29 = vpop.f32.mrf.mxu1  ;;  %v5421_v30 = vpop.f32.mrf.mxu0  ;;  %5620 = vmatmul.mubr.msk.bf16.gmra.mxu1 %vm493_vm1, %v5874_v25  ;;  %5660 = vmatmul.mubr.msk.bf16.gmra.mxu0 %vm493_vm1, %v5875_v12  ;;  %v348_v12 = vld [vmem:[#allocation2 + $0xf8] sm:$0xff] }
 0x146   : > { %v6448_v33 = vadd.f32 %v1433_v11, %v1111_v17  ;;  %v1116_v49 = vadd.f32 %v5381_v29, %v729_v28  ;;  %5623 = vmatprep.mubr.msk.bf16.mxu1 %vm493_vm1, %v5876_v8  ;;  %5663 = vmatprep.mubr.msk.bf16.mxu0 %vm493_vm1, %v5877_v9  ;;  %v734_v48 = vadd.f32 %v6316_v53, %v348_v12 }
 0x147   : > { %v1059_v32 = vpop.f32.mrf.mxu1  ;;  %v1446_v16 = vpop.f32.mrf.mxu0 }
 0x148   : > { %v6453_v43 = vadd.f32 %v5421_v30, %v1116_v49  ;;  %v1114_v51 = vadd.f32 %v1059_v32, %v727_v34  ;;  %v732_v30 = vadd.f32 %v6324_v60, %v346_v45 }
 0x149   : > { %v5382_v22 = vpop.f32.mrf.mxu1  ;;  %v5422_v37 = vpop.f32.mrf.mxu0 }
 0x14a   : > { %v6458_v52 = vadd.f32 %v1446_v16, %v1114_v51  ;;  %v1117_v57 = vadd.f32 %v5382_v22, %v730_v41 }
 0x14b   : > { %v1062_v0 = vpop.f32.mrf.mxu1  ;;  %v1449_v59 = vpop.f32.mrf.mxu0 }
 0x14c   : > { %v6461_v25 = vadd.f32 %v5422_v37, %v1117_v57  ;;  %v1115_v40 = vadd.f32 %v1062_v0, %v728_v56 }
 0x14d   : > { %v5385_v2 = vpop.f32.mrf.mxu1  ;;  %v5425_v4 = vpop.f32.mrf.mxu0  ;;  %5624 = vmatmul.mubr.msk.bf16.gmra.mxu1 %vm493_vm1, %v5878_v24  ;;  %5664 = vmatmul.mubr.msk.bf16.gmra.mxu0 %vm493_vm1, %v5879_v38 }
 0x14e   : > { %v6466_v8 = vadd.f32 %v1449_v59, %v1115_v40  ;;  %v1120_v9 = vadd.f32 %v5385_v2, %v733_v26 }
 0x14f   : > { %v1075_v14 = vpop.f32.mrf.mxu1  ;;  %v1462_v11 = vpop.f32.mrf.mxu0 }
 0x150   : > { %v6469_v28 = vadd.f32 %v5425_v4, %v1120_v9  ;;  %v1118_v17 = vadd.f32 %v1075_v14, %v731_v46 }
 0x151   : > { %v5386_v18 = vpop.f32.mrf.mxu1  ;;  %v5426_v29 = vpop.f32.mrf.mxu0 }
 0x152   : > { %v6472_v34 = vadd.f32 %v1462_v11, %v1118_v17  ;;  %v1121_v49 = vadd.f32 %v5386_v18, %v734_v48 }
 0x153   : > { %v1078_v36 = vpop.f32.mrf.mxu1  ;;  %v1465_v50 = vpop.f32.mrf.mxu0 }
 0x154   : > { %v6474_v32 = vadd.f32 %v5426_v29, %v1121_v49  ;;  %v1119_v16 = vadd.f32 %v1078_v36, %v732_v30 }
 0x155   : > { %v5437_v41 = vpop.f32.mrf.mxu1  ;;  %v5477_v51 = vpop.f32.mrf.mxu0 }
 0x156   : > { %v6476_v54 = vadd.f32 %v1465_v50, %v1119_v16  ;;  %v1866_v53 = vadd.f32 %v5437_v41, %v6333_v7 }
 0x157   : > { %v1737_v22 = vpop.f32.mrf.mxu1  ;;  %v2124_v37 = vpop.f32.mrf.mxu0 }
 0x158   : > { %v6479_v24 = vadd.f32 %v5477_v51, %v1866_v53  ;;  %v1864_v60 = vadd.f32 %v1737_v22, %v6338_v19 }
 0x159   : > { %v5438_v38 = vpop.f32.mrf.mxu1  ;;  %v5478_v56 = vpop.f32.mrf.mxu0 }
 0x15a   : > { %v6482_v57 = vadd.f32 %v2124_v37, %v1864_v60  ;;  %v1867_v63 = vadd.f32 %v5438_v38, %v6343_v42 }
 0x15b   : > { %v1740_v0 = vpop.f32.mrf.mxu1  ;;  %v2127_v59 = vpop.f32.mrf.mxu0 }
 0x15c   : > { %v6485_v26 = vadd.f32 %v5478_v56, %v1867_v63  ;;  %v1865_v40 = vadd.f32 %v1740_v0, %v6348_v55 }
 0x15d   : > { %v5441_v12 = vpop.f32.mrf.mxu1  ;;  %v5481_v7 = vpop.f32.mrf.mxu0 }
 0x15e   : > { %v6488_v2 = vadd.f32 %v2127_v59, %v1865_v40  ;;  %v1870_v4 = vadd.f32 %v5441_v12, %v6353_v62 }
 0x15f   : > { %v1753_v46 = vpop.f32.mrf.mxu1  ;;  %v2140_v19 = vpop.f32.mrf.mxu0 }
 0x160   : > { %v6491_v9 = vadd.f32 %v5481_v7, %v1870_v4  ;;  %v1868_v45 = vadd.f32 %v1753_v46, %v6358_v5 }
 0x161   : > { %v5442_v14 = vpop.f32.mrf.mxu1  ;;  %v5482_v42 = vpop.f32.mrf.mxu0 }
 0x162   : > { %v6494_v11 = vadd.f32 %v2140_v19, %v1868_v45  ;;  %v1871_v48 = vadd.f32 %v5442_v14, %v6363_v13 }
 0x163   : > { %v1756_v17 = vpop.f32.mrf.mxu1  ;;  %v2143_v55 = vpop.f32.mrf.mxu0 }
 0x164   : > { %v6497_v18 = vadd.f32 %v5482_v42, %v1871_v48  ;;  %v1869_v29 = vadd.f32 %v1756_v17, %v6368_v31 }
 0x165   : > { %v5445_v30 = vpop.f32.mrf.mxu1  ;;  %v5485_v62 = vpop.f32.mrf.mxu0 }
 0x166   : > { %v6500_v49 = vadd.f32 %v2143_v55, %v1869_v29  ;;  %v1874_v36 = vadd.f32 %v5445_v30, %v6373_v44 }
 0x167   : > { %v1769_v50 = vpop.f32.mrf.mxu1  ;;  %v2156_v5 = vpop.f32.mrf.mxu0 }
 0x168   : > { %v6503_v16 = vadd.f32 %v5485_v62, %v1874_v36  ;;  %v1872_v41 = vadd.f32 %v1769_v50, %v6378_v58 }
 0x169   : > { %v5446_v51 = vpop.f32.mrf.mxu1  ;;  %v5486_v13 = vpop.f32.mrf.mxu0 }
 0x16a   : > { %v6506_v53 = vadd.f32 %v2156_v5, %v1872_v41  ;;  %v1875_v22 = vadd.f32 %v5446_v51, %v6383_v3 }
 0x16b   : > { %v1772_v37 = vpop.f32.mrf.mxu1  ;;  %v2159_v31 = vpop.f32.mrf.mxu0 }
 0x16c   : > { %v6509_v60 = vadd.f32 %v5486_v13, %v1875_v22  ;;  %v1873_v38 = vadd.f32 %v1772_v37, %v6388_v10 }
 0x16d   : > { %v5449_v56 = vpop.f32.mrf.mxu1  ;;  %v5489_v44 = vpop.f32.mrf.mxu0 }
 0x16e   : > { %v6512_v63 = vadd.f32 %v2159_v31, %v1873_v38  ;;  %v1878_v0 = vadd.f32 %v5449_v56, %v6393_v20 }
 0x16f   : > { %v1785_v59 = vpop.f32.mrf.mxu1  ;;  %v2172_v58 = vpop.f32.mrf.mxu0 }
 0x170   : > { %v6515_v40 = vadd.f32 %v5489_v44, %v1878_v0  ;;  %v1876_v12 = vadd.f32 %v1785_v59, %v6398_v15 }
 0x171   : > { %v5450_v7 = vpop.f32.mrf.mxu1  ;;  %v5490_v3 = vpop.f32.mrf.mxu0 }
 0x172   : > { %v6518_v4 = vadd.f32 %v2172_v58, %v1876_v12  ;;  %v1879_v46 = vadd.f32 %v5450_v7, %v6403_v23 }
 0x173   : > { %v1788_v19 = vpop.f32.mrf.mxu1  ;;  %v2175_v10 = vpop.f32.mrf.mxu0 }
 0x174   : > { %v6521_v45 = vadd.f32 %v5490_v3, %v1879_v46  ;;  %v1877_v14 = vadd.f32 %v1788_v19, %v6408_v1 }
 0x175   : > { %v5453_v42 = vpop.f32.mrf.mxu1  ;;  %v5493_v20 = vpop.f32.mrf.mxu0 }
 0x176   : > { %v6524_v48 = vadd.f32 %v2175_v10, %v1877_v14  ;;  %v1882_v17 = vadd.f32 %v5453_v42, %v6413_v6 }
 0x177   : > { %v1801_v55 = vpop.f32.mrf.mxu1  ;;  %v2188_v15 = vpop.f32.mrf.mxu0 }
 0x178   : > { %v6527_v29 = vadd.f32 %v5493_v20, %v1882_v17  ;;  %v1880_v30 = vadd.f32 %v1801_v55, %v6418_v27 }
 0x179   : > { %v5454_v62 = vpop.f32.mrf.mxu1  ;;  %v5494_v23 = vpop.f32.mrf.mxu0 }
 0x17a   : > { %v6530_v36 = vadd.f32 %v2188_v15, %v1880_v30  ;;  %v1883_v50 = vadd.f32 %v5454_v62, %v6423_v35 }
 0x17b   : > { %v1804_v5 = vpop.f32.mrf.mxu1  ;;  %v2191_v1 = vpop.f32.mrf.mxu0 }
 0x17c   : > { %v6533_v41 = vadd.f32 %v5494_v23, %v1883_v50  ;;  %v1881_v51 = vadd.f32 %v1804_v5, %v6428_v21 }
 0x17d   : > { %v5457_v13 = vpop.f32.mrf.mxu1  ;;  %v5497_v6 = vpop.f32.mrf.mxu0 }
 0x17e   : > { %7052 = vst [vmem:[#allocation3_spill] sm:$0xff] %v6533_v41  ;;  %v6536_v22 = vadd.f32 %v2191_v1, %v1881_v51  ;;  %v1886_v37 = vadd.f32 %v5457_v13, %v6433_v61 }
 0x17f   : > { %v1817_v31 = vpop.f32.mrf.mxu1  ;;  %v2204_v27 = vpop.f32.mrf.mxu0 }
 0x180   : > { %7053 = vst [vmem:[#allocation4_spill] sm:$0xff] %v6536_v22  ;;  %v6539_v38 = vadd.f32 %v5497_v6, %v1886_v37  ;;  %v1884_v56 = vadd.f32 %v1817_v31, %v6438_v39 }
 0x181   : > { %v5458_v44 = vpop.f32.mrf.mxu1  ;;  %v5498_v35 = vpop.f32.mrf.mxu0 }
 0x182   : > { %7054 = vst [vmem:[#allocation5_spill] sm:$0xff] %v6539_v38  ;;  %v6542_v0 = vadd.f32 %v2204_v27, %v1884_v56  ;;  %v1887_v59 = vadd.f32 %v5458_v44, %v6443_v47 }
 0x183   : > { %v1820_v58 = vpop.f32.mrf.mxu1  ;;  %v2207_v21 = vpop.f32.mrf.mxu0 }
 0x184   : > { %7055 = vst [vmem:[#allocation6_spill] sm:$0xff] %v6542_v0  ;;  %v6545_v12 = vadd.f32 %v5498_v35, %v1887_v59  ;;  %v1885_v7 = vadd.f32 %v1820_v58, %v6448_v33 }
 0x185   : > { %v5461_v3 = vpop.f32.mrf.mxu1  ;;  %v5501_v61 = vpop.f32.mrf.mxu0 }
 0x186   : > { %7056 = vst [vmem:[#allocation7_spill] sm:$0xff] %v6545_v12  ;;  %v6548_v46 = vadd.f32 %v2207_v21, %v1885_v7  ;;  %v1890_v19 = vadd.f32 %v5461_v3, %v6453_v43 }
 0x187   : > { %v1833_v10 = vpop.f32.mrf.mxu1  ;;  %v2220_v39 = vpop.f32.mrf.mxu0 }
 0x188   : > { %7057 = vst [vmem:[#allocation8_spill] sm:$0xff] %v6548_v46  ;;  %v6551_v14 = vadd.f32 %v5501_v61, %v1890_v19  ;;  %v1888_v42 = vadd.f32 %v1833_v10, %v6458_v52 }
 0x189   : > { %v5462_v20 = vpop.f32.mrf.mxu1  ;;  %v5502_v47 = vpop.f32.mrf.mxu0 }
 0x18a   : > { %7058 = vst [vmem:[#allocation9_spill] sm:$0xff] %v6551_v14  ;;  %v6554_v17 = vadd.f32 %v2220_v39, %v1888_v42  ;;  %v1891_v55 = vadd.f32 %v5462_v20, %v6461_v25 }
 0x18b   : > { %v1836_v15 = vpop.f32.mrf.mxu1  ;;  %v2223_v33 = vpop.f32.mrf.mxu0 }
 0x18c   : > { %7059 = vst [vmem:[#allocation10_spill] sm:$0xff] %v6554_v17  ;;  %v6557_v30 = vadd.f32 %v5502_v47, %v1891_v55  ;;  %v1889_v62 = vadd.f32 %v1836_v15, %v6466_v8 }
 0x18d   : > { %v5465_v23 = vpop.f32.mrf.mxu1  ;;  %v5505_v43 = vpop.f32.mrf.mxu0 }
 0x18e   : > { %7060 = vst [vmem:[#allocation11_spill] sm:$0xff] %v6557_v30  ;;  %v6560_v50 = vadd.f32 %v2223_v33, %v1889_v62  ;;  %v1894_v5 = vadd.f32 %v5465_v23, %v6469_v28 }
 0x18f   : > { %v1849_v1 = vpop.f32.mrf.mxu1  ;;  %v2236_v52 = vpop.f32.mrf.mxu0 }
 0x190   : > { %7061 = vst [vmem:[#allocation12_spill] sm:$0xff] %v6560_v50  ;;  %v6563_v51 = vadd.f32 %v5505_v43, %v1894_v5  ;;  %v1892_v13 = vadd.f32 %v1849_v1, %v6472_v34 }
 0x191   : > { %v5466_v6 = vpop.f32.mrf.mxu1  ;;  %v5506_v25 = vpop.f32.mrf.mxu0 }
 0x192   : > { %7062 = vst [vmem:[#allocation13_spill] sm:$0xff] %v6563_v51  ;;  %v6566_v37 = vadd.f32 %v2236_v52, %v1892_v13  ;;  %v1895_v31 = vadd.f32 %v5466_v6, %v6474_v32 }
 0x193   : > { %v1852_v27 = vpop.f32.mrf.mxu1  ;;  %v2239_v8 = vpop.f32.mrf.mxu0 }
 0x194   : > { %7063 = vst [vmem:[#allocation14_spill] sm:$0xff] %v6566_v37  ;;  %v6569_v56 = vadd.f32 %v5506_v25, %v1895_v31  ;;  %v1893_v44 = vadd.f32 %v1852_v27, %v6476_v54 }
 0x195   : > { %v5517_v35 = vpop.f32.mrf.mxu1  ;;  %v6572_v28 = vpop.f32.mrf.mxu0 }
 0x196   : > { %7064 = vst [vmem:[#allocation15_spill] sm:$0xff] %v6569_v56  ;;  %v6574_v59 = vadd.f32 %v2239_v8, %v1893_v44 }
 0x197   : > { %v2511_v58 = vpop.f32.mrf.mxu1  ;;  %v6576_v21 = vpop.f32.mrf.mxu0 }
 0x198   : > { %7065 = vst [vmem:[#allocation16_spill] sm:$0xff] %v6574_v59 }
 0x199   : > { %v6578_v34 = vpop.f32.mrf.mxu1  ;;  %v6580_v7 = vpop.f32.mrf.mxu0 }
 0x19b   : > { %v6582_v3 = vpop.f32.mrf.mxu1  ;;  %v6584_v32 = vpop.f32.mrf.mxu0 }
 0x19d   : > { %v6586_v61 = vpop.f32.mrf.mxu1  ;;  %v6588_v19 = vpop.f32.mrf.mxu0 }
 0x19f   : > { %v6590_v54 = vpop.f32.mrf.mxu1  ;;  %v6592_v10 = vpop.f32.mrf.mxu0 }
 0x1a1   : > { %v6594_v39 = vpop.f32.mrf.mxu1  ;;  %v6596_v42 = vpop.f32.mrf.mxu0 }
 0x1a3   : > { %v6598_v20 = vpop.f32.mrf.mxu1  ;;  %v6600_v47 = vpop.f32.mrf.mxu0 }
 0x1a5   : > { %v6602_v55 = vpop.f32.mrf.mxu1  ;;  %v6604_v15 = vpop.f32.mrf.mxu0 }
 0x1a7   : > { %v6606_v33 = vpop.f32.mrf.mxu1  ;;  %v6608_v62 = vpop.f32.mrf.mxu0 }
 0x1a9   : > { %v6610_v23 = vpop.f32.mrf.mxu1  ;;  %v6612_v43 = vpop.f32.mrf.mxu0 }
 0x1ab   : > { %v6614_v5 = vpop.f32.mrf.mxu1  ;;  %v6616_v1 = vpop.f32.mrf.mxu0 }
 0x1ad   : > { %v6618_v52 = vpop.f32.mrf.mxu1  ;;  %v6620_v13 = vpop.f32.mrf.mxu0 }
 0x1af   : > { %v6622_v6 = vpop.f32.mrf.mxu1  ;;  %v6624_v25 = vpop.f32.mrf.mxu0 }
 0x1b1   : > { %v6626_v31 = vpop.f32.mrf.mxu1  ;;  %v6628_v27 = vpop.f32.mrf.mxu0 }
 0x1b3   : > { %v6630_v8 = vpop.f32.mrf.mxu1  ;;  %v6632_v44 = vpop.f32.mrf.mxu0 }
 0x1b5   : > { %v6634_v59 = vpop.f32.mrf.mxu1  ;;  %v6636_v56 = vpop.f32.mrf.mxu0 }
 0x1b7   : > { %v6638_v37 = vpop.f32.mrf.mxu1  ;;  %v6640_v51 = vpop.f32.mrf.mxu0 }
 0x1b8   : > { %7066 = vst [vmem:[#allocation17_spill] sm:$0xff] %v6640_v51 }
 0x1b9   : > { %v6642_v50 = vpop.f32.mrf.mxu1  ;;  %v6644_v30 = vpop.f32.mrf.mxu0 }
 0x1ba   : > { %7067 = vst [vmem:[#allocation18_spill] sm:$0xff] %v6642_v50  ;;  %7068 = vst [vmem:[#allocation19_spill] sm:$0xff] %v6644_v30 }
 0x1bb   : > { %v6646_v17 = vpop.f32.mrf.mxu1  ;;  %v6648_v14 = vpop.f32.mrf.mxu0 }
 0x1bc   : > { %7069 = vst [vmem:[#allocation20_spill] sm:$0xff] %v6646_v17  ;;  %7070 = vst [vmem:[#allocation21_spill] sm:$0xff] %v6648_v14 }
 0x1bd   : > { %v6650_v46 = vpop.f32.mrf.mxu1  ;;  %v6652_v12 = vpop.f32.mrf.mxu0 }
 0x1be   : > { %7071 = vst [vmem:[#allocation22_spill] sm:$0xff] %v6650_v46  ;;  %7072 = vst [vmem:[#allocation23_spill] sm:$0xff] %v6652_v12 }
 0x1bf   : > { %v6654_v0 = vpop.f32.mrf.mxu1  ;;  %v6656_v38 = vpop.f32.mrf.mxu0 }
 0x1c0   : > { %7073 = vst [vmem:[#allocation24_spill] sm:$0xff] %v6654_v0  ;;  %7074 = vst [vmem:[#allocation25_spill] sm:$0xff] %v6656_v38 }
 0x1c1   : > { %v6658_v22 = vpop.f32.mrf.mxu1  ;;  %v6660_v41 = vpop.f32.mrf.mxu0 }
 0x1c2   : > { %7075 = vst [vmem:[#allocation26_spill] sm:$0xff] %v6658_v22  ;;  %7076 = vst [vmem:[#allocation27_spill] sm:$0xff] %v6660_v41 }
 0x1c3   : > { %v6662_v51 = vpop.f32.mrf.mxu1  ;;  %v6664_v50 = vpop.f32.mrf.mxu0 }
 0x1c4   : > { %7077 = vst [vmem:[#allocation28_spill] sm:$0xff] %v6662_v51  ;;  %7078 = vst [vmem:[#allocation29_spill] sm:$0xff] %v6664_v50 }
 0x1c5   : > { %v6666_v30 = vpop.f32.mrf.mxu1  ;;  %v6668_v17 = vpop.f32.mrf.mxu0 }
 0x1c6   : > { %7079 = vst [vmem:[#allocation30_spill] sm:$0xff] %v6666_v30  ;;  %7080 = vst [vmem:[#allocation31_spill] sm:$0xff] %v6668_v17  ;;  %v2640_v17 = vadd.f32 %v5517_v35, %v6479_v24  ;;  %v2639_v24 = vadd.f32 %v6582_v3, %v6488_v2 }
 0x1c7   : > { %v6670_v14 = vpop.f32.mrf.mxu1  ;;  %v6672_v46 = vpop.f32.mrf.mxu0 }
 0x1c8   : > { %7081 = vst [vmem:[#allocation32_spill] sm:$0xff] %v6670_v14  ;;  %7082 = vst [vmem:[#allocation33_spill] sm:$0xff] %v6672_v46 }
 0x1c9   : > { %v6674_v12 = vpop.f32.mrf.mxu1  ;;  %v6676_v0 = vpop.f32.mrf.mxu0 }
 0x1ca   : > { %7083 = vst [vmem:[#allocation34_spill] sm:$0xff] %v6674_v12  ;;  %7084 = vst [vmem:[#allocation35_spill] sm:$0xff] %v6676_v0  ;;  %v2638_v0 = vadd.f32 %v2511_v58, %v6482_v57  ;;  %v2644_v58 = vadd.f32 %v6586_v61, %v6491_v9  ;;  %v2645_v9 = vadd.f32 %v6594_v39, %v6497_v18 }
 0x1cb   : > { %v6678_v38 = vpop.f32.mrf.mxu1  ;;  %v6680_v22 = vpop.f32.mrf.mxu0  ;;  %v2648_v18 = vadd.f32 %v6602_v55, %v6503_v16  ;;  %v2649_v16 = vadd.f32 %v6610_v23, %v6509_v60  ;;  %v2652_v60 = vadd.f32 %v6618_v52, %v6515_v40  ;;  %v2653_v40 = vadd.f32 %v6626_v31, %v6521_v45 }
 0x1cc   : > { %7085 = vst [vmem:[#allocation36_spill] sm:$0xff] %v6678_v38  ;;  %7086 = vst [vmem:[#allocation37_spill] sm:$0xff] %v6680_v22  ;;  %v3027_v22 = vadd.f32 %v6572_v28, %v2640_v17  ;;  %v3032_v61 = vadd.f32 %v6596_v42, %v2645_v9  ;;  %v2656_v45 = vadd.f32 %v6634_v59, %v6527_v29  ;;  %v7095_v29 = vld [vmem:[#allocation3_spill] sm:$0xff]  ;;  %v7096_v59 = vld [vmem:[#allocation18_spill] sm:$0xff] }
 0x1cd   : > { %v6682_v41 = vpop.f32.mrf.mxu1  ;;  %v6684_v51 = vpop.f32.mrf.mxu0 }
 0x1ce   : > { %7087 = vst [vmem:[#allocation38_spill] sm:$0xff] %v6682_v41  ;;  %7088 = vst [vmem:[#allocation39_spill] sm:$0xff] %v6684_v51  ;;  %v2641_v51 = vadd.f32 %v6578_v34, %v6485_v26  ;;  %v3026_v26 = vadd.f32 %v6584_v32, %v2639_v24 }
 0x1cf   : > { %v6686_v50 = vpop.f32.mrf.mxu1  ;;  %v6688_v30 = vpop.f32.mrf.mxu0 }
 0x1d0   : > { %7089 = vst [vmem:[#allocation40_spill] sm:$0xff] %v6686_v50  ;;  %7090 = vst [vmem:[#allocation41_spill] sm:$0xff] %v6688_v30  ;;  %v3025_v30 = vadd.f32 %v6576_v21, %v2638_v0  ;;  %v3028_v57 = vadd.f32 %v6580_v7, %v2641_v51  ;;  %v2642_v0 = vadd.f32 %v6590_v54, %v6494_v11 }
 0x1d1   : > { %v6691_v14 = vpop.f32.mrf.mxu1  ;;  %v6693_v46 = vpop.f32.mrf.mxu0  ;;  %v3031_v51 = vadd.f32 %v6588_v19, %v2644_v58  ;;  %v2643_v11 = vadd.f32 %v6598_v20, %v6500_v49  ;;  %v2646_v49 = vadd.f32 %v6606_v33, %v6506_v53  ;;  %v2647_v53 = vadd.f32 %v6614_v5, %v6512_v63 }
 0x1d2   : > { %7091 = vst [vmem:[#allocation42_spill] sm:$0xff] %v6691_v14  ;;  %7092 = vst [vmem:[#allocation43_spill] sm:$0xff] %v6693_v46  ;;  %v3029_v7 = vadd.f32 %v6592_v10, %v2642_v0  ;;  %v2650_v63 = vadd.f32 %v6622_v6, %v6518_v4  ;;  %v2651_v4 = vadd.f32 %v6630_v8, %v6524_v48 }
 0x1d3   : > { %v6696_v12 = vpop.f32.mrf.mxu1  ;;  %v6698_v38 = vpop.f32.mrf.mxu0  ;;  %v3030_v39 = vadd.f32 %v6600_v47, %v2643_v11  ;;  %v2654_v48 = vadd.f32 %v6638_v37, %v6530_v36  ;;  %v7098_v36 = vld [vmem:[#allocation4_spill] sm:$0xff] }
 0x1d4   : > { %7093 = vst [vmem:[#allocation44_spill] sm:$0xff] %v6696_v12  ;;  %7094 = vst [vmem:[#allocation45_spill] sm:$0xff] %v6698_v38  ;;  %v7099_v37 = vld [vmem:[#allocation20_spill] sm:$0xff] }
 0x1d5   : > { %v5597_v50 = vpop.f32.mrf.mxu1  ;;  %v5637_v41 = vpop.f32.mrf.mxu0 }
 0x1d6   : > { %v3414_v35 = vadd.f32 %v5597_v50, %v3027_v22 }
 0x1d7   : > { %v3285_v46 = vpop.f32.mrf.mxu1  ;;  %v3672_v14 = vpop.f32.mrf.mxu0 }
 0x1d8   : > { %v3801_v38 = vadd.f32 %v5637_v41, %v3414_v35  ;;  %v3412_v17 = vadd.f32 %v3285_v46, %v3025_v30 }
 0x1d9   : > { %v5598_v28 = vpop.f32.mrf.mxu1  ;;  %v5638_v12 = vpop.f32.mrf.mxu0 }
 0x1da   : > { %3833 = vst.msk [vmem:[#allocation2 + $0x10] sm:$0xff] %vm493_vm1, %v3801_v38  ;;  %v3799_v2 = vadd.f32 %v3672_v14, %v3412_v17  ;;  %v3415_v22 = vadd.f32 %v5598_v28, %v3028_v57  ;;  %v3035_v57 = vadd.f32 %v6604_v15, %v2648_v18  ;;  %v3033_v28 = vadd.f32 %v6608_v62, %v2646_v49  ;;  %v7097_v49 = vld [vmem:[#allocation17_spill] sm:$0xff] }
 0x1db   : > { %v3288_v50 = vpop.f32.mrf.mxu1  ;;  %v3675_v21 = vpop.f32.mrf.mxu0 }
 0x1dc   : > { %3831 = vst.msk [vmem:[#allocation2] sm:$0xff] %vm493_vm1, %v3799_v2  ;;  %v3802_v41 = vadd.f32 %v5638_v12, %v3415_v22  ;;  %v3413_v46 = vadd.f32 %v3288_v50, %v3026_v26  ;;  %v3036_v2 = vadd.f32 %v6612_v43, %v2649_v16  ;;  %v7100_v16 = vld [vmem:[#allocation19_spill] sm:$0xff] }
 0x1dd   : > { %v5601_v30 = vpop.f32.mrf.mxu1  ;;  %v5641_v34 = vpop.f32.mrf.mxu0 }
 0x1de   : > { %3834 = vst.msk [vmem:[#allocation2 + $0x18] sm:$0xff] %vm493_vm1, %v3802_v41  ;;  %v3800_v38 = vadd.f32 %v3675_v21, %v3413_v46  ;;  %v3418_v14 = vadd.f32 %v5601_v30, %v3031_v51  ;;  %v3034_v21 = vadd.f32 %v6616_v1, %v2647_v53  ;;  %v3039_v41 = vadd.f32 %v6620_v13, %v2652_v60  ;;  %v7105_v60 = vld [vmem:[#allocation24_spill] sm:$0xff] }
 0x1df   : > { %v3301_v3 = vpop.f32.mrf.mxu1  ;;  %v3688_v32 = vpop.f32.mrf.mxu0 }
 0x1e0   : > { %3832 = vst.msk [vmem:[#allocation2 + $0x8] sm:$0xff] %vm493_vm1, %v3800_v38  ;;  %v3805_v12 = vadd.f32 %v5641_v34, %v3418_v14  ;;  %v3416_v19 = vadd.f32 %v3301_v3, %v3029_v7  ;;  %v3037_v34 = vadd.f32 %v6624_v25, %v2650_v63  ;;  %v3040_v38 = vadd.f32 %v6628_v27, %v2653_v40  ;;  %v7106_v63 = vld [vmem:[#allocation23_spill] sm:$0xff] }
 0x1e1   : > { %v5602_v54 = vpop.f32.mrf.mxu1  ;;  %v5642_v10 = vpop.f32.mrf.mxu0 }
 0x1e2   : > { %3837 = vst.msk [vmem:[#allocation2 + $0x30] sm:$0xff] %vm493_vm1, %v3805_v12  ;;  %v3803_v20 = vadd.f32 %v3688_v32, %v3416_v19  ;;  %v3419_v24 = vadd.f32 %v5602_v54, %v3032_v61  ;;  %v3038_v32 = vadd.f32 %v6632_v44, %v2651_v4  ;;  %v3043_v12 = vadd.f32 %v6636_v56, %v2656_v45  ;;  %v7111_v4 = vld [vmem:[#allocation28_spill] sm:$0xff]  ;;  %v7112_v45 = vld [vmem:[#allocation27_spill] sm:$0xff] }
 0x1e3   : > { %v3304_v35 = vpop.f32.mrf.mxu1  ;;  %v3691_v42 = vpop.f32.mrf.mxu0  ;;  %v2657_v19 = vadd.f32 %v7096_v59, %v7095_v29  ;;  %v7117_v29 = vld [vmem:[#allocation32_spill] sm:$0xff] }
 0x1e4   : > { %3835 = vst.msk [vmem:[#allocation2 + $0x20] sm:$0xff] %vm493_vm1, %v3803_v20  ;;  %v3806_v55 = vadd.f32 %v5642_v10, %v3419_v24  ;;  %v3417_v58 = vadd.f32 %v3304_v35, %v3030_v39  ;;  %v3041_v20 = vadd.f32 %v7097_v49, %v2654_v48  ;;  %v2655_v24 = vadd.f32 %v7099_v37, %v7098_v36  ;;  %v7120_v36 = vld [vmem:[#allocation34_spill] sm:$0xff] }
 0x1e5   : > { %v5605_v17 = vpop.f32.mrf.mxu1  ;;  %v5645_v47 = vpop.f32.mrf.mxu0 }
 0x1e6   : > { %3838 = vst.msk [vmem:[#allocation2 + $0x38] sm:$0xff] %vm493_vm1, %v3806_v55  ;;  %v3804_v33 = vadd.f32 %v3691_v42, %v3417_v58  ;;  %v3422_v26 = vadd.f32 %v5605_v17, %v3035_v57  ;;  %v3044_v55 = vadd.f32 %v7100_v16, %v2657_v19  ;;  %v7101_v58 = vld [vmem:[#allocation5_spill] sm:$0xff]  ;;  %v7102_v17 = vld [vmem:[#allocation22_spill] sm:$0xff] }
 0x1e7   : > { %v3317_v0 = vpop.f32.mrf.mxu1  ;;  %v3704_v15 = vpop.f32.mrf.mxu0 }
 0x1e8   : > { %3836 = vst.msk [vmem:[#allocation2 + $0x28] sm:$0xff] %vm493_vm1, %v3804_v33  ;;  %v3809_v23 = vadd.f32 %v5645_v47, %v3422_v26  ;;  %v3420_v22 = vadd.f32 %v3317_v0, %v3033_v28  ;;  %v2660_v47 = vadd.f32 %v7102_v17, %v7101_v58  ;;  %v7103_v0 = vld [vmem:[#allocation21_spill] sm:$0xff]  ;;  %v7123_v58 = vld [vmem:[#allocation36_spill] sm:$0xff] }
 0x1e9   : > { %v5606_v50 = vpop.f32.mrf.mxu1  ;;  %v5646_v62 = vpop.f32.mrf.mxu0 }
 0x1ea   : > { %3841 = vst.msk [vmem:[#allocation2 + $0x50] sm:$0xff] %vm493_vm1, %v3809_v23  ;;  %v3807_v5 = vadd.f32 %v3704_v15, %v3420_v22  ;;  %v3423_v51 = vadd.f32 %v5606_v50, %v3036_v2  ;;  %v3042_v15 = vadd.f32 %v7103_v0, %v2655_v24  ;;  %v7104_v2 = vld [vmem:[#allocation6_spill] sm:$0xff] }
 0x1eb   : > { %v3320_v9 = vpop.f32.mrf.mxu1  ;;  %v3707_v43 = vpop.f32.mrf.mxu0  ;;  %v2658_v23 = vadd.f32 %v7105_v60, %v7104_v2  ;;  %v7126_v2 = vld [vmem:[#allocation38_spill] sm:$0xff] }
 0x1ec   : > { %3839 = vst.msk [vmem:[#allocation2 + $0x40] sm:$0xff] %vm493_vm1, %v3807_v5  ;;  %v3810_v52 = vadd.f32 %v5646_v62, %v3423_v51  ;;  %v3421_v46 = vadd.f32 %v3320_v9, %v3034_v21  ;;  %v3047_v5 = vadd.f32 %v7106_v63, %v2660_v47  ;;  %v7107_v51 = vld [vmem:[#allocation7_spill] sm:$0xff]  ;;  %v7108_v9 = vld [vmem:[#allocation26_spill] sm:$0xff] }
 0x1ed   : > { %v5609_v30 = vpop.f32.mrf.mxu1  ;;  %v5649_v1 = vpop.f32.mrf.mxu0 }
 0x1ee   : > { %3842 = vst.msk [vmem:[#allocation2 + $0x58] sm:$0xff] %vm493_vm1, %v3810_v52  ;;  %v3808_v6 = vadd.f32 %v3707_v43, %v3421_v46  ;;  %v3426_v7 = vadd.f32 %v5609_v30, %v3039_v41  ;;  %v2661_v43 = vadd.f32 %v7108_v9, %v7107_v51  ;;  %v7109_v30 = vld [vmem:[#allocation25_spill] sm:$0xff]  ;;  %v7129_v51 = vld [vmem:[#allocation40_spill] sm:$0xff] }
 0x1ef   : > { %v3333_v11 = vpop.f32.mrf.mxu1  ;;  %v3720_v13 = vpop.f32.mrf.mxu0 }
 0x1f0   : > { %3840 = vst.msk [vmem:[#allocation2 + $0x48] sm:$0xff] %vm493_vm1, %v3808_v6  ;;  %v3813_v31 = vadd.f32 %v5649_v1, %v3426_v7  ;;  %v3424_v14 = vadd.f32 %v3333_v11, %v3037_v34  ;;  %v3045_v1 = vadd.f32 %v7109_v30, %v2658_v23  ;;  %v7110_v34 = vld [vmem:[#allocation8_spill] sm:$0xff] }
 0x1f1   : > { %v5610_v3 = vpop.f32.mrf.mxu1  ;;  %v5650_v25 = vpop.f32.mrf.mxu0  ;;  %v2659_v6 = vadd.f32 %v7111_v4, %v7110_v34  ;;  %v7132_v34 = vld [vmem:[#allocation42_spill] sm:$0xff] }
 0x1f2   : > { %3845 = vst.msk [vmem:[#allocation2 + $0x70] sm:$0xff] %vm493_vm1, %v3813_v31  ;;  %v3811_v8 = vadd.f32 %v3720_v13, %v3424_v14  ;;  %v3427_v61 = vadd.f32 %v5610_v3, %v3040_v38  ;;  %v3048_v31 = vadd.f32 %v7112_v45, %v2661_v43  ;;  %v7113_v14 = vld [vmem:[#allocation9_spill] sm:$0xff]  ;;  %v7114_v3 = vld [vmem:[#allocation30_spill] sm:$0xff] }
 0x1f3   : > { %v3336_v18 = vpop.f32.mrf.mxu1  ;;  %v3723_v27 = vpop.f32.mrf.mxu0 }
 0x1f4   : > { %3843 = vst.msk [vmem:[#allocation2 + $0x60] sm:$0xff] %vm493_vm1, %v3811_v8  ;;  %v3814_v54 = vadd.f32 %v5650_v25, %v3427_v61  ;;  %v3425_v10 = vadd.f32 %v3336_v18, %v3038_v32  ;;  %v2664_v25 = vadd.f32 %v7114_v3, %v7113_v14  ;;  %v7115_v18 = vld [vmem:[#allocation29_spill] sm:$0xff]  ;;  %v7135_v14 = vld [vmem:[#allocation44_spill] sm:$0xff] }
 0x1f5   : > { %v5613_v39 = vpop.f32.mrf.mxu1  ;;  %v5653_v44 = vpop.f32.mrf.mxu0 }
 0x1f6   : > { %3846 = vst.msk [vmem:[#allocation2 + $0x78] sm:$0xff] %vm493_vm1, %v3814_v54  ;;  %v3812_v35 = vadd.f32 %v3723_v27, %v3425_v10  ;;  %v3430_v42 = vadd.f32 %v5613_v39, %v3043_v12  ;;  %v3046_v27 = vadd.f32 %v7115_v18, %v2659_v6  ;;  %v7116_v12 = vld [vmem:[#allocation10_spill] sm:$0xff] }
 0x1f7   : > { %v3349_v57 = vpop.f32.mrf.mxu1  ;;  %v3736_v56 = vpop.f32.mrf.mxu0  ;;  %v2662_v59 = vadd.f32 %v7117_v29, %v7116_v12 }
 0x1f8   : > { %3844 = vst.msk [vmem:[#allocation2 + $0x68] sm:$0xff] %vm493_vm1, %v3812_v35  ;;  %v3817_v28 = vadd.f32 %v5653_v44, %v3430_v42  ;;  %v3428_v53 = vadd.f32 %v3349_v57, %v3041_v20  ;;  %v7118_v44 = vld [vmem:[#allocation31_spill] sm:$0xff] }
 0x1f9   : > { %v5614_v33 = vpop.f32.mrf.mxu1  ;;  %v5654_v26 = vpop.f32.mrf.mxu0  ;;  %v3051_v49 = vadd.f32 %v7118_v44, %v2664_v25  ;;  %v7119_v20 = vld [vmem:[#allocation11_spill] sm:$0xff] }
 0x1fa   : > { %3849 = vst.msk [vmem:[#allocation2 + $0x90] sm:$0xff] %vm493_vm1, %v3817_v28  ;;  %v3815_v22 = vadd.f32 %v3736_v56, %v3428_v53  ;;  %v3431_v50 = vadd.f32 %v5614_v33, %v3044_v55  ;;  %v2665_v37 = vadd.f32 %v7120_v36, %v7119_v20  ;;  %v7121_v56 = vld [vmem:[#allocation33_spill] sm:$0xff]  ;;  %v7122_v55 = vld [vmem:[#allocation12_spill] sm:$0xff] }
 0x1fb   : > { %v3352_v62 = vpop.f32.mrf.mxu1  ;;  %v3739_v21 = vpop.f32.mrf.mxu0  ;;  %v3049_v16 = vadd.f32 %v7121_v56, %v2662_v59  ;;  %v2663_v17 = vadd.f32 %v7123_v58, %v7122_v55 }
 0x1fc   : > { %3847 = vst.msk [vmem:[#allocation2 + $0x80] sm:$0xff] %vm493_vm1, %v3815_v22  ;;  %v3818_v41 = vadd.f32 %v5654_v26, %v3431_v50  ;;  %v3429_v40 = vadd.f32 %v3352_v62, %v3042_v15  ;;  %v7124_v26 = vld [vmem:[#allocation35_spill] sm:$0xff]  ;;  %v7125_v15 = vld [vmem:[#allocation13_spill] sm:$0xff] }
 0x1fd   : > { %v5617_v52 = vpop.f32.mrf.mxu1  ;;  %v5657_v46 = vpop.f32.mrf.mxu0  ;;  %v3052_v0 = vadd.f32 %v7124_v26, %v2665_v37  ;;  %v2668_v60 = vadd.f32 %v7126_v2, %v7125_v15 }
 0x1fe   : > { %3850 = vst.msk [vmem:[#allocation2 + $0x98] sm:$0xff] %vm493_vm1, %v3818_v41  ;;  %v3816_v7 = vadd.f32 %v3739_v21, %v3429_v40  ;;  %v3434_v11 = vadd.f32 %v5617_v52, %v3047_v5  ;;  %v7127_v21 = vld [vmem:[#allocation37_spill] sm:$0xff]  ;;  %v7128_v5 = vld [vmem:[#allocation14_spill] sm:$0xff] }
 0x1ff   : > { %v3365_v13 = vpop.f32.mrf.mxu1  ;;  %v3752_v38 = vpop.f32.mrf.mxu0  ;;  %v3050_v63 = vadd.f32 %v7127_v21, %v2663_v17  ;;  %v2666_v9 = vadd.f32 %v7129_v51, %v7128_v5 }
 0x200   : > { %3848 = vst.msk [vmem:[#allocation2 + $0x88] sm:$0xff] %vm493_vm1, %v3816_v7  ;;  %v3821_v32 = vadd.f32 %v5657_v46, %v3434_v11  ;;  %v3432_v48 = vadd.f32 %v3365_v13, %v3045_v1  ;;  %v7130_v46 = vld [vmem:[#allocation39_spill] sm:$0xff] }
 0x201   : > { %v5618_v8 = vpop.f32.mrf.mxu1  ;;  %v5658_v61 = vpop.f32.mrf.mxu0  ;;  %v3055_v30 = vadd.f32 %v7130_v46, %v2668_v60  ;;  %v7131_v1 = vld [vmem:[#allocation15_spill] sm:$0xff] }
 0x202   : > { %3853 = vst.msk [vmem:[#allocation2 + $0xb0] sm:$0xff] %vm493_vm1, %v3821_v32  ;;  %v3819_v19 = vadd.f32 %v3752_v38, %v3432_v48  ;;  %v3435_v54 = vadd.f32 %v5618_v8, %v3048_v31  ;;  %v2669_v4 = vadd.f32 %v7132_v34, %v7131_v1  ;;  %v7133_v38 = vld [vmem:[#allocation41_spill] sm:$0xff]  ;;  %v7134_v31 = vld [vmem:[#allocation16_spill] sm:$0xff] }
 0x203   : > { %v3368_v10 = vpop.f32.mrf.mxu1  ;;  %v3755_v39 = vpop.f32.mrf.mxu0  ;;  %v3053_v45 = vadd.f32 %v7133_v38, %v2666_v9  ;;  %v2667_v3 = vadd.f32 %v7135_v14, %v7134_v31 }
 0x204   : > { %3851 = vst.msk [vmem:[#allocation2 + $0xa0] sm:$0xff] %vm493_vm1, %v3819_v19  ;;  %v3822_v24 = vadd.f32 %v5658_v61, %v3435_v54  ;;  %v3433_v35 = vadd.f32 %v3368_v10, %v3046_v27  ;;  %v7136_v61 = vld [vmem:[#allocation43_spill] sm:$0xff]  ;;  %v7137_v19 = vld [vmem:[#allocation45_spill] sm:$0xff] }
 0x205   : > { %v5621_v42 = vpop.f32.mrf.mxu1  ;;  %v5661_v57 = vpop.f32.mrf.mxu0  ;;  %v3056_v18 = vadd.f32 %v7136_v61, %v2669_v4  ;;  %v3054_v54 = vadd.f32 %v7137_v19, %v2667_v3 }
 0x206   : > { %3854 = vst.msk [vmem:[#allocation2 + $0xb8] sm:$0xff] %vm493_vm1, %v3822_v24  ;;  %v3820_v47 = vadd.f32 %v3755_v39, %v3433_v35  ;;  %v3438_v28 = vadd.f32 %v5621_v42, %v3051_v49 }
 0x207   : > { %v3381_v53 = vpop.f32.mrf.mxu1  ;;  %v3768_v33 = vpop.f32.mrf.mxu0 }
 0x208   : > { %3852 = vst.msk [vmem:[#allocation2 + $0xa8] sm:$0xff] %vm493_vm1, %v3820_v47  ;;  %v3825_v23 = vadd.f32 %v5661_v57, %v3438_v28  ;;  %v3436_v22 = vadd.f32 %v3381_v53, %v3049_v16 }
 0x209   : > { %v5622_v50 = vpop.f32.mrf.mxu1  ;;  %v5662_v62 = vpop.f32.mrf.mxu0 }
 0x20a   : > { %3857 = vst.msk [vmem:[#allocation2 + $0xd0] sm:$0xff] %vm493_vm1, %v3825_v23  ;;  %v3823_v43 = vadd.f32 %v3768_v33, %v3436_v22  ;;  %v3439_v41 = vadd.f32 %v5622_v50, %v3052_v0 }
 0x20b   : > { %v3384_v40 = vpop.f32.mrf.mxu1  ;;  %v3771_v52 = vpop.f32.mrf.mxu0 }
 0x20c   : > { %3855 = vst.msk [vmem:[#allocation2 + $0xc0] sm:$0xff] %vm493_vm1, %v3823_v43  ;;  %v3826_v6 = vadd.f32 %v5662_v62, %v3439_v41  ;;  %v3437_v7 = vadd.f32 %v3384_v40, %v3050_v63 }
 0x20d   : > { %v5625_v11 = vpop.f32.mrf.mxu1  ;;  %v5665_v13 = vpop.f32.mrf.mxu0 }
 0x20e   : > { %3858 = vst.msk [vmem:[#allocation2 + $0xd8] sm:$0xff] %vm493_vm1, %v3826_v6  ;;  %v3824_v25 = vadd.f32 %v3771_v52, %v3437_v7  ;;  %v3442_v32 = vadd.f32 %v5625_v11, %v3055_v30 }
 0x20f   : > { %v3397_v48 = vpop.f32.mrf.mxu1  ;;  %v3784_v8 = vpop.f32.mrf.mxu0 }
 0x210   : > { %3856 = vst.msk [vmem:[#allocation2 + $0xc8] sm:$0xff] %vm493_vm1, %v3824_v25  ;;  %v3829_v27 = vadd.f32 %v5665_v13, %v3442_v32  ;;  %v3440_v12 = vadd.f32 %v3397_v48, %v3053_v45 }
 0x211   : > { %v5626_v29 = vpop.f32.mrf.mxu1  ;;  %v5666_v59 = vpop.f32.mrf.mxu0 }
 0x212   : > { %3861 = vst.msk [vmem:[#allocation2 + $0xf0] sm:$0xff] %vm493_vm1, %v3829_v27  ;;  %v3827_v10 = vadd.f32 %v3784_v8, %v3440_v12  ;;  %v3443_v39 = vadd.f32 %v5626_v29, %v3056_v18 }
 0x213   : > { %v3400_v44 = vpop.f32.mrf.mxu1  ;;  %v3787_v36 = vpop.f32.mrf.mxu0 }
 0x214   : > { %3859 = vst.msk [vmem:[#allocation2 + $0xe0] sm:$0xff] %vm493_vm1, %v3827_v10  ;;  %v3830_v49 = vadd.f32 %v5666_v59, %v3443_v39  ;;  %v3441_v20 = vadd.f32 %v3400_v44, %v3054_v54  ;;  %3866 = sbr.rel (%p4976_p6) target bundleno = 585 (0x249), region = 44 }
 0x216   : > { %3862 = vst.msk [vmem:[#allocation2 + $0xf8] sm:$0xff] %vm493_vm1, %v3830_v49  ;;  %v3828_v37 = vadd.f32 %v3787_v36, %v3441_v20 }
 0x218   : > { %3860 = vst.msk [vmem:[#allocation2 + $0xe8] sm:$0xff] %vm493_vm1, %v3828_v37 }
 0x219   : > { %v3867_v24 = vld [vmem:[#allocation2] sm:$0xff]  ;;  %vm4194_vm2 = vcmask 519168   ;;  %v3868_v16 = vld [vmem:[#allocation2 + $0x8] sm:$0xff]  ;;  %v3869_v58 = vld [vmem:[#allocation2 + $0x10] sm:$0xff] }
 0x21a   : > { %v6828_v35 = vld [vmem:[%s7049_s2] ss:$0 sm:$0xff]  ;;  %v5112_v17 = vld [vmem:[%s7050_s3 + $0x8] sm:$0xff]   ;;  %v3870_v33 = vld [vmem:[#allocation2 + $0x18] sm:$0xff] }
 0x21b   : > { %v5049_v42 = vld [vmem:[%s7050_s3] sm:$0xff]   ;;  %v3906_v57 = vadd.f32 %v6828_v35, %v3867_v24  ;;  %v3907_v47 = vadd.f32 %v6828_v35, %v3868_v16  ;;  %v3908_v28 = vadd.f32 %v6828_v35, %v3869_v58  ;;  %v5054_v53 = vunpack.c.l.bf16 %v5112_v17  ;;  %v5113_v15 = vld [vmem:[%s7050_s3 + $0x10] sm:$0xff]   ;;  %v3872_v50 = vld [vmem:[#allocation2 + $0x28] sm:$0xff] }
 0x21c   : > { %v5050_v56 = vunpack.c.l.bf16 %v5049_v42  ;;  %v5051_v55 = vunpack.c.h.bf16 %v5049_v42  ;;  %v5055_v26 = vunpack.c.h.bf16 %v5112_v17  ;;  %v3871_v0 = vld [vmem:[#allocation2 + $0x20] sm:$0xff]  ;;  %v3909_v60 = vadd.f32 %v6828_v35, %v3870_v33  ;;  %v3873_v62 = vld [vmem:[#allocation2 + $0x30] sm:$0xff]  ;;  %v5114_v21 = vld [vmem:[%s7050_s3 + $0x18] sm:$0xff]  }
 0x21d   : > { %v3910_v23 = vadd.f32 %v6828_v35, %v3871_v0  ;;  %v5058_v22 = vunpack.c.l.bf16 %v5113_v15  ;;  %v4004_v5 = vadd.f32 %v5054_v53, %v3908_v28  ;;  %v3911_v51 = vadd.f32 %v6828_v35, %v3872_v50  ;;  %v3874_v43 = vld [vmem:[#allocation2 + $0x38] sm:$0xff]  ;;  %v3875_v6 = vld [vmem:[#allocation2 + $0x40] sm:$0xff]  ;;  %v3876_v31 = vld [vmem:[#allocation2 + $0x48] sm:$0xff] }
 0x21e   : > { %v4002_v2 = vadd.f32 %v5050_v56, %v3906_v57  ;;  %v4003_v63 = vadd.f32 %v5051_v55, %v3907_v47  ;;  %v5059_v9 = vunpack.c.h.bf16 %v5113_v15  ;;  %v4005_v40 = vadd.f32 %v5055_v26, %v3909_v60  ;;  %v5115_v45 = vld [vmem:[%s7050_s3 + $0x20] sm:$0xff]   ;;  %v3877_v48 = vld [vmem:[#allocation2 + $0x50] sm:$0xff]  ;;  %v5116_v8 = vld [vmem:[%s7050_s3 + $0x28] sm:$0xff]  }
 0x21f   : > { %v4006_v52 = vadd.f32 %v5058_v22, %v3910_v23  ;;  %v3912_v46 = vadd.f32 %v6828_v35, %v3873_v62  ;;  %v4036_v1 = vmax.f32 %v4004_v5, 0.0  ;;  %v5062_v4 = vunpack.c.l.bf16 %v5114_v21  ;;  %v3878_v29 = vld [vmem:[#allocation2 + $0x58] sm:$0xff]  ;;  %v3879_v39 = vld [vmem:[#allocation2 + $0x60] sm:$0xff]  ;;  %v5117_v37 = vld [vmem:[%s7050_s3 + $0x30] sm:$0xff]  }
 0x220   : > { %v4034_v41 = vmax.f32 %v4002_v2, 0.0  ;;  %v4035_v30 = vmax.f32 %v4003_v63, 0.0  ;;  %v4007_v34 = vadd.f32 %v5059_v9, %v3911_v51  ;;  %v4037_v11 = vmax.f32 %v4005_v40, 0.0  ;;  %v3880_v24 = vld [vmem:[#allocation2 + $0x68] sm:$0xff]  ;;  %v3881_v28 = vld [vmem:[#allocation2 + $0x70] sm:$0xff]  ;;  %v5118_v15 = vld [vmem:[%s7050_s3 + $0x38] sm:$0xff]  }
 0x221   : > { %v4038_v13 = vmax.f32 %v4006_v52, 0.0  ;;  %v3913_v38 = vadd.f32 %v6828_v35, %v3874_v43  ;;  %v5018_v3 = vpack.c.bf16 %v4036_v1, %v4036_v1  ;;  %v4008_v32 = vadd.f32 %v5062_v4, %v3912_v46  ;;  %v3882_v50 = vld [vmem:[#allocation2 + $0x78] sm:$0xff]  ;;  %v3883_v51 = vld [vmem:[#allocation2 + $0x80] sm:$0xff]  ;;  %v3884_v46 = vld [vmem:[#allocation2 + $0x88] sm:$0xff] }
 0x222   : > { %v5016_v7 = vpack.c.bf16 %v4034_v41, %v4034_v41  ;;  %v5017_v14 = vpack.c.bf16 %v4035_v30, %v4035_v30  ;;  %v4039_v25 = vmax.f32 %v4007_v34, 0.0  ;;  %v5019_v61 = vpack.c.bf16 %v4037_v11, %v4037_v11  ;;  %v5119_v9 = vld [vmem:[%s7050_s3 + $0x40] sm:$0xff]  }
 0x223   : > { %v5020_v18 = vpack.c.bf16 %v4038_v13, %v4038_v13  ;;  %v5063_v27 = vunpack.c.h.bf16 %v5114_v21  ;;  %v3914_v12 = vadd.f32 %v6828_v35, %v3875_v6  ;;  %4197 = vst.msk [vmem:[%s7051_s4 + $0x8] sm:$0xf] %vm4194_vm2, %v5018_v3  ;;  %v4040_v19 = vmax.f32 %v4008_v32, 0.0  ;;  %v3885_v6 = vld [vmem:[#allocation2 + $0x90] sm:$0xff] }
 0x224   : > { %4195 = vst.msk [vmem:[%s7051_s4] sm:$0xf] %vm4194_vm2, %v5016_v7  ;;  %4196 = vst.msk [vmem:[%s7051_s4 + $0x4] sm:$0xf] %vm4194_vm2, %v5017_v14  ;;  %v5021_v59 = vpack.c.bf16 %v4039_v25, %v4039_v25  ;;  %v5066_v54 = vunpack.c.l.bf16 %v5115_v45  ;;  %v3915_v10 = vadd.f32 %v6828_v35, %v3876_v31  ;;  %v5067_v49 = vunpack.c.h.bf16 %v5115_v45  ;;  %v5120_v45 = vld [vmem:[%s7050_s3 + $0x48] sm:$0xff]   ;;  %v3886_v31 = vld [vmem:[#allocation2 + $0x98] sm:$0xff] }
 0x225   : > { %4198 = vst.msk [vmem:[%s7051_s4 + $0xc] sm:$0xf] %vm4194_vm2, %v5019_v61  ;;  %4199 = vst.msk [vmem:[%s7051_s4 + $0x10] sm:$0xf] %vm4194_vm2, %v5020_v18  ;;  %v4009_v44 = vadd.f32 %v5063_v27, %v3913_v38  ;;  %v3916_v20 = vadd.f32 %v6828_v35, %v3877_v48  ;;  %v5070_v36 = vunpack.c.l.bf16 %v5116_v8  ;;  %v5022_v42 = vpack.c.bf16 %v4040_v19, %v4040_v19  ;;  %v3887_v48 = vld [vmem:[#allocation2 + $0xa0] sm:$0xff] }
 0x226   : > { %4200 = vst.msk [vmem:[%s7051_s4 + $0x14] sm:$0xf] %vm4194_vm2, %v5021_v59  ;;  %v4010_v57 = vadd.f32 %v5066_v54, %v3914_v12  ;;  %v3917_v56 = vadd.f32 %v6828_v35, %v3878_v29  ;;  %v5071_v16 = vunpack.c.h.bf16 %v5116_v8  ;;  %v4011_v58 = vadd.f32 %v5067_v49, %v3915_v10  ;;  %v5121_v12 = vld [vmem:[%s7050_s3 + $0x50] sm:$0xff]   ;;  %v3888_v10 = vld [vmem:[#allocation2 + $0xa8] sm:$0xff] }
 0x227   : > { %v4041_v55 = vmax.f32 %v4009_v44, 0.0  ;;  %v4012_v17 = vadd.f32 %v5070_v36, %v3916_v20  ;;  %v3918_v47 = vadd.f32 %v6828_v35, %v3879_v39  ;;  %4201 = vst.msk [vmem:[%s7051_s4 + $0x18] sm:$0xf] %vm4194_vm2, %v5022_v42  ;;  %v5074_v26 = vunpack.c.l.bf16 %v5117_v37  ;;  %v3889_v36 = vld [vmem:[#allocation2 + $0xb0] sm:$0xff] }
 0x228   : > { %v4042_v53 = vmax.f32 %v4010_v57, 0.0  ;;  %v4013_v33 = vadd.f32 %v5071_v16, %v3917_v56  ;;  %v3919_v0 = vadd.f32 %v6828_v35, %v3880_v24  ;;  %v4043_v60 = vmax.f32 %v4011_v58, 0.0  ;;  %v5122_v56 = vld [vmem:[%s7050_s3 + $0x58] sm:$0xff]  }
 0x229   : > { %v5023_v2 = vpack.c.bf16 %v4041_v55, %v4041_v55  ;;  %v4044_v23 = vmax.f32 %v4012_v17, 0.0  ;;  %v5075_v22 = vunpack.c.h.bf16 %v5117_v37  ;;  %v4014_v63 = vadd.f32 %v5074_v26, %v3918_v47  ;;  %v3890_v16 = vld [vmem:[#allocation2 + $0xb8] sm:$0xff] }
 0x22a   : > { %v5024_v62 = vpack.c.bf16 %v4042_v53, %v4042_v53  ;;  %v4045_v21 = vmax.f32 %v4013_v33, 0.0  ;;  %v3920_v5 = vadd.f32 %v6828_v35, %v3881_v28  ;;  %v5025_v43 = vpack.c.bf16 %v4043_v60, %v4043_v60  ;;  %v3891_v28 = vld [vmem:[#allocation2 + $0xc0] sm:$0xff] }
 0x22b   : > { %4202 = vst.msk [vmem:[%s7051_s4 + $0x1c] sm:$0xf] %vm4194_vm2, %v5023_v2  ;;  %v5026_v41 = vpack.c.bf16 %v4044_v23, %v4044_v23  ;;  %v4015_v40 = vadd.f32 %v5075_v22, %v3919_v0  ;;  %v5078_v52 = vunpack.c.l.bf16 %v5118_v15  ;;  %v4046_v1 = vmax.f32 %v4014_v63, 0.0 }
 0x22c   : > { %4203 = vst.msk [vmem:[%s7051_s4 + $0x20] sm:$0xf] %vm4194_vm2, %v5024_v62  ;;  %v5027_v30 = vpack.c.bf16 %v4045_v21, %v4045_v21  ;;  %v3921_v34 = vadd.f32 %v6828_v35, %v3882_v50  ;;  %v5079_v4 = vunpack.c.h.bf16 %v5118_v15  ;;  %4204 = vst.msk [vmem:[%s7051_s4 + $0x24] sm:$0xf] %vm4194_vm2, %v5025_v43  ;;  %v3922_v13 = vadd.f32 %v6828_v35, %v3883_v51  ;;  %v5123_v15 = vld [vmem:[%s7050_s3 + $0x60] sm:$0xff]   ;;  %v3892_v50 = vld [vmem:[#allocation2 + $0xc8] sm:$0xff] }
 0x22d   : > { %4205 = vst.msk [vmem:[%s7051_s4 + $0x28] sm:$0xf] %vm4194_vm2, %v5026_v41  ;;  %v4047_v7 = vmax.f32 %v4015_v40, 0.0  ;;  %v4016_v11 = vadd.f32 %v5078_v52, %v3920_v5  ;;  %v5082_v38 = vunpack.c.l.bf16 %v5119_v9  ;;  %v5028_v14 = vpack.c.bf16 %v4046_v1, %v4046_v1  ;;  %v3893_v51 = vld [vmem:[#allocation2 + $0xd0] sm:$0xff]  ;;  %v5124_v52 = vld [vmem:[%s7050_s3 + $0x68] sm:$0xff]  }
 0x22e   : > { %4206 = vst.msk [vmem:[%s7051_s4 + $0x2c] sm:$0xf] %vm4194_vm2, %v5027_v30  ;;  %v4017_v3 = vadd.f32 %v5079_v4, %v3921_v34  ;;  %v3923_v25 = vadd.f32 %v6828_v35, %v3884_v46  ;;  %v5083_v32 = vunpack.c.h.bf16 %v5119_v9  ;;  %v3924_v27 = vadd.f32 %v6828_v35, %v3885_v6  ;;  %v3894_v46 = vld [vmem:[#allocation2 + $0xd8] sm:$0xff]  ;;  %v3895_v6 = vld [vmem:[#allocation2 + $0xe0] sm:$0xff] }
 0x22f   : > { %v5029_v8 = vpack.c.bf16 %v4047_v7, %v4047_v7  ;;  %v4048_v61 = vmax.f32 %v4016_v11, 0.0  ;;  %v4018_v18 = vadd.f32 %v5082_v38, %v3922_v13  ;;  %4207 = vst.msk [vmem:[%s7051_s4 + $0x30] sm:$0xf] %vm4194_vm2, %v5028_v14  ;;  %v5086_v19 = vunpack.c.l.bf16 %v5120_v45 }
 0x230   : > { %v4049_v29 = vmax.f32 %v4017_v3, 0.0  ;;  %v4019_v59 = vadd.f32 %v5083_v32, %v3923_v25  ;;  %v3925_v54 = vadd.f32 %v6828_v35, %v3886_v31  ;;  %v5087_v49 = vunpack.c.h.bf16 %v5120_v45  ;;  %v5125_v45 = vld [vmem:[%s7050_s3 + $0x70] sm:$0xff]   ;;  %v3896_v32 = vld [vmem:[#allocation2 + $0xe8] sm:$0xff] }
 0x231   : > { %4208 = vst.msk [vmem:[%s7051_s4 + $0x34] sm:$0xf] %vm4194_vm2, %v5029_v8  ;;  %v5030_v39 = vpack.c.bf16 %v4048_v61, %v4048_v61  ;;  %v4050_v44 = vmax.f32 %v4018_v18, 0.0  ;;  %v3926_v20 = vadd.f32 %v6828_v35, %v3887_v48  ;;  %v4020_v42 = vadd.f32 %v5086_v19, %v3924_v27  ;;  %v3897_v27 = vld [vmem:[#allocation2 + $0xf0] sm:$0xff] }
 0x232   : > { %v5031_v37 = vpack.c.bf16 %v4049_v29, %v4049_v29  ;;  %v4051_v24 = vmax.f32 %v4019_v59, 0.0  ;;  %v5090_v57 = vunpack.c.l.bf16 %v5121_v12  ;;  %v4021_v58 = vadd.f32 %v5087_v49, %v3925_v54  ;;  %v5126_v54 = vld [vmem:[%s7050_s3 + $0x78] sm:$0xff]  }
 0x233   : > { %4209 = vst.msk [vmem:[%s7051_s4 + $0x38] sm:$0xf] %vm4194_vm2, %v5030_v39  ;;  %v5032_v55 = vpack.c.bf16 %v4050_v44, %v4050_v44  ;;  %v3927_v17 = vadd.f32 %v6828_v35, %v3888_v10  ;;  %v5091_v47 = vunpack.c.h.bf16 %v5121_v12  ;;  %v4052_v33 = vmax.f32 %v4020_v42, 0.0  ;;  %v3898_v10 = vld [vmem:[#allocation2 + $0xf8] sm:$0xff] }
 0x234   : > { %4210 = vst.msk [vmem:[%s7051_s4 + $0x3c] sm:$0xf] %vm4194_vm2, %v5031_v37  ;;  %v5033_v53 = vpack.c.bf16 %v4051_v24, %v4051_v24  ;;  %v4022_v26 = vadd.f32 %v5090_v57, %v3926_v20  ;;  %v3928_v0 = vadd.f32 %v6828_v35, %v3889_v36  ;;  %v4053_v2 = vmax.f32 %v4021_v58, 0.0 }
 0x235   : > { %4211 = vst.msk [vmem:[%s7051_s4 + $0x40] sm:$0xf] %vm4194_vm2, %v5032_v55  ;;  %v4023_v60 = vadd.f32 %v5091_v47, %v3927_v17  ;;  %v5094_v23 = vunpack.c.l.bf16 %v5122_v56  ;;  %v3929_v22 = vadd.f32 %v6828_v35, %v3890_v16  ;;  %v5034_v62 = vpack.c.bf16 %v4052_v33, %v4052_v33 }
 0x236   : > { %4212 = vst.msk [vmem:[%s7051_s4 + $0x44] sm:$0xf] %vm4194_vm2, %v5033_v53  ;;  %v4054_v21 = vmax.f32 %v4022_v26, 0.0  ;;  %v5095_v63 = vunpack.c.h.bf16 %v5122_v56  ;;  %v3930_v5 = vadd.f32 %v6828_v35, %v3891_v28  ;;  %v5035_v9 = vpack.c.bf16 %v4053_v2, %v4053_v2 }
 0x237   : > { %v4055_v43 = vmax.f32 %v4023_v60, 0.0  ;;  %v4024_v41 = vadd.f32 %v5094_v23, %v3928_v0  ;;  %v5098_v40 = vunpack.c.l.bf16 %v5123_v15  ;;  %4213 = vst.msk [vmem:[%s7051_s4 + $0x48] sm:$0xf] %vm4194_vm2, %v5034_v62  ;;  %v3931_v34 = vadd.f32 %v6828_v35, %v3892_v50 }
 0x238   : > { %v5036_v30 = vpack.c.bf16 %v4054_v21, %v4054_v21  ;;  %v4025_v1 = vadd.f32 %v5095_v63, %v3929_v22  ;;  %v5099_v4 = vunpack.c.h.bf16 %v5123_v15  ;;  %4214 = vst.msk [vmem:[%s7051_s4 + $0x4c] sm:$0xf] %vm4194_vm2, %v5035_v9  ;;  %v3932_v38 = vadd.f32 %v6828_v35, %v3893_v51 }
 0x239   : > { %v5037_v7 = vpack.c.bf16 %v4055_v43, %v4055_v43  ;;  %v4056_v11 = vmax.f32 %v4024_v41, 0.0  ;;  %v4026_v13 = vadd.f32 %v5098_v40, %v3930_v5  ;;  %v5102_v3 = vunpack.c.l.bf16 %v5124_v52 }
 0x23a   : > { %4215 = vst.msk [vmem:[%s7051_s4 + $0x50] sm:$0xf] %vm4194_vm2, %v5036_v30  ;;  %v4057_v31 = vmax.f32 %v4025_v1, 0.0  ;;  %v4027_v14 = vadd.f32 %v5099_v4, %v3931_v34  ;;  %v3933_v25 = vadd.f32 %v6828_v35, %v3894_v46  ;;  %v5103_v61 = vunpack.c.h.bf16 %v5124_v52 }
 0x23b   : > { %4216 = vst.msk [vmem:[%s7051_s4 + $0x54] sm:$0xf] %vm4194_vm2, %v5037_v7  ;;  %v5038_v48 = vpack.c.bf16 %v4056_v11, %v4056_v11  ;;  %v4058_v8 = vmax.f32 %v4026_v13, 0.0  ;;  %v3934_v18 = vadd.f32 %v6828_v35, %v3895_v6  ;;  %v4028_v59 = vadd.f32 %v5102_v3, %v3932_v38 }
 0x23c   : > { %v5039_v12 = vpack.c.bf16 %v4057_v31, %v4057_v31  ;;  %v4059_v29 = vmax.f32 %v4027_v14, 0.0  ;;  %v5106_v19 = vunpack.c.l.bf16 %v5125_v45  ;;  %v4029_v44 = vadd.f32 %v5103_v61, %v3933_v25 }
 0x23d   : > { %4217 = vst.msk [vmem:[%s7051_s4 + $0x58] sm:$0xf] %vm4194_vm2, %v5038_v48  ;;  %v5040_v39 = vpack.c.bf16 %v4058_v8, %v4058_v8  ;;  %v3935_v49 = vadd.f32 %v6828_v35, %v3896_v32  ;;  %v5107_v20 = vunpack.c.h.bf16 %v5125_v45  ;;  %v4060_v37 = vmax.f32 %v4028_v59, 0.0 }
 0x23e   : > { %4218 = vst.msk [vmem:[%s7051_s4 + $0x5c] sm:$0xf] %vm4194_vm2, %v5039_v12  ;;  %v5041_v36 = vpack.c.bf16 %v4059_v29, %v4059_v29  ;;  %v4030_v24 = vadd.f32 %v5106_v19, %v3934_v18  ;;  %v3936_v42 = vadd.f32 %v6828_v35, %v3897_v27  ;;  %v4061_v57 = vmax.f32 %v4029_v44, 0.0 }
 0x23f   : > { %4219 = vst.msk [vmem:[%s7051_s4 + $0x60] sm:$0xf] %vm4194_vm2, %v5040_v39  ;;  %v4031_v56 = vadd.f32 %v5107_v20, %v3935_v49  ;;  %v5110_v16 = vunpack.c.l.bf16 %v5126_v54  ;;  %v3937_v55 = vadd.f32 %v6828_v35, %v3898_v10  ;;  %v5042_v58 = vpack.c.bf16 %v4060_v37, %v4060_v37 }
 0x240   : > { %4220 = vst.msk [vmem:[%s7051_s4 + $0x64] sm:$0xf] %vm4194_vm2, %v5041_v36  ;;  %v4062_v17 = vmax.f32 %v4030_v24, 0.0  ;;  %v5111_v47 = vunpack.c.h.bf16 %v5126_v54  ;;  %v5043_v28 = vpack.c.bf16 %v4061_v57, %v4061_v57 }
 0x241   : > { %v4063_v53 = vmax.f32 %v4031_v56, 0.0  ;;  %v4032_v33 = vadd.f32 %v5110_v16, %v3936_v42  ;;  %4221 = vst.msk [vmem:[%s7051_s4 + $0x68] sm:$0xf] %vm4194_vm2, %v5042_v58 }
 0x242   : > { %v5044_v26 = vpack.c.bf16 %v4062_v17, %v4062_v17  ;;  %v4033_v0 = vadd.f32 %v5111_v47, %v3937_v55  ;;  %4222 = vst.msk [vmem:[%s7051_s4 + $0x6c] sm:$0xf] %vm4194_vm2, %v5043_v28 }
 0x243   : > { %v5045_v35 = vpack.c.bf16 %v4063_v53, %v4063_v53  ;;  %v4064_v15 = vmax.f32 %v4032_v33, 0.0 }
 0x244   : > { %4223 = vst.msk [vmem:[%s7051_s4 + $0x70] sm:$0xf] %vm4194_vm2, %v5044_v26  ;;  %v4065_v2 = vmax.f32 %v4033_v0, 0.0 }
 0x245   : > { %4224 = vst.msk [vmem:[%s7051_s4 + $0x74] sm:$0xf] %vm4194_vm2, %v5045_v35  ;;  %v5046_v60 = vpack.c.bf16 %v4064_v15, %v4064_v15 }
 0x246   : > { %v5047_v23 = vpack.c.bf16 %v4065_v2, %v4065_v2 }
 0x247   : > { %4225 = vst.msk [vmem:[%s7051_s4 + $0x78] sm:$0xf] %vm4194_vm2, %v5046_v60 }
 0x248   : > { %4226 = vst.msk [vmem:[%s7051_s4 + $0x7c] sm:$0xf] %vm4194_vm2, %v5047_v23 }
 0x249 PF: > { %s14_s17 = sadd.s32 1, %s5902_s17   ;;  %s7138_s15 = smov %s5898_s16 }
 0x24a   : > { %p11_p7 = scmp.ge.s32.totalorder %s14_s17, 5   ;;  %s7139_s16 = smov %s7141_s18 }
 0x24c   :  { %13 = sbr.rel (!%p11_p7) target bundleno = 2 (0x2), region = 96 }

// kernel: resnet_l1_forward.16
= control target key start
LH: loop header
LB: loop body
LE: loop exit
PB: predicated region body
PF: predicated region fallthrough
CT: control target
= control target key end

     0   :  { %s151_s0 = inlined_call_operand.vmem [shape: bf16[3,32,128], index: 0, kind: input, shape index: {}]   ;;  %s152_s1 = inlined_call_operand.vmem [shape: bf16[32,128], index: 1, kind: output, shape index: {}]  }
   0x1   :  { %v78_v0 = vld [vmem:[%s151_s0] sm:$0xff]   ;;  %v112_v1 = vld [vmem:[%s151_s0 + $0x10] sm:$0xff]   ;;  %v111_v7 = vld [vmem:[%s151_s0 + $0x8] sm:$0xff]  }
   0x2   :  { %v114_v2 = vld [vmem:[%s151_s0 + $0x20] sm:$0xff]   ;;  %v79_v3 = vunpack.c.l.bf16 %v78_v0  ;;  %v80_v4 = vunpack.c.h.bf16 %v78_v0  ;;  %v87_v5 = vunpack.c.l.bf16 %v112_v1  ;;  %v88_v6 = vunpack.c.h.bf16 %v112_v1  ;;  %v113_v8 = vld [vmem:[%s151_s0 + $0x18] sm:$0xff]   ;;  %v115_v9 = vld [vmem:[%s151_s0 + $0x28] sm:$0xff]  }
   0x3   :  { %v95_v10 = vunpack.c.l.bf16 %v114_v2  ;;  %v96_v11 = vunpack.c.h.bf16 %v114_v2  ;;  %v83_v12 = vunpack.c.l.bf16 %v111_v7  ;;  %v84_v13 = vunpack.c.h.bf16 %v111_v7 }
   0x4   :  { %v32_v14 = vadd.f32 %v87_v5, %v79_v3  ;;  %v34_v15 = vadd.f32 %v88_v6, %v80_v4  ;;  %v91_v16 = vunpack.c.l.bf16 %v113_v8  ;;  %v92_v17 = vunpack.c.h.bf16 %v113_v8 }
   0x5   :  { %v99_v18 = vunpack.c.l.bf16 %v115_v9  ;;  %v100_v19 = vunpack.c.h.bf16 %v115_v9 }
   0x6   :  { %v33_v20 = vadd.f32 %v95_v10, %v32_v14  ;;  %v35_v21 = vadd.f32 %v96_v11, %v34_v15  ;;  %v36_v22 = vadd.f32 %v91_v16, %v83_v12  ;;  %v38_v23 = vadd.f32 %v92_v17, %v84_v13 }
   0x8   :  { %v41_v24 = vmul.f32 0.33333334, %v33_v20  ;;  %v42_v25 = vmul.f32 0.33333334, %v35_v21  ;;  %v37_v26 = vadd.f32 %v99_v18, %v36_v22  ;;  %v39_v27 = vadd.f32 %v100_v19, %v38_v23 }
   0xa   :  { %v104_v28 = vpack.c.bf16 %v42_v25, %v41_v24  ;;  %v43_v29 = vmul.f32 0.33333334, %v37_v26  ;;  %v44_v30 = vmul.f32 0.33333334, %v39_v27 }
   0xc   :  { %105 = vst [vmem:[%s152_s1] sm:$0xff] %v104_v28   ;;  %v109_v31 = vpack.c.bf16 %v44_v30, %v43_v29 }
   0xe   :  { %116 = vst [vmem:[%s152_s1 + $0x8] sm:$0xff] %v109_v31  }

// kernel: resnet_l1_forward.17
= control target key start
LH: loop header
LB: loop body
LE: loop exit
PB: predicated region body
PF: predicated region fallthrough
CT: control target
= control target key end

     0   :  { %s47_s0 = inlined_call_operand.vmem [shape: bf16[3,8,128], index: 0, kind: input, shape index: {}]   ;;  %s48_s1 = inlined_call_operand.vmem [shape: bf16[8,128], index: 1, kind: output, shape index: {}]  }
   0x1   :  { %v25_v0 = vld [vmem:[%s47_s0] sm:$0xff]   ;;  %v10_v1 = vld [vmem:[%s47_s0 + $0x8] sm:$0xf] }
   0x2   :  { %v26_v2 = vunpack.c.l.bf16 %v25_v0  ;;  %v27_v3 = vunpack.c.h.bf16 %v25_v0  ;;  %v13_v4 = vunpack.c.l.bf16 %v10_v1 }
   0x4   :  { %v14_v5 = vadd.f32 %v27_v3, %v26_v2 }
   0x6   :  { %v15_v6 = vadd.f32 %v14_v5, %v13_v4 }
   0x8   :  { %v17_v7 = vmul.f32 0.33333334, %v15_v6 }
   0xa   :  { %v18_v8 = vpack.c.bf16 %v17_v7, %v17_v7 }
   0xc   :  { %19 = vst [vmem:[%s48_s1] sm:$0xf] %v18_v8 }

// kernel: resnet_l1_forward.19
= control target key start
LH: loop header
LB: loop body
LE: loop exit
PB: predicated region body
PF: predicated region fallthrough
CT: control target
= control target key end

     0   :  { %v302_v1 = vmov 0   ;;  %vm124_vm0 = vcmask 523264   ;;  %v227_v18 = vlaneseq  ;;  %s389_s1 = inlined_call_operand.vmem [shape: bf16[64,512], index: 1, kind: input, shape index: {}]   ;;  %s390_s0 = inlined_call_operand.vmem [shape: bf16[8,64], index: 0, kind: input, shape index: {}]   ;;  %s391_s2 = inlined_call_operand.vmem [shape: f32[1,512], index: 2, kind: input, shape index: {}]   ;;  %s392_s3 = inlined_call_operand.vmem [shape: f32[8,512], index: 3, kind: output, shape index: {}]  }
   0x1   :  { %v278_v0 = vld [vmem:[%s389_s1 + $0x64] ss:$16 sps:$4 sm:$0xff]   ;;  %160 = vmatprep.mubr.bf16.mxu0 %v302_v1  ;;  %201 = vmatprep.mubr.bf16.mxu1 %v302_v1  ;;  %v280_v2 = vld [vmem:[%s389_s1 + $0x6c] ss:$16 sps:$4 sm:$0xff]   ;;  %v282_v3 = vld [vmem:[%s389_s1 + $0x60] ss:$16 sps:$4 sm:$0xff]  }
   0x2   :  { %136 = vmatprep.subr.bf16.mxu0 %v278_v0  ;;  %v283_v4 = vld [vmem:[%s389_s1 + $0x68] ss:$16 sps:$4 sm:$0xff]   ;;  %177 = vmatprep.subr.bf16.mxu1 %v280_v2  ;;  %v284_v5 = vld [vmem:[%s389_s1 + $0x44] ss:$16 sps:$4 sm:$0xff]   ;;  %v286_v6 = vld [vmem:[%s389_s1 + $0x4c] ss:$16 sps:$4 sm:$0xff]  }
   0x3   :  { %137 = vmatpush1.bf16.msra.mxu0 %v282_v3  ;;  %178 = vmatpush1.bf16.msra.mxu1 %v283_v4  ;;  %v288_v7 = vld [vmem:[%s389_s1 + $0x40] ss:$16 sps:$4 sm:$0xff]   ;;  %v289_v8 = vld [vmem:[%s389_s1 + $0x48] ss:$16 sps:$4 sm:$0xff]   ;;  %v290_v9 = vld [vmem:[%s389_s1 + $0x24] ss:$16 sps:$4 sm:$0xff]  }
   0x4   :  { %138 = vmatprep.subr.bf16.mxu0 %v284_v5  ;;  %179 = vmatprep.subr.bf16.mxu1 %v286_v6  ;;  %v292_v10 = vld [vmem:[%s389_s1 + $0x2c] ss:$16 sps:$4 sm:$0xff]   ;;  %v294_v11 = vld [vmem:[%s389_s1 + $0x20] ss:$16 sps:$4 sm:$0xff]   ;;  %v295_v12 = vld [vmem:[%s389_s1 + $0x28] ss:$16 sps:$4 sm:$0xff]  }
   0x5   :  { %v296_v13 = vld [vmem:[%s389_s1 + $0x4] ss:$16 sps:$4 sm:$0xff]   ;;  %v298_v14 = vld [vmem:[%s389_s1 + $0xc] ss:$16 sps:$4 sm:$0xff]   ;;  %v300_v15 = vld [vmem:[%s389_s1] ss:$16 sps:$4 sm:$0xff]  }
   0x6   :  { %v301_v16 = vld [vmem:[%s389_s1 + $0x8] ss:$16 sps:$4 sm:$0xff]   ;;  %v27_v17 = vld [vmem:[%s390_s0] sm:$0xf]  ;;  %v228_v19 = vshrl.u32 %v227_v18, 7 }
   0x7   :  { %139 = vmatpush1.bf16.msra.mxu0 %v288_v7  ;;  %180 = vmatpush1.bf16.msra.mxu1 %v289_v8  ;;  %v225_v22 = vld [vmem:[%s391_s2] sm:$0xf] }
   0x8   :  { %140 = vmatprep.subr.bf16.mxu0 %v290_v9  ;;  %181 = vmatprep.subr.bf16.mxu1 %v292_v10  ;;  %v229_v20 = vsub.s32 0, %v228_v19  ;;  %v237_v21 = vsub.s32 2, %v228_v19  ;;  %v233_v23 = vsub.s32 1, %v228_v19  ;;  %v241_v24 = vsub.s32 3, %v228_v19 }
   0xa   :  { %v230_v25 = vrot.slane %v225_v22, %v229_v20  ;;  %v238_v26 = vrot.slane %v225_v22, %v237_v21  ;;  %v234_v27 = vrot.slane %v225_v22, %v233_v23  ;;  %v242_v28 = vrot.slane %v225_v22, %v241_v24 }
   0xb   :  { %141 = vmatpush1.bf16.msra.mxu0 %v294_v11  ;;  %182 = vmatpush1.bf16.msra.mxu1 %v295_v12 }
   0xc   :  { %142 = vmatprep.subr.bf16.mxu0 %v296_v13  ;;  %183 = vmatprep.subr.bf16.mxu1 %v298_v14 }
   0xf   :  { %143 = vmatpush1.bf16.msra.mxu0 %v300_v15  ;;  %184 = vmatpush1.bf16.msra.mxu1 %v301_v16 }
  0x12   :  { %275 = vmatmul.mubr.msk.bf16.vlgmr.msra.gmra.mxu0 %vm124_vm0, %v27_v17  ;;  %276 = vmatmul.mubr.msk.bf16.vlgmr.msra.gmra.mxu1 %vm124_vm0, %v27_v17 }
  0xd2   :  { %v162_v29 = vpop.f32.mrf.mxu0  ;;  %v203_v30 = vpop.f32.mrf.mxu1 }
  0xd3   :  { %v247_v31 = vadd.f32 %v230_v25, %v162_v29  ;;  %v249_v32 = vadd.f32 %v238_v26, %v203_v30 }
  0xd4   :  { %v164_v33 = vpop.f32.mrf.mxu0  ;;  %v205_v34 = vpop.f32.mrf.mxu1 }
  0xd5   :  { %251 = vst [vmem:[%s392_s3] sm:$0xff] %v247_v31  ;;  %253 = vst [vmem:[%s392_s3 + $0x10] sm:$0xff] %v249_v32  ;;  %v248_v35 = vadd.f32 %v234_v27, %v164_v33  ;;  %v250_v36 = vadd.f32 %v242_v28, %v205_v34 }
  0xd6   :  { %v166_v37 = vpop.f32.mrf.mxu0  ;;  %v207_v38 = vpop.f32.mrf.mxu1 }
  0xd7   :  { %252 = vst [vmem:[%s392_s3 + $0x8] sm:$0xff] %v248_v35  ;;  %254 = vst [vmem:[%s392_s3 + $0x18] sm:$0xff] %v250_v36 }
  0xd8   :  { %v167_v39 = vpop.f32.mrf.mxu0  ;;  %v208_v40 = vpop.f32.mrf.mxu1 }

</bundles_post_ra>
